<compile_context>
chip_gen: v7x
topology: tpu7x:2x2x1
jax: 0.10.0
libtpu: 0.0.40
codegen_flags: <defaults>
</compile_context>

<pallas_src>
import jax
import jax.numpy as jnp
from jax.experimental import pallas as pl
from jax.experimental.pallas import tpu as pltpu

_VMEM_LIMIT = 32 * 1024 * 1024   # fits scoped budgets on v5e/v6e/v7x
_PROJ_TILE_M_CAP = 512           # rows; double-buffered K=8320 bf16 tiles ~19 MiB
_SQRT1_2 = 0.7071067811865476


def _gelu_exact(x):
    # nn.GELU() default in PyTorch = exact erf formulation (f32 math here).
    return 0.5 * x * (1.0 + jax.lax.erf(x * _SQRT1_2))


# --------------------- wrapper-side im2col (first conv only) ----------------
# Only the raw network inputs (784 / 3072 values per sample) are patched by
# XLA; every later conv re-patches entirely inside VMEM within the kernel.

def _im2col_k4s2p1(x_nhwc):
    b, h, w, c = x_nhwc.shape
    oh, ow = h // 2, w // 2
    xp = jnp.pad(x_nhwc, ((0, 0), (1, 1), (1, 1), (0, 0)))
    cols = []
    for kh in range(4):
        for kw in range(4):
            cols.append(xp[:, kh:kh + 2 * oh:2, kw:kw + 2 * ow:2, :])
    patches = jnp.stack(cols, axis=3)              # (B, OH, OW, 16, C)
    return patches.reshape(b, oh * ow, 16 * c)     # feature order (kh, kw, c)


# --------------------------- fused conv-branch kernel -----------------------

def make_branch_forward(h_in, channels):
    """Fused forward for a stack of Conv2d(4, 2, 1, bias=False) + GELU.

    channels = (cin, c1, ..., cL); square h_in x h_in input.  Grid = (batch,),
    one sample per step ("parallel" -> megacore sharding).  The first conv
    consumes wrapper-built patches; each later conv keeps its padded input as
    a flat (Hp*Wp, Cin) f32 VMEM scratch and computes
        out[i, j] = sum_taps Xpad[2i+kh, 2j+kw] @ W[kh, kw]
    where tap (kh, kw) of every output pixel sits at flat scratch row
    2*(i*Wp + j) + (kh*Wp + kw): one stride-2 read + one matmul per tap.
    Output: (B, ohL*ohL, cL) bf16, pixels row-major, channels minor (lane-dense).
    """
    L = len(channels) - 1
    sizes = [h_in // (2 ** k) for k in range(L + 1)]
    out_hw = sizes[L]
    out_pixels = out_hw * out_hw
    c_out = channels[-1]
    n_patch_rows = sizes[1] * sizes[1]
    patch_k = 16 * channels[0]

    def kernel(*refs):
        p_ref = refs[0]
        w_refs = refs[1:1 + L]
        o_ref = refs[1 + L]
        scr_refs = refs[2 + L:]

        # ---- conv 0: plain matmul + exact GELU on wrapper patches ----
        h = _gelu_exact(jnp.dot(p_ref[0], w_refs[0][...],
                                preferred_element_type=jnp.float32))
        prev_stride = sizes[1]          # rows of `h` are i*prev_stride + j

        # ---- convs 1..L-1: in-VMEM re-patching via 16 strided taps ----
        for l in range(1, L):
            hin = sizes[l]
            oh = sizes[l + 1]
            wp = hin + 2
            cin = channels[l]
            cout = channels[l + 1]
            nacc = (oh - 1) * wp + oh
            scr = scr_refs[l - 1]

            # zero fill (the conv's spatial zero padding), then deposit the
            # previous activation into the padded flat image.
            scr[...] = jnp.zeros(scr.shape, scr.dtype)
            for i in range(hin):
                dst = (i + 1) * wp + 1
                scr[dst:dst + hin, :] = h[i * prev_stride:i * prev_stride + hin, :]

            acc = jnp.zeros((nacc, cout), jnp.float32)
            for kh in range(4):
                for kw in range(4):
                    t = kh * 4 + kw
                    taps = scr[pl.ds(kh * wp + kw, nacc, stride=2), :]
                    acc = acc + jnp.dot(taps, w_refs[l][t * cin:(t + 1) * cin, :],
                                        preferred_element_type=jnp.float32)
            h = _gelu_exact(acc)
            prev_stride = wp             # valid rows are i*wp + j, j < oh

        # ---- lane-dense output: (pixels, 128) ----
        for i in range(out_hw):
            o_ref[0, i * out_hw:(i + 1) * out_hw, :] = (
                h[i * prev_stride:i * prev_stride + out_hw, :].astype(o_ref.dtype))

    # advisory cost estimate so XLA overlaps the tiny wrapper glue with the call
    flops = 2 * n_patch_rows * patch_k * channels[1]
    trans = n_patch_rows * channels[1]
    for l in range(1, L):
        wp = sizes[l] + 2
        nacc = (sizes[l + 1] - 1) * wp + sizes[l + 1]
        flops += 2 * nacc * 16 * channels[l] * channels[l + 1]
        trans += nacc * channels[l + 1]
    w_bytes = 4 * sum(16 * channels[l] * channels[l + 1] for l in range(L))

    def forward(patches, *w_mats):
        assert len(w_mats) == L
        b = patches.shape[0]
        in_specs = [pl.BlockSpec((1, n_patch_rows, patch_k), lambda i: (i, 0, 0))]
        for w in w_mats:
            # Grid-invariant weights; double-buffered copies are <2 MiB total
            # so single-buffering (pl.Buffered(1)) is intentionally not used.
            in_specs.append(pl.BlockSpec(w.shape, lambda i: (0, 0)))
        cost = pl.CostEstimate(
            flops=b * flops,
            transcendentals=b * trans,
            bytes_accessed=b * (n_patch_rows * patch_k * 4 + out_pixels * c_out * 2)
                           + w_bytes)
        return pl.pallas_call(
            kernel,
            out_shape=jax.ShapeDtypeStruct((b, out_pixels, c_out), jnp.bfloat16),
            grid=(b,),
            in_specs=in_specs,
            out_specs=pl.BlockSpec((1, out_pixels, c_out), lambda i: (i, 0, 0)),
            scratch_shapes=[
                pltpu.VMEM(((sizes[l] + 2) ** 2, channels[l]), jnp.float32)
                for l in range(1, L)],
            compiler_params=pltpu.CompilerParams(
                dimension_semantics=("parallel",),
                vmem_limit_bytes=_VMEM_LIMIT),
            cost_estimate=cost,
        )(patches, *w_mats)

    return forward, out_pixels, c_out


_mnist_branch, _M_PIX, _M_C = make_branch_forward(28, (1, 64, 128))
_svhn_branch, _S_PIX, _S_C = make_branch_forward(32, (3, 32, 64, 128))
_MNIST_DIM = _M_PIX * _M_C       # 6272
_SVHN_DIM = _S_PIX * _S_C        # 2048


# --------------------------------- projector --------------------------------

def _proj_kernel(hm_ref, hs_ref, wm_ref, ws_ref, b_ref, o_ref):
    acc = jnp.dot(hm_ref[...], wm_ref[...], preferred_element_type=jnp.float32)
    acc = acc + jnp.dot(hs_ref[...], ws_ref[...],
                        preferred_element_type=jnp.float32)
    o_ref[...] = (acc + b_ref[...]).astype(o_ref.dtype)


def pallas_projector(hm, hs, wm, ws, b):
    """Concat-free projector: dot(hm, wm) + dot(hs, ws) + b, M-tiled, no pad."""
    m, k1 = hm.shape
    _, k2 = hs.shape
    n = wm.shape[1]
    tm = m if m <= _PROJ_TILE_M_CAP else _PROJ_TILE_M_CAP   # cap is 8-aligned
    grid_m = pl.cdiv(m, tm)          # ragged tail handled by Pallas (no jnp.pad)
    cost = pl.CostEstimate(
        flops=2 * m * (k1 + k2) * n,
        transcendentals=0,
        bytes_accessed=(m * (k1 + k2) + (k1 + k2) * n) * 2 + m * n * 4 + n * 4)
    return pl.pallas_call(
        _proj_kernel,
        out_shape=jax.ShapeDtypeStruct((m, n), jnp.float32),
        grid=(grid_m,),
        in_specs=[
            pl.BlockSpec((tm, k1), lambda i: (i, 0)),
            pl.BlockSpec((tm, k2), lambda i: (i, 0)),
            pl.BlockSpec((k1, n), lambda i: (0, 0)),
            pl.BlockSpec((k2, n), lambda i: (0, 0)),
            pl.BlockSpec((1, n), lambda i: (0, 0)),
        ],
        out_specs=pl.BlockSpec((tm, n), lambda i: (i, 0)),
        compiler_params=pltpu.CompilerParams(
            dimension_semantics=("parallel",),
            vmem_limit_bytes=_VMEM_LIMIT),
        cost_estimate=cost,
    )(hm, hs, wm, ws, b)


# ------------------------------ params & forward ----------------------------

def init_params(key, common_dim):
    """Canonical (torch-like) parameter layout; pw is (in_features, out)."""
    keys = jax.random.split(key, 7)
    s = 0.05
    return {
        "mw1": s * jax.random.normal(keys[0], (64, 1, 4, 4), jnp.float32),
        "mw2": s * jax.random.normal(keys[1], (128, 64, 4, 4), jnp.float32),
        "sw1": s * jax.random.normal(keys[2], (32, 3, 4, 4), jnp.float32),
        "sw2": s * jax.random.normal(keys[3], (64, 32, 4, 4), jnp.float32),
        "sw3": s * jax.random.normal(keys[4], (128, 64, 4, 4), jnp.float32),
        "pw": s * jax.random.normal(keys[5], (_MNIST_DIM + _SVHN_DIM, common_dim),
                                    jnp.float32),
        "pb": s * jax.random.normal(keys[6], (common_dim,), jnp.float32),
    }


def _conv_w_to_mat(w_oihw):
    # (O, I, KH, KW) -> (KH, KW, I, O) -> (KH*KW*I, O): row = (kh*4+kw)*I + i
    o = w_oihw.shape[0]
    return jnp.transpose(w_oihw, (2, 3, 1, 0)).reshape(-1, o).astype(jnp.float32)


def prepare_kernel_params(params):
    """One-time weight prep (review #10): conv weights -> matmul layout (f32);
    projector weight split + row-permuted from torch's channel-major flatten to
    the kernels' (pixel-major, channel-minor) flatten, cast to bf16."""
    cd = params["pw"].shape[1]
    pw = params["pw"]
    pwm = (pw[:_MNIST_DIM].reshape(_M_C, _M_PIX, cd)
           .transpose(1, 0, 2).reshape(_MNIST_DIM, cd))
    pws = (pw[_MNIST_DIM:].reshape(_S_C, _S_PIX, cd)
           .transpose(1, 0, 2).reshape(_SVHN_DIM, cd))
    return {
        "mw1": _conv_w_to_mat(params["mw1"]),
        "mw2": _conv_w_to_mat(params["mw2"]),
        "sw1": _conv_w_to_mat(params["sw1"]),
        "sw2": _conv_w_to_mat(params["sw2"]),
        "sw3": _conv_w_to_mat(params["sw3"]),
        "pwm": pwm.astype(jnp.bfloat16),
        "pws": pws.astype(jnp.bfloat16),
        "pb": params["pb"].reshape(1, cd).astype(jnp.float32),
    }


def ms_joint_processor_forward(kparams, x_mnist_nchw, x_svhn_nchw):
    b = x_mnist_nchw.shape[0]
    # First-conv im2col on the tiny raw inputs only; later re-patching is in-VMEM.
    pm = _im2col_k4s2p1(jnp.transpose(x_mnist_nchw, (0, 2, 3, 1)))  # (B, 196, 16)
    ps = _im2col_k4s2p1(jnp.transpose(x_svhn_nchw, (0, 2, 3, 1)))   # (B, 256, 48)

    hm = _mnist_branch(pm, kparams["mw1"], kparams["mw2"])          # (B, 49, 128)
    hs = _svhn_branch(ps, kparams["sw1"], kparams["sw2"], kparams["sw3"])  # (B,16,128)

    # Free row-major reshapes; projector weights were permuted once to match,
    # so no transpose / concat of activations is ever materialized.
    hm = hm.reshape(b, _MNIST_DIM)
    hs = hs.reshape(b, _SVHN_DIM)
    # TODO(synk): for very large batch, process several samples per branch grid
    # step (raises per-matmul M) and bump the projector tile to 1024 on the
    # 128-MiB-VMEM parts (v5e/v6e).
    return pallas_projector(hm, hs, kparams["pwm"], kparams["pws"], kparams["pb"])


# ----------------------------- pure-JAX reference ---------------------------

def reference_forward(params, x_mnist, x_svhn):
    def conv(x, w):
        return jax.lax.conv_general_dilated(
            x, w, window_strides=(2, 2), padding=((1, 1), (1, 1)),
            dimension_numbers=("NCHW", "OIHW", "NCHW"))

    g = lambda t: jax.nn.gelu(t, approximate=False)
    hm = g(conv(g(conv(x_mnist, params["mw1"])), params["mw2"]))
    hs = g(conv(g(conv(g(conv(x_svhn, params["sw1"])), params["sw2"])),
                params["sw3"]))
    hm = hm.reshape(hm.shape[0], -1)
    hs = hs.reshape(hs.shape[0], -1)
    h = jnp.concatenate([hm, hs], axis=-1)
    return h @ params["pw"] + params["pb"]


if __name__ == "__main__":
    B, common_dim = 2, 64
    key = jax.random.PRNGKey(0)
    k_in_m, k_in_s, k_params = jax.random.split(key, 3)

    x_mnist = jax.random.normal(k_in_m, (B, 1, 28, 28), jnp.float32)
    x_svhn = jax.random.normal(k_in_s, (B, 3, 32, 32), jnp.float32)

    params = init_params(k_params, common_dim)
    kparams = prepare_kernel_params(params)   # one-time weight prep, outside jit

    fwd = jax.jit(ms_joint_processor_forward)
    out = jax.block_until_ready(fwd(kparams, x_mnist, x_svhn))

    assert out.shape == (B, common_dim), out.shape
    assert bool(jnp.all(jnp.isfinite(out)))

    ref = reference_forward(params, x_mnist, x_svhn)
    assert bool(jnp.allclose(out, ref, rtol=3e-2, atol=3e-2)), \
        float(jnp.max(jnp.abs(out - ref)))

    print("KERNEL_OK")
</pallas_src>

<mosaic_0001>
module attributes {stable_mosaic.version = 11 : i64} {
  func.func @kernel(%arg0: i32, %arg1: memref<1x196x16xf32, #tpu.memory_space<vmem>>, %arg2: memref<16x64xf32, #tpu.memory_space<vmem>>, %arg3: memref<1024x128xf32, #tpu.memory_space<vmem>>, %arg4: memref<1x49x128xbf16, #tpu.memory_space<vmem>>, %arg5: memref<256x64xf32, #tpu.memory_space<vmem>>) attributes {dimension_semantics = [#tpu.dimension_semantics<parallel>], iteration_bounds = array<i64: 2>, scalar_prefetch = 0 : i64, scratch_operands = 1 : i64, tpu.core_type = #tpu.core_type<tc>, window_params = [{transform_indices = @transform_0, window_bounds = array<i64: 1, 196, 16>}, {pipeline_mode = #tpu.pipeline_mode<synchronous>, transform_indices = @transform_1, window_bounds = array<i64: 16, 64>}, {pipeline_mode = #tpu.pipeline_mode<synchronous>, transform_indices = @transform_2, window_bounds = array<i64: 1024, 128>}, {transform_indices = @transform_3, window_bounds = array<i64: 1, 49, 128>}]} {
    %c0 = arith.constant 0 : index
    %c0_0 = arith.constant 0 : index
    %c0_1 = arith.constant 0 : index
    %0 = vector.load %arg1[%c0, %c0_0, %c0_1] : memref<1x196x16xf32, #tpu.memory_space<vmem>>, vector<1x196x16xf32>
    %1 = vector.shape_cast %0 : vector<1x196x16xf32> to vector<196x16xf32>
    %c0_2 = arith.constant 0 : index
    %c0_3 = arith.constant 0 : index
    %2 = vector.load %arg2[%c0_2, %c0_3] : memref<16x64xf32, #tpu.memory_space<vmem>>, vector<16x64xf32>
    %cst = arith.constant dense<0.000000e+00> : vector<196x64xf32>
    %3 = tpu.matmul %1, %2, %cst {dimension_numbers = #tpu.dot_dimension_numbers<[1], [0], [0], [1], [0, 0, 1, 1], [], []>} : vector<196x16xf32>, vector<16x64xf32>, vector<196x64xf32> -> vector<196x64xf32>
    %cst_4 = arith.constant 5.000000e-01 : f32
    %4 = vector.broadcast %cst_4 : f32 to vector<196x64xf32>
    %5 = arith.mulf %4, %3 : vector<196x64xf32>
    %cst_5 = arith.constant 0.707106769 : f32
    %6 = vector.broadcast %cst_5 : f32 to vector<196x64xf32>
    %7 = arith.mulf %3, %6 : vector<196x64xf32>
    %8 = math.erf %7 : vector<196x64xf32>
    %cst_6 = arith.constant 1.000000e+00 : f32
    %9 = vector.broadcast %cst_6 : f32 to vector<196x64xf32>
    %10 = arith.addf %9, %8 : vector<196x64xf32>
    %11 = arith.mulf %5, %10 : vector<196x64xf32>
    %cst_7 = arith.constant 0.000000e+00 : f32
    %12 = vector.broadcast %cst_7 : f32 to vector<256x64xf32>
    %c0_8 = arith.constant 0 : index
    %c0_9 = arith.constant 0 : index
    %13 = vector.load %arg5[%c0_8, %c0_9] : memref<256x64xf32, #tpu.memory_space<vmem>>, vector<256x64xf32>
    tpu.vector_store %arg5[%c0_8, %c0_9], %12 {strides = array<i32>} : memref<256x64xf32, #tpu.memory_space<vmem>>, vector<256x64xf32>,
    %14 = vector.extract_strided_slice %11 {offsets = [0, 0], sizes = [14, 64], strides = [1, 1]} : vector<196x64xf32> to vector<14x64xf32>
    %c17 = arith.constant 17 : index
    %c0_10 = arith.constant 0 : index
    %15 = vector.load %arg5[%c17, %c0_10] : memref<256x64xf32, #tpu.memory_space<vmem>>, vector<14x64xf32>
    tpu.vector_store %arg5[%c17, %c0_10], %14 {strides = array<i32>} : memref<256x64xf32, #tpu.memory_space<vmem>>, vector<14x64xf32>,
    %16 = vector.extract_strided_slice %11 {offsets = [14, 0], sizes = [14, 64], strides = [1, 1]} : vector<196x64xf32> to vector<14x64xf32>
    %c33 = arith.constant 33 : index
    %c0_11 = arith.constant 0 : index
    %17 = vector.load %arg5[%c33, %c0_11] : memref<256x64xf32, #tpu.memory_space<vmem>>, vector<14x64xf32>
    tpu.vector_store %arg5[%c33, %c0_11], %16 {strides = array<i32>} : memref<256x64xf32, #tpu.memory_space<vmem>>, vector<14x64xf32>,
    %18 = vector.extract_strided_slice %11 {offsets = [28, 0], sizes = [14, 64], strides = [1, 1]} : vector<196x64xf32> to vector<14x64xf32>
    %c49 = arith.constant 49 : index
    %c0_12 = arith.constant 0 : index
    %19 = vector.load %arg5[%c49, %c0_12] : memref<256x64xf32, #tpu.memory_space<vmem>>, vector<14x64xf32>
    tpu.vector_store %arg5[%c49, %c0_12], %18 {strides = array<i32>} : memref<256x64xf32, #tpu.memory_space<vmem>>, vector<14x64xf32>,
    %20 = vector.extract_strided_slice %11 {offsets = [42, 0], sizes = [14, 64], strides = [1, 1]} : vector<196x64xf32> to vector<14x64xf32>
    %c65 = arith.constant 65 : index
    %c0_13 = arith.constant 0 : index
    %21 = vector.load %arg5[%c65, %c0_13] : memref<256x64xf32, #tpu.memory_space<vmem>>, vector<14x64xf32>
    tpu.vector_store %arg5[%c65, %c0_13], %20 {strides = array<i32>} : memref<256x64xf32, #tpu.memory_space<vmem>>, vector<14x64xf32>,
    %22 = vector.extract_strided_slice %11 {offsets = [56, 0], sizes = [14, 64], strides = [1, 1]} : vector<196x64xf32> to vector<14x64xf32>
    %c81 = arith.constant 81 : index
    %c0_14 = arith.constant 0 : index
    %23 = vector.load %arg5[%c81, %c0_14] : memref<256x64xf32, #tpu.memory_space<vmem>>, vector<14x64xf32>
    tpu.vector_store %arg5[%c81, %c0_14], %22 {strides = array<i32>} : memref<256x64xf32, #tpu.memory_space<vmem>>, vector<14x64xf32>,
    %24 = vector.extract_strided_slice %11 {offsets = [70, 0], sizes = [14, 64], strides = [1, 1]} : vector<196x64xf32> to vector<14x64xf32>
    %c97 = arith.constant 97 : index
    %c0_15 = arith.constant 0 : index
    %25 = vector.load %arg5[%c97, %c0_15] : memref<256x64xf32, #tpu.memory_space<vmem>>, vector<14x64xf32>
    tpu.vector_store %arg5[%c97, %c0_15], %24 {strides = array<i32>} : memref<256x64xf32, #tpu.memory_space<vmem>>, vector<14x64xf32>,
    %26 = vector.extract_strided_slice %11 {offsets = [84, 0], sizes = [14, 64], strides = [1, 1]} : vector<196x64xf32> to vector<14x64xf32>
    %c113 = arith.constant 113 : index
    %c0_16 = arith.constant 0 : index
    %27 = vector.load %arg5[%c113, %c0_16] : memref<256x64xf32, #tpu.memory_space<vmem>>, vector<14x64xf32>
    tpu.vector_store %arg5[%c113, %c0_16], %26 {strides = array<i32>} : memref<256x64xf32, #tpu.memory_space<vmem>>, vector<14x64xf32>,
    %28 = vector.extract_strided_slice %11 {offsets = [98, 0], sizes = [14, 64], strides = [1, 1]} : vector<196x64xf32> to vector<14x64xf32>
    %c129 = arith.constant 129 : index
    %c0_17 = arith.constant 0 : index
    %29 = vector.load %arg5[%c129, %c0_17] : memref<256x64xf32, #tpu.memory_space<vmem>>, vector<14x64xf32>
    tpu.vector_store %arg5[%c129, %c0_17], %28 {strides = array<i32>} : memref<256x64xf32, #tpu.memory_space<vmem>>, vector<14x64xf32>,
    %30 = vector.extract_strided_slice %11 {offsets = [112, 0], sizes = [14, 64], strides = [1, 1]} : vector<196x64xf32> to vector<14x64xf32>
    %c145 = arith.constant 145 : index
    %c0_18 = arith.constant 0 : index
    %31 = vector.load %arg5[%c145, %c0_18] : memref<256x64xf32, #tpu.memory_space<vmem>>, vector<14x64xf32>
    tpu.vector_store %arg5[%c145, %c0_18], %30 {strides = array<i32>} : memref<256x64xf32, #tpu.memory_space<vmem>>, vector<14x64xf32>,
    %32 = vector.extract_strided_slice %11 {offsets = [126, 0], sizes = [14, 64], strides = [1, 1]} : vector<196x64xf32> to vector<14x64xf32>
    %c161 = arith.constant 161 : index
    %c0_19 = arith.constant 0 : index
    %33 = vector.load %arg5[%c161, %c0_19] : memref<256x64xf32, #tpu.memory_space<vmem>>, vector<14x64xf32>
    tpu.vector_store %arg5[%c161, %c0_19], %32 {strides = array<i32>} : memref<256x64xf32, #tpu.memory_space<vmem>>, vector<14x64xf32>,
    %34 = vector.extract_strided_slice %11 {offsets = [140, 0], sizes = [14, 64], strides = [1, 1]} : vector<196x64xf32> to vector<14x64xf32>
    %c177 = arith.constant 177 : index
    %c0_20 = arith.constant 0 : index
    %35 = vector.load %arg5[%c177, %c0_20] : memref<256x64xf32, #tpu.memory_space<vmem>>, vector<14x64xf32>
    tpu.vector_store %arg5[%c177, %c0_20], %34 {strides = array<i32>} : memref<256x64xf32, #tpu.memory_space<vmem>>, vector<14x64xf32>,
    %36 = vector.extract_strided_slice %11 {offsets = [154, 0], sizes = [14, 64], strides = [1, 1]} : vector<196x64xf32> to vector<14x64xf32>
    %c193 = arith.constant 193 : index
    %c0_21 = arith.constant 0 : index
    %37 = vector.load %arg5[%c193, %c0_21] : memref<256x64xf32, #tpu.memory_space<vmem>>, vector<14x64xf32>
    tpu.vector_store %arg5[%c193, %c0_21], %36 {strides = array<i32>} : memref<256x64xf32, #tpu.memory_space<vmem>>, vector<14x64xf32>,
    %38 = vector.extract_strided_slice %11 {offsets = [168, 0], sizes = [14, 64], strides = [1, 1]} : vector<196x64xf32> to vector<14x64xf32>
    %c209 = arith.constant 209 : index
    %c0_22 = arith.constant 0 : index
    %39 = vector.load %arg5[%c209, %c0_22] : memref<256x64xf32, #tpu.memory_space<vmem>>, vector<14x64xf32>
    tpu.vector_store %arg5[%c209, %c0_22], %38 {strides = array<i32>} : memref<256x64xf32, #tpu.memory_space<vmem>>, vector<14x64xf32>,
    %40 = vector.extract_strided_slice %11 {offsets = [182, 0], sizes = [14, 64], strides = [1, 1]} : vector<196x64xf32> to vector<14x64xf32>
    %c225 = arith.constant 225 : index
    %c0_23 = arith.constant 0 : index
    %41 = vector.load %arg5[%c225, %c0_23] : memref<256x64xf32, #tpu.memory_space<vmem>>, vector<14x64xf32>
    tpu.vector_store %arg5[%c225, %c0_23], %40 {strides = array<i32>} : memref<256x64xf32, #tpu.memory_space<vmem>>, vector<14x64xf32>,
    %cst_24 = arith.constant 0.000000e+00 : f32
    %42 = vector.broadcast %cst_24 : f32 to vector<103x128xf32>
    %c0_25 = arith.constant 0 : index
    %c0_26 = arith.constant 0 : index
    %43 = tpu.strided_load %arg5[%c0_25, %c0_26] {strides = array<i32: 2, 1>} : memref<256x64xf32, #tpu.memory_space<vmem>>, vector<103x64xf32>
    %c0_27 = arith.constant 0 : index
    %c0_28 = arith.constant 0 : index
    %44 = vector.load %arg3[%c0_27, %c0_28] : memref<1024x128xf32, #tpu.memory_space<vmem>>, vector<64x128xf32>
    %cst_29 = arith.constant dense<0.000000e+00> : vector<103x128xf32>
    %45 = tpu.matmul %43, %44, %cst_29 {dimension_numbers = #tpu.dot_dimension_numbers<[1], [0], [0], [1], [0, 0, 1, 1], [], []>} : vector<103x64xf32>, vector<64x128xf32>, vector<103x128xf32> -> vector<103x128xf32>
    %46 = arith.addf %42, %45 : vector<103x128xf32>
    %c1 = arith.constant 1 : index
    %c0_30 = arith.constant 0 : index
    %47 = tpu.strided_load %arg5[%c1, %c0_30] {strides = array<i32: 2, 1>} : memref<256x64xf32, #tpu.memory_space<vmem>>, vector<103x64xf32>
    %c64 = arith.constant 64 : index
    %c0_31 = arith.constant 0 : index
    %48 = vector.load %arg3[%c64, %c0_31] : memref<1024x128xf32, #tpu.memory_space<vmem>>, vector<64x128xf32>
    %cst_32 = arith.constant dense<0.000000e+00> : vector<103x128xf32>
    %49 = tpu.matmul %47, %48, %cst_32 {dimension_numbers = #tpu.dot_dimension_numbers<[1], [0], [0], [1], [0, 0, 1, 1], [], []>} : vector<103x64xf32>, vector<64x128xf32>, vector<103x128xf32> -> vector<103x128xf32>
    %50 = arith.addf %46, %49 : vector<103x128xf32>
    %c2 = arith.constant 2 : index
    %c0_33 = arith.constant 0 : index
    %51 = tpu.strided_load %arg5[%c2, %c0_33] {strides = array<i32: 2, 1>} : memref<256x64xf32, #tpu.memory_space<vmem>>, vector<103x64xf32>
    %c128 = arith.constant 128 : index
    %c0_34 = arith.constant 0 : index
    %52 = vector.load %arg3[%c128, %c0_34] : memref<1024x128xf32, #tpu.memory_space<vmem>>, vector<64x128xf32>
    %cst_35 = arith.constant dense<0.000000e+00> : vector<103x128xf32>
    %53 = tpu.matmul %51, %52, %cst_35 {dimension_numbers = #tpu.dot_dimension_numbers<[1], [0], [0], [1], [0, 0, 1, 1], [], []>} : vector<103x64xf32>, vector<64x128xf32>, vector<103x128xf32> -> vector<103x128xf32>
    %54 = arith.addf %50, %53 : vector<103x128xf32>
    %c3 = arith.constant 3 : index
    %c0_36 = arith.constant 0 : index
    %55 = tpu.strided_load %arg5[%c3, %c0_36] {strides = array<i32: 2, 1>} : memref<256x64xf32, #tpu.memory_space<vmem>>, vector<103x64xf32>
    %c192 = arith.constant 192 : index
    %c0_37 = arith.constant 0 : index
    %56 = vector.load %arg3[%c192, %c0_37] : memref<1024x128xf32, #tpu.memory_space<vmem>>, vector<64x128xf32>
    %cst_38 = arith.constant dense<0.000000e+00> : vector<103x128xf32>
    %57 = tpu.matmul %55, %56, %cst_38 {dimension_numbers = #tpu.dot_dimension_numbers<[1], [0], [0], [1], [0, 0, 1, 1], [], []>} : vector<103x64xf32>, vector<64x128xf32>, vector<103x128xf32> -> vector<103x128xf32>
    %58 = arith.addf %54, %57 : vector<103x128xf32>
    %c16 = arith.constant 16 : index
    %c0_39 = arith.constant 0 : index
    %59 = tpu.strided_load %arg5[%c16, %c0_39] {strides = array<i32: 2, 1>} : memref<256x64xf32, #tpu.memory_space<vmem>>, vector<103x64xf32>
    %c256 = arith.constant 256 : index
    %c0_40 = arith.constant 0 : index
    %60 = vector.load %arg3[%c256, %c0_40] : memref<1024x128xf32, #tpu.memory_space<vmem>>, vector<64x128xf32>
    %cst_41 = arith.constant dense<0.000000e+00> : vector<103x128xf32>
    %61 = tpu.matmul %59, %60, %cst_41 {dimension_numbers = #tpu.dot_dimension_numbers<[1], [0], [0], [1], [0, 0, 1, 1], [], []>} : vector<103x64xf32>, vector<64x128xf32>, vector<103x128xf32> -> vector<103x128xf32>
    %62 = arith.addf %58, %61 : vector<103x128xf32>
    %c17_42 = arith.constant 17 : index
    %c0_43 = arith.constant 0 : index
    %63 = tpu.strided_load %arg5[%c17_42, %c0_43] {strides = array<i32: 2, 1>} : memref<256x64xf32, #tpu.memory_space<vmem>>, vector<103x64xf32>
    %c320 = arith.constant 320 : index
    %c0_44 = arith.constant 0 : index
    %64 = vector.load %arg3[%c320, %c0_44] : memref<1024x128xf32, #tpu.memory_space<vmem>>, vector<64x128xf32>
    %cst_45 = arith.constant dense<0.000000e+00> : vector<103x128xf32>
    %65 = tpu.matmul %63, %64, %cst_45 {dimension_numbers = #tpu.dot_dimension_numbers<[1], [0], [0], [1], [0, 0, 1, 1], [], []>} : vector<103x64xf32>, vector<64x128xf32>, vector<103x128xf32> -> vector<103x128xf32>
    %66 = arith.addf %62, %65 : vector<103x128xf32>
    %c18 = arith.constant 18 : index
    %c0_46 = arith.constant 0 : index
    %67 = tpu.strided_load %arg5[%c18, %c0_46] {strides = array<i32: 2, 1>} : memref<256x64xf32, #tpu.memory_space<vmem>>, vector<103x64xf32>
    %c384 = arith.constant 384 : index
    %c0_47 = arith.constant 0 : index
    %68 = vector.load %arg3[%c384, %c0_47] : memref<1024x128xf32, #tpu.memory_space<vmem>>, vector<64x128xf32>
    %cst_48 = arith.constant dense<0.000000e+00> : vector<103x128xf32>
    %69 = tpu.matmul %67, %68, %cst_48 {dimension_numbers = #tpu.dot_dimension_numbers<[1], [0], [0], [1], [0, 0, 1, 1], [], []>} : vector<103x64xf32>, vector<64x128xf32>, vector<103x128xf32> -> vector<103x128xf32>
    %70 = arith.addf %66, %69 : vector<103x128xf32>
    %c19 = arith.constant 19 : index
    %c0_49 = arith.constant 0 : index
    %71 = tpu.strided_load %arg5[%c19, %c0_49] {strides = array<i32: 2, 1>} : memref<256x64xf32, #tpu.memory_space<vmem>>, vector<103x64xf32>
    %c448 = arith.constant 448 : index
    %c0_50 = arith.constant 0 : index
    %72 = vector.load %arg3[%c448, %c0_50] : memref<1024x128xf32, #tpu.memory_space<vmem>>, vector<64x128xf32>
    %cst_51 = arith.constant dense<0.000000e+00> : vector<103x128xf32>
    %73 = tpu.matmul %71, %72, %cst_51 {dimension_numbers = #tpu.dot_dimension_numbers<[1], [0], [0], [1], [0, 0, 1, 1], [], []>} : vector<103x64xf32>, vector<64x128xf32>, vector<103x128xf32> -> vector<103x128xf32>
    %74 = arith.addf %70, %73 : vector<103x128xf32>
    %c32 = arith.constant 32 : index
    %c0_52 = arith.constant 0 : index
    %75 = tpu.strided_load %arg5[%c32, %c0_52] {strides = array<i32: 2, 1>} : memref<256x64xf32, #tpu.memory_space<vmem>>, vector<103x64xf32>
    %c512 = arith.constant 512 : index
    %c0_53 = arith.constant 0 : index
    %76 = vector.load %arg3[%c512, %c0_53] : memref<1024x128xf32, #tpu.memory_space<vmem>>, vector<64x128xf32>
    %cst_54 = arith.constant dense<0.000000e+00> : vector<103x128xf32>
    %77 = tpu.matmul %75, %76, %cst_54 {dimension_numbers = #tpu.dot_dimension_numbers<[1], [0], [0], [1], [0, 0, 1, 1], [], []>} : vector<103x64xf32>, vector<64x128xf32>, vector<103x128xf32> -> vector<103x128xf32>
    %78 = arith.addf %74, %77 : vector<103x128xf32>
    %c33_55 = arith.constant 33 : index
    %c0_56 = arith.constant 0 : index
    %79 = tpu.strided_load %arg5[%c33_55, %c0_56] {strides = array<i32: 2, 1>} : memref<256x64xf32, #tpu.memory_space<vmem>>, vector<103x64xf32>
    %c576 = arith.constant 576 : index
    %c0_57 = arith.constant 0 : index
    %80 = vector.load %arg3[%c576, %c0_57] : memref<1024x128xf32, #tpu.memory_space<vmem>>, vector<64x128xf32>
    %cst_58 = arith.constant dense<0.000000e+00> : vector<103x128xf32>
    %81 = tpu.matmul %79, %80, %cst_58 {dimension_numbers = #tpu.dot_dimension_numbers<[1], [0], [0], [1], [0, 0, 1, 1], [], []>} : vector<103x64xf32>, vector<64x128xf32>, vector<103x128xf32> -> vector<103x128xf32>
    %82 = arith.addf %78, %81 : vector<103x128xf32>
    %c34 = arith.constant 34 : index
    %c0_59 = arith.constant 0 : index
    %83 = tpu.strided_load %arg5[%c34, %c0_59] {strides = array<i32: 2, 1>} : memref<256x64xf32, #tpu.memory_space<vmem>>, vector<103x64xf32>
    %c640 = arith.constant 640 : index
    %c0_60 = arith.constant 0 : index
    %84 = vector.load %arg3[%c640, %c0_60] : memref<1024x128xf32, #tpu.memory_space<vmem>>, vector<64x128xf32>
    %cst_61 = arith.constant dense<0.000000e+00> : vector<103x128xf32>
    %85 = tpu.matmul %83, %84, %cst_61 {dimension_numbers = #tpu.dot_dimension_numbers<[1], [0], [0], [1], [0, 0, 1, 1], [], []>} : vector<103x64xf32>, vector<64x128xf32>, vector<103x128xf32> -> vector<103x128xf32>
    %86 = arith.addf %82, %85 : vector<103x128xf32>
    %c35 = arith.constant 35 : index
    %c0_62 = arith.constant 0 : index
    %87 = tpu.strided_load %arg5[%c35, %c0_62] {strides = array<i32: 2, 1>} : memref<256x64xf32, #tpu.memory_space<vmem>>, vector<103x64xf32>
    %c704 = arith.constant 704 : index
    %c0_63 = arith.constant 0 : index
    %88 = vector.load %arg3[%c704, %c0_63] : memref<1024x128xf32, #tpu.memory_space<vmem>>, vector<64x128xf32>
    %cst_64 = arith.constant dense<0.000000e+00> : vector<103x128xf32>
    %89 = tpu.matmul %87, %88, %cst_64 {dimension_numbers = #tpu.dot_dimension_numbers<[1], [0], [0], [1], [0, 0, 1, 1], [], []>} : vector<103x64xf32>, vector<64x128xf32>, vector<103x128xf32> -> vector<103x128xf32>
    %90 = arith.addf %86, %89 : vector<103x128xf32>
    %c48 = arith.constant 48 : index
    %c0_65 = arith.constant 0 : index
    %91 = tpu.strided_load %arg5[%c48, %c0_65] {strides = array<i32: 2, 1>} : memref<256x64xf32, #tpu.memory_space<vmem>>, vector<103x64xf32>
    %c768 = arith.constant 768 : index
    %c0_66 = arith.constant 0 : index
    %92 = vector.load %arg3[%c768, %c0_66] : memref<1024x128xf32, #tpu.memory_space<vmem>>, vector<64x128xf32>
    %cst_67 = arith.constant dense<0.000000e+00> : vector<103x128xf32>
    %93 = tpu.matmul %91, %92, %cst_67 {dimension_numbers = #tpu.dot_dimension_numbers<[1], [0], [0], [1], [0, 0, 1, 1], [], []>} : vector<103x64xf32>, vector<64x128xf32>, vector<103x128xf32> -> vector<103x128xf32>
    %94 = arith.addf %90, %93 : vector<103x128xf32>
    %c49_68 = arith.constant 49 : index
    %c0_69 = arith.constant 0 : index
    %95 = tpu.strided_load %arg5[%c49_68, %c0_69] {strides = array<i32: 2, 1>} : memref<256x64xf32, #tpu.memory_space<vmem>>, vector<103x64xf32>
    %c832 = arith.constant 832 : index
    %c0_70 = arith.constant 0 : index
    %96 = vector.load %arg3[%c832, %c0_70] : memref<1024x128xf32, #tpu.memory_space<vmem>>, vector<64x128xf32>
    %cst_71 = arith.constant dense<0.000000e+00> : vector<103x128xf32>
    %97 = tpu.matmul %95, %96, %cst_71 {dimension_numbers = #tpu.dot_dimension_numbers<[1], [0], [0], [1], [0, 0, 1, 1], [], []>} : vector<103x64xf32>, vector<64x128xf32>, vector<103x128xf32> -> vector<103x128xf32>
    %98 = arith.addf %94, %97 : vector<103x128xf32>
    %c50 = arith.constant 50 : index
    %c0_72 = arith.constant 0 : index
    %99 = tpu.strided_load %arg5[%c50, %c0_72] {strides = array<i32: 2, 1>} : memref<256x64xf32, #tpu.memory_space<vmem>>, vector<103x64xf32>
    %c896 = arith.constant 896 : index
    %c0_73 = arith.constant 0 : index
    %100 = vector.load %arg3[%c896, %c0_73] : memref<1024x128xf32, #tpu.memory_space<vmem>>, vector<64x128xf32>
    %cst_74 = arith.constant dense<0.000000e+00> : vector<103x128xf32>
    %101 = tpu.matmul %99, %100, %cst_74 {dimension_numbers = #tpu.dot_dimension_numbers<[1], [0], [0], [1], [0, 0, 1, 1], [], []>} : vector<103x64xf32>, vector<64x128xf32>, vector<103x128xf32> -> vector<103x128xf32>
    %102 = arith.addf %98, %101 : vector<103x128xf32>
    %c51 = arith.constant 51 : index
    %c0_75 = arith.constant 0 : index
    %103 = tpu.strided_load %arg5[%c51, %c0_75] {strides = array<i32: 2, 1>} : memref<256x64xf32, #tpu.memory_space<vmem>>, vector<103x64xf32>
    %c960 = arith.constant 960 : index
    %c0_76 = arith.constant 0 : index
    %104 = vector.load %arg3[%c960, %c0_76] : memref<1024x128xf32, #tpu.memory_space<vmem>>, vector<64x128xf32>
    %cst_77 = arith.constant dense<0.000000e+00> : vector<103x128xf32>
    %105 = tpu.matmul %103, %104, %cst_77 {dimension_numbers = #tpu.dot_dimension_numbers<[1], [0], [0], [1], [0, 0, 1, 1], [], []>} : vector<103x64xf32>, vector<64x128xf32>, vector<103x128xf32> -> vector<103x128xf32>
    %106 = arith.addf %102, %105 : vector<103x128xf32>
    %cst_78 = arith.constant 5.000000e-01 : f32
    %107 = vector.broadcast %cst_78 : f32 to vector<103x128xf32>
    %108 = arith.mulf %107, %106 : vector<103x128xf32>
    %cst_79 = arith.constant 0.707106769 : f32
    %109 = vector.broadcast %cst_79 : f32 to vector<103x128xf32>
    %110 = arith.mulf %106, %109 : vector<103x128xf32>
    %111 = math.erf %110 : vector<103x128xf32>
    %cst_80 = arith.constant 1.000000e+00 : f32
    %112 = vector.broadcast %cst_80 : f32 to vector<103x128xf32>
    %113 = arith.addf %112, %111 : vector<103x128xf32>
    %114 = arith.mulf %108, %113 : vector<103x128xf32>
    %115 = vector.extract_strided_slice %114 {offsets = [0, 0], sizes = [7, 128], strides = [1, 1]} : vector<103x128xf32> to vector<7x128xf32>
    %116 = arith.truncf %115 : vector<7x128xf32> to vector<7x128xbf16>
    %c0_81 = arith.constant 0 : index
    %c0_82 = arith.constant 0 : index
    %c0_83 = arith.constant 0 : index
    %117 = vector.load %arg4[%c0_81, %c0_82, %c0_83] : memref<1x49x128xbf16, #tpu.memory_space<vmem>>, vector<1x7x128xbf16>
    %118 = vector.shape_cast %117 : vector<1x7x128xbf16> to vector<7x128xbf16>
    %119 = vector.shape_cast %116 : vector<7x128xbf16> to vector<1x7x128xbf16>
    tpu.vector_store %arg4[%c0_81, %c0_82, %c0_83], %119 {strides = array<i32>} : memref<1x49x128xbf16, #tpu.memory_space<vmem>>, vector<1x7x128xbf16>,
    %120 = vector.extract_strided_slice %114 {offsets = [16, 0], sizes = [7, 128], strides = [1, 1]} : vector<103x128xf32> to vector<7x128xf32>
    %121 = arith.truncf %120 : vector<7x128xf32> to vector<7x128xbf16>
    %c0_84 = arith.constant 0 : index
    %c7 = arith.constant 7 : index
    %c0_85 = arith.constant 0 : index
    %122 = vector.load %arg4[%c0_84, %c7, %c0_85] : memref<1x49x128xbf16, #tpu.memory_space<vmem>>, vector<1x7x128xbf16>
    %123 = vector.shape_cast %122 : vector<1x7x128xbf16> to vector<7x128xbf16>
    %124 = vector.shape_cast %121 : vector<7x128xbf16> to vector<1x7x128xbf16>
    tpu.vector_store %arg4[%c0_84, %c7, %c0_85], %124 {strides = array<i32>} : memref<1x49x128xbf16, #tpu.memory_space<vmem>>, vector<1x7x128xbf16>,
    %125 = vector.extract_strided_slice %114 {offsets = [32, 0], sizes = [7, 128], strides = [1, 1]} : vector<103x128xf32> to vector<7x128xf32>
    %126 = arith.truncf %125 : vector<7x128xf32> to vector<7x128xbf16>
    %c0_86 = arith.constant 0 : index
    %c14 = arith.constant 14 : index
    %c0_87 = arith.constant 0 : index
    %127 = vector.load %arg4[%c0_86, %c14, %c0_87] : memref<1x49x128xbf16, #tpu.memory_space<vmem>>, vector<1x7x128xbf16>
    %128 = vector.shape_cast %127 : vector<1x7x128xbf16> to vector<7x128xbf16>
    %129 = vector.shape_cast %126 : vector<7x128xbf16> to vector<1x7x128xbf16>
    tpu.vector_store %arg4[%c0_86, %c14, %c0_87], %129 {strides = array<i32>} : memref<1x49x128xbf16, #tpu.memory_space<vmem>>, vector<1x7x128xbf16>,
    %130 = vector.extract_strided_slice %114 {offsets = [48, 0], sizes = [7, 128], strides = [1, 1]} : vector<103x128xf32> to vector<7x128xf32>
    %131 = arith.truncf %130 : vector<7x128xf32> to vector<7x128xbf16>
    %c0_88 = arith.constant 0 : index
    %c21 = arith.constant 21 : index
    %c0_89 = arith.constant 0 : index
    %132 = vector.load %arg4[%c0_88, %c21, %c0_89] : memref<1x49x128xbf16, #tpu.memory_space<vmem>>, vector<1x7x128xbf16>
    %133 = vector.shape_cast %132 : vector<1x7x128xbf16> to vector<7x128xbf16>
    %134 = vector.shape_cast %131 : vector<7x128xbf16> to vector<1x7x128xbf16>
    tpu.vector_store %arg4[%c0_88, %c21, %c0_89], %134 {strides = array<i32>} : memref<1x49x128xbf16, #tpu.memory_space<vmem>>, vector<1x7x128xbf16>,
    %135 = vector.extract_strided_slice %114 {offsets = [64, 0], sizes = [7, 128], strides = [1, 1]} : vector<103x128xf32> to vector<7x128xf32>
    %136 = arith.truncf %135 : vector<7x128xf32> to vector<7x128xbf16>
    %c0_90 = arith.constant 0 : index
    %c28 = arith.constant 28 : index
    %c0_91 = arith.constant 0 : index
    %137 = vector.load %arg4[%c0_90, %c28, %c0_91] : memref<1x49x128xbf16, #tpu.memory_space<vmem>>, vector<1x7x128xbf16>
    %138 = vector.shape_cast %137 : vector<1x7x128xbf16> to vector<7x128xbf16>
    %139 = vector.shape_cast %136 : vector<7x128xbf16> to vector<1x7x128xbf16>
    tpu.vector_store %arg4[%c0_90, %c28, %c0_91], %139 {strides = array<i32>} : memref<1x49x128xbf16, #tpu.memory_space<vmem>>, vector<1x7x128xbf16>,
    %140 = vector.extract_strided_slice %114 {offsets = [80, 0], sizes = [7, 128], strides = [1, 1]} : vector<103x128xf32> to vector<7x128xf32>
    %141 = arith.truncf %140 : vector<7x128xf32> to vector<7x128xbf16>
    %c0_92 = arith.constant 0 : index
    %c35_93 = arith.constant 35 : index
    %c0_94 = arith.constant 0 : index
    %142 = vector.load %arg4[%c0_92, %c35_93, %c0_94] : memref<1x49x128xbf16, #tpu.memory_space<vmem>>, vector<1x7x128xbf16>
    %143 = vector.shape_cast %142 : vector<1x7x128xbf16> to vector<7x128xbf16>
    %144 = vector.shape_cast %141 : vector<7x128xbf16> to vector<1x7x128xbf16>
    tpu.vector_store %arg4[%c0_92, %c35_93, %c0_94], %144 {strides = array<i32>} : memref<1x49x128xbf16, #tpu.memory_space<vmem>>, vector<1x7x128xbf16>,
    %145 = vector.extract_strided_slice %114 {offsets = [96, 0], sizes = [7, 128], strides = [1, 1]} : vector<103x128xf32> to vector<7x128xf32>
    %146 = arith.truncf %145 : vector<7x128xf32> to vector<7x128xbf16>
    %c0_95 = arith.constant 0 : index
    %c42 = arith.constant 42 : index
    %c0_96 = arith.constant 0 : index
    %147 = vector.load %arg4[%c0_95, %c42, %c0_96] : memref<1x49x128xbf16, #tpu.memory_space<vmem>>, vector<1x7x128xbf16>
    %148 = vector.shape_cast %147 : vector<1x7x128xbf16> to vector<7x128xbf16>
    %149 = vector.shape_cast %146 : vector<7x128xbf16> to vector<1x7x128xbf16>
    tpu.vector_store %arg4[%c0_95, %c42, %c0_96], %149 {strides = array<i32>} : memref<1x49x128xbf16, #tpu.memory_space<vmem>>, vector<1x7x128xbf16>,
    return
  }
  func.func @transform_0(%arg0: i32) -> (i32, i32, i32) {
    %c0_i32 = arith.constant 0 : i32
    %c0_i32_0 = arith.constant 0 : i32
    %c0_i32_1 = arith.constant 0 : i32
    return %arg0, %c0_i32, %c0_i32_0 : i32, i32, i32
  }
  func.func @transform_1(%arg0: i32) -> (i32, i32) {
    %c0_i32 = arith.constant 0 : i32
    %c0_i32_0 = arith.constant 0 : i32
    %c0_i32_1 = arith.constant 0 : i32
    return %c0_i32, %c0_i32_0 : i32, i32
  }
  func.func @transform_2(%arg0: i32) -> (i32, i32) {
    %c0_i32 = arith.constant 0 : i32
    %c0_i32_0 = arith.constant 0 : i32
    %c0_i32_1 = arith.constant 0 : i32
    return %c0_i32, %c0_i32_0 : i32, i32
  }
  func.func @transform_3(%arg0: i32) -> (i32, i32, i32) {
    %c0_i32 = arith.constant 0 : i32
    %c0_i32_0 = arith.constant 0 : i32
    %c0_i32_1 = arith.constant 0 : i32
    return %arg0, %c0_i32, %c0_i32_0 : i32, i32, i32
  }
}

module attributes {stable_mosaic.version = 11 : i64} {
  func.func @kernel(%arg0: i32, %arg1: memref<1x256x48xf32, #tpu.memory_space<vmem>>, %arg2: memref<48x32xf32, #tpu.memory_space<vmem>>, %arg3: memref<512x64xf32, #tpu.memory_space<vmem>>, %arg4: memref<1024x128xf32, #tpu.memory_space<vmem>>, %arg5: memref<1x16x128xbf16, #tpu.memory_space<vmem>>, %arg6: memref<324x32xf32, #tpu.memory_space<vmem>>, %arg7: memref<100x64xf32, #tpu.memory_space<vmem>>) attributes {dimension_semantics = [#tpu.dimension_semantics<parallel>], iteration_bounds = array<i64: 2>, scalar_prefetch = 0 : i64, scratch_operands = 2 : i64, tpu.core_type = #tpu.core_type<tc>, window_params = [{transform_indices = @transform_0, window_bounds = array<i64: 1, 256, 48>}, {pipeline_mode = #tpu.pipeline_mode<synchronous>, transform_indices = @transform_1, window_bounds = array<i64: 48, 32>}, {pipeline_mode = #tpu.pipeline_mode<synchronous>, transform_indices = @transform_2, window_bounds = array<i64: 512, 64>}, {pipeline_mode = #tpu.pipeline_mode<synchronous>, transform_indices = @transform_3, window_bounds = array<i64: 1024, 128>}, {transform_indices = @transform_4, window_bounds = array<i64: 1, 16, 128>}]} {
    %c0 = arith.constant 0 : index
    %c0_0 = arith.constant 0 : index
    %c0_1 = arith.constant 0 : index
    %0 = vector.load %arg1[%c0, %c0_0, %c0_1] : memref<1x256x48xf32, #tpu.memory_space<vmem>>, vector<1x256x48xf32>
    %1 = vector.shape_cast %0 : vector<1x256x48xf32> to vector<256x48xf32>
    %c0_2 = arith.constant 0 : index
    %c0_3 = arith.constant 0 : index
    %2 = vector.load %arg2[%c0_2, %c0_3] : memref<48x32xf32, #tpu.memory_space<vmem>>, vector<48x32xf32>
    %cst = arith.constant dense<0.000000e+00> : vector<256x32xf32>
    %3 = tpu.matmul %1, %2, %cst {dimension_numbers = #tpu.dot_dimension_numbers<[1], [0], [0], [1], [0, 0, 1, 1], [], []>} : vector<256x48xf32>, vector<48x32xf32>, vector<256x32xf32> -> vector<256x32xf32>
    %cst_4 = arith.constant 5.000000e-01 : f32
    %4 = vector.broadcast %cst_4 : f32 to vector<256x32xf32>
    %5 = arith.mulf %4, %3 : vector<256x32xf32>
    %cst_5 = arith.constant 0.707106769 : f32
    %6 = vector.broadcast %cst_5 : f32 to vector<256x32xf32>
    %7 = arith.mulf %3, %6 : vector<256x32xf32>
    %8 = math.erf %7 : vector<256x32xf32>
    %cst_6 = arith.constant 1.000000e+00 : f32
    %9 = vector.broadcast %cst_6 : f32 to vector<256x32xf32>
    %10 = arith.addf %9, %8 : vector<256x32xf32>
    %11 = arith.mulf %5, %10 : vector<256x32xf32>
    %cst_7 = arith.constant 0.000000e+00 : f32
    %12 = vector.broadcast %cst_7 : f32 to vector<324x32xf32>
    %c0_8 = arith.constant 0 : index
    %c0_9 = arith.constant 0 : index
    %13 = vector.load %arg6[%c0_8, %c0_9] : memref<324x32xf32, #tpu.memory_space<vmem>>, vector<324x32xf32>
    tpu.vector_store %arg6[%c0_8, %c0_9], %12 {strides = array<i32>} : memref<324x32xf32, #tpu.memory_space<vmem>>, vector<324x32xf32>,
    %14 = vector.extract_strided_slice %11 {offsets = [0, 0], sizes = [16, 32], strides = [1, 1]} : vector<256x32xf32> to vector<16x32xf32>
    %c19 = arith.constant 19 : index
    %c0_10 = arith.constant 0 : index
    %15 = vector.load %arg6[%c19, %c0_10] : memref<324x32xf32, #tpu.memory_space<vmem>>, vector<16x32xf32>
    tpu.vector_store %arg6[%c19, %c0_10], %14 {strides = array<i32>} : memref<324x32xf32, #tpu.memory_space<vmem>>, vector<16x32xf32>,
    %16 = vector.extract_strided_slice %11 {offsets = [16, 0], sizes = [16, 32], strides = [1, 1]} : vector<256x32xf32> to vector<16x32xf32>
    %c37 = arith.constant 37 : index
    %c0_11 = arith.constant 0 : index
    %17 = vector.load %arg6[%c37, %c0_11] : memref<324x32xf32, #tpu.memory_space<vmem>>, vector<16x32xf32>
    tpu.vector_store %arg6[%c37, %c0_11], %16 {strides = array<i32>} : memref<324x32xf32, #tpu.memory_space<vmem>>, vector<16x32xf32>,
    %18 = vector.extract_strided_slice %11 {offsets = [32, 0], sizes = [16, 32], strides = [1, 1]} : vector<256x32xf32> to vector<16x32xf32>
    %c55 = arith.constant 55 : index
    %c0_12 = arith.constant 0 : index
    %19 = vector.load %arg6[%c55, %c0_12] : memref<324x32xf32, #tpu.memory_space<vmem>>, vector<16x32xf32>
    tpu.vector_store %arg6[%c55, %c0_12], %18 {strides = array<i32>} : memref<324x32xf32, #tpu.memory_space<vmem>>, vector<16x32xf32>,
    %20 = vector.extract_strided_slice %11 {offsets = [48, 0], sizes = [16, 32], strides = [1, 1]} : vector<256x32xf32> to vector<16x32xf32>
    %c73 = arith.constant 73 : index
    %c0_13 = arith.constant 0 : index
    %21 = vector.load %arg6[%c73, %c0_13] : memref<324x32xf32, #tpu.memory_space<vmem>>, vector<16x32xf32>
    tpu.vector_store %arg6[%c73, %c0_13], %20 {strides = array<i32>} : memref<324x32xf32, #tpu.memory_space<vmem>>, vector<16x32xf32>,
    %22 = vector.extract_strided_slice %11 {offsets = [64, 0], sizes = [16, 32], strides = [1, 1]} : vector<256x32xf32> to vector<16x32xf32>
    %c91 = arith.constant 91 : index
    %c0_14 = arith.constant 0 : index
    %23 = vector.load %arg6[%c91, %c0_14] : memref<324x32xf32, #tpu.memory_space<vmem>>, vector<16x32xf32>
    tpu.vector_store %arg6[%c91, %c0_14], %22 {strides = array<i32>} : memref<324x32xf32, #tpu.memory_space<vmem>>, vector<16x32xf32>,
    %24 = vector.extract_strided_slice %11 {offsets = [80, 0], sizes = [16, 32], strides = [1, 1]} : vector<256x32xf32> to vector<16x32xf32>
    %c109 = arith.constant 109 : index
    %c0_15 = arith.constant 0 : index
    %25 = vector.load %arg6[%c109, %c0_15] : memref<324x32xf32, #tpu.memory_space<vmem>>, vector<16x32xf32>
    tpu.vector_store %arg6[%c109, %c0_15], %24 {strides = array<i32>} : memref<324x32xf32, #tpu.memory_space<vmem>>, vector<16x32xf32>,
    %26 = vector.extract_strided_slice %11 {offsets = [96, 0], sizes = [16, 32], strides = [1, 1]} : vector<256x32xf32> to vector<16x32xf32>
    %c127 = arith.constant 127 : index
    %c0_16 = arith.constant 0 : index
    %27 = vector.load %arg6[%c127, %c0_16] : memref<324x32xf32, #tpu.memory_space<vmem>>, vector<16x32xf32>
    tpu.vector_store %arg6[%c127, %c0_16], %26 {strides = array<i32>} : memref<324x32xf32, #tpu.memory_space<vmem>>, vector<16x32xf32>,
    %28 = vector.extract_strided_slice %11 {offsets = [112, 0], sizes = [16, 32], strides = [1, 1]} : vector<256x32xf32> to vector<16x32xf32>
    %c145 = arith.constant 145 : index
    %c0_17 = arith.constant 0 : index
    %29 = vector.load %arg6[%c145, %c0_17] : memref<324x32xf32, #tpu.memory_space<vmem>>, vector<16x32xf32>
    tpu.vector_store %arg6[%c145, %c0_17], %28 {strides = array<i32>} : memref<324x32xf32, #tpu.memory_space<vmem>>, vector<16x32xf32>,
    %30 = vector.extract_strided_slice %11 {offsets = [128, 0], sizes = [16, 32], strides = [1, 1]} : vector<256x32xf32> to vector<16x32xf32>
    %c163 = arith.constant 163 : index
    %c0_18 = arith.constant 0 : index
    %31 = vector.load %arg6[%c163, %c0_18] : memref<324x32xf32, #tpu.memory_space<vmem>>, vector<16x32xf32>
    tpu.vector_store %arg6[%c163, %c0_18], %30 {strides = array<i32>} : memref<324x32xf32, #tpu.memory_space<vmem>>, vector<16x32xf32>,
    %32 = vector.extract_strided_slice %11 {offsets = [144, 0], sizes = [16, 32], strides = [1, 1]} : vector<256x32xf32> to vector<16x32xf32>
    %c181 = arith.constant 181 : index
    %c0_19 = arith.constant 0 : index
    %33 = vector.load %arg6[%c181, %c0_19] : memref<324x32xf32, #tpu.memory_space<vmem>>, vector<16x32xf32>
    tpu.vector_store %arg6[%c181, %c0_19], %32 {strides = array<i32>} : memref<324x32xf32, #tpu.memory_space<vmem>>, vector<16x32xf32>,
    %34 = vector.extract_strided_slice %11 {offsets = [160, 0], sizes = [16, 32], strides = [1, 1]} : vector<256x32xf32> to vector<16x32xf32>
    %c199 = arith.constant 199 : index
    %c0_20 = arith.constant 0 : index
    %35 = vector.load %arg6[%c199, %c0_20] : memref<324x32xf32, #tpu.memory_space<vmem>>, vector<16x32xf32>
    tpu.vector_store %arg6[%c199, %c0_20], %34 {strides = array<i32>} : memref<324x32xf32, #tpu.memory_space<vmem>>, vector<16x32xf32>,
    %36 = vector.extract_strided_slice %11 {offsets = [176, 0], sizes = [16, 32], strides = [1, 1]} : vector<256x32xf32> to vector<16x32xf32>
    %c217 = arith.constant 217 : index
    %c0_21 = arith.constant 0 : index
    %37 = vector.load %arg6[%c217, %c0_21] : memref<324x32xf32, #tpu.memory_space<vmem>>, vector<16x32xf32>
    tpu.vector_store %arg6[%c217, %c0_21], %36 {strides = array<i32>} : memref<324x32xf32, #tpu.memory_space<vmem>>, vector<16x32xf32>,
    %38 = vector.extract_strided_slice %11 {offsets = [192, 0], sizes = [16, 32], strides = [1, 1]} : vector<256x32xf32> to vector<16x32xf32>
    %c235 = arith.constant 235 : index
    %c0_22 = arith.constant 0 : index
    %39 = vector.load %arg6[%c235, %c0_22] : memref<324x32xf32, #tpu.memory_space<vmem>>, vector<16x32xf32>
    tpu.vector_store %arg6[%c235, %c0_22], %38 {strides = array<i32>} : memref<324x32xf32, #tpu.memory_space<vmem>>, vector<16x32xf32>,
    %40 = vector.extract_strided_slice %11 {offsets = [208, 0], sizes = [16, 32], strides = [1, 1]} : vector<256x32xf32> to vector<16x32xf32>
    %c253 = arith.constant 253 : index
    %c0_23 = arith.constant 0 : index
    %41 = vector.load %arg6[%c253, %c0_23] : memref<324x32xf32, #tpu.memory_space<vmem>>, vector<16x32xf32>
    tpu.vector_store %arg6[%c253, %c0_23], %40 {strides = array<i32>} : memref<324x32xf32, #tpu.memory_space<vmem>>, vector<16x32xf32>,
    %42 = vector.extract_strided_slice %11 {offsets = [224, 0], sizes = [16, 32], strides = [1, 1]} : vector<256x32xf32> to vector<16x32xf32>
    %c271 = arith.constant 271 : index
    %c0_24 = arith.constant 0 : index
    %43 = vector.load %arg6[%c271, %c0_24] : memref<324x32xf32, #tpu.memory_space<vmem>>, vector<16x32xf32>
    tpu.vector_store %arg6[%c271, %c0_24], %42 {strides = array<i32>} : memref<324x32xf32, #tpu.memory_space<vmem>>, vector<16x32xf32>,
    %44 = vector.extract_strided_slice %11 {offsets = [240, 0], sizes = [16, 32], strides = [1, 1]} : vector<256x32xf32> to vector<16x32xf32>
    %c289 = arith.constant 289 : index
    %c0_25 = arith.constant 0 : index
    %45 = vector.load %arg6[%c289, %c0_25] : memref<324x32xf32, #tpu.memory_space<vmem>>, vector<16x32xf32>
    tpu.vector_store %arg6[%c289, %c0_25], %44 {strides = array<i32>} : memref<324x32xf32, #tpu.memory_space<vmem>>, vector<16x32xf32>,
    %cst_26 = arith.constant 0.000000e+00 : f32
    %46 = vector.broadcast %cst_26 : f32 to vector<134x64xf32>
    %c0_27 = arith.constant 0 : index
    %c0_28 = arith.constant 0 : index
    %47 = tpu.strided_load %arg6[%c0_27, %c0_28] {strides = array<i32: 2, 1>} : memref<324x32xf32, #tpu.memory_space<vmem>>, vector<134x32xf32>
    %c0_29 = arith.constant 0 : index
    %c0_30 = arith.constant 0 : index
    %48 = vector.load %arg3[%c0_29, %c0_30] : memref<512x64xf32, #tpu.memory_space<vmem>>, vector<32x64xf32>
    %cst_31 = arith.constant dense<0.000000e+00> : vector<134x64xf32>
    %49 = tpu.matmul %47, %48, %cst_31 {dimension_numbers = #tpu.dot_dimension_numbers<[1], [0], [0], [1], [0, 0, 1, 1], [], []>} : vector<134x32xf32>, vector<32x64xf32>, vector<134x64xf32> -> vector<134x64xf32>
    %50 = arith.addf %46, %49 : vector<134x64xf32>
    %c1 = arith.constant 1 : index
    %c0_32 = arith.constant 0 : index
    %51 = tpu.strided_load %arg6[%c1, %c0_32] {strides = array<i32: 2, 1>} : memref<324x32xf32, #tpu.memory_space<vmem>>, vector<134x32xf32>
    %c32 = arith.constant 32 : index
    %c0_33 = arith.constant 0 : index
    %52 = vector.load %arg3[%c32, %c0_33] : memref<512x64xf32, #tpu.memory_space<vmem>>, vector<32x64xf32>
    %cst_34 = arith.constant dense<0.000000e+00> : vector<134x64xf32>
    %53 = tpu.matmul %51, %52, %cst_34 {dimension_numbers = #tpu.dot_dimension_numbers<[1], [0], [0], [1], [0, 0, 1, 1], [], []>} : vector<134x32xf32>, vector<32x64xf32>, vector<134x64xf32> -> vector<134x64xf32>
    %54 = arith.addf %50, %53 : vector<134x64xf32>
    %c2 = arith.constant 2 : index
    %c0_35 = arith.constant 0 : index
    %55 = tpu.strided_load %arg6[%c2, %c0_35] {strides = array<i32: 2, 1>} : memref<324x32xf32, #tpu.memory_space<vmem>>, vector<134x32xf32>
    %c64 = arith.constant 64 : index
    %c0_36 = arith.constant 0 : index
    %56 = vector.load %arg3[%c64, %c0_36] : memref<512x64xf32, #tpu.memory_space<vmem>>, vector<32x64xf32>
    %cst_37 = arith.constant dense<0.000000e+00> : vector<134x64xf32>
    %57 = tpu.matmul %55, %56, %cst_37 {dimension_numbers = #tpu.dot_dimension_numbers<[1], [0], [0], [1], [0, 0, 1, 1], [], []>} : vector<134x32xf32>, vector<32x64xf32>, vector<134x64xf32> -> vector<134x64xf32>
    %58 = arith.addf %54, %57 : vector<134x64xf32>
    %c3 = arith.constant 3 : index
    %c0_38 = arith.constant 0 : index
    %59 = tpu.strided_load %arg6[%c3, %c0_38] {strides = array<i32: 2, 1>} : memref<324x32xf32, #tpu.memory_space<vmem>>, vector<134x32xf32>
    %c96 = arith.constant 96 : index
    %c0_39 = arith.constant 0 : index
    %60 = vector.load %arg3[%c96, %c0_39] : memref<512x64xf32, #tpu.memory_space<vmem>>, vector<32x64xf32>
    %cst_40 = arith.constant dense<0.000000e+00> : vector<134x64xf32>
    %61 = tpu.matmul %59, %60, %cst_40 {dimension_numbers = #tpu.dot_dimension_numbers<[1], [0], [0], [1], [0, 0, 1, 1], [], []>} : vector<134x32xf32>, vector<32x64xf32>, vector<134x64xf32> -> vector<134x64xf32>
    %62 = arith.addf %58, %61 : vector<134x64xf32>
    %c18 = arith.constant 18 : index
    %c0_41 = arith.constant 0 : index
    %63 = tpu.strided_load %arg6[%c18, %c0_41] {strides = array<i32: 2, 1>} : memref<324x32xf32, #tpu.memory_space<vmem>>, vector<134x32xf32>
    %c128 = arith.constant 128 : index
    %c0_42 = arith.constant 0 : index
    %64 = vector.load %arg3[%c128, %c0_42] : memref<512x64xf32, #tpu.memory_space<vmem>>, vector<32x64xf32>
    %cst_43 = arith.constant dense<0.000000e+00> : vector<134x64xf32>
    %65 = tpu.matmul %63, %64, %cst_43 {dimension_numbers = #tpu.dot_dimension_numbers<[1], [0], [0], [1], [0, 0, 1, 1], [], []>} : vector<134x32xf32>, vector<32x64xf32>, vector<134x64xf32> -> vector<134x64xf32>
    %66 = arith.addf %62, %65 : vector<134x64xf32>
    %c19_44 = arith.constant 19 : index
    %c0_45 = arith.constant 0 : index
    %67 = tpu.strided_load %arg6[%c19_44, %c0_45] {strides = array<i32: 2, 1>} : memref<324x32xf32, #tpu.memory_space<vmem>>, vector<134x32xf32>
    %c160 = arith.constant 160 : index
    %c0_46 = arith.constant 0 : index
    %68 = vector.load %arg3[%c160, %c0_46] : memref<512x64xf32, #tpu.memory_space<vmem>>, vector<32x64xf32>
    %cst_47 = arith.constant dense<0.000000e+00> : vector<134x64xf32>
    %69 = tpu.matmul %67, %68, %cst_47 {dimension_numbers = #tpu.dot_dimension_numbers<[1], [0], [0], [1], [0, 0, 1, 1], [], []>} : vector<134x32xf32>, vector<32x64xf32>, vector<134x64xf32> -> vector<134x64xf32>
    %70 = arith.addf %66, %69 : vector<134x64xf32>
    %c20 = arith.constant 20 : index
    %c0_48 = arith.constant 0 : index
    %71 = tpu.strided_load %arg6[%c20, %c0_48] {strides = array<i32: 2, 1>} : memref<324x32xf32, #tpu.memory_space<vmem>>, vector<134x32xf32>
    %c192 = arith.constant 192 : index
    %c0_49 = arith.constant 0 : index
    %72 = vector.load %arg3[%c192, %c0_49] : memref<512x64xf32, #tpu.memory_space<vmem>>, vector<32x64xf32>
    %cst_50 = arith.constant dense<0.000000e+00> : vector<134x64xf32>
    %73 = tpu.matmul %71, %72, %cst_50 {dimension_numbers = #tpu.dot_dimension_numbers<[1], [0], [0], [1], [0, 0, 1, 1], [], []>} : vector<134x32xf32>, vector<32x64xf32>, vector<134x64xf32> -> vector<134x64xf32>
    %74 = arith.addf %70, %73 : vector<134x64xf32>
    %c21 = arith.constant 21 : index
    %c0_51 = arith.constant 0 : index
    %75 = tpu.strided_load %arg6[%c21, %c0_51] {strides = array<i32: 2, 1>} : memref<324x32xf32, #tpu.memory_space<vmem>>, vector<134x32xf32>
    %c224 = arith.constant 224 : index
    %c0_52 = arith.constant 0 : index
    %76 = vector.load %arg3[%c224, %c0_52] : memref<512x64xf32, #tpu.memory_space<vmem>>, vector<32x64xf32>
    %cst_53 = arith.constant dense<0.000000e+00> : vector<134x64xf32>
    %77 = tpu.matmul %75, %76, %cst_53 {dimension_numbers = #tpu.dot_dimension_numbers<[1], [0], [0], [1], [0, 0, 1, 1], [], []>} : vector<134x32xf32>, vector<32x64xf32>, vector<134x64xf32> -> vector<134x64xf32>
    %78 = arith.addf %74, %77 : vector<134x64xf32>
    %c36 = arith.constant 36 : index
    %c0_54 = arith.constant 0 : index
    %79 = tpu.strided_load %arg6[%c36, %c0_54] {strides = array<i32: 2, 1>} : memref<324x32xf32, #tpu.memory_space<vmem>>, vector<134x32xf32>
    %c256 = arith.constant 256 : index
    %c0_55 = arith.constant 0 : index
    %80 = vector.load %arg3[%c256, %c0_55] : memref<512x64xf32, #tpu.memory_space<vmem>>, vector<32x64xf32>
    %cst_56 = arith.constant dense<0.000000e+00> : vector<134x64xf32>
    %81 = tpu.matmul %79, %80, %cst_56 {dimension_numbers = #tpu.dot_dimension_numbers<[1], [0], [0], [1], [0, 0, 1, 1], [], []>} : vector<134x32xf32>, vector<32x64xf32>, vector<134x64xf32> -> vector<134x64xf32>
    %82 = arith.addf %78, %81 : vector<134x64xf32>
    %c37_57 = arith.constant 37 : index
    %c0_58 = arith.constant 0 : index
    %83 = tpu.strided_load %arg6[%c37_57, %c0_58] {strides = array<i32: 2, 1>} : memref<324x32xf32, #tpu.memory_space<vmem>>, vector<134x32xf32>
    %c288 = arith.constant 288 : index
    %c0_59 = arith.constant 0 : index
    %84 = vector.load %arg3[%c288, %c0_59] : memref<512x64xf32, #tpu.memory_space<vmem>>, vector<32x64xf32>
    %cst_60 = arith.constant dense<0.000000e+00> : vector<134x64xf32>
    %85 = tpu.matmul %83, %84, %cst_60 {dimension_numbers = #tpu.dot_dimension_numbers<[1], [0], [0], [1], [0, 0, 1, 1], [], []>} : vector<134x32xf32>, vector<32x64xf32>, vector<134x64xf32> -> vector<134x64xf32>
    %86 = arith.addf %82, %85 : vector<134x64xf32>
    %c38 = arith.constant 38 : index
    %c0_61 = arith.constant 0 : index
    %87 = tpu.strided_load %arg6[%c38, %c0_61] {strides = array<i32: 2, 1>} : memref<324x32xf32, #tpu.memory_space<vmem>>, vector<134x32xf32>
    %c320 = arith.constant 320 : index
    %c0_62 = arith.constant 0 : index
    %88 = vector.load %arg3[%c320, %c0_62] : memref<512x64xf32, #tpu.memory_space<vmem>>, vector<32x64xf32>
    %cst_63 = arith.constant dense<0.000000e+00> : vector<134x64xf32>
    %89 = tpu.matmul %87, %88, %cst_63 {dimension_numbers = #tpu.dot_dimension_numbers<[1], [0], [0], [1], [0, 0, 1, 1], [], []>} : vector<134x32xf32>, vector<32x64xf32>, vector<134x64xf32> -> vector<134x64xf32>
    %90 = arith.addf %86, %89 : vector<134x64xf32>
    %c39 = arith.constant 39 : index
    %c0_64 = arith.constant 0 : index
    %91 = tpu.strided_load %arg6[%c39, %c0_64] {strides = array<i32: 2, 1>} : memref<324x32xf32, #tpu.memory_space<vmem>>, vector<134x32xf32>
    %c352 = arith.constant 352 : index
    %c0_65 = arith.constant 0 : index
    %92 = vector.load %arg3[%c352, %c0_65] : memref<512x64xf32, #tpu.memory_space<vmem>>, vector<32x64xf32>
    %cst_66 = arith.constant dense<0.000000e+00> : vector<134x64xf32>
    %93 = tpu.matmul %91, %92, %cst_66 {dimension_numbers = #tpu.dot_dimension_numbers<[1], [0], [0], [1], [0, 0, 1, 1], [], []>} : vector<134x32xf32>, vector<32x64xf32>, vector<134x64xf32> -> vector<134x64xf32>
    %94 = arith.addf %90, %93 : vector<134x64xf32>
    %c54 = arith.constant 54 : index
    %c0_67 = arith.constant 0 : index
    %95 = tpu.strided_load %arg6[%c54, %c0_67] {strides = array<i32: 2, 1>} : memref<324x32xf32, #tpu.memory_space<vmem>>, vector<134x32xf32>
    %c384 = arith.constant 384 : index
    %c0_68 = arith.constant 0 : index
    %96 = vector.load %arg3[%c384, %c0_68] : memref<512x64xf32, #tpu.memory_space<vmem>>, vector<32x64xf32>
    %cst_69 = arith.constant dense<0.000000e+00> : vector<134x64xf32>
    %97 = tpu.matmul %95, %96, %cst_69 {dimension_numbers = #tpu.dot_dimension_numbers<[1], [0], [0], [1], [0, 0, 1, 1], [], []>} : vector<134x32xf32>, vector<32x64xf32>, vector<134x64xf32> -> vector<134x64xf32>
    %98 = arith.addf %94, %97 : vector<134x64xf32>
    %c55_70 = arith.constant 55 : index
    %c0_71 = arith.constant 0 : index
    %99 = tpu.strided_load %arg6[%c55_70, %c0_71] {strides = array<i32: 2, 1>} : memref<324x32xf32, #tpu.memory_space<vmem>>, vector<134x32xf32>
    %c416 = arith.constant 416 : index
    %c0_72 = arith.constant 0 : index
    %100 = vector.load %arg3[%c416, %c0_72] : memref<512x64xf32, #tpu.memory_space<vmem>>, vector<32x64xf32>
    %cst_73 = arith.constant dense<0.000000e+00> : vector<134x64xf32>
    %101 = tpu.matmul %99, %100, %cst_73 {dimension_numbers = #tpu.dot_dimension_numbers<[1], [0], [0], [1], [0, 0, 1, 1], [], []>} : vector<134x32xf32>, vector<32x64xf32>, vector<134x64xf32> -> vector<134x64xf32>
    %102 = arith.addf %98, %101 : vector<134x64xf32>
    %c56 = arith.constant 56 : index
    %c0_74 = arith.constant 0 : index
    %103 = tpu.strided_load %arg6[%c56, %c0_74] {strides = array<i32: 2, 1>} : memref<324x32xf32, #tpu.memory_space<vmem>>, vector<134x32xf32>
    %c448 = arith.constant 448 : index
    %c0_75 = arith.constant 0 : index
    %104 = vector.load %arg3[%c448, %c0_75] : memref<512x64xf32, #tpu.memory_space<vmem>>, vector<32x64xf32>
    %cst_76 = arith.constant dense<0.000000e+00> : vector<134x64xf32>
    %105 = tpu.matmul %103, %104, %cst_76 {dimension_numbers = #tpu.dot_dimension_numbers<[1], [0], [0], [1], [0, 0, 1, 1], [], []>} : vector<134x32xf32>, vector<32x64xf32>, vector<134x64xf32> -> vector<134x64xf32>
    %106 = arith.addf %102, %105 : vector<134x64xf32>
    %c57 = arith.constant 57 : index
    %c0_77 = arith.constant 0 : index
    %107 = tpu.strided_load %arg6[%c57, %c0_77] {strides = array<i32: 2, 1>} : memref<324x32xf32, #tpu.memory_space<vmem>>, vector<134x32xf32>
    %c480 = arith.constant 480 : index
    %c0_78 = arith.constant 0 : index
    %108 = vector.load %arg3[%c480, %c0_78] : memref<512x64xf32, #tpu.memory_space<vmem>>, vector<32x64xf32>
    %cst_79 = arith.constant dense<0.000000e+00> : vector<134x64xf32>
    %109 = tpu.matmul %107, %108, %cst_79 {dimension_numbers = #tpu.dot_dimension_numbers<[1], [0], [0], [1], [0, 0, 1, 1], [], []>} : vector<134x32xf32>, vector<32x64xf32>, vector<134x64xf32> -> vector<134x64xf32>
    %110 = arith.addf %106, %109 : vector<134x64xf32>
    %cst_80 = arith.constant 5.000000e-01 : f32
    %111 = vector.broadcast %cst_80 : f32 to vector<134x64xf32>
    %112 = arith.mulf %111, %110 : vector<134x64xf32>
    %cst_81 = arith.constant 0.707106769 : f32
    %113 = vector.broadcast %cst_81 : f32 to vector<134x64xf32>
    %114 = arith.mulf %110, %113 : vector<134x64xf32>
    %115 = math.erf %114 : vector<134x64xf32>
    %cst_82 = arith.constant 1.000000e+00 : f32
    %116 = vector.broadcast %cst_82 : f32 to vector<134x64xf32>
    %117 = arith.addf %116, %115 : vector<134x64xf32>
    %118 = arith.mulf %112, %117 : vector<134x64xf32>
    %cst_83 = arith.constant 0.000000e+00 : f32
    %119 = vector.broadcast %cst_83 : f32 to vector<100x64xf32>
    %c0_84 = arith.constant 0 : index
    %c0_85 = arith.constant 0 : index
    %120 = vector.load %arg7[%c0_84, %c0_85] : memref<100x64xf32, #tpu.memory_space<vmem>>, vector<100x64xf32>
    tpu.vector_store %arg7[%c0_84, %c0_85], %119 {strides = array<i32>} : memref<100x64xf32, #tpu.memory_space<vmem>>, vector<100x64xf32>,
    %121 = vector.extract_strided_slice %118 {offsets = [0, 0], sizes = [8, 64], strides = [1, 1]} : vector<134x64xf32> to vector<8x64xf32>
    %c11 = arith.constant 11 : index
    %c0_86 = arith.constant 0 : index
    %122 = vector.load %arg7[%c11, %c0_86] : memref<100x64xf32, #tpu.memory_space<vmem>>, vector<8x64xf32>
    tpu.vector_store %arg7[%c11, %c0_86], %121 {strides = array<i32>} : memref<100x64xf32, #tpu.memory_space<vmem>>, vector<8x64xf32>,
    %123 = vector.extract_strided_slice %118 {offsets = [18, 0], sizes = [8, 64], strides = [1, 1]} : vector<134x64xf32> to vector<8x64xf32>
    %c21_87 = arith.constant 21 : index
    %c0_88 = arith.constant 0 : index
    %124 = vector.load %arg7[%c21_87, %c0_88] : memref<100x64xf32, #tpu.memory_space<vmem>>, vector<8x64xf32>
    tpu.vector_store %arg7[%c21_87, %c0_88], %123 {strides = array<i32>} : memref<100x64xf32, #tpu.memory_space<vmem>>, vector<8x64xf32>,
    %125 = vector.extract_strided_slice %118 {offsets = [36, 0], sizes = [8, 64], strides = [1, 1]} : vector<134x64xf32> to vector<8x64xf32>
    %c31 = arith.constant 31 : index
    %c0_89 = arith.constant 0 : index
    %126 = vector.load %arg7[%c31, %c0_89] : memref<100x64xf32, #tpu.memory_space<vmem>>, vector<8x64xf32>
    tpu.vector_store %arg7[%c31, %c0_89], %125 {strides = array<i32>} : memref<100x64xf32, #tpu.memory_space<vmem>>, vector<8x64xf32>,
    %127 = vector.extract_strided_slice %118 {offsets = [54, 0], sizes = [8, 64], strides = [1, 1]} : vector<134x64xf32> to vector<8x64xf32>
    %c41 = arith.constant 41 : index
    %c0_90 = arith.constant 0 : index
    %128 = vector.load %arg7[%c41, %c0_90] : memref<100x64xf32, #tpu.memory_space<vmem>>, vector<8x64xf32>
    tpu.vector_store %arg7[%c41, %c0_90], %127 {strides = array<i32>} : memref<100x64xf32, #tpu.memory_space<vmem>>, vector<8x64xf32>,
    %129 = vector.extract_strided_slice %118 {offsets = [72, 0], sizes = [8, 64], strides = [1, 1]} : vector<134x64xf32> to vector<8x64xf32>
    %c51 = arith.constant 51 : index
    %c0_91 = arith.constant 0 : index
    %130 = vector.load %arg7[%c51, %c0_91] : memref<100x64xf32, #tpu.memory_space<vmem>>, vector<8x64xf32>
    tpu.vector_store %arg7[%c51, %c0_91], %129 {strides = array<i32>} : memref<100x64xf32, #tpu.memory_space<vmem>>, vector<8x64xf32>,
    %131 = vector.extract_strided_slice %118 {offsets = [90, 0], sizes = [8, 64], strides = [1, 1]} : vector<134x64xf32> to vector<8x64xf32>
    %c61 = arith.constant 61 : index
    %c0_92 = arith.constant 0 : index
    %132 = vector.load %arg7[%c61, %c0_92] : memref<100x64xf32, #tpu.memory_space<vmem>>, vector<8x64xf32>
    tpu.vector_store %arg7[%c61, %c0_92], %131 {strides = array<i32>} : memref<100x64xf32, #tpu.memory_space<vmem>>, vector<8x64xf32>,
    %133 = vector.extract_strided_slice %118 {offsets = [108, 0], sizes = [8, 64], strides = [1, 1]} : vector<134x64xf32> to vector<8x64xf32>
    %c71 = arith.constant 71 : index
    %c0_93 = arith.constant 0 : index
    %134 = vector.load %arg7[%c71, %c0_93] : memref<100x64xf32, #tpu.memory_space<vmem>>, vector<8x64xf32>
    tpu.vector_store %arg7[%c71, %c0_93], %133 {strides = array<i32>} : memref<100x64xf32, #tpu.memory_space<vmem>>, vector<8x64xf32>,
    %135 = vector.extract_strided_slice %118 {offsets = [126, 0], sizes = [8, 64], strides = [1, 1]} : vector<134x64xf32> to vector<8x64xf32>
    %c81 = arith.constant 81 : index
    %c0_94 = arith.constant 0 : index
    %136 = vector.load %arg7[%c81, %c0_94] : memref<100x64xf32, #tpu.memory_space<vmem>>, vector<8x64xf32>
    tpu.vector_store %arg7[%c81, %c0_94], %135 {strides = array<i32>} : memref<100x64xf32, #tpu.memory_space<vmem>>, vector<8x64xf32>,
    %cst_95 = arith.constant 0.000000e+00 : f32
    %137 = vector.broadcast %cst_95 : f32 to vector<34x128xf32>
    %c0_96 = arith.constant 0 : index
    %c0_97 = arith.constant 0 : index
    %138 = tpu.strided_load %arg7[%c0_96, %c0_97] {strides = array<i32: 2, 1>} : memref<100x64xf32, #tpu.memory_space<vmem>>, vector<34x64xf32>
    %c0_98 = arith.constant 0 : index
    %c0_99 = arith.constant 0 : index
    %139 = vector.load %arg4[%c0_98, %c0_99] : memref<1024x128xf32, #tpu.memory_space<vmem>>, vector<64x128xf32>
    %cst_100 = arith.constant dense<0.000000e+00> : vector<34x128xf32>
    %140 = tpu.matmul %138, %139, %cst_100 {dimension_numbers = #tpu.dot_dimension_numbers<[1], [0], [0], [1], [0, 0, 1, 1], [], []>} : vector<34x64xf32>, vector<64x128xf32>, vector<34x128xf32> -> vector<34x128xf32>
    %141 = arith.addf %137, %140 : vector<34x128xf32>
    %c1_101 = arith.constant 1 : index
    %c0_102 = arith.constant 0 : index
    %142 = tpu.strided_load %arg7[%c1_101, %c0_102] {strides = array<i32: 2, 1>} : memref<100x64xf32, #tpu.memory_space<vmem>>, vector<34x64xf32>
    %c64_103 = arith.constant 64 : index
    %c0_104 = arith.constant 0 : index
    %143 = vector.load %arg4[%c64_103, %c0_104] : memref<1024x128xf32, #tpu.memory_space<vmem>>, vector<64x128xf32>
    %cst_105 = arith.constant dense<0.000000e+00> : vector<34x128xf32>
    %144 = tpu.matmul %142, %143, %cst_105 {dimension_numbers = #tpu.dot_dimension_numbers<[1], [0], [0], [1], [0, 0, 1, 1], [], []>} : vector<34x64xf32>, vector<64x128xf32>, vector<34x128xf32> -> vector<34x128xf32>
    %145 = arith.addf %141, %144 : vector<34x128xf32>
    %c2_106 = arith.constant 2 : index
    %c0_107 = arith.constant 0 : index
    %146 = tpu.strided_load %arg7[%c2_106, %c0_107] {strides = array<i32: 2, 1>} : memref<100x64xf32, #tpu.memory_space<vmem>>, vector<34x64xf32>
    %c128_108 = arith.constant 128 : index
    %c0_109 = arith.constant 0 : index
    %147 = vector.load %arg4[%c128_108, %c0_109] : memref<1024x128xf32, #tpu.memory_space<vmem>>, vector<64x128xf32>
    %cst_110 = arith.constant dense<0.000000e+00> : vector<34x128xf32>
    %148 = tpu.matmul %146, %147, %cst_110 {dimension_numbers = #tpu.dot_dimension_numbers<[1], [0], [0], [1], [0, 0, 1, 1], [], []>} : vector<34x64xf32>, vector<64x128xf32>, vector<34x128xf32> -> vector<34x128xf32>
    %149 = arith.addf %145, %148 : vector<34x128xf32>
    %c3_111 = arith.constant 3 : index
    %c0_112 = arith.constant 0 : index
    %150 = tpu.strided_load %arg7[%c3_111, %c0_112] {strides = array<i32: 2, 1>} : memref<100x64xf32, #tpu.memory_space<vmem>>, vector<34x64xf32>
    %c192_113 = arith.constant 192 : index
    %c0_114 = arith.constant 0 : index
    %151 = vector.load %arg4[%c192_113, %c0_114] : memref<1024x128xf32, #tpu.memory_space<vmem>>, vector<64x128xf32>
    %cst_115 = arith.constant dense<0.000000e+00> : vector<34x128xf32>
    %152 = tpu.matmul %150, %151, %cst_115 {dimension_numbers = #tpu.dot_dimension_numbers<[1], [0], [0], [1], [0, 0, 1, 1], [], []>} : vector<34x64xf32>, vector<64x128xf32>, vector<34x128xf32> -> vector<34x128xf32>
    %153 = arith.addf %149, %152 : vector<34x128xf32>
    %c10 = arith.constant 10 : index
    %c0_116 = arith.constant 0 : index
    %154 = tpu.strided_load %arg7[%c10, %c0_116] {strides = array<i32: 2, 1>} : memref<100x64xf32, #tpu.memory_space<vmem>>, vector<34x64xf32>
    %c256_117 = arith.constant 256 : index
    %c0_118 = arith.constant 0 : index
    %155 = vector.load %arg4[%c256_117, %c0_118] : memref<1024x128xf32, #tpu.memory_space<vmem>>, vector<64x128xf32>
    %cst_119 = arith.constant dense<0.000000e+00> : vector<34x128xf32>
    %156 = tpu.matmul %154, %155, %cst_119 {dimension_numbers = #tpu.dot_dimension_numbers<[1], [0], [0], [1], [0, 0, 1, 1], [], []>} : vector<34x64xf32>, vector<64x128xf32>, vector<34x128xf32> -> vector<34x128xf32>
    %157 = arith.addf %153, %156 : vector<34x128xf32>
    %c11_120 = arith.constant 11 : index
    %c0_121 = arith.constant 0 : index
    %158 = tpu.strided_load %arg7[%c11_120, %c0_121] {strides = array<i32: 2, 1>} : memref<100x64xf32, #tpu.memory_space<vmem>>, vector<34x64xf32>
    %c320_122 = arith.constant 320 : index
    %c0_123 = arith.constant 0 : index
    %159 = vector.load %arg4[%c320_122, %c0_123] : memref<1024x128xf32, #tpu.memory_space<vmem>>, vector<64x128xf32>
    %cst_124 = arith.constant dense<0.000000e+00> : vector<34x128xf32>
    %160 = tpu.matmul %158, %159, %cst_124 {dimension_numbers = #tpu.dot_dimension_numbers<[1], [0], [0], [1], [0, 0, 1, 1], [], []>} : vector<34x64xf32>, vector<64x128xf32>, vector<34x128xf32> -> vector<34x128xf32>
    %161 = arith.addf %157, %160 : vector<34x128xf32>
    %c12 = arith.constant 12 : index
    %c0_125 = arith.constant 0 : index
    %162 = tpu.strided_load %arg7[%c12, %c0_125] {strides = array<i32: 2, 1>} : memref<100x64xf32, #tpu.memory_space<vmem>>, vector<34x64xf32>
    %c384_126 = arith.constant 384 : index
    %c0_127 = arith.constant 0 : index
    %163 = vector.load %arg4[%c384_126, %c0_127] : memref<1024x128xf32, #tpu.memory_space<vmem>>, vector<64x128xf32>
    %cst_128 = arith.constant dense<0.000000e+00> : vector<34x128xf32>
    %164 = tpu.matmul %162, %163, %cst_128 {dimension_numbers = #tpu.dot_dimension_numbers<[1], [0], [0], [1], [0, 0, 1, 1], [], []>} : vector<34x64xf32>, vector<64x128xf32>, vector<34x128xf32> -> vector<34x128xf32>
    %165 = arith.addf %161, %164 : vector<34x128xf32>
    %c13 = arith.constant 13 : index
    %c0_129 = arith.constant 0 : index
    %166 = tpu.strided_load %arg7[%c13, %c0_129] {strides = array<i32: 2, 1>} : memref<100x64xf32, #tpu.memory_space<vmem>>, vector<34x64xf32>
    %c448_130 = arith.constant 448 : index
    %c0_131 = arith.constant 0 : index
    %167 = vector.load %arg4[%c448_130, %c0_131] : memref<1024x128xf32, #tpu.memory_space<vmem>>, vector<64x128xf32>
    %cst_132 = arith.constant dense<0.000000e+00> : vector<34x128xf32>
    %168 = tpu.matmul %166, %167, %cst_132 {dimension_numbers = #tpu.dot_dimension_numbers<[1], [0], [0], [1], [0, 0, 1, 1], [], []>} : vector<34x64xf32>, vector<64x128xf32>, vector<34x128xf32> -> vector<34x128xf32>
    %169 = arith.addf %165, %168 : vector<34x128xf32>
    %c20_133 = arith.constant 20 : index
    %c0_134 = arith.constant 0 : index
    %170 = tpu.strided_load %arg7[%c20_133, %c0_134] {strides = array<i32: 2, 1>} : memref<100x64xf32, #tpu.memory_space<vmem>>, vector<34x64xf32>
    %c512 = arith.constant 512 : index
    %c0_135 = arith.constant 0 : index
    %171 = vector.load %arg4[%c512, %c0_135] : memref<1024x128xf32, #tpu.memory_space<vmem>>, vector<64x128xf32>
    %cst_136 = arith.constant dense<0.000000e+00> : vector<34x128xf32>
    %172 = tpu.matmul %170, %171, %cst_136 {dimension_numbers = #tpu.dot_dimension_numbers<[1], [0], [0], [1], [0, 0, 1, 1], [], []>} : vector<34x64xf32>, vector<64x128xf32>, vector<34x128xf32> -> vector<34x128xf32>
    %173 = arith.addf %169, %172 : vector<34x128xf32>
    %c21_137 = arith.constant 21 : index
    %c0_138 = arith.constant 0 : index
    %174 = tpu.strided_load %arg7[%c21_137, %c0_138] {strides = array<i32: 2, 1>} : memref<100x64xf32, #tpu.memory_space<vmem>>, vector<34x64xf32>
    %c576 = arith.constant 576 : index
    %c0_139 = arith.constant 0 : index
    %175 = vector.load %arg4[%c576, %c0_139] : memref<1024x128xf32, #tpu.memory_space<vmem>>, vector<64x128xf32>
    %cst_140 = arith.constant dense<0.000000e+00> : vector<34x128xf32>
    %176 = tpu.matmul %174, %175, %cst_140 {dimension_numbers = #tpu.dot_dimension_numbers<[1], [0], [0], [1], [0, 0, 1, 1], [], []>} : vector<34x64xf32>, vector<64x128xf32>, vector<34x128xf32> -> vector<34x128xf32>
    %177 = arith.addf %173, %176 : vector<34x128xf32>
    %c22 = arith.constant 22 : index
    %c0_141 = arith.constant 0 : index
    %178 = tpu.strided_load %arg7[%c22, %c0_141] {strides = array<i32: 2, 1>} : memref<100x64xf32, #tpu.memory_space<vmem>>, vector<34x64xf32>
    %c640 = arith.constant 640 : index
    %c0_142 = arith.constant 0 : index
    %179 = vector.load %arg4[%c640, %c0_142] : memref<1024x128xf32, #tpu.memory_space<vmem>>, vector<64x128xf32>
    %cst_143 = arith.constant dense<0.000000e+00> : vector<34x128xf32>
    %180 = tpu.matmul %178, %179, %cst_143 {dimension_numbers = #tpu.dot_dimension_numbers<[1], [0], [0], [1], [0, 0, 1, 1], [], []>} : vector<34x64xf32>, vector<64x128xf32>, vector<34x128xf32> -> vector<34x128xf32>
    %181 = arith.addf %177, %180 : vector<34x128xf32>
    %c23 = arith.constant 23 : index
    %c0_144 = arith.constant 0 : index
    %182 = tpu.strided_load %arg7[%c23, %c0_144] {strides = array<i32: 2, 1>} : memref<100x64xf32, #tpu.memory_space<vmem>>, vector<34x64xf32>
    %c704 = arith.constant 704 : index
    %c0_145 = arith.constant 0 : index
    %183 = vector.load %arg4[%c704, %c0_145] : memref<1024x128xf32, #tpu.memory_space<vmem>>, vector<64x128xf32>
    %cst_146 = arith.constant dense<0.000000e+00> : vector<34x128xf32>
    %184 = tpu.matmul %182, %183, %cst_146 {dimension_numbers = #tpu.dot_dimension_numbers<[1], [0], [0], [1], [0, 0, 1, 1], [], []>} : vector<34x64xf32>, vector<64x128xf32>, vector<34x128xf32> -> vector<34x128xf32>
    %185 = arith.addf %181, %184 : vector<34x128xf32>
    %c30 = arith.constant 30 : index
    %c0_147 = arith.constant 0 : index
    %186 = tpu.strided_load %arg7[%c30, %c0_147] {strides = array<i32: 2, 1>} : memref<100x64xf32, #tpu.memory_space<vmem>>, vector<34x64xf32>
    %c768 = arith.constant 768 : index
    %c0_148 = arith.constant 0 : index
    %187 = vector.load %arg4[%c768, %c0_148] : memref<1024x128xf32, #tpu.memory_space<vmem>>, vector<64x128xf32>
    %cst_149 = arith.constant dense<0.000000e+00> : vector<34x128xf32>
    %188 = tpu.matmul %186, %187, %cst_149 {dimension_numbers = #tpu.dot_dimension_numbers<[1], [0], [0], [1], [0, 0, 1, 1], [], []>} : vector<34x64xf32>, vector<64x128xf32>, vector<34x128xf32> -> vector<34x128xf32>
    %189 = arith.addf %185, %188 : vector<34x128xf32>
    %c31_150 = arith.constant 31 : index
    %c0_151 = arith.constant 0 : index
    %190 = tpu.strided_load %arg7[%c31_150, %c0_151] {strides = array<i32: 2, 1>} : memref<100x64xf32, #tpu.memory_space<vmem>>, vector<34x64xf32>
    %c832 = arith.constant 832 : index
    %c0_152 = arith.constant 0 : index
    %191 = vector.load %arg4[%c832, %c0_152] : memref<1024x128xf32, #tpu.memory_space<vmem>>, vector<64x128xf32>
    %cst_153 = arith.constant dense<0.000000e+00> : vector<34x128xf32>
    %192 = tpu.matmul %190, %191, %cst_153 {dimension_numbers = #tpu.dot_dimension_numbers<[1], [0], [0], [1], [0, 0, 1, 1], [], []>} : vector<34x64xf32>, vector<64x128xf32>, vector<34x128xf32> -> vector<34x128xf32>
    %193 = arith.addf %189, %192 : vector<34x128xf32>
    %c32_154 = arith.constant 32 : index
    %c0_155 = arith.constant 0 : index
    %194 = tpu.strided_load %arg7[%c32_154, %c0_155] {strides = array<i32: 2, 1>} : memref<100x64xf32, #tpu.memory_space<vmem>>, vector<34x64xf32>
    %c896 = arith.constant 896 : index
    %c0_156 = arith.constant 0 : index
    %195 = vector.load %arg4[%c896, %c0_156] : memref<1024x128xf32, #tpu.memory_space<vmem>>, vector<64x128xf32>
    %cst_157 = arith.constant dense<0.000000e+00> : vector<34x128xf32>
    %196 = tpu.matmul %194, %195, %cst_157 {dimension_numbers = #tpu.dot_dimension_numbers<[1], [0], [0], [1], [0, 0, 1, 1], [], []>} : vector<34x64xf32>, vector<64x128xf32>, vector<34x128xf32> -> vector<34x128xf32>
    %197 = arith.addf %193, %196 : vector<34x128xf32>
    %c33 = arith.constant 33 : index
    %c0_158 = arith.constant 0 : index
    %198 = tpu.strided_load %arg7[%c33, %c0_158] {strides = array<i32: 2, 1>} : memref<100x64xf32, #tpu.memory_space<vmem>>, vector<34x64xf32>
    %c960 = arith.constant 960 : index
    %c0_159 = arith.constant 0 : index
    %199 = vector.load %arg4[%c960, %c0_159] : memref<1024x128xf32, #tpu.memory_space<vmem>>, vector<64x128xf32>
    %cst_160 = arith.constant dense<0.000000e+00> : vector<34x128xf32>
    %200 = tpu.matmul %198, %199, %cst_160 {dimension_numbers = #tpu.dot_dimension_numbers<[1], [0], [0], [1], [0, 0, 1, 1], [], []>} : vector<34x64xf32>, vector<64x128xf32>, vector<34x128xf32> -> vector<34x128xf32>
    %201 = arith.addf %197, %200 : vector<34x128xf32>
    %cst_161 = arith.constant 5.000000e-01 : f32
    %202 = vector.broadcast %cst_161 : f32 to vector<34x128xf32>
    %203 = arith.mulf %202, %201 : vector<34x128xf32>
    %cst_162 = arith.constant 0.707106769 : f32
    %204 = vector.broadcast %cst_162 : f32 to vector<34x128xf32>
    %205 = arith.mulf %201, %204 : vector<34x128xf32>
    %206 = math.erf %205 : vector<34x128xf32>
    %cst_163 = arith.constant 1.000000e+00 : f32
    %207 = vector.broadcast %cst_163 : f32 to vector<34x128xf32>
    %208 = arith.addf %207, %206 : vector<34x128xf32>
    %209 = arith.mulf %203, %208 : vector<34x128xf32>
    %210 = vector.extract_strided_slice %209 {offsets = [0, 0], sizes = [4, 128], strides = [1, 1]} : vector<34x128xf32> to vector<4x128xf32>
    %211 = arith.truncf %210 : vector<4x128xf32> to vector<4x128xbf16>
    %c0_164 = arith.constant 0 : index
    %c0_165 = arith.constant 0 : index
    %c0_166 = arith.constant 0 : index
    %212 = vector.load %arg5[%c0_164, %c0_165, %c0_166] : memref<1x16x128xbf16, #tpu.memory_space<vmem>>, vector<1x4x128xbf16>
    %213 = vector.shape_cast %212 : vector<1x4x128xbf16> to vector<4x128xbf16>
    %214 = vector.shape_cast %211 : vector<4x128xbf16> to vector<1x4x128xbf16>
    tpu.vector_store %arg5[%c0_164, %c0_165, %c0_166], %214 {strides = array<i32>} : memref<1x16x128xbf16, #tpu.memory_space<vmem>>, vector<1x4x128xbf16>,
    %215 = vector.extract_strided_slice %209 {offsets = [10, 0], sizes = [4, 128], strides = [1, 1]} : vector<34x128xf32> to vector<4x128xf32>
    %216 = arith.truncf %215 : vector<4x128xf32> to vector<4x128xbf16>
    %c0_167 = arith.constant 0 : index
    %c4 = arith.constant 4 : index
    %c0_168 = arith.constant 0 : index
    %217 = vector.load %arg5[%c0_167, %c4, %c0_168] : memref<1x16x128xbf16, #tpu.memory_space<vmem>>, vector<1x4x128xbf16>
    %218 = vector.shape_cast %217 : vector<1x4x128xbf16> to vector<4x128xbf16>
    %219 = vector.shape_cast %216 : vector<4x128xbf16> to vector<1x4x128xbf16>
    tpu.vector_store %arg5[%c0_167, %c4, %c0_168], %219 {strides = array<i32>} : memref<1x16x128xbf16, #tpu.memory_space<vmem>>, vector<1x4x128xbf16>,
    %220 = vector.extract_strided_slice %209 {offsets = [20, 0], sizes = [4, 128], strides = [1, 1]} : vector<34x128xf32> to vector<4x128xf32>
    %221 = arith.truncf %220 : vector<4x128xf32> to vector<4x128xbf16>
    %c0_169 = arith.constant 0 : index
    %c8 = arith.constant 8 : index
    %c0_170 = arith.constant 0 : index
    %222 = vector.load %arg5[%c0_169, %c8, %c0_170] : memref<1x16x128xbf16, #tpu.memory_space<vmem>>, vector<1x4x128xbf16>
    %223 = vector.shape_cast %222 : vector<1x4x128xbf16> to vector<4x128xbf16>
    %224 = vector.shape_cast %221 : vector<4x128xbf16> to vector<1x4x128xbf16>
    tpu.vector_store %arg5[%c0_169, %c8, %c0_170], %224 {strides = array<i32>} : memref<1x16x128xbf16, #tpu.memory_space<vmem>>, vector<1x4x128xbf16>,
    %225 = vector.extract_strided_slice %209 {offsets = [30, 0], sizes = [4, 128], strides = [1, 1]} : vector<34x128xf32> to vector<4x128xf32>
    %226 = arith.truncf %225 : vector<4x128xf32> to vector<4x128xbf16>
    %c0_171 = arith.constant 0 : index
    %c12_172 = arith.constant 12 : index
    %c0_173 = arith.constant 0 : index
    %227 = vector.load %arg5[%c0_171, %c12_172, %c0_173] : memref<1x16x128xbf16, #tpu.memory_space<vmem>>, vector<1x4x128xbf16>
    %228 = vector.shape_cast %227 : vector<1x4x128xbf16> to vector<4x128xbf16>
    %229 = vector.shape_cast %226 : vector<4x128xbf16> to vector<1x4x128xbf16>
    tpu.vector_store %arg5[%c0_171, %c12_172, %c0_173], %229 {strides = array<i32>} : memref<1x16x128xbf16, #tpu.memory_space<vmem>>, vector<1x4x128xbf16>,
    return
  }
  func.func @transform_0(%arg0: i32) -> (i32, i32, i32) {
    %c0_i32 = arith.constant 0 : i32
    %c0_i32_0 = arith.constant 0 : i32
    %c0_i32_1 = arith.constant 0 : i32
    return %arg0, %c0_i32, %c0_i32_0 : i32, i32, i32
  }
  func.func @transform_1(%arg0: i32) -> (i32, i32) {
    %c0_i32 = arith.constant 0 : i32
    %c0_i32_0 = arith.constant 0 : i32
    %c0_i32_1 = arith.constant 0 : i32
    return %c0_i32, %c0_i32_0 : i32, i32
  }
  func.func @transform_2(%arg0: i32) -> (i32, i32) {
    %c0_i32 = arith.constant 0 : i32
    %c0_i32_0 = arith.constant 0 : i32
    %c0_i32_1 = arith.constant 0 : i32
    return %c0_i32, %c0_i32_0 : i32, i32
  }
  func.func @transform_3(%arg0: i32) -> (i32, i32) {
    %c0_i32 = arith.constant 0 : i32
    %c0_i32_0 = arith.constant 0 : i32
    %c0_i32_1 = arith.constant 0 : i32
    return %c0_i32, %c0_i32_0 : i32, i32
  }
  func.func @transform_4(%arg0: i32) -> (i32, i32, i32) {
    %c0_i32 = arith.constant 0 : i32
    %c0_i32_0 = arith.constant 0 : i32
    %c0_i32_1 = arith.constant 0 : i32
    return %arg0, %c0_i32, %c0_i32_0 : i32, i32, i32
  }
}

module attributes {stable_mosaic.version = 11 : i64} {
  func.func @_proj_kernel(%arg0: i32, %arg1: memref<2x6272xbf16, #tpu.memory_space<vmem>>, %arg2: memref<2x2048xbf16, #tpu.memory_space<vmem>>, %arg3: memref<6272x64xbf16, #tpu.memory_space<vmem>>, %arg4: memref<2048x64xbf16, #tpu.memory_space<vmem>>, %arg5: memref<1x64xf32, #tpu.memory_space<vmem>>, %arg6: memref<2x64xf32, #tpu.memory_space<vmem>>) attributes {dimension_semantics = [#tpu.dimension_semantics<parallel>], iteration_bounds = array<i64: 1>, scalar_prefetch = 0 : i64, scratch_operands = 0 : i64, tpu.core_type = #tpu.core_type<tc>, window_params = [{transform_indices = @transform_0, window_bounds = array<i64: 2, 6272>}, {transform_indices = @transform_1, window_bounds = array<i64: 2, 2048>}, {pipeline_mode = #tpu.pipeline_mode<synchronous>, transform_indices = @transform_2, window_bounds = array<i64: 6272, 64>}, {pipeline_mode = #tpu.pipeline_mode<synchronous>, transform_indices = @transform_3, window_bounds = array<i64: 2048, 64>}, {pipeline_mode = #tpu.pipeline_mode<synchronous>, transform_indices = @transform_4, window_bounds = array<i64: 1, 64>}, {transform_indices = @transform_5, window_bounds = array<i64: 2, 64>}]} {
    %c0 = arith.constant 0 : index
    %c0_0 = arith.constant 0 : index
    %0 = vector.load %arg1[%c0, %c0_0] : memref<2x6272xbf16, #tpu.memory_space<vmem>>, vector<2x6272xbf16>
    %c0_1 = arith.constant 0 : index
    %c0_2 = arith.constant 0 : index
    %1 = vector.load %arg3[%c0_1, %c0_2] : memref<6272x64xbf16, #tpu.memory_space<vmem>>, vector<6272x64xbf16>
    %cst = arith.constant dense<0.000000e+00> : vector<2x64xf32>
    %2 = tpu.matmul %0, %1, %cst {dimension_numbers = #tpu.dot_dimension_numbers<[1], [0], [0], [1], [0, 0, 1, 1], [], []>} : vector<2x6272xbf16>, vector<6272x64xbf16>, vector<2x64xf32> -> vector<2x64xf32>
    %c0_3 = arith.constant 0 : index
    %c0_4 = arith.constant 0 : index
    %3 = vector.load %arg2[%c0_3, %c0_4] : memref<2x2048xbf16, #tpu.memory_space<vmem>>, vector<2x2048xbf16>
    %c0_5 = arith.constant 0 : index
    %c0_6 = arith.constant 0 : index
    %4 = vector.load %arg4[%c0_5, %c0_6] : memref<2048x64xbf16, #tpu.memory_space<vmem>>, vector<2048x64xbf16>
    %cst_7 = arith.constant dense<0.000000e+00> : vector<2x64xf32>
    %5 = tpu.matmul %3, %4, %cst_7 {dimension_numbers = #tpu.dot_dimension_numbers<[1], [0], [0], [1], [0, 0, 1, 1], [], []>} : vector<2x2048xbf16>, vector<2048x64xbf16>, vector<2x64xf32> -> vector<2x64xf32>
    %6 = arith.addf %2, %5 : vector<2x64xf32>
    %c0_8 = arith.constant 0 : index
    %c0_9 = arith.constant 0 : index
    %7 = vector.load %arg5[%c0_8, %c0_9] : memref<1x64xf32, #tpu.memory_space<vmem>>, vector<1x64xf32>
    %8 = vector.broadcast %7 : vector<1x64xf32> to vector<2x64xf32>
    %9 = arith.addf %6, %8 : vector<2x64xf32>
    %c0_10 = arith.constant 0 : index
    %c0_11 = arith.constant 0 : index
    %10 = vector.load %arg6[%c0_10, %c0_11] : memref<2x64xf32, #tpu.memory_space<vmem>>, vector<2x64xf32>
    tpu.vector_store %arg6[%c0_10, %c0_11], %9 {strides = array<i32>} : memref<2x64xf32, #tpu.memory_space<vmem>>, vector<2x64xf32>,
    return
  }
  func.func @transform_0(%arg0: i32) -> (i32, i32) {
    %c0_i32 = arith.constant 0 : i32
    %c0_i32_0 = arith.constant 0 : i32
    return %arg0, %c0_i32 : i32, i32
  }
  func.func @transform_1(%arg0: i32) -> (i32, i32) {
    %c0_i32 = arith.constant 0 : i32
    %c0_i32_0 = arith.constant 0 : i32
    return %arg0, %c0_i32 : i32, i32
  }
  func.func @transform_2(%arg0: i32) -> (i32, i32) {
    %c0_i32 = arith.constant 0 : i32
    %c0_i32_0 = arith.constant 0 : i32
    %c0_i32_1 = arith.constant 0 : i32
    return %c0_i32, %c0_i32_0 : i32, i32
  }
  func.func @transform_3(%arg0: i32) -> (i32, i32) {
    %c0_i32 = arith.constant 0 : i32
    %c0_i32_0 = arith.constant 0 : i32
    %c0_i32_1 = arith.constant 0 : i32
    return %c0_i32, %c0_i32_0 : i32, i32
  }
  func.func @transform_4(%arg0: i32) -> (i32, i32) {
    %c0_i32 = arith.constant 0 : i32
    %c0_i32_0 = arith.constant 0 : i32
    %c0_i32_1 = arith.constant 0 : i32
    return %c0_i32, %c0_i32_0 : i32, i32
  }
  func.func @transform_5(%arg0: i32) -> (i32, i32) {
    %c0_i32 = arith.constant 0 : i32
    %c0_i32_0 = arith.constant 0 : i32
    return %arg0, %c0_i32 : i32, i32
  }
}

</mosaic_0001>

<bundles_post_ra>
// kernel: ms_joint_processor_forward.3
= control target key start
LH: loop header
LB: loop body
LE: loop exit
PB: predicated region body
PF: predicated region fallthrough
CT: control target
= control target key end

     0   :  { %s6066_s12 = smov 0   ;;  %s7428_s0 = inlined_call_operand.vmem [shape: f32[2,196,16], index: 0, kind: input, shape index: {}]   ;;  %s7429_s1 = inlined_call_operand.vmem [shape: f32[16,64], index: 1, kind: input, shape index: {}]   ;;  %s7430_s2 = inlined_call_operand.vmem [shape: f32[1024,128], index: 2, kind: input, shape index: {}]   ;;  %s7431_s3 = inlined_call_operand.vmem [shape: bf16[2,49,128], index: 3, kind: output, shape index: {}]  }
   0x1 LB: > { %s3976_s13 = sadd.s32 4294967295, %s6041_s12   ;;  %p3980_p0 = scmp.ge.s32.totalorder %s6041_s12, 1  ;;  %s6041_s12 = sphi %s6066_s12, %s13_s12  }
   0x2   : > { %p137_p1 = scmp.lt.s32.totalorder %s6041_s12, 3 }
   0x4   : > { %p138_p2 = pnand %p3980_p0, %p137_p1 }
   0x5   : > { %v196_v0 = vld [vmem:[%s7429_s1] sm:$0xff] (!%p138_p2)  ;;  %v197_v1 = vld [vmem:[%s7429_s1 + $0x8] sm:$0xff] (!%p138_p2)  ;;  %p161_p3 = scmp.lt.s32.totalorder (!%p138_p2), %s3976_s13, 1  ;;  %v6043_v2 = vmov (!%p138_p2), 0.0|0.0   ;;  %vm6044_vm0 = vmmov (!%p138_p2), 0   ;;  %v6045_v4 = vmov (!%p138_p2), 0.0  }
   0x6   : > { %141 = sbr.rel (%p138_p2) target bundleno = 998 (0x3e6), region = 32  ;;  %5552 = vmatprep.subr.bf16.mxu0 (!%p138_p2), %v6043_v2  ;;  %v5553_v3 = vpack.c.bf16 (!%p138_p2), %v197_v1, %v196_v0  ;;  %4597 = vmatprep.mubr.msk.f32.mxu0 (!%p138_p2), %vm6044_vm0, %v6045_v4  ;;  %vm198_vm1 = vcmask (!%p138_p2), 130048   ;;  %v722_v29 = vld [vmem:[%s7430_s2 + $0x40] sm:$0xff] (!%p138_p2)  ;;  %v723_v30 = vld [vmem:[%s7430_s2 + $0x48] sm:$0xff] (!%p138_p2)  ;;  %v724_v33 = vld [vmem:[%s7430_s2 + $0x50] sm:$0xff] (!%p138_p2)  ;;  %vm589_vm2 = vcmask (!%p138_p2), 523264  }
   0x7   : > { %5747 = vmatprep.subr.bf16.mxu1 (!%p138_p2), %v6043_v2  ;;  %5079 = vmatprep.mubr.msk.f32.mxu1 (!%p138_p2), %vm6044_vm0, %v6045_v4  ;;  %v5556_v31 = vpack.c.bf16 (!%p138_p2), %v723_v30, %v722_v29  ;;  %v725_v34 = vld [vmem:[%s7430_s2 + $0x58] sm:$0xff] (!%p138_p2)  ;;  %v726_v36 = vld [vmem:[%s7430_s2 + $0x60] sm:$0xff] (!%p138_p2)  ;;  %v727_v37 = vld [vmem:[%s7430_s2 + $0x68] sm:$0xff] (!%p138_p2)  ;;  %592 = vst.msk [vmem:[#allocation2 + $0x10] sm:$0xff] (!%p138_p2), %vm589_vm2, %v6045_v4  ;;  %vm623_vm3 = vcmask (!%p138_p2), 521216   ;;  %vm625_vm4 = vcmask (!%p138_p2), 523270  }
   0x8   : > { %5554 = vmatpush3.bf16.msra.mxu0 (!%p138_p2), %v5553_v3  ;;  %v5559_v35 = vpack.c.bf16 (!%p138_p2), %v725_v34, %v724_v33  ;;  %593 = vst.msk [vmem:[#allocation2 + $0x18] sm:$0xff] (!%p138_p2), %vm589_vm2, %v6045_v4  ;;  %590 = vst.msk [vmem:[#allocation2] sm:$0xff] (!%p138_p2), %vm589_vm2, %v6045_v4  ;;  %v5562_v38 = vpack.c.bf16 (!%p138_p2), %v727_v37, %v726_v36  ;;  %v728_v39 = vld [vmem:[%s7430_s2 + $0x70] sm:$0xff] (!%p138_p2)  ;;  %v729_v40 = vld [vmem:[%s7430_s2 + $0x78] sm:$0xff] (!%p138_p2)  ;;  %vm628_vm5 = vcmask (!%p138_p2), 519168   ;;  %vm630_vm6 = vcmask (!%p138_p2), 523268  }
   0x9   : > { %5555 = vmatprep.subr.bf16.mxu0 (!%p138_p2), %v6043_v2  ;;  %591 = vst.msk [vmem:[#allocation2 + $0x8] sm:$0xff] (!%p138_p2), %vm589_vm2, %v6045_v4  ;;  %594 = vst.msk [vmem:[#allocation2 + $0x20] sm:$0xff] (!%p138_p2), %vm589_vm2, %v6045_v4  ;;  %v5565_v41 = vpack.c.bf16 (!%p138_p2), %v729_v40, %v728_v39  ;;  %v2054_v43 = vld [vmem:[%s7430_s2 + $0x1c0] sm:$0xff] (!%p138_p2)  ;;  %v2055_v44 = vld [vmem:[%s7430_s2 + $0x1c8] sm:$0xff] (!%p138_p2)  ;;  %vm633_vm7 = vcmask (!%p138_p2), 517120   ;;  %vm635_vm8 = vcmask (!%p138_p2), 523266  }
   0xa   : > { %595 = vst.msk [vmem:[#allocation2 + $0x28] sm:$0xff] (!%p138_p2), %vm589_vm2, %v6045_v4  ;;  %596 = vst.msk [vmem:[#allocation2 + $0x30] sm:$0xff] (!%p138_p2), %vm589_vm2, %v6045_v4  ;;  %v6296_v45 = vpack.c.bf16 (!%p138_p2), %v2055_v44, %v2054_v43  ;;  %v2056_v46 = vld [vmem:[%s7430_s2 + $0x1d0] sm:$0xff] (!%p138_p2)  ;;  %v2057_v47 = vld [vmem:[%s7430_s2 + $0x1d8] sm:$0xff] (!%p138_p2)  ;;  %vm3804_vm9 = vcmask (!%p138_p2), 1043456   ;;  %vm3825_vm12 = vcmask (!%p138_p2), 1043459  }
   0xb   : > { %597 = vst.msk [vmem:[#allocation2 + $0x38] sm:$0xff] (!%p138_p2), %vm589_vm2, %v6045_v4  ;;  %598 = vst.msk [vmem:[#allocation2 + $0x40] sm:$0xff] (!%p138_p2), %vm589_vm2, %v6045_v4  ;;  %v6306_v48 = vpack.c.bf16 (!%p138_p2), %v2057_v47, %v2056_v46  ;;  %v2058_v49 = vld [vmem:[%s7430_s2 + $0x1e0] sm:$0xff] (!%p138_p2)  ;;  %v2059_v50 = vld [vmem:[%s7430_s2 + $0x1e8] sm:$0xff] (!%p138_p2)  ;;  %vm3805_vm10 = vsmask.f32 (!%p138_p2), 3328 }
   0xc   : > { %599 = vst.msk [vmem:[#allocation2 + $0x48] sm:$0xff] (!%p138_p2), %vm589_vm2, %v6045_v4  ;;  %600 = vst.msk [vmem:[#allocation2 + $0x50] sm:$0xff] (!%p138_p2), %vm589_vm2, %v6045_v4  ;;  %5751 = vmatpush3.bf16.msra.mxu1 (!%p138_p2), %v6296_v45  ;;  %v6316_v51 = vpack.c.bf16 (!%p138_p2), %v2059_v50, %v2058_v49  ;;  %v2060_v52 = vld [vmem:[%s7430_s2 + $0x1f0] sm:$0xff] (!%p138_p2)  ;;  %v2061_v53 = vld [vmem:[%s7430_s2 + $0x1f8] sm:$0xff] (!%p138_p2)  ;;  %vm3826_vm13 = vsmask.f32 (!%p138_p2), 7950 }
   0xd   : > { %s7433_s13 = smov (!%p161_p3, %s3976_s13), 1  ;;  %601 = vst.msk [vmem:[#allocation2 + $0x58] sm:$0xff] %vm589_vm2, %v6045_v4  ;;  %602 = vst.msk [vmem:[#allocation2 + $0x60] sm:$0xff] %vm589_vm2, %v6045_v4  ;;  %5748 = vmatprep.subr.bf16.mxu1 %v6043_v2  ;;  %v6326_v54 = vpack.c.bf16 %v2061_v53, %v2060_v52  ;;  %v688_v55 = vld [vmem:[%s7430_s2] sm:$0xff]  ;;  %v689_v56 = vld [vmem:[%s7430_s2 + $0x8] sm:$0xff]  ;;  %vm3841_vm15 = vcmask 1042432  }
   0xe   : > { %s5958_s18 = smul.u32 200, %s7433_s13  ;;  %603 = vst.msk [vmem:[#allocation2 + $0x68] sm:$0xff] %vm589_vm2, %v6045_v4  ;;  %604 = vst.msk [vmem:[#allocation2 + $0x70] sm:$0xff] %vm589_vm2, %v6045_v4  ;;  %v5568_v57 = vpack.c.bf16 %v689_v56, %v688_v55  ;;  %v690_v58 = vld [vmem:[%s7430_s2 + $0x10] sm:$0xff]  ;;  %v691_v59 = vld [vmem:[%s7430_s2 + $0x18] sm:$0xff] }
   0xf   : > { %605 = vst.msk [vmem:[#allocation2 + $0x78] sm:$0xff] %vm589_vm2, %v6045_v4  ;;  %606 = vst.msk [vmem:[#allocation2 + $0x80] sm:$0xff] %vm589_vm2, %v6045_v4  ;;  %v5571_v60 = vpack.c.bf16 %v691_v59, %v690_v58  ;;  %v692_v61 = vld [vmem:[%s7430_s2 + $0x20] sm:$0xff]  ;;  %v693_v62 = vld [vmem:[%s7430_s2 + $0x28] sm:$0xff]  ;;  %s5959_s28 = smul.u32 28, %s7433_s13 }
  0x10   : > { %s6093_s21 = scalar_lea.vmem %s7428_s0, %s5958_s18  ;;  %607 = vst.msk [vmem:[#allocation2 + $0x88] sm:$0xff] %vm589_vm2, %v6045_v4  ;;  %608 = vst.msk [vmem:[#allocation2 + $0x90] sm:$0xff] %vm589_vm2, %v6045_v4  ;;  %v697_v42 = vld [vmem:[#allocation2 + $0x1] ss:$2 sm:$0xff]  ;;  %5752 = vmatpush3.bf16.msra.mxu1 %v6306_v48  ;;  %v5574_v63 = vpack.c.bf16 %v693_v62, %v692_v61  ;;  %v694_v0 = vld [vmem:[%s7430_s2 + $0x30] sm:$0xff] }
  0x11   : > { %v171_v5 = vld [vmem:[%s6093_s21] sm:$0xff]  ;;  %v172_v6 = vld [vmem:[%s6093_s21 + $0x8] sm:$0xff]  ;;  %v173_v7 = vld [vmem:[%s6093_s21 + $0x10] sm:$0xff]  ;;  %609 = vst.msk [vmem:[#allocation2 + $0x98] sm:$0xff] %vm589_vm2, %v6045_v4  ;;  %5749 = vmatprep.subr.bf16.mxu1 %v6043_v2  ;;  %s7398_s4 = scalar_lea.vmem %s7431_s3, %s5959_s28 }
  0x12   : > { %4598 = vmatmul.mubr.msk.f32.vlgmr.msra.gmra.mrb[0].mxu0 %vm198_vm1, %v171_v5  ;;  %v174_v8 = vld [vmem:[%s6093_s21 + $0x18] sm:$0xff]  ;;  %v175_v9 = vld [vmem:[%s6093_s21 + $0x20] sm:$0xff]  ;;  %v176_v10 = vld [vmem:[%s6093_s21 + $0x28] sm:$0xff]  ;;  %610 = vst.msk [vmem:[#allocation2 + $0xa0] sm:$0xff] %vm589_vm2, %v6045_v4 }
  0x13   : > { %4600 = vmatprep.mubr.msk.f32.mxu0 %vm6044_vm0, %v6045_v4  ;;  %v177_v11 = vld [vmem:[%s6093_s21 + $0x30] sm:$0xff]  ;;  %v178_v12 = vld [vmem:[%s6093_s21 + $0x38] sm:$0xff]  ;;  %v179_v13 = vld [vmem:[%s6093_s21 + $0x40] sm:$0xff]  ;;  %5557 = vmatpush3.bf16.msra.mxu0 %v5556_v31  ;;  %611 = vst.msk [vmem:[#allocation2 + $0xa8] sm:$0xff] %vm589_vm2, %v6045_v4 }
  0x14   : > { %v180_v14 = vld [vmem:[%s6093_s21 + $0x48] sm:$0xff]  ;;  %v181_v15 = vld [vmem:[%s6093_s21 + $0x50] sm:$0xff]  ;;  %v182_v16 = vld [vmem:[%s6093_s21 + $0x58] sm:$0xff]  ;;  %5558 = vmatprep.subr.bf16.mxu0 %v6043_v2  ;;  %612 = vst.msk [vmem:[#allocation2 + $0xb0] sm:$0xff] %vm589_vm2, %v6045_v4  ;;  %5753 = vmatpush3.bf16.msra.mxu1 %v6316_v51 }
  0x15   : > { %v183_v17 = vld [vmem:[%s6093_s21 + $0x60] sm:$0xff]  ;;  %v184_v18 = vld [vmem:[%s6093_s21 + $0x68] sm:$0xff]  ;;  %v185_v19 = vld [vmem:[%s6093_s21 + $0x70] sm:$0xff]  ;;  %613 = vst.msk [vmem:[#allocation2 + $0xb8] sm:$0xff] %vm589_vm2, %v6045_v4  ;;  %5750 = vmatprep.subr.bf16.mxu1 %v6043_v2 }
  0x16   : > { %4601 = vmatmul.mubr.msk.f32.gmra.mrb[2].mxu0 %vm198_vm1, %v172_v6  ;;  %v186_v20 = vld [vmem:[%s6093_s21 + $0x78] sm:$0xff]  ;;  %v187_v21 = vld [vmem:[%s6093_s21 + $0x80] sm:$0xff]  ;;  %v188_v22 = vld [vmem:[%s6093_s21 + $0x88] sm:$0xff]  ;;  %614 = vst.msk [vmem:[#allocation2 + $0xc0] sm:$0xff] %vm589_vm2, %v6045_v4 }
  0x17   : > { %4603 = vmatprep.mubr.msk.f32.mxu0 %vm6044_vm0, %v6045_v4  ;;  %v189_v23 = vld [vmem:[%s6093_s21 + $0x90] sm:$0xff]  ;;  %v190_v24 = vld [vmem:[%s6093_s21 + $0x98] sm:$0xff]  ;;  %v191_v25 = vld [vmem:[%s6093_s21 + $0xa0] sm:$0xff]  ;;  %5560 = vmatpush3.bf16.msra.mxu0 %v5559_v35  ;;  %615 = vst.msk [vmem:[#allocation2 + $0xc8] sm:$0xff] %vm589_vm2, %v6045_v4 }
  0x18   : > { %v192_v26 = vld [vmem:[%s6093_s21 + $0xa8] sm:$0xff]  ;;  %v193_v27 = vld [vmem:[%s6093_s21 + $0xb0] sm:$0xff]  ;;  %v194_v28 = vld [vmem:[%s6093_s21 + $0xb8] sm:$0xff]  ;;  %5561 = vmatprep.subr.bf16.mxu0 %v6043_v2  ;;  %616 = vst.msk [vmem:[#allocation2 + $0xd0] sm:$0xff] %vm589_vm2, %v6045_v4  ;;  %5754 = vmatpush3.bf16.msra.mxu1 %v6326_v54 }
  0x19   : > { %v195_v32 = vld [vmem:[%s6093_s21 + $0xc0] sm:$0xf]  ;;  %617 = vst.msk [vmem:[#allocation2 + $0xd8] sm:$0xff] %vm589_vm2, %v6045_v4  ;;  %618 = vst.msk [vmem:[#allocation2 + $0xe0] sm:$0xff] %vm589_vm2, %v6045_v4  ;;  %5651 = vmatprep.subr.bf16.mxu1 %v6043_v2  ;;  %v695_v1 = vld [vmem:[%s7430_s2 + $0x38] sm:$0xff] }
  0x1a   : > { %4604 = vmatmul.mubr.msk.f32.gmra.mrb[4].mxu0 %vm198_vm1, %v173_v7  ;;  %619 = vst.msk [vmem:[#allocation2 + $0xe8] sm:$0xff] %vm589_vm2, %v6045_v4  ;;  %620 = vst.msk [vmem:[#allocation2 + $0xf0] sm:$0xff] %vm589_vm2, %v6045_v4  ;;  %v5577_v3 = vpack.c.bf16 %v695_v1, %v694_v0 }
  0x1b   : > { %4606 = vmatprep.mubr.msk.f32.mxu0 %vm6044_vm0, %v6045_v4  ;;  %621 = vst.msk [vmem:[#allocation2 + $0xf8] sm:$0xff] %vm589_vm2, %v6045_v4  ;;  %5563 = vmatpush3.bf16.msra.mxu0 %v5562_v38  ;;  %vm3806_vm11 = vmand %vm3804_vm9, %vm3805_vm10  ;;  %vm3900_vm9 = vsmask.f32 7942 }
  0x1c   : > { %5564 = vmatprep.subr.bf16.mxu0 %v6043_v2  ;;  %vm3827_vm14 = vmand %vm3825_vm12, %vm3826_vm13  ;;  %vm3916_vm12 = vsmask.f32 256 }
  0x1e   : > { %4607 = vmatmul.mubr.msk.f32.gmra.mrb[6].mxu0 %vm198_vm1, %v174_v8 }
  0x1f   : > { %4609 = vmatprep.mubr.msk.f32.mxu0 %vm6044_vm0, %v6045_v4  ;;  %5566 = vmatpush3.bf16.msra.mxu0 %v5565_v41 }
  0x20   : > { %5567 = vmatprep.subr.bf16.mxu0 %v6043_v2 }
  0x22   : > { %4610 = vmatmul.mubr.msk.f32.gmra.mrb[8].mxu0 %vm198_vm1, %v175_v9 }
  0x23   : > { %4612 = vmatprep.mubr.msk.f32.mxu0 %vm6044_vm0, %v6045_v4 }
  0x26   : > { %4613 = vmatmul.mubr.msk.f32.gmra.mrb[10].mxu0 %vm198_vm1, %v176_v10 }
  0x27   : > { %4615 = vmatprep.mubr.msk.f32.mxu0 %vm6044_vm0, %v6045_v4 }
  0x2a   : > { %4616 = vmatmul.mubr.msk.f32.gmra.mrb[12].mxu0 %vm198_vm1, %v177_v11 }
  0x2b   : > { %4618 = vmatprep.mubr.msk.f32.mxu0 %vm6044_vm0, %v6045_v4 }
  0x2e   : > { %4619 = vmatmul.mubr.msk.f32.gmra.mrb[14].mxu0 %vm198_vm1, %v178_v12 }
  0x2f   : > { %4621 = vmatprep.mubr.msk.f32.mxu0 %vm6044_vm0, %v6045_v4 }
  0x32   : > { %4622 = vmatmul.mubr.msk.f32.gmra.mrb[16].mxu0 %vm198_vm1, %v179_v13 }
  0x33   : > { %4624 = vmatprep.mubr.msk.f32.mxu0 %vm6044_vm0, %v6045_v4 }
  0x36   : > { %4625 = vmatmul.mubr.msk.f32.gmra.mrb[18].mxu0 %vm198_vm1, %v180_v14 }
  0x37   : > { %4627 = vmatprep.mubr.msk.f32.mxu0 %vm6044_vm0, %v6045_v4 }
  0x3a   : > { %4628 = vmatmul.mubr.msk.f32.gmra.mrb[20].mxu0 %vm198_vm1, %v181_v15 }
  0x3b   : > { %4630 = vmatprep.mubr.msk.f32.mxu0 %vm6044_vm0, %v6045_v4 }
  0x3e   : > { %4631 = vmatmul.mubr.msk.f32.gmra.mrb[22].mxu0 %vm198_vm1, %v182_v16 }
  0x3f   : > { %4633 = vmatprep.mubr.msk.f32.mxu0 %vm6044_vm0, %v6045_v4 }
  0x42   : > { %4634 = vmatmul.mubr.msk.f32.gmra.mrb[24].mxu0 %vm198_vm1, %v183_v17 }
  0x43   : > { %4636 = vmatprep.mubr.msk.f32.mxu0 %vm6044_vm0, %v6045_v4 }
  0x46   : > { %4637 = vmatmul.mubr.msk.f32.gmra.mrb[26].mxu0 %vm198_vm1, %v184_v18 }
  0x47   : > { %4639 = vmatprep.mubr.msk.f32.mxu0 %vm6044_vm0, %v6045_v4 }
  0x4a   : > { %4640 = vmatmul.mubr.msk.f32.gmra.mrb[28].mxu0 %vm198_vm1, %v185_v19 }
  0x4b   : > { %4642 = vmatprep.mubr.msk.f32.mxu0 %vm6044_vm0, %v6045_v4 }
  0x4e   : > { %4643 = vmatmul.mubr.msk.f32.gmra.mrb[30].mxu0 %vm198_vm1, %v186_v20 }
  0x4f   : > { %4645 = vmatprep.mubr.msk.f32.mxu0 %vm6044_vm0, %v6045_v4 }
  0x52   : > { %4646 = vmatmul.mubr.msk.f32.gmra.mrb[32].mxu0 %vm198_vm1, %v187_v21 }
  0x53   : > { %4648 = vmatprep.mubr.msk.f32.mxu0 %vm6044_vm0, %v6045_v4 }
  0x56   : > { %4649 = vmatmul.mubr.msk.f32.gmra.mrb[34].mxu0 %vm198_vm1, %v188_v22 }
  0x57   : > { %4651 = vmatprep.mubr.msk.f32.mxu0 %vm6044_vm0, %v6045_v4 }
  0x5a   : > { %4652 = vmatmul.mubr.msk.f32.gmra.mrb[36].mxu0 %vm198_vm1, %v189_v23 }
  0x5b   : > { %4654 = vmatprep.mubr.msk.f32.mxu0 %vm6044_vm0, %v6045_v4 }
  0x5e   : > { %4655 = vmatmul.mubr.msk.f32.gmra.mrb[38].mxu0 %vm198_vm1, %v190_v24 }
  0x5f   : > { %4657 = vmatprep.mubr.msk.f32.mxu0 %vm6044_vm0, %v6045_v4 }
  0x62   : > { %4658 = vmatmul.mubr.msk.f32.gmra.mrb[40].mxu0 %vm198_vm1, %v191_v25 }
  0x63   : > { %4660 = vmatprep.mubr.msk.f32.mxu0 %vm6044_vm0, %v6045_v4 }
  0x66   : > { %4661 = vmatmul.mubr.msk.f32.gmra.mrb[42].mxu0 %vm198_vm1, %v192_v26 }
  0x67   : > { %4663 = vmatprep.mubr.msk.f32.mxu0 %vm6044_vm0, %v6045_v4 }
  0x6a   : > { %4664 = vmatmul.mubr.msk.f32.gmra.mrb[44].mxu0 %vm198_vm1, %v193_v27 }
  0x6b   : > { %4666 = vmatprep.mubr.msk.f32.mxu0 %vm6044_vm0, %v6045_v4 }
  0x6e   : > { %4667 = vmatmul.mubr.msk.f32.gmra.mrb[46].mxu0 %vm198_vm1, %v194_v28 }
  0x6f   : > { %4669 = vmatprep.mubr.msk.f32.mxu0 %vm6044_vm0, %v6045_v4 }
  0x72   : > { %4670 = vmatmul.mubr.msk.f32.gmra.mrb[48].mxu0 %vm198_vm1, %v195_v32 }
  0x73   : > { %4688 = vmatprep.mubr.msk.f32.mxu0 %vm6044_vm0, %v6045_v4 }
  0x76   : > { %4689 = vmatmul.mubr.msk.f32.vlgmr.msra.gmra.mrb[50].mxu0 %vm589_vm2, %v697_v42 }
  0x77   : > { %4691 = vmatprep.mubr.msk.f32.mxu0 %vm6044_vm0, %v6045_v4  ;;  %5569 = vmatpush3.bf16.msra.mxu0 %v5568_v57 }
  0x78   : > { %5570 = vmatprep.subr.bf16.mxu0 %v6043_v2 }
  0x7b   : > { %5572 = vmatpush3.bf16.msra.mxu0 %v5571_v60 }
  0x7c   : > { %5573 = vmatprep.subr.bf16.mxu0 %v6043_v2 }
  0x7f   : > { %5575 = vmatpush3.bf16.msra.mxu0 %v5574_v63 }
  0x80   : > { %5576 = vmatprep.subr.bf16.mxu0 %v6043_v2 }
  0x83   : > { %5578 = vmatpush3.bf16.msra.mxu0 %v5577_v3 }
  0x84   : > { %5579 = vmatprep.subr.bf16.mxu0 %v6043_v2 }
  0xe5   : > { %v340_v5 = vpop.f32.mrb[0].mxu0 }
  0xe6   : > { %v489_v6 = vmul.f32 0.70710677, %v340_v5  ;;  %v4599_v7 = vpop.f32.mrb[1].mxu0  ;;  %v464_v18 = vmul.f32 0.5, %v340_v5 }
  0xe8   : > { %5971 = verf.f32 %v489_v6 }
  0xe9   : > { %v345_v8 = vpop.f32.mrb[2].mxu0 }
  0xea   : > { %v490_v9 = vmul.f32 0.70710677, %v345_v8  ;;  %v4602_v10 = vpop.f32.mrb[3].mxu0  ;;  %v465_v25 = vmul.f32 0.5, %v345_v8 }
  0xec   : > { %5973 = verf.f32 %v490_v9 }
  0xed   : > { %v350_v11 = vpop.f32.mrb[4].mxu0 }
  0xee   : > { %v491_v12 = vmul.f32 0.70710677, %v350_v11  ;;  %v4605_v13 = vpop.f32.mrb[5].mxu0  ;;  %v466_v32 = vmul.f32 0.5, %v350_v11  ;;  %v2246_v11 = vld [vmem:[%s7430_s2 + $0x200] sm:$0xff] }
  0xf0   : > { %5975 = verf.f32 %v491_v12  ;;  %v2247_v12 = vld [vmem:[%s7430_s2 + $0x208] sm:$0xff] }
  0xf1   : > { %v355_v14 = vpop.f32.mrb[6].mxu0 }
  0xf2   : > { %v5972_v15 = vpop.eup %5971  ;;  %v492_v16 = vmul.f32 0.70710677, %v355_v14  ;;  %v4608_v17 = vpop.f32.mrb[7].mxu0  ;;  %v467_v39 = vmul.f32 0.5, %v355_v14 }
  0xf3   : > { %v539_v19 = vadd.f32 1.0, %v5972_v15  ;;  %v5652_v17 = vpack.c.bf16 %v2247_v12, %v2246_v11 }
  0xf4   : > { %5977 = verf.f32 %v492_v16 }
  0xf5   : > { %v564_v20 = vmul.f32 %v539_v19, %v464_v18  ;;  %v360_v21 = vpop.f32.mrb[8].mxu0  ;;  %v2248_v18 = vld [vmem:[%s7430_s2 + $0x210] sm:$0xff] }
  0xf6   : > { %v5974_v22 = vpop.eup %5973  ;;  %v493_v23 = vmul.f32 0.70710677, %v360_v21  ;;  %v4611_v24 = vpop.f32.mrb[9].mxu0  ;;  %v468_v49 = vmul.f32 0.5, %v360_v21 }
  0xf7   : > { %622 = vst.msk [vmem:[#allocation2 + $0x11] sm:$0xff] %vm589_vm2, %v564_v20  ;;  %v540_v26 = vadd.f32 1.0, %v5974_v22 }
  0xf8   : > { %5979 = verf.f32 %v493_v23  ;;  %v2249_v23 = vld [vmem:[%s7430_s2 + $0x218] sm:$0xff] }
  0xf9   : > { %v565_v27 = vmul.f32 %v540_v26, %v465_v25  ;;  %v365_v28 = vpop.f32.mrb[10].mxu0 }
  0xfa   : > { %v5976_v29 = vpop.eup %5975  ;;  %v494_v30 = vmul.f32 0.70710677, %v365_v28  ;;  %v4614_v31 = vpop.f32.mrb[11].mxu0  ;;  %v469_v58 = vmul.f32 0.5, %v365_v28 }
  0xfb   : > { %624 = vst.msk [vmem:[#allocation2 + $0x19] sm:$0x3f] %vm623_vm3, %v565_v27  ;;  %v541_v33 = vadd.f32 1.0, %v5976_v29  ;;  %v5655_v29 = vpack.c.bf16 %v2249_v23, %v2248_v18 }
  0xfc   : > { %626 = vst.msk [vmem:[#allocation2 + $0x1b] sm:$0xc0] %vm625_vm4, %v565_v27  ;;  %5981 = verf.f32 %v494_v30  ;;  %v2250_v30 = vld [vmem:[%s7430_s2 + $0x220] sm:$0xff] }
  0xfd   : > { %v566_v34 = vmul.f32 %v541_v33, %v466_v32  ;;  %v370_v35 = vpop.f32.mrb[12].mxu0 }
  0xfe   : > { %v5978_v36 = vpop.eup %5977  ;;  %v495_v37 = vmul.f32 0.70710677, %v370_v35  ;;  %v4617_v38 = vpop.f32.mrb[13].mxu0  ;;  %v470_v3 = vmul.f32 0.5, %v370_v35  ;;  %v2251_v35 = vld [vmem:[%s7430_s2 + $0x228] sm:$0xff] }
  0xff   : > { %627 = vst.msk [vmem:[#allocation2 + $0x23] sm:$0xff] %vm589_vm2, %v566_v34  ;;  %v542_v40 = vadd.f32 1.0, %v5978_v36 }
 0x100   : > { %5983 = verf.f32 %v495_v37 }
 0x101   : > { %v567_v41 = vmul.f32 %v542_v40, %v467_v39  ;;  %v375_v42 = vpop.f32.mrb[14].mxu0  ;;  %v5658_v40 = vpack.c.bf16 %v2251_v35, %v2250_v30 }
 0x102   : > { %v5980_v43 = vpop.eup %5979  ;;  %v496_v44 = vmul.f32 0.70710677, %v375_v42  ;;  %v4620_v46 = vpop.f32.mrb[15].mxu0  ;;  %v699_v47 = vld [vmem:[#allocation2 + $0x11] ss:$2 sm:$0xff]  ;;  %v471_v13 = vmul.f32 0.5, %v375_v42 }
 0x103   : > { %629 = vst.msk [vmem:[#allocation2 + $0x2b] sm:$0xf] %vm628_vm5, %v567_v41  ;;  %v543_v50 = vadd.f32 1.0, %v5980_v43  ;;  %4692 = vmatmul.mubr.msk.f32.gmra.mrb[52].mxu0 %vm589_vm2, %v699_v47  ;;  %v2253_v47 = vld [vmem:[%s7430_s2 + $0x238] sm:$0xff] }
 0x104   : > { %631 = vst.msk [vmem:[#allocation2 + $0x2d] sm:$0xf0] %vm630_vm6, %v567_v41  ;;  %5985 = verf.f32 %v496_v44  ;;  %4694 = vmatprep.mubr.msk.f32.mxu0 %vm6044_vm0, %v6045_v4  ;;  %v2252_v41 = vld [vmem:[%s7430_s2 + $0x230] sm:$0xff] }
 0x105   : > { %v568_v52 = vmul.f32 %v543_v50, %v468_v49  ;;  %v380_v53 = vpop.f32.mrb[16].mxu0 }
 0x106   : > { %v5982_v55 = vpop.eup %5981  ;;  %v497_v56 = vmul.f32 0.70710677, %v380_v53  ;;  %v4623_v57 = vpop.f32.mrb[17].mxu0  ;;  %v472_v24 = vmul.f32 0.5, %v380_v53 }
 0x107   : > { %632 = vst.msk [vmem:[#allocation2 + $0x35] sm:$0xff] %vm589_vm2, %v568_v52  ;;  %v544_v59 = vadd.f32 1.0, %v5982_v55  ;;  %v5661_v55 = vpack.c.bf16 %v2253_v47, %v2252_v41 }
 0x108   : > { %5987 = verf.f32 %v497_v56 }
 0x109   : > { %v569_v60 = vmul.f32 %v544_v59, %v469_v58  ;;  %v385_v61 = vpop.f32.mrb[18].mxu0 }
 0x10a   : > { %v5984_v62 = vpop.eup %5983  ;;  %v498_v63 = vmul.f32 0.70710677, %v385_v61  ;;  %v4626_v0 = vpop.f32.mrb[19].mxu0  ;;  %v701_v1 = vld [vmem:[#allocation2 + $0x21] ss:$2 sm:$0xff]  ;;  %v473_v36 = vmul.f32 0.5, %v385_v61 }
 0x10b   : > { %634 = vst.msk [vmem:[#allocation2 + $0x3d] sm:$0x3] %vm633_vm7, %v569_v60  ;;  %v545_v5 = vadd.f32 1.0, %v5984_v62  ;;  %4695 = vmatmul.mubr.msk.f32.gmra.mrb[54].mxu0 %vm589_vm2, %v701_v1 }
 0x10c   : > { %636 = vst.msk [vmem:[#allocation2 + $0x3f] sm:$0xfc] %vm635_vm8, %v569_v60  ;;  %5989 = verf.f32 %v498_v63  ;;  %4697 = vmatprep.mubr.msk.f32.mxu0 %vm6044_vm0, %v6045_v4 }
 0x10d   : > { %v570_v6 = vmul.f32 %v545_v5, %v470_v3  ;;  %v390_v7 = vpop.f32.mrb[20].mxu0 }
 0x10e   : > { %v5986_v8 = vpop.eup %5985  ;;  %v499_v9 = vmul.f32 0.70710677, %v390_v7  ;;  %v4629_v10 = vpop.f32.mrb[21].mxu0  ;;  %v474_v49 = vmul.f32 0.5, %v390_v7 }
 0x10f   : > { %637 = vst.msk [vmem:[#allocation2 + $0x47] sm:$0xff] %vm589_vm2, %v570_v6  ;;  %v546_v14 = vadd.f32 1.0, %v5986_v8 }
 0x110   : > { %5991 = verf.f32 %v499_v9 }
 0x111   : > { %v571_v15 = vmul.f32 %v546_v14, %v471_v13  ;;  %v6380_v16 = vpop.f32.mrb[22].mxu0 }
 0x112   : > { %v5988_v19 = vpop.eup %5987  ;;  %v500_v20 = vmul.f32 0.70710677, %v6380_v16  ;;  %v4632_v21 = vpop.f32.mrb[23].mxu0  ;;  %v703_v22 = vld [vmem:[#allocation2 + $0x31] ss:$2 sm:$0xff]  ;;  %v475_v60 = vmul.f32 0.5, %v6380_v16 }
 0x113   : > { %638 = vst.msk [vmem:[#allocation2 + $0x51] sm:$0xff] %vm589_vm2, %v571_v15  ;;  %v547_v25 = vadd.f32 1.0, %v5988_v19  ;;  %4698 = vmatmul.mubr.msk.f32.gmra.mrb[56].mxu0 %vm589_vm2, %v703_v22  ;;  %v2042_v26 = vld [vmem:[#allocation2 + $0x33] ss:$2 sm:$0xff] }
 0x114   : > { %5993 = verf.f32 %v500_v20  ;;  %5080 = vmatmul.mubr.msk.f32.vlgmr.msra.gmra.mrb[0].mxu1 %vm589_vm2, %v2042_v26  ;;  %4700 = vmatprep.mubr.msk.f32.mxu0 %vm6044_vm0, %v6045_v4 }
 0x115   : > { %v572_v27 = vmul.f32 %v547_v25, %v472_v24  ;;  %v400_v28 = vpop.f32.mrb[24].mxu0  ;;  %5082 = vmatprep.mubr.msk.f32.mxu1 %vm6044_vm0, %v6045_v4  ;;  %5653 = vmatpush3.bf16.msra.mxu1 %v5652_v17 }
 0x116   : > { %v5990_v31 = vpop.eup %5989  ;;  %v501_v32 = vmul.f32 0.70710677, %v400_v28  ;;  %v4635_v33 = vpop.f32.mrb[25].mxu0  ;;  %v705_v34 = vld [vmem:[#allocation2 + $0x41] ss:$2 sm:$0xff]  ;;  %5654 = vmatprep.subr.bf16.mxu1 %v6043_v2  ;;  %v476_v6 = vmul.f32 0.5, %v400_v28 }
 0x117   : > { %639 = vst.msk [vmem:[#allocation2 + $0x59] sm:$0x3f] %vm623_vm3, %v572_v27  ;;  %v548_v37 = vadd.f32 1.0, %v5990_v31  ;;  %4701 = vmatmul.mubr.msk.f32.gmra.mrb[58].mxu0 %vm589_vm2, %v705_v34 }
 0x118   : > { %640 = vst.msk [vmem:[#allocation2 + $0x5b] sm:$0xc0] %vm625_vm4, %v572_v27  ;;  %5995 = verf.f32 %v501_v32  ;;  %4703 = vmatprep.mubr.msk.f32.mxu0 %vm6044_vm0, %v6045_v4 }
 0x119   : > { %v573_v38 = vmul.f32 %v548_v37, %v473_v36  ;;  %v405_v39 = vpop.f32.mrb[26].mxu0  ;;  %5656 = vmatpush3.bf16.msra.mxu1 %v5655_v29 }
 0x11a   : > { %v5992_v42 = vpop.eup %5991  ;;  %v502_v43 = vmul.f32 0.70710677, %v405_v39  ;;  %v4638_v44 = vpop.f32.mrb[27].mxu0  ;;  %v2043_v46 = vld [vmem:[#allocation2 + $0x43] ss:$2 sm:$0xff]  ;;  %5657 = vmatprep.subr.bf16.mxu1 %v6043_v2  ;;  %v477_v14 = vmul.f32 0.5, %v405_v39 }
 0x11b   : > { %641 = vst.msk [vmem:[#allocation2 + $0x63] sm:$0xff] %vm589_vm2, %v573_v38  ;;  %v549_v50 = vadd.f32 1.0, %v5992_v42  ;;  %5083 = vmatmul.mubr.msk.f32.gmra.mrb[2].mxu1 %vm589_vm2, %v2043_v46 }
 0x11c   : > { %5997 = verf.f32 %v502_v43  ;;  %5085 = vmatprep.mubr.msk.f32.mxu1 %vm6044_vm0, %v6045_v4 }
 0x11d   : > { %v574_v52 = vmul.f32 %v549_v50, %v474_v49  ;;  %v410_v53 = vpop.f32.mrb[28].mxu0  ;;  %5659 = vmatpush3.bf16.msra.mxu1 %v5658_v40 }
 0x11e   : > { %v5994_v56 = vpop.eup %5993  ;;  %v503_v57 = vmul.f32 0.70710677, %v410_v53  ;;  %v4641_v58 = vpop.f32.mrb[29].mxu0  ;;  %v707_v59 = vld [vmem:[#allocation2 + $0x51] ss:$2 sm:$0xff]  ;;  %5660 = vmatprep.subr.bf16.mxu1 %v6043_v2  ;;  %v478_v22 = vmul.f32 0.5, %v410_v53 }
 0x11f   : > { %642 = vst.msk [vmem:[#allocation2 + $0x6b] sm:$0xf] %vm628_vm5, %v574_v52  ;;  %v550_v61 = vadd.f32 1.0, %v5994_v56  ;;  %4704 = vmatmul.mubr.msk.f32.gmra.mrb[60].mxu0 %vm589_vm2, %v707_v59  ;;  %v2044_v62 = vld [vmem:[#allocation2 + $0x53] ss:$2 sm:$0xff] }
 0x120   : > { %643 = vst.msk [vmem:[#allocation2 + $0x6d] sm:$0xf0] %vm630_vm6, %v574_v52  ;;  %5999 = verf.f32 %v503_v57  ;;  %5086 = vmatmul.mubr.msk.f32.gmra.mrb[4].mxu1 %vm589_vm2, %v2044_v62  ;;  %4706 = vmatprep.mubr.msk.f32.mxu0 %vm6044_vm0, %v6045_v4 }
 0x121   : > { %v575_v63 = vmul.f32 %v550_v61, %v475_v60  ;;  %v415_v0 = vpop.f32.mrb[30].mxu0  ;;  %5088 = vmatprep.mubr.msk.f32.mxu1 %vm6044_vm0, %v6045_v4  ;;  %5662 = vmatpush3.bf16.msra.mxu1 %v5661_v55 }
 0x122   : > { %v5996_v1 = vpop.eup %5995  ;;  %v504_v3 = vmul.f32 0.70710677, %v415_v0  ;;  %v4644_v5 = vpop.f32.mrb[31].mxu0  ;;  %5663 = vmatprep.subr.bf16.mxu1 %v6043_v2  ;;  %v479_v30 = vmul.f32 0.5, %v415_v0 }
 0x123   : > { %644 = vst.msk [vmem:[#allocation2 + $0x75] sm:$0xff] %vm589_vm2, %v575_v63  ;;  %v551_v7 = vadd.f32 1.0, %v5996_v1 }
 0x124   : > { %6001 = verf.f32 %v504_v3 }
 0x125   : > { %v576_v8 = vmul.f32 %v551_v7, %v476_v6  ;;  %v420_v9 = vpop.f32.mrb[32].mxu0 }
 0x126   : > { %v5998_v10 = vpop.eup %5997  ;;  %v505_v11 = vmul.f32 0.70710677, %v420_v9  ;;  %v4647_v12 = vpop.f32.mrb[33].mxu0  ;;  %v709_v13 = vld [vmem:[#allocation2 + $0x61] ss:$2 sm:$0xff]  ;;  %v480_v39 = vmul.f32 0.5, %v420_v9 }
 0x127   : > { %645 = vst.msk [vmem:[#allocation2 + $0x7d] sm:$0x3] %vm633_vm7, %v576_v8  ;;  %v552_v15 = vadd.f32 1.0, %v5998_v10  ;;  %4707 = vmatmul.mubr.msk.f32.gmra.mrb[62].mxu0 %vm589_vm2, %v709_v13  ;;  %v2045_v16 = vld [vmem:[#allocation2 + $0x63] ss:$2 sm:$0xff] }
 0x128   : > { %646 = vst.msk [vmem:[#allocation2 + $0x7f] sm:$0xfc] %vm635_vm8, %v576_v8  ;;  %6003 = verf.f32 %v505_v11  ;;  %5089 = vmatmul.mubr.msk.f32.gmra.mrb[6].mxu1 %vm589_vm2, %v2045_v16  ;;  %4709 = vmatprep.mubr.msk.f32.mxu0 %vm6044_vm0, %v6045_v4 }
 0x129   : > { %v577_v17 = vmul.f32 %v552_v15, %v477_v14  ;;  %v425_v18 = vpop.f32.mrb[34].mxu0  ;;  %5091 = vmatprep.mubr.msk.f32.mxu1 %vm6044_vm0, %v6045_v4 }
 0x12a   : > { %v6000_v19 = vpop.eup %5999  ;;  %v506_v20 = vmul.f32 0.70710677, %v425_v18  ;;  %v4650_v21 = vpop.f32.mrb[35].mxu0  ;;  %v481_v49 = vmul.f32 0.5, %v425_v18 }
 0x12b   : > { %647 = vst.msk [vmem:[#allocation2 + $0x87] sm:$0xff] %vm589_vm2, %v577_v17  ;;  %v553_v23 = vadd.f32 1.0, %v6000_v19 }
 0x12c   : > { %6005 = verf.f32 %v506_v20 }
 0x12d   : > { %v578_v24 = vmul.f32 %v553_v23, %v478_v22  ;;  %v430_v25 = vpop.f32.mrb[36].mxu0 }
 0x12e   : > { %v6002_v26 = vpop.eup %6001  ;;  %v507_v27 = vmul.f32 0.70710677, %v430_v25  ;;  %v4653_v28 = vpop.f32.mrb[37].mxu0  ;;  %v711_v29 = vld [vmem:[#allocation2 + $0x71] ss:$2 sm:$0xff]  ;;  %v482_v59 = vmul.f32 0.5, %v430_v25 }
 0x12f   : > { %648 = vst.msk [vmem:[#allocation2 + $0x91] sm:$0xff] %vm589_vm2, %v578_v24  ;;  %v554_v31 = vadd.f32 1.0, %v6002_v26  ;;  %4710 = vmatmul.mubr.msk.f32.gmra.mrb[64].mxu0 %vm589_vm2, %v711_v29  ;;  %v2046_v32 = vld [vmem:[#allocation2 + $0x73] ss:$2 sm:$0xff] }
 0x130   : > { %6007 = verf.f32 %v507_v27  ;;  %5092 = vmatmul.mubr.msk.f32.gmra.mrb[8].mxu1 %vm589_vm2, %v2046_v32  ;;  %4712 = vmatprep.mubr.msk.f32.mxu0 %vm6044_vm0, %v6045_v4 }
 0x131   : > { %v579_v33 = vmul.f32 %v554_v31, %v479_v30  ;;  %v435_v34 = vpop.f32.mrb[38].mxu0  ;;  %5094 = vmatprep.mubr.msk.f32.mxu1 %vm6044_vm0, %v6045_v4 }
 0x132   : > { %v6004_v35 = vpop.eup %6003  ;;  %v508_v36 = vmul.f32 0.70710677, %v435_v34  ;;  %v4656_v37 = vpop.f32.mrb[39].mxu0  ;;  %v713_v38 = vld [vmem:[#allocation2 + $0x81] ss:$2 sm:$0xff]  ;;  %v483_v5 = vmul.f32 0.5, %v435_v34 }
 0x133   : > { %649 = vst.msk [vmem:[#allocation2 + $0x99] sm:$0x3f] %vm623_vm3, %v579_v33  ;;  %v555_v40 = vadd.f32 1.0, %v6004_v35  ;;  %4713 = vmatmul.mubr.msk.f32.gmra.mrb[66].mxu0 %vm589_vm2, %v713_v38  ;;  %v1083_v34 = vld [vmem:[%s7430_s2 + $0x88] sm:$0xff] }
 0x134   : > { %650 = vst.msk [vmem:[#allocation2 + $0x9b] sm:$0xc0] %vm625_vm4, %v579_v33  ;;  %6009 = verf.f32 %v508_v36  ;;  %4715 = vmatprep.mubr.msk.f32.mxu0 %vm6044_vm0, %v6045_v4  ;;  %v1082_v33 = vld [vmem:[%s7430_s2 + $0x80] sm:$0xff] }
 0x135   : > { %v580_v41 = vmul.f32 %v555_v40, %v480_v39  ;;  %v440_v42 = vpop.f32.mrb[40].mxu0  ;;  %v663_v36 = vld [vmem:[#allocation2] ss:$2 sm:$0xff]  ;;  %v5580_v39 = vpack.c.bf16 %v1083_v34, %v1082_v33 }
 0x136   : > { %v6006_v43 = vpop.eup %6005  ;;  %v509_v44 = vmul.f32 0.70710677, %v440_v42  ;;  %v4659_v46 = vpop.f32.mrb[41].mxu0  ;;  %v2047_v47 = vld [vmem:[#allocation2 + $0x83] ss:$2 sm:$0xff]  ;;  %v484_v13 = vmul.f32 0.5, %v440_v42 }
 0x137   : > { %651 = vst.msk [vmem:[#allocation2 + $0xa3] sm:$0xff] %vm589_vm2, %v580_v41  ;;  %v556_v50 = vadd.f32 1.0, %v6006_v43  ;;  %5095 = vmatmul.mubr.msk.f32.gmra.mrb[10].mxu1 %vm589_vm2, %v2047_v47  ;;  %v1084_v42 = vld [vmem:[%s7430_s2 + $0x90] sm:$0xff]  ;;  %v1085_v43 = vld [vmem:[%s7430_s2 + $0x98] sm:$0xff]  ;;  %v2438_v47 = vld [vmem:[%s7430_s2 + $0x240] sm:$0xff] }
 0x138   : > { %6011 = verf.f32 %v509_v44  ;;  %5097 = vmatprep.mubr.msk.f32.mxu1 %vm6044_vm0, %v6045_v4  ;;  %v1057_v33 = vld [vmem:[#allocation2 + $0x2] ss:$2 sm:$0xff] }
 0x139   : > { %v581_v52 = vmul.f32 %v556_v50, %v481_v49  ;;  %v445_v53 = vpop.f32.mrb[42].mxu0  ;;  %v2439_v49 = vld [vmem:[%s7430_s2 + $0x248] sm:$0xff]  ;;  %v5583_v50 = vpack.c.bf16 %v1085_v43, %v1084_v42  ;;  %v1290_v43 = vld [vmem:[%s7430_s2 + $0xe0] sm:$0xff] }
 0x13a   : > { %v6008_v55 = vpop.eup %6007  ;;  %v510_v56 = vmul.f32 0.70710677, %v445_v53  ;;  %v4662_v57 = vpop.f32.mrb[43].mxu0  ;;  %v715_v58 = vld [vmem:[#allocation2 + $0x91] ss:$2 sm:$0xff]  ;;  %v485_v21 = vmul.f32 0.5, %v445_v53 }
 0x13b   : > { %652 = vst.msk [vmem:[#allocation2 + $0xab] sm:$0xf] %vm628_vm5, %v581_v52  ;;  %v557_v60 = vadd.f32 1.0, %v6008_v55  ;;  %4716 = vmatmul.mubr.msk.f32.gmra.mrb[68].mxu0 %vm589_vm2, %v715_v58  ;;  %v2048_v61 = vld [vmem:[#allocation2 + $0x93] ss:$2 sm:$0xff]  ;;  %v5664_v57 = vpack.c.bf16 %v2439_v49, %v2438_v47 }
 0x13c   : > { %653 = vst.msk [vmem:[#allocation2 + $0xad] sm:$0xf0] %vm630_vm6, %v581_v52  ;;  %6013 = verf.f32 %v510_v56  ;;  %5098 = vmatmul.mubr.msk.f32.gmra.mrb[12].mxu1 %vm589_vm2, %v2048_v61  ;;  %4718 = vmatprep.mubr.msk.f32.mxu0 %vm6044_vm0, %v6045_v4  ;;  %v665_v52 = vld [vmem:[#allocation2 + $0x10] ss:$2 sm:$0xff]  ;;  %v1086_v55 = vld [vmem:[%s7430_s2 + $0xa0] sm:$0xff]  ;;  %v1087_v56 = vld [vmem:[%s7430_s2 + $0xa8] sm:$0xff] }
 0x13d   : > { %v582_v62 = vmul.f32 %v557_v60, %v482_v59  ;;  %v450_v63 = vpop.f32.mrb[44].mxu0  ;;  %5100 = vmatprep.mubr.msk.f32.mxu1 %vm6044_vm0, %v6045_v4  ;;  %v2440_v58 = vld [vmem:[%s7430_s2 + $0x250] sm:$0xff]  ;;  %v667_v59 = vld [vmem:[#allocation2 + $0x20] ss:$2 sm:$0xff]  ;;  %v2441_v61 = vld [vmem:[%s7430_s2 + $0x258] sm:$0xff] }
 0x13e   : > { %v6010_v0 = vpop.eup %6009  ;;  %v511_v1 = vmul.f32 0.70710677, %v450_v63  ;;  %v4665_v3 = vpop.f32.mrb[45].mxu0  ;;  %v486_v27 = vmul.f32 0.5, %v450_v63  ;;  %v2232_v60 = vld [vmem:[#allocation2 + $0x20] ss:$2 sm:$0xff] }
 0x13f   : > { %654 = vst.msk [vmem:[#allocation2 + $0xb5] sm:$0xff] %vm589_vm2, %v582_v62  ;;  %v558_v6 = vadd.f32 1.0, %v6010_v0  ;;  %v5586_v62 = vpack.c.bf16 %v1087_v56, %v1086_v55  ;;  %v1088_v63 = vld [vmem:[%s7430_s2 + $0xb0] sm:$0xff]  ;;  %v1089_v0 = vld [vmem:[%s7430_s2 + $0xb8] sm:$0xff]  ;;  %v2442_v3 = vld [vmem:[%s7430_s2 + $0x260] sm:$0xff] }
 0x140   : > { %6015 = verf.f32 %v511_v1  ;;  %v5667_v1 = vpack.c.bf16 %v2441_v61, %v2440_v58  ;;  %v1061_v47 = vld [vmem:[#allocation2 + $0x22] ss:$2 sm:$0xff]  ;;  %v2424_v49 = vld [vmem:[#allocation2 + $0x21] ss:$2 sm:$0xff]  ;;  %v1293_v56 = vld [vmem:[%s7430_s2 + $0xf8] sm:$0xff] }
 0x141   : > { %v583_v7 = vmul.f32 %v558_v6, %v483_v5  ;;  %v455_v8 = vpop.f32.mrb[46].mxu0  ;;  %v669_v5 = vld [vmem:[#allocation2 + $0x30] ss:$2 sm:$0xff]  ;;  %v2635_v61 = vld [vmem:[%s7430_s2 + $0x2a8] sm:$0xff]  ;;  %vm3879_vm6 = vsmask.f32 1280 }
 0x142   : > { %v6012_v9 = vpop.eup %6011  ;;  %v512_v10 = vmul.f32 0.70710677, %v455_v8  ;;  %v717_v11 = vld [vmem:[#allocation2 + $0xa1] ss:$2 sm:$0xff]  ;;  %v4668_v12 = vpop.f32.mrb[47].mxu0  ;;  %v487_v30 = vmul.f32 0.5, %v455_v8  ;;  %v5589_v8 = vpack.c.bf16 %v1089_v0, %v1088_v63 }
 0x143   : > { %655 = vst.msk [vmem:[#allocation2 + $0xbd] sm:$0x3] %vm633_vm7, %v583_v7  ;;  %v559_v14 = vadd.f32 1.0, %v6012_v9  ;;  %4719 = vmatmul.mubr.msk.f32.gmra.mrb[70].mxu0 %vm589_vm2, %v717_v11  ;;  %v2049_v15 = vld [vmem:[#allocation2 + $0xa3] ss:$2 sm:$0xff] }
 0x144   : > { %656 = vst.msk [vmem:[#allocation2 + $0xbf] sm:$0xfc] %vm635_vm8, %v583_v7  ;;  %6017 = verf.f32 %v512_v10  ;;  %5101 = vmatmul.mubr.msk.f32.gmra.mrb[14].mxu1 %vm589_vm2, %v2049_v15  ;;  %4721 = vmatprep.mubr.msk.f32.mxu0 %vm6044_vm0, %v6045_v4  ;;  %v2233_v6 = vld [vmem:[#allocation2 + $0x30] ss:$2 sm:$0xff]  ;;  %v2443_v7 = vld [vmem:[%s7430_s2 + $0x268] sm:$0xff]  ;;  %vm3899_vm8 = vcmask 1043457  }
 0x145   : > { %v584_v16 = vmul.f32 %v559_v14, %v484_v13  ;;  %v460_v17 = vpop.f32.mrb[48].mxu0  ;;  %5103 = vmatprep.mubr.msk.f32.mxu1 %vm6044_vm0, %v6045_v4  ;;  %v5670_v9 = vpack.c.bf16 %v2443_v7, %v2442_v3  ;;  %v2444_v10 = vld [vmem:[%s7430_s2 + $0x270] sm:$0xff]  ;;  %v671_v11 = vld [vmem:[#allocation2 + $0x40] ss:$2 sm:$0xff]  ;;  %v2445_v13 = vld [vmem:[%s7430_s2 + $0x278] sm:$0xff] }
 0x146   : > { %v6014_v18 = vpop.eup %6013  ;;  %v513_v19 = vmul.f32 0.70710677, %v460_v17  ;;  %v4671_v20 = vpop.f32.mrb[49].mxu0  ;;  %v488_v38 = vmul.f32 0.5, %v460_v17  ;;  %v2234_v12 = vld [vmem:[#allocation2 + $0x40] ss:$2 sm:$0xff]  ;;  %v5673_v14 = vpack.c.bf16 %v2445_v13, %v2444_v10  ;;  %vm3901_vm10 = vmand %vm3899_vm8, %vm3900_vm9 }
 0x147   : > { %657 = vst.msk [vmem:[#allocation2 + $0xc7] sm:$0xff] %vm589_vm2, %v584_v16  ;;  %v560_v22 = vadd.f32 1.0, %v6014_v18  ;;  %v673_v15 = vld [vmem:[#allocation2 + $0x50] ss:$2 sm:$0xff]  ;;  %v675_v17 = vld [vmem:[#allocation2 + $0x60] ss:$2 sm:$0xff] }
 0x148   : > { %6019 = verf.f32 %v513_v19  ;;  %v2235_v16 = vld [vmem:[#allocation2 + $0x50] ss:$2 sm:$0xff]  ;;  %v2236_v18 = vld [vmem:[#allocation2 + $0x60] ss:$2 sm:$0xff]  ;;  %v2428_v10 = vld [vmem:[#allocation2 + $0x61] ss:$2 sm:$0xff] }
 0x149   : > { %v585_v23 = vmul.f32 %v560_v22, %v485_v21  ;;  %v677_v19 = vld [vmem:[#allocation2 + $0x70] ss:$2 sm:$0xff]  ;;  %v679_v21 = vld [vmem:[#allocation2 + $0x80] ss:$2 sm:$0xff] }
 0x14a   : > { %v6016_v24 = vpop.eup %6015  ;;  %v719_v25 = vld [vmem:[#allocation2 + $0xb1] ss:$2 sm:$0xff]  ;;  %v2237_v20 = vld [vmem:[#allocation2 + $0x70] ss:$2 sm:$0xff]  ;;  %v2238_v22 = vld [vmem:[#allocation2 + $0x80] ss:$2 sm:$0xff] }
 0x14b   : > { %v2050_v26 = vld [vmem:[#allocation2 + $0xb3] ss:$2 sm:$0xff]  ;;  %658 = vst.msk [vmem:[#allocation2 + $0xd1] sm:$0xff] %vm589_vm2, %v585_v23  ;;  %v561_v28 = vadd.f32 1.0, %v6016_v24  ;;  %4722 = vmatmul.mubr.msk.f32.gmra.mrb[72].mxu0 %vm589_vm2, %v719_v25  ;;  %v681_v23 = vld [vmem:[#allocation2 + $0x90] ss:$2 sm:$0xff] }
 0x14c   : > { %5104 = vmatmul.mubr.msk.f32.gmra.mrb[16].mxu1 %vm589_vm2, %v2050_v26  ;;  %4724 = vmatprep.mubr.msk.f32.mxu0 %vm6044_vm0, %v6045_v4  ;;  %v2239_v24 = vld [vmem:[#allocation2 + $0x90] ss:$2 sm:$0xff]  ;;  %v683_v25 = vld [vmem:[#allocation2 + $0xa0] ss:$2 sm:$0xff] }
 0x14d   : > { %5106 = vmatprep.mubr.msk.f32.mxu1 %vm6044_vm0, %v6045_v4  ;;  %v586_v29 = vmul.f32 %v561_v28, %v486_v27  ;;  %v2240_v26 = vld [vmem:[#allocation2 + $0xa0] ss:$2 sm:$0xff]  ;;  %v685_v27 = vld [vmem:[#allocation2 + $0xb0] ss:$2 sm:$0xff] }
 0x14e   : > { %v6018_v31 = vpop.eup %6017  ;;  %v721_v32 = vld [vmem:[#allocation2 + $0xc1] ss:$2 sm:$0x7f]  ;;  %v2241_v28 = vld [vmem:[#allocation2 + $0xb0] ss:$2 sm:$0xff] }
 0x14f   : > { %659 = vst.msk [vmem:[#allocation2 + $0xd9] sm:$0x3f] %vm623_vm3, %v586_v29  ;;  %v562_v35 = vadd.f32 1.0, %v6018_v31  ;;  %4725 = vmatmul.mubr.msk.f32.gmra.mrb[74].mxu0 %vm589_vm2, %v721_v32  ;;  %v2242_v31 = vld [vmem:[#allocation2 + $0xc0] ss:$2 sm:$0xff]  ;;  %v1292_v55 = vld [vmem:[%s7430_s2 + $0xf0] sm:$0xff] }
 0x150   : > { %660 = vst.msk [vmem:[#allocation2 + $0xdb] sm:$0xc0] %vm625_vm4, %v586_v29  ;;  %4743 = vmatprep.mubr.msk.f32.mxu0 %vm6044_vm0, %v6045_v4  ;;  %v1286_v29 = vld [vmem:[%s7430_s2 + $0xc0] sm:$0xff]  ;;  %v1287_v32 = vld [vmem:[%s7430_s2 + $0xc8] sm:$0xff]  ;;  %v2636_v3 = vld [vmem:[%s7430_s2 + $0x2b0] sm:$0xff] }
 0x151   : > { %v587_v37 = vmul.f32 %v562_v35, %v487_v30  ;;  %v687_v30 = vld [vmem:[#allocation2 + $0xc0] ss:$2 sm:$0x7f]  ;;  %v5592_v34 = vpack.c.bf16 %v1287_v32, %v1286_v29  ;;  %v1481_v29 = vld [vmem:[%s7430_s2 + $0x118] sm:$0xff]  ;;  %vm3863_vm3 = vsmask.f32 7946 }
 0x152   : > { %v6020_v40 = vpop.eup %6019  ;;  %v2051_v41 = vld [vmem:[#allocation2 + $0xc3] ss:$2 sm:$0xff]  ;;  %v1065_v63 = vld [vmem:[#allocation2 + $0x42] ss:$2 sm:$0xff]  ;;  %v1067_v7 = vld [vmem:[#allocation2 + $0x52] ss:$2 sm:$0xff] }
 0x153   : > { %661 = vst.msk [vmem:[#allocation2 + $0xe3] sm:$0xff] %vm589_vm2, %v587_v37  ;;  %v563_v44 = vadd.f32 1.0, %v6020_v40  ;;  %4744 = vmatmul.mubr.msk.f32.vlgmr.msra.gmra.mrb[50].mxu0 %vm589_vm2, %v663_v36  ;;  %5107 = vmatmul.mubr.msk.f32.gmra.mrb[18].mxu1 %vm589_vm2, %v2051_v41  ;;  %v1288_v36 = vld [vmem:[%s7430_s2 + $0xd0] sm:$0xff]  ;;  %v1289_v37 = vld [vmem:[%s7430_s2 + $0xd8] sm:$0xff] }
 0x154   : > { %4746 = vmatprep.mubr.msk.f32.mxu0 %vm6044_vm0, %v6045_v4  ;;  %5109 = vmatprep.mubr.msk.f32.mxu1 %vm6044_vm0, %v6045_v4  ;;  %v5595_v40 = vpack.c.bf16 %v1289_v37, %v1288_v36  ;;  %v1059_v41 = vld [vmem:[#allocation2 + $0x12] ss:$2 sm:$0xff]  ;;  %v1073_v13 = vld [vmem:[#allocation2 + $0x82] ss:$2 sm:$0xff] }
 0x155   : > { %v588_v46 = vmul.f32 %v563_v44, %v488_v38  ;;  %5581 = vmatpush3.bf16.msra.mxu0 %v5580_v39  ;;  %v2630_v38 = vld [vmem:[%s7430_s2 + $0x280] sm:$0xff]  ;;  %v2631_v39 = vld [vmem:[%s7430_s2 + $0x288] sm:$0xff] }
 0x156   : > { %v2053_v53 = vld [vmem:[#allocation2 + $0xd3] ss:$2 sm:$0x7f]  ;;  %5582 = vmatprep.subr.bf16.mxu0 %v6043_v2  ;;  %v2243_v35 = vld [vmem:[#allocation2 + $0xd0] ss:$2 sm:$0xff]  ;;  %v1291_v44 = vld [vmem:[%s7430_s2 + $0xe8] sm:$0xff] }
 0x157   : > { %662 = vst.msk [vmem:[#allocation2 + $0xeb] sm:$0xf] %vm628_vm5, %v588_v46  ;;  %4747 = vmatmul.mubr.msk.f32.gmra.mrb[76].mxu0 %vm589_vm2, %v665_v52  ;;  %5110 = vmatmul.mubr.msk.f32.gmra.mrb[20].mxu1 %vm589_vm2, %v2053_v53  ;;  %v5676_v46 = vpack.c.bf16 %v2631_v39, %v2630_v38  ;;  %v2633_v52 = vld [vmem:[%s7430_s2 + $0x298] sm:$0xff]  ;;  %v5598_v53 = vpack.c.bf16 %v1291_v44, %v1290_v43  ;;  %v1483_v36 = vld [vmem:[%s7430_s2 + $0x128] sm:$0xff]  ;;  %v1484_v43 = vld [vmem:[%s7430_s2 + $0x130] sm:$0xff]  ;;  %vm3878_vm5 = vcmask 1041408  }
 0x158   : > { %4749 = vmatprep.mubr.msk.f32.mxu0 %vm6044_vm0, %v6045_v4  ;;  %5128 = vmatprep.mubr.msk.f32.mxu1 %vm6044_vm0, %v6045_v4  ;;  %v1265_v38 = vld [vmem:[#allocation2 + $0x23] ss:$2 sm:$0xff]  ;;  %v2616_v39 = vld [vmem:[#allocation2 + $0x22] ss:$2 sm:$0xff]  ;;  %v1485_v44 = vld [vmem:[%s7430_s2 + $0x138] sm:$0xff] }
 0x159   : > { %5584 = vmatpush3.bf16.msra.mxu0 %v5583_v50  ;;  %v2632_v50 = vld [vmem:[%s7430_s2 + $0x290] sm:$0xff]  ;;  %vm3880_vm7 = vmand %vm3878_vm5, %vm3879_vm6 }
 0x15a   : > { %5585 = vmatprep.subr.bf16.mxu0 %v6043_v2  ;;  %v5679_v58 = vpack.c.bf16 %v2633_v52, %v2632_v50  ;;  %v2826_v50 = vld [vmem:[%s7430_s2 + $0x2e0] sm:$0xff]  ;;  %v2827_v52 = vld [vmem:[%s7430_s2 + $0x2e8] sm:$0xff] }
 0x15b   : > { %4750 = vmatmul.mubr.msk.f32.gmra.mrb[54].mxu0 %vm589_vm2, %v667_v59  ;;  %5129 = vmatmul.mubr.msk.f32.vlgmr.msra.gmra.mrb[22].mxu1 %vm589_vm2, %v2232_v60  ;;  %v2425_v59 = vld [vmem:[#allocation2 + $0x31] ss:$2 sm:$0xff]  ;;  %v2634_v60 = vld [vmem:[%s7430_s2 + $0x2a0] sm:$0xff] }
 0x15c   : > { %5665 = vmatpush3.bf16.msra.mxu1 %v5664_v57  ;;  %4752 = vmatprep.mubr.msk.f32.mxu0 %vm6044_vm0, %v6045_v4  ;;  %v1063_v57 = vld [vmem:[#allocation2 + $0x32] ss:$2 sm:$0xff]  ;;  %v5682_v0 = vpack.c.bf16 %v2635_v61, %v2634_v60  ;;  %v1271_v61 = vld [vmem:[#allocation2 + $0x53] ss:$2 sm:$0xff] }
 0x15d   : > { %5131 = vmatprep.mubr.msk.f32.mxu1 %vm6044_vm0, %v6045_v4  ;;  %5666 = vmatprep.subr.bf16.mxu1 %v6043_v2 }
 0x15e   : > { %5587 = vmatpush3.bf16.msra.mxu0 %v5586_v62  ;;  %v2245_v42 = vld [vmem:[#allocation2 + $0xe0] ss:$2 sm:$0x7f]  ;;  %v5601_v62 = vpack.c.bf16 %v1293_v56, %v1292_v55  ;;  %v5694_v56 = vpack.c.bf16 %v2827_v52, %v2826_v50 }
 0x15f   : > { %4753 = vmatmul.mubr.msk.f32.gmra.mrb[78].mxu0 %vm589_vm2, %v669_v5  ;;  %5132 = vmatmul.mubr.msk.f32.gmra.mrb[24].mxu1 %vm589_vm2, %v2233_v6  ;;  %v2637_v5 = vld [vmem:[%s7430_s2 + $0x2b8] sm:$0xff]  ;;  %v2618_v55 = vld [vmem:[#allocation2 + $0x42] ss:$2 sm:$0xff] }
 0x160   : > { %4755 = vmatprep.mubr.msk.f32.mxu0 %vm6044_vm0, %v6045_v4  ;;  %5134 = vmatprep.mubr.msk.f32.mxu1 %vm6044_vm0, %v6045_v4  ;;  %v5685_v6 = vpack.c.bf16 %v2637_v5, %v2636_v3  ;;  %v1275_v3 = vld [vmem:[#allocation2 + $0x73] ss:$2 sm:$0xff]  ;;  %v2621_v5 = vld [vmem:[#allocation2 + $0x72] ss:$2 sm:$0xff]  ;;  %v3019_v52 = vld [vmem:[%s7430_s2 + $0x328] sm:$0xff] }
 0x161   : > { %5668 = vmatpush3.bf16.msra.mxu1 %v5667_v1  ;;  %5588 = vmatprep.subr.bf16.mxu0 %v6043_v2  ;;  %v2426_v1 = vld [vmem:[#allocation2 + $0x41] ss:$2 sm:$0xff] }
 0x162   : > { %5669 = vmatprep.subr.bf16.mxu1 %v6043_v2  ;;  %5590 = vmatpush3.bf16.msra.mxu0 %v5589_v8  ;;  %v2427_v8 = vld [vmem:[#allocation2 + $0x51] ss:$2 sm:$0xff]  ;;  %v3018_v50 = vld [vmem:[%s7430_s2 + $0x320] sm:$0xff] }
 0x163   : > { %4756 = vmatmul.mubr.msk.f32.gmra.mrb[58].mxu0 %vm589_vm2, %v671_v11  ;;  %5135 = vmatmul.mubr.msk.f32.gmra.mrb[0].mxu1 %vm589_vm2, %v2234_v12  ;;  %v1071_v11 = vld [vmem:[#allocation2 + $0x72] ss:$2 sm:$0xff]  ;;  %v2429_v12 = vld [vmem:[#allocation2 + $0x71] ss:$2 sm:$0xff] }
 0x164   : > { %4758 = vmatprep.mubr.msk.f32.mxu0 %vm6044_vm0, %v6045_v4  ;;  %5137 = vmatprep.mubr.msk.f32.mxu1 %vm6044_vm0, %v6045_v4 }
 0x165   : > { %5671 = vmatpush3.bf16.msra.mxu1 %v5670_v9  ;;  %5591 = vmatprep.subr.bf16.mxu0 %v6043_v2  ;;  %v1069_v9 = vld [vmem:[#allocation2 + $0x62] ss:$2 sm:$0xff] }
 0x166   : > { %5672 = vmatprep.subr.bf16.mxu1 %v6043_v2 }
 0x167   : > { %4759 = vmatmul.mubr.msk.f32.gmra.mrb[80].mxu0 %vm589_vm2, %v673_v15  ;;  %5138 = vmatmul.mubr.msk.f32.gmra.mrb[26].mxu1 %vm589_vm2, %v2235_v16  ;;  %v1075_v15 = vld [vmem:[#allocation2 + $0x92] ss:$2 sm:$0xff]  ;;  %v2431_v16 = vld [vmem:[#allocation2 + $0x91] ss:$2 sm:$0xff] }
 0x168   : > { %4761 = vmatprep.mubr.msk.f32.mxu0 %vm6044_vm0, %v6045_v4  ;;  %5140 = vmatprep.mubr.msk.f32.mxu1 %vm6044_vm0, %v6045_v4 }
 0x169   : > { %5674 = vmatpush3.bf16.msra.mxu1 %v5673_v14  ;;  %v2430_v14 = vld [vmem:[#allocation2 + $0x81] ss:$2 sm:$0xff] }
 0x16a   : > { %5675 = vmatprep.subr.bf16.mxu1 %v6043_v2 }
 0x16b   : > { %4762 = vmatmul.mubr.msk.f32.gmra.mrb[62].mxu0 %vm589_vm2, %v675_v17  ;;  %5141 = vmatmul.mubr.msk.f32.gmra.mrb[4].mxu1 %vm589_vm2, %v2236_v18  ;;  %v1077_v17 = vld [vmem:[#allocation2 + $0xa2] ss:$2 sm:$0xff]  ;;  %v2432_v18 = vld [vmem:[#allocation2 + $0xa1] ss:$2 sm:$0xff] }
 0x16c   : > { %4764 = vmatprep.mubr.msk.f32.mxu0 %vm6044_vm0, %v6045_v4  ;;  %5143 = vmatprep.mubr.msk.f32.mxu1 %vm6044_vm0, %v6045_v4 }
 0x16f   : > { %4765 = vmatmul.mubr.msk.f32.gmra.mrb[82].mxu0 %vm589_vm2, %v677_v19  ;;  %5144 = vmatmul.mubr.msk.f32.gmra.mrb[28].mxu1 %vm589_vm2, %v2237_v20  ;;  %v1079_v19 = vld [vmem:[#allocation2 + $0xb2] ss:$2 sm:$0xff]  ;;  %v2433_v20 = vld [vmem:[#allocation2 + $0xb1] ss:$2 sm:$0xff] }
 0x170   : > { %4767 = vmatprep.mubr.msk.f32.mxu0 %vm6044_vm0, %v6045_v4  ;;  %5146 = vmatprep.mubr.msk.f32.mxu1 %vm6044_vm0, %v6045_v4 }
 0x173   : > { %4768 = vmatmul.mubr.msk.f32.gmra.mrb[66].mxu0 %vm589_vm2, %v679_v21  ;;  %5147 = vmatmul.mubr.msk.f32.gmra.mrb[8].mxu1 %vm589_vm2, %v2238_v22  ;;  %v1081_v21 = vld [vmem:[#allocation2 + $0xc2] ss:$2 sm:$0x7f]  ;;  %v2434_v22 = vld [vmem:[#allocation2 + $0xc1] ss:$2 sm:$0xff] }
 0x174   : > { %4770 = vmatprep.mubr.msk.f32.mxu0 %vm6044_vm0, %v6045_v4  ;;  %5149 = vmatprep.mubr.msk.f32.mxu1 %vm6044_vm0, %v6045_v4 }
 0x177   : > { %4771 = vmatmul.mubr.msk.f32.gmra.mrb[84].mxu0 %vm589_vm2, %v681_v23  ;;  %5150 = vmatmul.mubr.msk.f32.gmra.mrb[30].mxu1 %vm589_vm2, %v2239_v24  ;;  %v1478_v23 = vld [vmem:[%s7430_s2 + $0x100] sm:$0xff]  ;;  %v1479_v24 = vld [vmem:[%s7430_s2 + $0x108] sm:$0xff] }
 0x178   : > { %4773 = vmatprep.mubr.msk.f32.mxu0 %vm6044_vm0, %v6045_v4  ;;  %5152 = vmatprep.mubr.msk.f32.mxu1 %vm6044_vm0, %v6045_v4 }
 0x17b   : > { %4774 = vmatmul.mubr.msk.f32.gmra.mrb[70].mxu0 %vm589_vm2, %v683_v25  ;;  %5153 = vmatmul.mubr.msk.f32.gmra.mrb[12].mxu1 %vm589_vm2, %v2240_v26  ;;  %v1261_v25 = vld [vmem:[#allocation2 + $0x3] ss:$2 sm:$0xff]  ;;  %v5604_v26 = vpack.c.bf16 %v1479_v24, %v1478_v23  ;;  %v2627_v24 = vld [vmem:[#allocation2 + $0xd2] ss:$2 sm:$0xff] }
 0x17c   : > { %4776 = vmatprep.mubr.msk.f32.mxu0 %vm6044_vm0, %v6045_v4  ;;  %5155 = vmatprep.mubr.msk.f32.mxu1 %vm6044_vm0, %v6045_v4 }
 0x17f   : > { %4777 = vmatmul.mubr.msk.f32.gmra.mrb[86].mxu0 %vm589_vm2, %v685_v27  ;;  %5156 = vmatmul.mubr.msk.f32.gmra.mrb[32].mxu1 %vm589_vm2, %v2241_v28  ;;  %v2435_v27 = vld [vmem:[#allocation2 + $0xd1] ss:$2 sm:$0xff] }
 0x180   : > { %4779 = vmatprep.mubr.msk.f32.mxu0 %vm6044_vm0, %v6045_v4  ;;  %5158 = vmatprep.mubr.msk.f32.mxu1 %vm6044_vm0, %v6045_v4  ;;  %v1480_v28 = vld [vmem:[%s7430_s2 + $0x110] sm:$0xff] }
 0x181   : > { %v5607_v32 = vpack.c.bf16 %v1481_v29, %v1480_v28  ;;  %v3014_v28 = vld [vmem:[%s7430_s2 + $0x300] sm:$0xff]  ;;  %v3015_v29 = vld [vmem:[%s7430_s2 + $0x308] sm:$0xff] }
 0x183   : > { %4780 = vmatmul.mubr.msk.f32.gmra.mrb[74].mxu0 %vm589_vm2, %v687_v30  ;;  %5159 = vmatmul.mubr.msk.f32.gmra.mrb[16].mxu1 %vm589_vm2, %v2242_v31  ;;  %v2822_v30 = vld [vmem:[%s7430_s2 + $0x2c0] sm:$0xff]  ;;  %v2823_v31 = vld [vmem:[%s7430_s2 + $0x2c8] sm:$0xff] }
 0x184   : > { %4798 = vmatprep.mubr.msk.f32.mxu0 %vm6044_vm0, %v6045_v4  ;;  %5161 = vmatprep.mubr.msk.f32.mxu1 %vm6044_vm0, %v6045_v4  ;;  %v5688_v37 = vpack.c.bf16 %v2823_v31, %v2822_v30 }
 0x187   : > { %4799 = vmatmul.mubr.msk.f32.vlgmr.msra.gmra.mrb[50].mxu0 %vm589_vm2, %v1057_v33  ;;  %5162 = vmatmul.mubr.msk.f32.gmra.mrb[34].mxu1 %vm589_vm2, %v2243_v35  ;;  %v1263_v33 = vld [vmem:[#allocation2 + $0x13] ss:$2 sm:$0xff] }
 0x188   : > { %4801 = vmatprep.mubr.msk.f32.mxu0 %vm6044_vm0, %v6045_v4  ;;  %5164 = vmatprep.mubr.msk.f32.mxu1 %vm6044_vm0, %v6045_v4  ;;  %v1482_v35 = vld [vmem:[%s7430_s2 + $0x120] sm:$0xff] }
 0x189   : > { %5593 = vmatpush3.bf16.msra.mxu0 %v5592_v34  ;;  %v2437_v34 = vld [vmem:[#allocation2 + $0xe1] ss:$2 sm:$0x7f] }
 0x18a   : > { %5594 = vmatprep.subr.bf16.mxu0 %v6043_v2 }
 0x18b   : > { %4802 = vmatmul.mubr.msk.f32.gmra.mrb[88].mxu0 %vm589_vm2, %v1059_v41  ;;  %5165 = vmatmul.mubr.msk.f32.gmra.mrb[20].mxu1 %vm589_vm2, %v2245_v42  ;;  %v2825_v41 = vld [vmem:[%s7430_s2 + $0x2d8] sm:$0xff]  ;;  %v5610_v42 = vpack.c.bf16 %v1483_v36, %v1482_v35  ;;  %v1674_v35 = vld [vmem:[%s7430_s2 + $0x160] sm:$0xff]  ;;  %v1675_v36 = vld [vmem:[%s7430_s2 + $0x168] sm:$0xff] }
 0x18c   : > { %4804 = vmatprep.mubr.msk.f32.mxu0 %vm6044_vm0, %v6045_v4  ;;  %5183 = vmatprep.mubr.msk.f32.mxu1 %vm6044_vm0, %v6045_v4 }
 0x18d   : > { %5596 = vmatpush3.bf16.msra.mxu0 %v5595_v40  ;;  %v2824_v40 = vld [vmem:[%s7430_s2 + $0x2d0] sm:$0xff] }
 0x18e   : > { %5597 = vmatprep.subr.bf16.mxu0 %v6043_v2 }
 0x18f   : > { %4805 = vmatmul.mubr.msk.f32.gmra.mrb[54].mxu0 %vm589_vm2, %v1061_v47  ;;  %5184 = vmatmul.mubr.msk.f32.vlgmr.msra.gmra.mrb[22].mxu1 %vm589_vm2, %v2424_v49  ;;  %v5691_v47 = vpack.c.bf16 %v2825_v41, %v2824_v40  ;;  %v2617_v49 = vld [vmem:[#allocation2 + $0x32] ss:$2 sm:$0xff] }
 0x190   : > { %5677 = vmatpush3.bf16.msra.mxu1 %v5676_v46  ;;  %4807 = vmatprep.mubr.msk.f32.mxu0 %vm6044_vm0, %v6045_v4  ;;  %v1267_v46 = vld [vmem:[#allocation2 + $0x33] ss:$2 sm:$0xff] }
 0x191   : > { %5186 = vmatprep.mubr.msk.f32.mxu1 %vm6044_vm0, %v6045_v4  ;;  %5678 = vmatprep.subr.bf16.mxu1 %v6043_v2  ;;  %v3016_v40 = vld [vmem:[%s7430_s2 + $0x310] sm:$0xff]  ;;  %v3017_v41 = vld [vmem:[%s7430_s2 + $0x318] sm:$0xff] }
 0x192   : > { %5599 = vmatpush3.bf16.msra.mxu0 %v5598_v53  ;;  %v5613_v53 = vpack.c.bf16 %v1485_v44, %v1484_v43  ;;  %v1676_v43 = vld [vmem:[%s7430_s2 + $0x170] sm:$0xff]  ;;  %v1677_v44 = vld [vmem:[%s7430_s2 + $0x178] sm:$0xff] }
 0x193   : > { %4808 = vmatmul.mubr.msk.f32.gmra.mrb[90].mxu0 %vm589_vm2, %v1063_v57  ;;  %5187 = vmatmul.mubr.msk.f32.gmra.mrb[36].mxu1 %vm589_vm2, %v2425_v59  ;;  %v1269_v57 = vld [vmem:[#allocation2 + $0x43] ss:$2 sm:$0xff]  ;;  %v2829_v59 = vld [vmem:[%s7430_s2 + $0x2f8] sm:$0xff] }
 0x194   : > { %4810 = vmatprep.mubr.msk.f32.mxu0 %vm6044_vm0, %v6045_v4  ;;  %5189 = vmatprep.mubr.msk.f32.mxu1 %vm6044_vm0, %v6045_v4 }
 0x195   : > { %5680 = vmatpush3.bf16.msra.mxu1 %v5679_v58  ;;  %5600 = vmatprep.subr.bf16.mxu0 %v6043_v2  ;;  %v2828_v58 = vld [vmem:[%s7430_s2 + $0x2f0] sm:$0xff] }
 0x196   : > { %5681 = vmatprep.subr.bf16.mxu1 %v6043_v2  ;;  %5602 = vmatpush3.bf16.msra.mxu0 %v5601_v62  ;;  %v5697_v60 = vpack.c.bf16 %v2829_v59, %v2828_v58  ;;  %v2619_v62 = vld [vmem:[#allocation2 + $0x52] ss:$2 sm:$0xff]  ;;  %v5706_v58 = vpack.c.bf16 %v3019_v52, %v3018_v50 }
 0x197   : > { %4811 = vmatmul.mubr.msk.f32.gmra.mrb[58].mxu0 %vm589_vm2, %v1065_v63  ;;  %5190 = vmatmul.mubr.msk.f32.gmra.mrb[0].mxu1 %vm589_vm2, %v2426_v1  ;;  %v1273_v63 = vld [vmem:[#allocation2 + $0x63] ss:$2 sm:$0xff]  ;;  %v1468_v59 = vld [vmem:[#allocation2 + $0x50] ss:$2 sm:$0xff] }
 0x198   : > { %4813 = vmatprep.mubr.msk.f32.mxu0 %vm6044_vm0, %v6045_v4  ;;  %5192 = vmatprep.mubr.msk.f32.mxu1 %vm6044_vm0, %v6045_v4  ;;  %v3209_v50 = vld [vmem:[%s7430_s2 + $0x358] sm:$0xff] }
 0x199   : > { %5683 = vmatpush3.bf16.msra.mxu1 %v5682_v0  ;;  %5603 = vmatprep.subr.bf16.mxu0 %v6043_v2  ;;  %v2620_v0 = vld [vmem:[#allocation2 + $0x62] ss:$2 sm:$0xff] }
 0x19a   : > { %5684 = vmatprep.subr.bf16.mxu1 %v6043_v2 }
 0x19b   : > { %4814 = vmatmul.mubr.msk.f32.gmra.mrb[92].mxu0 %vm589_vm2, %v1067_v7  ;;  %5193 = vmatmul.mubr.msk.f32.gmra.mrb[38].mxu1 %vm589_vm2, %v2427_v8  ;;  %v1277_v7 = vld [vmem:[#allocation2 + $0x83] ss:$2 sm:$0xff]  ;;  %v2622_v8 = vld [vmem:[#allocation2 + $0x82] ss:$2 sm:$0xff] }
 0x19c   : > { %4816 = vmatprep.mubr.msk.f32.mxu0 %vm6044_vm0, %v6045_v4  ;;  %5195 = vmatprep.mubr.msk.f32.mxu1 %vm6044_vm0, %v6045_v4 }
 0x19d   : > { %5686 = vmatpush3.bf16.msra.mxu1 %v5685_v6 }
 0x19e   : > { %5687 = vmatprep.subr.bf16.mxu1 %v6043_v2 }
 0x19f   : > { %4817 = vmatmul.mubr.msk.f32.gmra.mrb[62].mxu0 %vm589_vm2, %v1069_v9  ;;  %5196 = vmatmul.mubr.msk.f32.gmra.mrb[4].mxu1 %vm589_vm2, %v2428_v10  ;;  %v1279_v9 = vld [vmem:[#allocation2 + $0x93] ss:$2 sm:$0xff]  ;;  %v2623_v10 = vld [vmem:[#allocation2 + $0x92] ss:$2 sm:$0xff] }
 0x1a0   : > { %4819 = vmatprep.mubr.msk.f32.mxu0 %vm6044_vm0, %v6045_v4  ;;  %5198 = vmatprep.mubr.msk.f32.mxu1 %vm6044_vm0, %v6045_v4 }
 0x1a3   : > { %4820 = vmatmul.mubr.msk.f32.gmra.mrb[94].mxu0 %vm589_vm2, %v1071_v11  ;;  %5199 = vmatmul.mubr.msk.f32.gmra.mrb[40].mxu1 %vm589_vm2, %v2429_v12  ;;  %v1281_v11 = vld [vmem:[#allocation2 + $0xa3] ss:$2 sm:$0xff]  ;;  %v2624_v12 = vld [vmem:[#allocation2 + $0xa2] ss:$2 sm:$0xff] }
 0x1a4   : > { %4822 = vmatprep.mubr.msk.f32.mxu0 %vm6044_vm0, %v6045_v4  ;;  %5201 = vmatprep.mubr.msk.f32.mxu1 %vm6044_vm0, %v6045_v4 }
 0x1a7   : > { %4823 = vmatmul.mubr.msk.f32.gmra.mrb[66].mxu0 %vm589_vm2, %v1073_v13  ;;  %5202 = vmatmul.mubr.msk.f32.gmra.mrb[8].mxu1 %vm589_vm2, %v2430_v14  ;;  %v1283_v14 = vld [vmem:[#allocation2 + $0xb3] ss:$2 sm:$0xff] }
 0x1a8   : > { %4825 = vmatprep.mubr.msk.f32.mxu0 %vm6044_vm0, %v6045_v4  ;;  %5204 = vmatprep.mubr.msk.f32.mxu1 %vm6044_vm0, %v6045_v4 }
 0x1ab   : > { %4826 = vmatmul.mubr.msk.f32.gmra.mrb[96].mxu0 %vm589_vm2, %v1075_v15  ;;  %5205 = vmatmul.mubr.msk.f32.gmra.mrb[42].mxu1 %vm589_vm2, %v2431_v16  ;;  %v2625_v15 = vld [vmem:[#allocation2 + $0xb2] ss:$2 sm:$0xff] }
 0x1ac   : > { %4828 = vmatprep.mubr.msk.f32.mxu0 %vm6044_vm0, %v6045_v4  ;;  %5207 = vmatprep.mubr.msk.f32.mxu1 %vm6044_vm0, %v6045_v4 }
 0x1af   : > { %4829 = vmatmul.mubr.msk.f32.gmra.mrb[70].mxu0 %vm589_vm2, %v1077_v17  ;;  %5208 = vmatmul.mubr.msk.f32.gmra.mrb[12].mxu1 %vm589_vm2, %v2432_v18  ;;  %v1285_v17 = vld [vmem:[#allocation2 + $0xc3] ss:$2 sm:$0x7f]  ;;  %v2626_v18 = vld [vmem:[#allocation2 + $0xc2] ss:$2 sm:$0xff] }
 0x1b0   : > { %4831 = vmatprep.mubr.msk.f32.mxu0 %vm6044_vm0, %v6045_v4  ;;  %5210 = vmatprep.mubr.msk.f32.mxu1 %vm6044_vm0, %v6045_v4 }
 0x1b3   : > { %4832 = vmatmul.mubr.msk.f32.gmra.mrb[98].mxu0 %vm589_vm2, %v1079_v19  ;;  %5211 = vmatmul.mubr.msk.f32.gmra.mrb[44].mxu1 %vm589_vm2, %v2433_v20  ;;  %v1670_v19 = vld [vmem:[%s7430_s2 + $0x140] sm:$0xff]  ;;  %v1671_v20 = vld [vmem:[%s7430_s2 + $0x148] sm:$0xff] }
 0x1b4   : > { %4834 = vmatprep.mubr.msk.f32.mxu0 %vm6044_vm0, %v6045_v4  ;;  %5213 = vmatprep.mubr.msk.f32.mxu1 %vm6044_vm0, %v6045_v4 }
 0x1b7   : > { %4835 = vmatmul.mubr.msk.f32.gmra.mrb[74].mxu0 %vm589_vm2, %v1081_v21  ;;  %5214 = vmatmul.mubr.msk.f32.gmra.mrb[16].mxu1 %vm589_vm2, %v2434_v22  ;;  %v1464_v21 = vld [vmem:[#allocation2 + $0x10] ss:$2 sm:$0xff]  ;;  %v5616_v22 = vpack.c.bf16 %v1671_v20, %v1670_v19 }
 0x1b8   : > { %4853 = vmatprep.mubr.msk.f32.mxu0 %vm6044_vm0, %v6045_v4  ;;  %5216 = vmatprep.mubr.msk.f32.mxu1 %vm6044_vm0, %v6045_v4 }
 0x1bb   : > { %4854 = vmatmul.mubr.msk.f32.vlgmr.msra.gmra.mrb[50].mxu0 %vm589_vm2, %v1261_v25  ;;  %5217 = vmatmul.mubr.msk.f32.gmra.mrb[46].mxu1 %vm589_vm2, %v2435_v27  ;;  %v1672_v25 = vld [vmem:[%s7430_s2 + $0x150] sm:$0xff] }
 0x1bc   : > { %4856 = vmatprep.mubr.msk.f32.mxu0 %vm6044_vm0, %v6045_v4  ;;  %5219 = vmatprep.mubr.msk.f32.mxu1 %vm6044_vm0, %v6045_v4 }
 0x1bd   : > { %5605 = vmatpush3.bf16.msra.mxu0 %v5604_v26  ;;  %v1673_v26 = vld [vmem:[%s7430_s2 + $0x158] sm:$0xff] }
 0x1be   : > { %5606 = vmatprep.subr.bf16.mxu0 %v6043_v2  ;;  %v5619_v30 = vpack.c.bf16 %v1673_v26, %v1672_v25  ;;  %v1477_v25 = vld [vmem:[#allocation2 + $0xd0] ss:$2 sm:$0x7f]  ;;  %v1862_v26 = vld [vmem:[%s7430_s2 + $0x180] sm:$0xff] }
 0x1bf   : > { %4857 = vmatmul.mubr.msk.f32.gmra.mrb[100].mxu0 %vm589_vm2, %v1263_v33  ;;  %5220 = vmatmul.mubr.msk.f32.gmra.mrb[20].mxu1 %vm589_vm2, %v2437_v34  ;;  %v2629_v33 = vld [vmem:[#allocation2 + $0xe2] ss:$2 sm:$0x7f] }
 0x1c0   : > { %4859 = vmatprep.mubr.msk.f32.mxu0 %vm6044_vm0, %v6045_v4  ;;  %5238 = vmatprep.mubr.msk.f32.mxu1 %vm6044_vm0, %v6045_v4 }
 0x1c1   : > { %5608 = vmatpush3.bf16.msra.mxu0 %v5607_v32  ;;  %v1465_v32 = vld [vmem:[#allocation2 + $0x20] ss:$2 sm:$0xff] }
 0x1c2   : > { %5609 = vmatprep.subr.bf16.mxu0 %v6043_v2 }
 0x1c3   : > { %4860 = vmatmul.mubr.msk.f32.gmra.mrb[54].mxu0 %vm589_vm2, %v1265_v38  ;;  %5239 = vmatmul.mubr.msk.f32.vlgmr.msra.gmra.mrb[22].mxu1 %vm589_vm2, %v2616_v39  ;;  %v2808_v38 = vld [vmem:[#allocation2 + $0x23] ss:$2 sm:$0xff]  ;;  %v1466_v39 = vld [vmem:[#allocation2 + $0x30] ss:$2 sm:$0xff] }
 0x1c4   : > { %5689 = vmatpush3.bf16.msra.mxu1 %v5688_v37  ;;  %4862 = vmatprep.mubr.msk.f32.mxu0 %vm6044_vm0, %v6045_v4  ;;  %v5700_v37 = vpack.c.bf16 %v3015_v29, %v3014_v28  ;;  %v1656_v29 = vld [vmem:[#allocation2 + $0x11] ss:$2 sm:$0xff] }
 0x1c5   : > { %5241 = vmatprep.mubr.msk.f32.mxu1 %vm6044_vm0, %v6045_v4  ;;  %5690 = vmatprep.subr.bf16.mxu1 %v6043_v2 }
 0x1c6   : > { %5611 = vmatpush3.bf16.msra.mxu0 %v5610_v42  ;;  %v5622_v42 = vpack.c.bf16 %v1675_v36, %v1674_v35  ;;  %v3207_v35 = vld [vmem:[%s7430_s2 + $0x348] sm:$0xff] }
 0x1c7   : > { %4863 = vmatmul.mubr.msk.f32.gmra.mrb[102].mxu0 %vm589_vm2, %v1267_v46  ;;  %5242 = vmatmul.mubr.msk.f32.gmra.mrb[48].mxu1 %vm589_vm2, %v2617_v49  ;;  %v1467_v46 = vld [vmem:[#allocation2 + $0x40] ss:$2 sm:$0xff]  ;;  %v2809_v49 = vld [vmem:[#allocation2 + $0x33] ss:$2 sm:$0xff] }
 0x1c8   : > { %4865 = vmatprep.mubr.msk.f32.mxu0 %vm6044_vm0, %v6045_v4  ;;  %5244 = vmatprep.mubr.msk.f32.mxu1 %vm6044_vm0, %v6045_v4 }
 0x1c9   : > { %5692 = vmatpush3.bf16.msra.mxu1 %v5691_v47  ;;  %5612 = vmatprep.subr.bf16.mxu0 %v6043_v2  ;;  %v5703_v47 = vpack.c.bf16 %v3017_v41, %v3016_v40  ;;  %v1866_v41 = vld [vmem:[%s7430_s2 + $0x1a0] sm:$0xff] }
 0x1ca   : > { %5693 = vmatprep.subr.bf16.mxu1 %v6043_v2  ;;  %5614 = vmatpush3.bf16.msra.mxu0 %v5613_v53  ;;  %v5625_v53 = vpack.c.bf16 %v1677_v44, %v1676_v43  ;;  %v1658_v44 = vld [vmem:[#allocation2 + $0x31] ss:$2 sm:$0xff] }
 0x1cb   : > { %4866 = vmatmul.mubr.msk.f32.gmra.mrb[58].mxu0 %vm589_vm2, %v1269_v57  ;;  %5245 = vmatmul.mubr.msk.f32.gmra.mrb[0].mxu1 %vm589_vm2, %v2618_v55  ;;  %v2810_v57 = vld [vmem:[#allocation2 + $0x43] ss:$2 sm:$0xff] }
 0x1cc   : > { %4868 = vmatprep.mubr.msk.f32.mxu0 %vm6044_vm0, %v6045_v4  ;;  %5247 = vmatprep.mubr.msk.f32.mxu1 %vm6044_vm0, %v6045_v4 }
 0x1cd   : > { %5695 = vmatpush3.bf16.msra.mxu1 %v5694_v56  ;;  %5615 = vmatprep.subr.bf16.mxu0 %v6043_v2 }
 0x1ce   : > { %5696 = vmatprep.subr.bf16.mxu1 %v6043_v2 }
 0x1cf   : > { %4869 = vmatmul.mubr.msk.f32.gmra.mrb[104].mxu0 %vm589_vm2, %v1271_v61  ;;  %5248 = vmatmul.mubr.msk.f32.gmra.mrb[50].mxu1 %vm589_vm2, %v2619_v62  ;;  %v3021_v61 = vld [vmem:[%s7430_s2 + $0x338] sm:$0xff] }
 0x1d0   : > { %4871 = vmatprep.mubr.msk.f32.mxu0 %vm6044_vm0, %v6045_v4  ;;  %5250 = vmatprep.mubr.msk.f32.mxu1 %vm6044_vm0, %v6045_v4 }
 0x1d1   : > { %5698 = vmatpush3.bf16.msra.mxu1 %v5697_v60  ;;  %v3020_v60 = vld [vmem:[%s7430_s2 + $0x330] sm:$0xff] }
 0x1d2   : > { %5699 = vmatprep.subr.bf16.mxu1 %v6043_v2  ;;  %v5709_v62 = vpack.c.bf16 %v3021_v61, %v3020_v60  ;;  %v3210_v60 = vld [vmem:[%s7430_s2 + $0x360] sm:$0xff]  ;;  %v3211_v61 = vld [vmem:[%s7430_s2 + $0x368] sm:$0xff] }
 0x1d3   : > { %4872 = vmatmul.mubr.msk.f32.gmra.mrb[62].mxu0 %vm589_vm2, %v1273_v63  ;;  %5251 = vmatmul.mubr.msk.f32.gmra.mrb[4].mxu1 %vm589_vm2, %v2620_v0  ;;  %v1469_v0 = vld [vmem:[#allocation2 + $0x60] ss:$2 sm:$0xff] }
 0x1d4   : > { %4874 = vmatprep.mubr.msk.f32.mxu0 %vm6044_vm0, %v6045_v4  ;;  %5253 = vmatprep.mubr.msk.f32.mxu1 %vm6044_vm0, %v6045_v4 }
 0x1d6   : > { %v840_v1 = vpop.f32.mrb[52].mxu0 }
 0x1d7   : > { %v4693_v6 = vpop.f32.mrb[53].mxu0  ;;  %4875 = vmatmul.mubr.msk.f32.gmra.mrb[106].mxu0 %vm589_vm2, %v1275_v3  ;;  %5254 = vmatmul.mubr.msk.f32.gmra.mrb[52].mxu1 %vm589_vm2, %v2621_v5  ;;  %v2811_v1 = vld [vmem:[#allocation2 + $0x53] ss:$2 sm:$0xff]  ;;  %v1470_v5 = vld [vmem:[#allocation2 + $0x70] ss:$2 sm:$0xff] }
 0x1d8   : > { %4877 = vmatprep.mubr.msk.f32.mxu0 %vm6044_vm0, %v6045_v4  ;;  %5256 = vmatprep.mubr.msk.f32.mxu1 %vm6044_vm0, %v6045_v4  ;;  %v2812_v6 = vld [vmem:[#allocation2 + $0x63] ss:$2 sm:$0xff] }
 0x1db   : > { %4878 = vmatmul.mubr.msk.f32.gmra.mrb[66].mxu0 %vm589_vm2, %v1277_v7  ;;  %5257 = vmatmul.mubr.msk.f32.gmra.mrb[8].mxu1 %vm589_vm2, %v2622_v8  ;;  %v1471_v8 = vld [vmem:[#allocation2 + $0x80] ss:$2 sm:$0xff] }
 0x1dc   : > { %4880 = vmatprep.mubr.msk.f32.mxu0 %vm6044_vm0, %v6045_v4  ;;  %5259 = vmatprep.mubr.msk.f32.mxu1 %vm6044_vm0, %v6045_v4 }
 0x1df   : > { %4881 = vmatmul.mubr.msk.f32.gmra.mrb[108].mxu0 %vm589_vm2, %v1279_v9  ;;  %5260 = vmatmul.mubr.msk.f32.gmra.mrb[54].mxu1 %vm589_vm2, %v2623_v10  ;;  %v2813_v9 = vld [vmem:[#allocation2 + $0x73] ss:$2 sm:$0xff] }
 0x1e0   : > { %4883 = vmatprep.mubr.msk.f32.mxu0 %vm6044_vm0, %v6045_v4  ;;  %5262 = vmatprep.mubr.msk.f32.mxu1 %vm6044_vm0, %v6045_v4 }
 0x1e3   : > { %4884 = vmatmul.mubr.msk.f32.gmra.mrb[70].mxu0 %vm589_vm2, %v1281_v11  ;;  %5263 = vmatmul.mubr.msk.f32.gmra.mrb[12].mxu1 %vm589_vm2, %v2624_v12  ;;  %v1472_v12 = vld [vmem:[#allocation2 + $0x90] ss:$2 sm:$0xff] }
 0x1e4   : > { %4886 = vmatprep.mubr.msk.f32.mxu0 %vm6044_vm0, %v6045_v4  ;;  %5265 = vmatprep.mubr.msk.f32.mxu1 %vm6044_vm0, %v6045_v4 }
 0x1e6   : > { %v849_v13 = vpop.f32.mrb[56].mxu0 }
 0x1e7   : > { %v4699_v16 = vpop.f32.mrb[57].mxu0  ;;  %4887 = vmatmul.mubr.msk.f32.gmra.mrb[110].mxu0 %vm589_vm2, %v1283_v14  ;;  %5266 = vmatmul.mubr.msk.f32.gmra.mrb[56].mxu1 %vm589_vm2, %v2625_v15  ;;  %v2814_v13 = vld [vmem:[#allocation2 + $0x83] ss:$2 sm:$0xff]  ;;  %v1473_v15 = vld [vmem:[#allocation2 + $0xa0] ss:$2 sm:$0xff] }
 0x1e8   : > { %4889 = vmatprep.mubr.msk.f32.mxu0 %vm6044_vm0, %v6045_v4  ;;  %5268 = vmatprep.mubr.msk.f32.mxu1 %vm6044_vm0, %v6045_v4  ;;  %v2815_v16 = vld [vmem:[#allocation2 + $0x93] ss:$2 sm:$0xff] }
 0x1eb   : > { %4890 = vmatmul.mubr.msk.f32.gmra.mrb[74].mxu0 %vm589_vm2, %v1285_v17  ;;  %5269 = vmatmul.mubr.msk.f32.gmra.mrb[16].mxu1 %vm589_vm2, %v2626_v18  ;;  %v1474_v17 = vld [vmem:[#allocation2 + $0xb0] ss:$2 sm:$0xff]  ;;  %v2816_v18 = vld [vmem:[#allocation2 + $0xa3] ss:$2 sm:$0xff] }
 0x1ec   : > { %4908 = vmatprep.mubr.msk.f32.mxu0 %vm6044_vm0, %v6045_v4  ;;  %5271 = vmatprep.mubr.msk.f32.mxu1 %vm6044_vm0, %v6045_v4 }
 0x1ee   : > { %v2181_v23 = vpop.f32.mrb[2].mxu1 }
 0x1ef   : > { %4909 = vmatmul.mubr.msk.f32.vlgmr.msra.gmra.mrb[50].mxu0 %vm589_vm2, %v1464_v21  ;;  %v5084_v27 = vpop.f32.mrb[3].mxu1  ;;  %5272 = vmatmul.mubr.msk.f32.gmra.mrb[58].mxu1 %vm589_vm2, %v2627_v24  ;;  %v1475_v21 = vld [vmem:[#allocation2 + $0xc0] ss:$2 sm:$0xff]  ;;  %v2818_v23 = vld [vmem:[#allocation2 + $0xc3] ss:$2 sm:$0xff] }
 0x1f0   : > { %4911 = vmatprep.mubr.msk.f32.mxu0 %vm6044_vm0, %v6045_v4  ;;  %5274 = vmatprep.mubr.msk.f32.mxu1 %vm6044_vm0, %v6045_v4  ;;  %v1863_v27 = vld [vmem:[%s7430_s2 + $0x188] sm:$0xff] }
 0x1f1   : > { %5617 = vmatpush3.bf16.msra.mxu0 %v5616_v22  ;;  %v2817_v22 = vld [vmem:[#allocation2 + $0xb3] ss:$2 sm:$0xff] }
 0x1f2   : > { %v858_v31 = vpop.f32.mrb[60].mxu0  ;;  %5618 = vmatprep.subr.bf16.mxu0 %v6043_v2 }
 0x1f3   : > { %v4705_v34 = vpop.f32.mrb[61].mxu0  ;;  %4912 = vmatmul.mubr.msk.f32.gmra.mrb[112].mxu0 %vm589_vm2, %v1465_v32  ;;  %5275 = vmatmul.mubr.msk.f32.gmra.mrb[20].mxu1 %vm589_vm2, %v2629_v33  ;;  %v2819_v31 = vld [vmem:[#allocation2 + $0xd3] ss:$2 sm:$0xff] }
 0x1f4   : > { %4914 = vmatprep.mubr.msk.f32.mxu0 %vm6044_vm0, %v6045_v4  ;;  %5293 = vmatprep.mubr.msk.f32.mxu1 %vm6044_vm0, %v6045_v4  ;;  %v1864_v32 = vld [vmem:[%s7430_s2 + $0x190] sm:$0xff]  ;;  %v1865_v33 = vld [vmem:[%s7430_s2 + $0x198] sm:$0xff]  ;;  %v3206_v34 = vld [vmem:[%s7430_s2 + $0x340] sm:$0xff] }
 0x1f5   : > { %5620 = vmatpush3.bf16.msra.mxu0 %v5619_v30  ;;  %v5628_v30 = vpack.c.bf16 %v1863_v27, %v1862_v26  ;;  %v5631_v36 = vpack.c.bf16 %v1865_v33, %v1864_v32  ;;  %v5712_v43 = vpack.c.bf16 %v3207_v35, %v3206_v34  ;;  %v1665_v27 = vld [vmem:[#allocation2 + $0xa1] ss:$2 sm:$0xff]  ;;  %v3008_v32 = vld [vmem:[#allocation2 + $0xb0] ss:$2 sm:$0xff] }
 0x1f6   : > { %5621 = vmatprep.subr.bf16.mxu0 %v6043_v2  ;;  %v1667_v35 = vld [vmem:[#allocation2 + $0xc1] ss:$2 sm:$0xff] }
 0x1f7   : > { %4915 = vmatmul.mubr.msk.f32.gmra.mrb[54].mxu0 %vm589_vm2, %v1466_v39  ;;  %5294 = vmatmul.mubr.msk.f32.vlgmr.msra.gmra.mrb[22].mxu1 %vm589_vm2, %v2808_v38  ;;  %v1657_v38 = vld [vmem:[#allocation2 + $0x21] ss:$2 sm:$0xff] }
 0x1f8   : > { %5701 = vmatpush3.bf16.msra.mxu1 %v5700_v37  ;;  %4917 = vmatprep.mubr.msk.f32.mxu0 %vm6044_vm0, %v6045_v4  ;;  %v2821_v39 = vld [vmem:[#allocation2 + $0xe3] ss:$2 sm:$0x7f] }
 0x1f9   : > { %5296 = vmatprep.mubr.msk.f32.mxu1 %vm6044_vm0, %v6045_v4  ;;  %5702 = vmatprep.subr.bf16.mxu1 %v6043_v2 }
 0x1fa   : > { %5623 = vmatpush3.bf16.msra.mxu0 %v5622_v42  ;;  %v1867_v42 = vld [vmem:[%s7430_s2 + $0x1a8] sm:$0xff] }
 0x1fb   : > { %v2190_v55 = vpop.f32.mrb[6].mxu1  ;;  %4918 = vmatmul.mubr.msk.f32.gmra.mrb[114].mxu0 %vm589_vm2, %v1467_v46  ;;  %5297 = vmatmul.mubr.msk.f32.gmra.mrb[60].mxu1 %vm589_vm2, %v2809_v49  ;;  %v3208_v49 = vld [vmem:[%s7430_s2 + $0x350] sm:$0xff]  ;;  %v5634_v52 = vpack.c.bf16 %v1867_v42, %v1866_v41 }
 0x1fc   : > { %v5090_v56 = vpop.f32.mrb[7].mxu1  ;;  %4920 = vmatprep.mubr.msk.f32.mxu0 %vm6044_vm0, %v6045_v4  ;;  %5299 = vmatprep.mubr.msk.f32.mxu1 %vm6044_vm0, %v6045_v4  ;;  %v1868_v55 = vld [vmem:[%s7430_s2 + $0x1b0] sm:$0xff] }
 0x1fd   : > { %5704 = vmatpush3.bf16.msra.mxu1 %v5703_v47  ;;  %5624 = vmatprep.subr.bf16.mxu0 %v6043_v2  ;;  %v3000_v47 = vld [vmem:[#allocation2 + $0x30] ss:$2 sm:$0xff] }
 0x1fe   : > { %5705 = vmatprep.subr.bf16.mxu1 %v6043_v2  ;;  %5626 = vmatpush3.bf16.msra.mxu0 %v5625_v53  ;;  %v1869_v56 = vld [vmem:[%s7430_s2 + $0x1b8] sm:$0xff] }
 0x1ff   : > { %4921 = vmatmul.mubr.msk.f32.gmra.mrb[58].mxu0 %vm589_vm2, %v1468_v59  ;;  %5300 = vmatmul.mubr.msk.f32.gmra.mrb[0].mxu1 %vm589_vm2, %v2810_v57  ;;  %v1659_v57 = vld [vmem:[#allocation2 + $0x41] ss:$2 sm:$0xff]  ;;  %v3001_v59 = vld [vmem:[#allocation2 + $0x40] ss:$2 sm:$0xff] }
 0x200   : > { %4923 = vmatprep.mubr.msk.f32.mxu0 %vm6044_vm0, %v6045_v4  ;;  %5302 = vmatprep.mubr.msk.f32.mxu1 %vm6044_vm0, %v6045_v4 }
 0x201   : > { %5707 = vmatpush3.bf16.msra.mxu1 %v5706_v58  ;;  %5627 = vmatprep.subr.bf16.mxu0 %v6043_v2  ;;  %v5715_v58 = vpack.c.bf16 %v3209_v50, %v3208_v49  ;;  %v3399_v49 = vld [vmem:[%s7430_s2 + $0x388] sm:$0xff] }
 0x202   : > { %v867_v63 = vpop.f32.mrb[64].mxu0  ;;  %5708 = vmatprep.subr.bf16.mxu1 %v6043_v2 }
 0x203   : > { %v4711_v3 = vpop.f32.mrb[65].mxu0  ;;  %4924 = vmatmul.mubr.msk.f32.gmra.mrb[116].mxu0 %vm589_vm2, %v1469_v0  ;;  %5303 = vmatmul.mubr.msk.f32.gmra.mrb[62].mxu1 %vm589_vm2, %v2811_v1  ;;  %v1660_v63 = vld [vmem:[#allocation2 + $0x51] ss:$2 sm:$0xff]  ;;  %v5718_v0 = vpack.c.bf16 %v3211_v61, %v3210_v60 }
 0x204   : > { %4926 = vmatprep.mubr.msk.f32.mxu0 %vm6044_vm0, %v6045_v4  ;;  %5305 = vmatprep.mubr.msk.f32.mxu1 %vm6044_vm0, %v6045_v4 }
 0x205   : > { %5710 = vmatpush3.bf16.msra.mxu1 %v5709_v62  ;;  %v5637_v62 = vpack.c.bf16 %v1869_v56, %v1868_v55  ;;  %v1850_v56 = vld [vmem:[#allocation2 + $0x32] ss:$2 sm:$0xff] }
 0x206   : > { %5711 = vmatprep.subr.bf16.mxu1 %v6043_v2 }
 0x207   : > { %4927 = vmatmul.mubr.msk.f32.gmra.mrb[62].mxu0 %vm589_vm2, %v1470_v5  ;;  %5306 = vmatmul.mubr.msk.f32.gmra.mrb[4].mxu1 %vm589_vm2, %v2812_v6  ;;  %v3002_v5 = vld [vmem:[#allocation2 + $0x50] ss:$2 sm:$0xff] }
 0x208   : > { %4929 = vmatprep.mubr.msk.f32.mxu0 %vm6044_vm0, %v6045_v4  ;;  %5308 = vmatprep.mubr.msk.f32.mxu1 %vm6044_vm0, %v6045_v4  ;;  %v3212_v6 = vld [vmem:[%s7430_s2 + $0x370] sm:$0xff] }
 0x20a   : > { %v2199_v7 = vpop.f32.mrb[10].mxu1 }
 0x20b   : > { %4930 = vmatmul.mubr.msk.f32.gmra.mrb[118].mxu0 %vm589_vm2, %v1471_v8  ;;  %v5096_v10 = vpop.f32.mrb[11].mxu1  ;;  %5309 = vmatmul.mubr.msk.f32.gmra.mrb[64].mxu1 %vm589_vm2, %v2813_v9  ;;  %v3213_v7 = vld [vmem:[%s7430_s2 + $0x378] sm:$0xff] }
 0x20c   : > { %4932 = vmatprep.mubr.msk.f32.mxu0 %vm6044_vm0, %v6045_v4  ;;  %5311 = vmatprep.mubr.msk.f32.mxu1 %vm6044_vm0, %v6045_v4  ;;  %v5721_v10 = vpack.c.bf16 %v3213_v7, %v3212_v6  ;;  %v3194_v7 = vld [vmem:[#allocation2 + $0x51] ss:$2 sm:$0xff] }
 0x20e   : > { %v876_v11 = vpop.f32.mrb[68].mxu0 }
 0x20f   : > { %v4717_v14 = vpop.f32.mrb[69].mxu0  ;;  %4933 = vmatmul.mubr.msk.f32.gmra.mrb[66].mxu0 %vm589_vm2, %v1472_v12  ;;  %5312 = vmatmul.mubr.msk.f32.gmra.mrb[8].mxu1 %vm589_vm2, %v2814_v13  ;;  %v1661_v11 = vld [vmem:[#allocation2 + $0x61] ss:$2 sm:$0xff]  ;;  %v3003_v12 = vld [vmem:[#allocation2 + $0x60] ss:$2 sm:$0xff] }
 0x210   : > { %4935 = vmatprep.mubr.msk.f32.mxu0 %vm6044_vm0, %v6045_v4  ;;  %5314 = vmatprep.mubr.msk.f32.mxu1 %vm6044_vm0, %v6045_v4 }
 0x213   : > { %4936 = vmatmul.mubr.msk.f32.gmra.mrb[120].mxu0 %vm589_vm2, %v1473_v15  ;;  %5315 = vmatmul.mubr.msk.f32.gmra.mrb[66].mxu1 %vm589_vm2, %v2815_v16  ;;  %v1662_v15 = vld [vmem:[#allocation2 + $0x71] ss:$2 sm:$0xff]  ;;  %v3004_v16 = vld [vmem:[#allocation2 + $0x70] ss:$2 sm:$0xff] }
 0x214   : > { %4938 = vmatprep.mubr.msk.f32.mxu0 %vm6044_vm0, %v6045_v4  ;;  %5317 = vmatprep.mubr.msk.f32.mxu1 %vm6044_vm0, %v6045_v4 }
 0x217   : > { %v2208_v19 = vpop.f32.mrb[14].mxu1  ;;  %4939 = vmatmul.mubr.msk.f32.gmra.mrb[70].mxu0 %vm589_vm2, %v1474_v17  ;;  %5318 = vmatmul.mubr.msk.f32.gmra.mrb[12].mxu1 %vm589_vm2, %v2816_v18 }
 0x218   : > { %v5102_v20 = vpop.f32.mrb[15].mxu1  ;;  %4941 = vmatprep.mubr.msk.f32.mxu0 %vm6044_vm0, %v6045_v4  ;;  %5320 = vmatprep.mubr.msk.f32.mxu1 %vm6044_vm0, %v6045_v4  ;;  %v1663_v19 = vld [vmem:[#allocation2 + $0x81] ss:$2 sm:$0xff] }
 0x219   : > { %v3005_v20 = vld [vmem:[#allocation2 + $0x80] ss:$2 sm:$0xff] }
 0x21b   : > { %4942 = vmatmul.mubr.msk.f32.gmra.mrb[122].mxu0 %vm589_vm2, %v1475_v21  ;;  %5321 = vmatmul.mubr.msk.f32.gmra.mrb[68].mxu1 %vm589_vm2, %v2817_v22 }
 0x21c   : > { %4944 = vmatprep.mubr.msk.f32.mxu0 %vm6044_vm0, %v6045_v4  ;;  %5323 = vmatprep.mubr.msk.f32.mxu1 %vm6044_vm0, %v6045_v4 }
 0x21e   : > { %v885_v24 = vpop.f32.mrb[72].mxu0 }
 0x21f   : > { %v4723_v28 = vpop.f32.mrb[73].mxu0  ;;  %4945 = vmatmul.mubr.msk.f32.gmra.mrb[74].mxu0 %vm589_vm2, %v1477_v25  ;;  %5324 = vmatmul.mubr.msk.f32.gmra.mrb[16].mxu1 %vm589_vm2, %v2818_v23  ;;  %v1664_v23 = vld [vmem:[#allocation2 + $0x91] ss:$2 sm:$0xff]  ;;  %v3006_v24 = vld [vmem:[#allocation2 + $0x90] ss:$2 sm:$0xff] }
 0x220   : > { %4963 = vmatprep.mubr.msk.f32.mxu0 %vm6044_vm0, %v6045_v4  ;;  %5326 = vmatprep.mubr.msk.f32.mxu1 %vm6044_vm0, %v6045_v4  ;;  %v3007_v28 = vld [vmem:[#allocation2 + $0xa0] ss:$2 sm:$0xff] }
 0x223   : > { %4964 = vmatmul.mubr.msk.f32.vlgmr.msra.gmra.mrb[50].mxu0 %vm589_vm2, %v1656_v29  ;;  %5327 = vmatmul.mubr.msk.f32.gmra.mrb[70].mxu1 %vm589_vm2, %v2819_v31  ;;  %v1666_v31 = vld [vmem:[#allocation2 + $0xb1] ss:$2 sm:$0xff] }
 0x224   : > { %4966 = vmatprep.mubr.msk.f32.mxu0 %vm6044_vm0, %v6045_v4  ;;  %5329 = vmatprep.mubr.msk.f32.mxu1 %vm6044_vm0, %v6045_v4 }
 0x225   : > { %5629 = vmatpush3.bf16.msra.mxu0 %v5628_v30 }
 0x226   : > { %v2217_v37 = vpop.f32.mrb[18].mxu1  ;;  %5630 = vmatprep.subr.bf16.mxu0 %v6043_v2 }
 0x227   : > { %4967 = vmatmul.mubr.msk.f32.gmra.mrb[124].mxu0 %vm589_vm2, %v1657_v38  ;;  %v5108_v40 = vpop.f32.mrb[19].mxu1  ;;  %5330 = vmatmul.mubr.msk.f32.gmra.mrb[20].mxu1 %vm589_vm2, %v2821_v39  ;;  %v1669_v37 = vld [vmem:[#allocation2 + $0xd1] ss:$2 sm:$0x7f] }
 0x228   : > { %4969 = vmatprep.mubr.msk.f32.mxu0 %vm6044_vm0, %v6045_v4  ;;  %5348 = vmatprep.mubr.msk.f32.mxu1 %vm6044_vm0, %v6045_v4  ;;  %v3010_v40 = vld [vmem:[#allocation2 + $0xd0] ss:$2 sm:$0xff] }
 0x229   : > { %5632 = vmatpush3.bf16.msra.mxu0 %v5631_v36  ;;  %v3009_v36 = vld [vmem:[#allocation2 + $0xc0] ss:$2 sm:$0xff] }
 0x22a   : > { %v1003_v46 = vpop.f32.mrb[76].mxu0  ;;  %5633 = vmatprep.subr.bf16.mxu0 %v6043_v2 }
 0x22b   : > { %v4748_v53 = vpop.f32.mrb[77].mxu0  ;;  %4970 = vmatmul.mubr.msk.f32.gmra.mrb[54].mxu0 %vm589_vm2, %v1658_v44  ;;  %5349 = vmatmul.mubr.msk.f32.vlgmr.msra.gmra.mrb[22].mxu1 %vm589_vm2, %v3000_v47  ;;  %v3011_v44 = vld [vmem:[#allocation2 + $0xe0] ss:$2 sm:$0xff]  ;;  %v3013_v46 = vld [vmem:[#allocation2 + $0xf0] ss:$2 sm:$0x7f] }
 0x22c   : > { %5713 = vmatpush3.bf16.msra.mxu1 %v5712_v43  ;;  %4972 = vmatprep.mubr.msk.f32.mxu0 %vm6044_vm0, %v6045_v4  ;;  %v1848_v43 = vld [vmem:[#allocation2 + $0x12] ss:$2 sm:$0xff] }
 0x22d   : > { %5351 = vmatprep.mubr.msk.f32.mxu1 %vm6044_vm0, %v6045_v4  ;;  %5714 = vmatprep.subr.bf16.mxu1 %v6043_v2  ;;  %v3398_v47 = vld [vmem:[%s7430_s2 + $0x380] sm:$0xff] }
 0x22e   : > { %5635 = vmatpush3.bf16.msra.mxu0 %v5634_v52  ;;  %v1849_v52 = vld [vmem:[#allocation2 + $0x22] ss:$2 sm:$0xff]  ;;  %v5724_v55 = vpack.c.bf16 %v3399_v49, %v3398_v47 }
 0x22f   : > { %4973 = vmatmul.mubr.msk.f32.gmra.mrb[126].mxu0 %vm589_vm2, %v1659_v57  ;;  %5352 = vmatmul.mubr.msk.f32.gmra.mrb[72].mxu1 %vm589_vm2, %v3001_v59  ;;  %v3192_v57 = vld [vmem:[#allocation2 + $0x31] ss:$2 sm:$0xff]  ;;  %v3590_v47 = vld [vmem:[%s7430_s2 + $0x3c0] sm:$0xff]  ;;  %v3591_v49 = vld [vmem:[%s7430_s2 + $0x3c8] sm:$0xff] }
 0x230   : > { %4975 = vmatprep.mubr.msk.f32.mxu0 %vm6044_vm0, %v6045_v4  ;;  %5354 = vmatprep.mubr.msk.f32.mxu1 %vm6044_vm0, %v6045_v4  ;;  %v3401_v59 = vld [vmem:[%s7430_s2 + $0x398] sm:$0xff] }
 0x231   : > { %5716 = vmatpush3.bf16.msra.mxu1 %v5715_v58  ;;  %5636 = vmatprep.subr.bf16.mxu0 %v6043_v2  ;;  %v3400_v58 = vld [vmem:[%s7430_s2 + $0x390] sm:$0xff] }
 0x232   : > { %v1012_v1 = vpop.f32.mrb[78].mxu0  ;;  %v2364_v3 = vpop.f32.mrb[24].mxu1  ;;  %5717 = vmatprep.subr.bf16.mxu1 %v6043_v2  ;;  %5638 = vmatpush3.bf16.msra.mxu0 %v5637_v62  ;;  %v5727_v61 = vpack.c.bf16 %v3401_v59, %v3400_v58  ;;  %v3193_v62 = vld [vmem:[#allocation2 + $0x41] ss:$2 sm:$0xff]  ;;  %v3384_v58 = vld [vmem:[#allocation2 + $0x32] ss:$2 sm:$0xff] }
 0x233   : > { %v4754_v8 = vpop.f32.mrb[79].mxu0  ;;  %4976 = vmatmul.mubr.msk.f32.gmra.mrb[58].mxu0 %vm589_vm2, %v1660_v63  ;;  %v5133_v9 = vpop.f32.mrb[25].mxu1  ;;  %5355 = vmatmul.mubr.msk.f32.gmra.mrb[0].mxu1 %vm589_vm2, %v3002_v5  ;;  %v3402_v63 = vld [vmem:[%s7430_s2 + $0x3a0] sm:$0xff] }
 0x234   : > { %4978 = vmatprep.mubr.msk.f32.mxu0 %vm6044_vm0, %v6045_v4  ;;  %5357 = vmatprep.mubr.msk.f32.mxu1 %vm6044_vm0, %v6045_v4  ;;  %v1852_v1 = vld [vmem:[#allocation2 + $0x52] ss:$2 sm:$0xff] }
 0x235   : > { %5719 = vmatpush3.bf16.msra.mxu1 %v5718_v0  ;;  %5639 = vmatprep.subr.bf16.mxu0 %v6043_v2  ;;  %v3403_v0 = vld [vmem:[%s7430_s2 + $0x3a8] sm:$0xff]  ;;  %v3405_v8 = vld [vmem:[%s7430_s2 + $0x3b8] sm:$0xff] }
 0x236   : > { %5720 = vmatprep.subr.bf16.mxu1 %v6043_v2  ;;  %v5730_v3 = vpack.c.bf16 %v3403_v0, %v3402_v63  ;;  %v3596_v0 = vld [vmem:[%s7430_s2 + $0x3f0] sm:$0xff] }
 0x237   : > { %4979 = vmatmul.mubr.msk.f32.gmra.mrb[128].mxu0 %vm589_vm2, %v1661_v11  ;;  %5358 = vmatmul.mubr.msk.f32.gmra.mrb[74].mxu1 %vm589_vm2, %v3003_v12  ;;  %v1853_v12 = vld [vmem:[#allocation2 + $0x62] ss:$2 sm:$0xff] }
 0x238   : > { %4981 = vmatprep.mubr.msk.f32.mxu0 %vm6044_vm0, %v6045_v4  ;;  %5360 = vmatprep.mubr.msk.f32.mxu1 %vm6044_vm0, %v6045_v4 }
 0x239   : > { %5722 = vmatpush3.bf16.msra.mxu1 %v5721_v10 }
 0x23a   : > { %v1021_v13 = vpop.f32.mrb[80].mxu0  ;;  %v2373_v14 = vpop.f32.mrb[26].mxu1  ;;  %5723 = vmatprep.subr.bf16.mxu1 %v6043_v2 }
 0x23b   : > { %v4760_v17 = vpop.f32.mrb[81].mxu0  ;;  %4982 = vmatmul.mubr.msk.f32.gmra.mrb[62].mxu0 %vm589_vm2, %v1662_v15  ;;  %v5139_v18 = vpop.f32.mrb[27].mxu1  ;;  %5361 = vmatmul.mubr.msk.f32.gmra.mrb[4].mxu1 %vm589_vm2, %v3004_v16  ;;  %v3195_v13 = vld [vmem:[#allocation2 + $0x61] ss:$2 sm:$0xff]  ;;  %v1854_v15 = vld [vmem:[#allocation2 + $0x72] ss:$2 sm:$0xff] }
 0x23c   : > { %4984 = vmatprep.mubr.msk.f32.mxu0 %vm6044_vm0, %v6045_v4  ;;  %5363 = vmatprep.mubr.msk.f32.mxu1 %vm6044_vm0, %v6045_v4  ;;  %v3196_v16 = vld [vmem:[#allocation2 + $0x71] ss:$2 sm:$0xff] }
 0x23f   : > { %4985 = vmatmul.mubr.msk.f32.gmra.mrb[130].mxu0 %vm589_vm2, %v1663_v19  ;;  %5364 = vmatmul.mubr.msk.f32.gmra.mrb[76].mxu1 %vm589_vm2, %v3005_v20  ;;  %v1855_v19 = vld [vmem:[#allocation2 + $0x82] ss:$2 sm:$0xff]  ;;  %v3197_v20 = vld [vmem:[#allocation2 + $0x81] ss:$2 sm:$0xff] }
 0x240   : > { %4987 = vmatprep.mubr.msk.f32.mxu0 %vm6044_vm0, %v6045_v4  ;;  %5366 = vmatprep.mubr.msk.f32.mxu1 %vm6044_vm0, %v6045_v4 }
 0x242   : > { %v1030_v21 = vpop.f32.mrb[82].mxu0  ;;  %v2382_v22 = vpop.f32.mrb[28].mxu1 }
 0x243   : > { %v4766_v25 = vpop.f32.mrb[83].mxu0  ;;  %4988 = vmatmul.mubr.msk.f32.gmra.mrb[66].mxu0 %vm589_vm2, %v1664_v23  ;;  %v5145_v26 = vpop.f32.mrb[29].mxu1  ;;  %5367 = vmatmul.mubr.msk.f32.gmra.mrb[8].mxu1 %vm589_vm2, %v3006_v24  ;;  %v1856_v23 = vld [vmem:[#allocation2 + $0x92] ss:$2 sm:$0xff]  ;;  %v3198_v24 = vld [vmem:[#allocation2 + $0x91] ss:$2 sm:$0xff] }
 0x244   : > { %4990 = vmatprep.mubr.msk.f32.mxu0 %vm6044_vm0, %v6045_v4  ;;  %5369 = vmatprep.mubr.msk.f32.mxu1 %vm6044_vm0, %v6045_v4 }
 0x247   : > { %4991 = vmatmul.mubr.msk.f32.gmra.mrb[132].mxu0 %vm589_vm2, %v1665_v27  ;;  %5370 = vmatmul.mubr.msk.f32.gmra.mrb[78].mxu1 %vm589_vm2, %v3007_v28  ;;  %v1857_v27 = vld [vmem:[#allocation2 + $0xa2] ss:$2 sm:$0xff]  ;;  %v3199_v28 = vld [vmem:[#allocation2 + $0xa1] ss:$2 sm:$0xff] }
 0x248   : > { %4993 = vmatprep.mubr.msk.f32.mxu0 %vm6044_vm0, %v6045_v4  ;;  %5372 = vmatprep.mubr.msk.f32.mxu1 %vm6044_vm0, %v6045_v4 }
 0x24a   : > { %v1039_v29 = vpop.f32.mrb[84].mxu0  ;;  %v2391_v30 = vpop.f32.mrb[30].mxu1 }
 0x24b   : > { %v4772_v33 = vpop.f32.mrb[85].mxu0  ;;  %4994 = vmatmul.mubr.msk.f32.gmra.mrb[70].mxu0 %vm589_vm2, %v1666_v31  ;;  %v5151_v34 = vpop.f32.mrb[31].mxu1  ;;  %5373 = vmatmul.mubr.msk.f32.gmra.mrb[12].mxu1 %vm589_vm2, %v3008_v32  ;;  %v1858_v31 = vld [vmem:[#allocation2 + $0xb2] ss:$2 sm:$0xff]  ;;  %v3200_v32 = vld [vmem:[#allocation2 + $0xb1] ss:$2 sm:$0xff] }
 0x24c   : > { %4996 = vmatprep.mubr.msk.f32.mxu0 %vm6044_vm0, %v6045_v4  ;;  %5375 = vmatprep.mubr.msk.f32.mxu1 %vm6044_vm0, %v6045_v4 }
 0x24f   : > { %4997 = vmatmul.mubr.msk.f32.gmra.mrb[134].mxu0 %vm589_vm2, %v1667_v35  ;;  %5376 = vmatmul.mubr.msk.f32.gmra.mrb[80].mxu1 %vm589_vm2, %v3009_v36  ;;  %v1859_v35 = vld [vmem:[#allocation2 + $0xc2] ss:$2 sm:$0xff]  ;;  %v3201_v36 = vld [vmem:[#allocation2 + $0xc1] ss:$2 sm:$0xff] }
 0x250   : > { %4999 = vmatprep.mubr.msk.f32.mxu0 %vm6044_vm0, %v6045_v4  ;;  %5378 = vmatprep.mubr.msk.f32.mxu1 %vm6044_vm0, %v6045_v4 }
 0x252   : > { %v1048_v38 = vpop.f32.mrb[86].mxu0  ;;  %v2400_v39 = vpop.f32.mrb[32].mxu1 }
 0x253   : > { %v4778_v41 = vpop.f32.mrb[87].mxu0  ;;  %5000 = vmatmul.mubr.msk.f32.gmra.mrb[74].mxu0 %vm589_vm2, %v1669_v37  ;;  %v5157_v42 = vpop.f32.mrb[33].mxu1  ;;  %5379 = vmatmul.mubr.msk.f32.gmra.mrb[16].mxu1 %vm589_vm2, %v3010_v40  ;;  %v1861_v37 = vld [vmem:[#allocation2 + $0xd2] ss:$2 sm:$0x7f] }
 0x254   : > { %5018 = vmatprep.mubr.msk.f32.mxu0 %vm6044_vm0, %v6045_v4  ;;  %5381 = vmatprep.mubr.msk.f32.mxu1 %vm6044_vm0, %v6045_v4  ;;  %v3202_v40 = vld [vmem:[#allocation2 + $0xd1] ss:$2 sm:$0xff] }
 0x257   : > { %5019 = vmatmul.mubr.msk.f32.vlgmr.msra.gmra.mrb[50].mxu0 %vm589_vm2, %v1848_v43  ;;  %5382 = vmatmul.mubr.msk.f32.gmra.mrb[82].mxu1 %vm589_vm2, %v3011_v44  ;;  %v2040_v43 = vld [vmem:[#allocation2 + $0x13] ss:$2 sm:$0xff] }
 0x258   : > { %5021 = vmatprep.mubr.msk.f32.mxu0 %vm6044_vm0, %v6045_v4  ;;  %5384 = vmatprep.mubr.msk.f32.mxu1 %vm6044_vm0, %v6045_v4  ;;  %v3203_v44 = vld [vmem:[#allocation2 + $0xe1] ss:$2 sm:$0xff] }
 0x259   : > { %5641 = vmatpush3.bf16.msra.mxu0 %v6296_v45 }
 0x25a   : > { %v2409_v50 = vpop.f32.mrb[34].mxu1  ;;  %5642 = vmatprep.subr.bf16.mxu0 %v6043_v2 }
 0x25b   : > { %5022 = vmatmul.mubr.msk.f32.gmra.mrb[136].mxu0 %vm589_vm2, %v1849_v52  ;;  %v5163_v53 = vpop.f32.mrb[35].mxu1  ;;  %5385 = vmatmul.mubr.msk.f32.gmra.mrb[20].mxu1 %vm589_vm2, %v3013_v46  ;;  %v3205_v46 = vld [vmem:[#allocation2 + $0xf1] ss:$2 sm:$0x7f] }
 0x25c   : > { %5024 = vmatprep.mubr.msk.f32.mxu0 %vm6044_vm0, %v6045_v4  ;;  %5403 = vmatprep.mubr.msk.f32.mxu1 %vm6044_vm0, %v6045_v4  ;;  %v2041_v52 = vld [vmem:[#allocation2 + $0x23] ss:$2 sm:$0xff] }
 0x25d   : > { %5644 = vmatpush3.bf16.msra.mxu0 %v6306_v48  ;;  %v1851_v48 = vld [vmem:[#allocation2 + $0x42] ss:$2 sm:$0xff] }
 0x25e   : > { %v1200_v45 = vpop.f32.mrb[88].mxu0  ;;  %5645 = vmatprep.subr.bf16.mxu0 %v6043_v2 }
 0x25f   : > { %v4803_v60 = vpop.f32.mrb[89].mxu0  ;;  %5025 = vmatmul.mubr.msk.f32.gmra.mrb[54].mxu0 %vm589_vm2, %v1850_v56  ;;  %5404 = vmatmul.mubr.msk.f32.vlgmr.msra.gmra.mrb[22].mxu1 %vm589_vm2, %v3192_v57  ;;  %v3592_v56 = vld [vmem:[%s7430_s2 + $0x3d0] sm:$0xff]  ;;  %v3593_v45 = vld [vmem:[%s7430_s2 + $0x3d8] sm:$0xff] }
 0x260   : > { %5725 = vmatpush3.bf16.msra.mxu1 %v5724_v55  ;;  %5027 = vmatprep.mubr.msk.f32.mxu0 %vm6044_vm0, %v6045_v4  ;;  %v5736_v55 = vpack.c.bf16 %v3591_v49, %v3590_v47  ;;  %v5739_v60 = vpack.c.bf16 %v3593_v45, %v3592_v56  ;;  %v3580_v49 = vld [vmem:[#allocation2 + $0x73] ss:$2 sm:$0xff] }
 0x261   : > { %5406 = vmatprep.mubr.msk.f32.mxu1 %vm6044_vm0, %v6045_v4  ;;  %5726 = vmatprep.subr.bf16.mxu1 %v6043_v2  ;;  %v3582_v45 = vld [vmem:[#allocation2 + $0x93] ss:$2 sm:$0xff] }
 0x262   : > { %5647 = vmatpush3.bf16.msra.mxu0 %v6316_v51  ;;  %v3404_v51 = vld [vmem:[%s7430_s2 + $0x3b0] sm:$0xff] }
 0x263   : > { %5028 = vmatmul.mubr.msk.f32.gmra.mrb[138].mxu0 %vm589_vm2, %v1851_v48  ;;  %5407 = vmatmul.mubr.msk.f32.gmra.mrb[84].mxu1 %vm589_vm2, %v3193_v62  ;;  %v5733_v11 = vpack.c.bf16 %v3405_v8, %v3404_v51  ;;  %v3594_v48 = vld [vmem:[%s7430_s2 + $0x3e0] sm:$0xff] }
 0x264   : > { %5030 = vmatprep.mubr.msk.f32.mxu0 %vm6044_vm0, %v6045_v4  ;;  %5409 = vmatprep.mubr.msk.f32.mxu1 %vm6044_vm0, %v6045_v4  ;;  %v3385_v62 = vld [vmem:[#allocation2 + $0x42] ss:$2 sm:$0xff] }
 0x265   : > { %5728 = vmatpush3.bf16.msra.mxu1 %v5727_v61  ;;  %5648 = vmatprep.subr.bf16.mxu0 %v6043_v2  ;;  %v3595_v61 = vld [vmem:[%s7430_s2 + $0x3e8] sm:$0xff] }
 0x266   : > { %v1209_v5 = vpop.f32.mrb[90].mxu0  ;;  %v2556_v6 = vpop.f32.mrb[36].mxu1  ;;  %5729 = vmatprep.subr.bf16.mxu1 %v6043_v2  ;;  %5650 = vmatpush3.bf16.msra.mxu0 %v6326_v54  ;;  %v5742_v63 = vpack.c.bf16 %v3595_v61, %v3594_v48  ;;  %v3584_v61 = vld [vmem:[#allocation2 + $0xb3] ss:$2 sm:$0xff] }
 0x267   : > { %v4809_v9 = vpop.f32.mrb[91].mxu0  ;;  %5031 = vmatmul.mubr.msk.f32.gmra.mrb[58].mxu0 %vm589_vm2, %v1852_v1  ;;  %v5188_v10 = vpop.f32.mrb[37].mxu1  ;;  %5410 = vmatmul.mubr.msk.f32.gmra.mrb[0].mxu1 %vm589_vm2, %v3194_v7  ;;  %v3597_v1 = vld [vmem:[%s7430_s2 + $0x3f8] sm:$0xff] }
 0x268   : > { %5033 = vmatprep.mubr.msk.f32.mxu0 %vm6044_vm0, %v6045_v4  ;;  %5412 = vmatprep.mubr.msk.f32.mxu1 %vm6044_vm0, %v6045_v4  ;;  %v3386_v6 = vld [vmem:[#allocation2 + $0x52] ss:$2 sm:$0xff]  ;;  %v5745_v8 = vpack.c.bf16 %v3597_v1, %v3596_v0  ;;  %v3387_v9 = vld [vmem:[#allocation2 + $0x62] ss:$2 sm:$0xff]  ;;  %v3585_v0 = vld [vmem:[#allocation2 + $0xc3] ss:$2 sm:$0xff] }
 0x269   : > { %5731 = vmatpush3.bf16.msra.mxu1 %v5730_v3 }
 0x26a   : > { %5732 = vmatprep.subr.bf16.mxu1 %v6043_v2 }
 0x26b   : > { %5034 = vmatmul.mubr.msk.f32.gmra.mrb[140].mxu0 %vm589_vm2, %v1853_v12  ;;  %5413 = vmatmul.mubr.msk.f32.gmra.mrb[86].mxu1 %vm589_vm2, %v3195_v13  ;;  %v3388_v12 = vld [vmem:[#allocation2 + $0x72] ss:$2 sm:$0xff] }
 0x26c   : > { %5036 = vmatprep.mubr.msk.f32.mxu0 %vm6044_vm0, %v6045_v4  ;;  %5415 = vmatprep.mubr.msk.f32.mxu1 %vm6044_vm0, %v6045_v4 }
 0x26d   : > { %5734 = vmatpush3.bf16.msra.mxu1 %v5733_v11 }
 0x26e   : > { %v1218_v54 = vpop.f32.mrb[92].mxu0  ;;  %v2565_v14 = vpop.f32.mrb[38].mxu1  ;;  %5735 = vmatprep.subr.bf16.mxu1 %v6043_v2 }
 0x26f   : > { %v4815_v17 = vpop.f32.mrb[93].mxu0  ;;  %5037 = vmatmul.mubr.msk.f32.gmra.mrb[62].mxu0 %vm589_vm2, %v1854_v15  ;;  %v5194_v18 = vpop.f32.mrb[39].mxu1  ;;  %5416 = vmatmul.mubr.msk.f32.gmra.mrb[4].mxu1 %vm589_vm2, %v3196_v16  ;;  %v3389_v14 = vld [vmem:[#allocation2 + $0x82] ss:$2 sm:$0xff]  ;;  %v3390_v16 = vld [vmem:[#allocation2 + $0x92] ss:$2 sm:$0xff] }
 0x270   : > { %5039 = vmatprep.mubr.msk.f32.mxu0 %vm6044_vm0, %v6045_v4  ;;  %5418 = vmatprep.mubr.msk.f32.mxu1 %vm6044_vm0, %v6045_v4 }
 0x273   : > { %5040 = vmatmul.mubr.msk.f32.gmra.mrb[142].mxu0 %vm589_vm2, %v1855_v19  ;;  %5419 = vmatmul.mubr.msk.f32.gmra.mrb[88].mxu1 %vm589_vm2, %v3197_v20  ;;  %v3391_v19 = vld [vmem:[#allocation2 + $0xa2] ss:$2 sm:$0xff] }
 0x274   : > { %5042 = vmatprep.mubr.msk.f32.mxu0 %vm6044_vm0, %v6045_v4  ;;  %5421 = vmatprep.mubr.msk.f32.mxu1 %vm6044_vm0, %v6045_v4 }
 0x276   : > { %v1227_v21 = vpop.f32.mrb[94].mxu0  ;;  %v2574_v22 = vpop.f32.mrb[40].mxu1 }
 0x277   : > { %v4821_v25 = vpop.f32.mrb[95].mxu0  ;;  %5043 = vmatmul.mubr.msk.f32.gmra.mrb[66].mxu0 %vm589_vm2, %v1856_v23  ;;  %v5200_v26 = vpop.f32.mrb[41].mxu1  ;;  %5422 = vmatmul.mubr.msk.f32.gmra.mrb[8].mxu1 %vm589_vm2, %v3198_v24  ;;  %v3392_v22 = vld [vmem:[#allocation2 + $0xb2] ss:$2 sm:$0xff] }
 0x278   : > { %5045 = vmatprep.mubr.msk.f32.mxu0 %vm6044_vm0, %v6045_v4  ;;  %5424 = vmatprep.mubr.msk.f32.mxu1 %vm6044_vm0, %v6045_v4  ;;  %v3393_v25 = vld [vmem:[#allocation2 + $0xc2] ss:$2 sm:$0xff] }
 0x27b   : > { %5046 = vmatmul.mubr.msk.f32.gmra.mrb[144].mxu0 %vm589_vm2, %v1857_v27  ;;  %5425 = vmatmul.mubr.msk.f32.gmra.mrb[90].mxu1 %vm589_vm2, %v3199_v28  ;;  %v3394_v28 = vld [vmem:[#allocation2 + $0xd2] ss:$2 sm:$0xff] }
 0x27c   : > { %5048 = vmatprep.mubr.msk.f32.mxu0 %vm6044_vm0, %v6045_v4  ;;  %5427 = vmatprep.mubr.msk.f32.mxu1 %vm6044_vm0, %v6045_v4 }
 0x27e   : > { %v1236_v29 = vpop.f32.mrb[96].mxu0  ;;  %v2583_v30 = vpop.f32.mrb[42].mxu1 }
 0x27f   : > { %v4827_v33 = vpop.f32.mrb[97].mxu0  ;;  %5049 = vmatmul.mubr.msk.f32.gmra.mrb[70].mxu0 %vm589_vm2, %v1858_v31  ;;  %v5206_v34 = vpop.f32.mrb[43].mxu1  ;;  %5428 = vmatmul.mubr.msk.f32.gmra.mrb[12].mxu1 %vm589_vm2, %v3200_v32  ;;  %v3395_v31 = vld [vmem:[#allocation2 + $0xe2] ss:$2 sm:$0xff] }
 0x280   : > { %5051 = vmatprep.mubr.msk.f32.mxu0 %vm6044_vm0, %v6045_v4  ;;  %5430 = vmatprep.mubr.msk.f32.mxu1 %vm6044_vm0, %v6045_v4  ;;  %v3397_v32 = vld [vmem:[#allocation2 + $0xf2] ss:$2 sm:$0x7f] }
 0x283   : > { %5052 = vmatmul.mubr.msk.f32.gmra.mrb[146].mxu0 %vm589_vm2, %v1859_v35  ;;  %5431 = vmatmul.mubr.msk.f32.gmra.mrb[92].mxu1 %vm589_vm2, %v3201_v36  ;;  %v3576_v36 = vld [vmem:[#allocation2 + $0x33] ss:$2 sm:$0xff] }
 0x284   : > { %5054 = vmatprep.mubr.msk.f32.mxu0 %vm6044_vm0, %v6045_v4  ;;  %5433 = vmatprep.mubr.msk.f32.mxu1 %vm6044_vm0, %v6045_v4 }
 0x286   : > { %v1245_v38 = vpop.f32.mrb[98].mxu0  ;;  %v2592_v39 = vpop.f32.mrb[44].mxu1 }
 0x287   : > { %v4833_v41 = vpop.f32.mrb[99].mxu0  ;;  %5055 = vmatmul.mubr.msk.f32.gmra.mrb[74].mxu0 %vm589_vm2, %v1861_v37  ;;  %v5212_v42 = vpop.f32.mrb[45].mxu1  ;;  %5434 = vmatmul.mubr.msk.f32.gmra.mrb[16].mxu1 %vm589_vm2, %v3202_v40  ;;  %v3577_v38 = vld [vmem:[#allocation2 + $0x43] ss:$2 sm:$0xff] }
 0x288   : > { %5073 = vmatprep.mubr.msk.f32.mxu0 %vm6044_vm0, %v6045_v4  ;;  %5436 = vmatprep.mubr.msk.f32.mxu1 %vm6044_vm0, %v6045_v4  ;;  %v3578_v41 = vld [vmem:[#allocation2 + $0x53] ss:$2 sm:$0xff] }
 0x28b   : > { %5074 = vmatmul.mubr.msk.f32.vlgmr.msra.gmra.mrb[50].mxu0 %vm589_vm2, %v2040_v43  ;;  %5437 = vmatmul.mubr.msk.f32.gmra.mrb[94].mxu1 %vm589_vm2, %v3203_v44  ;;  %v3579_v44 = vld [vmem:[#allocation2 + $0x63] ss:$2 sm:$0xff] }
 0x28c   : > { %5076 = vmatprep.mubr.msk.f32.mxu0 %vm6044_vm0, %v6045_v4  ;;  %5439 = vmatprep.mubr.msk.f32.mxu1 %vm6044_vm0, %v6045_v4 }
 0x28e   : > { %v2601_v50 = vpop.f32.mrb[46].mxu1 }
 0x28f   : > { %5077 = vmatmul.mubr.msk.f32.gmra.mrb[148].mxu0 %vm589_vm2, %v2041_v52  ;;  %v5218_v53 = vpop.f32.mrb[47].mxu1  ;;  %5440 = vmatmul.mubr.msk.f32.gmra.mrb[20].mxu1 %vm589_vm2, %v3205_v46 }
 0x290   : > { %5458 = vmatprep.mubr.msk.f32.mxu1 %vm6044_vm0, %v6045_v4  ;;  %v3581_v53 = vld [vmem:[#allocation2 + $0x83] ss:$2 sm:$0xff] }
 0x292   : > { %v1404_v57 = vpop.f32.mrb[100].mxu0 }
 0x293   : > { %v4858_v59 = vpop.f32.mrb[101].mxu0  ;;  %5459 = vmatmul.mubr.msk.f32.vlgmr.msra.gmra.mrb[22].mxu1 %vm589_vm2, %v3384_v58 }
 0x294   : > { %5737 = vmatpush3.bf16.msra.mxu1 %v5736_v55  ;;  %5461 = vmatprep.mubr.msk.f32.mxu1 %vm6044_vm0, %v6045_v4  ;;  %v3583_v59 = vld [vmem:[#allocation2 + $0xa3] ss:$2 sm:$0xff] }
 0x295   : > { %5738 = vmatprep.subr.bf16.mxu1 %v6043_v2 }
 0x297   : > { %5462 = vmatmul.mubr.msk.f32.gmra.mrb[96].mxu1 %vm589_vm2, %v3385_v62 }
 0x298   : > { %5464 = vmatprep.mubr.msk.f32.mxu1 %vm6044_vm0, %v6045_v4  ;;  %5740 = vmatpush3.bf16.msra.mxu1 %v5739_v60 }
 0x299   : > { %5741 = vmatprep.subr.bf16.mxu1 %v6043_v2 }
 0x29a   : > { %v1413_v3 = vpop.f32.mrb[102].mxu0  ;;  %v2748_v5 = vpop.f32.mrb[48].mxu1 }
 0x29b   : > { %v4864_v7 = vpop.f32.mrb[103].mxu0  ;;  %v5243_v51 = vpop.f32.mrb[49].mxu1  ;;  %5465 = vmatmul.mubr.msk.f32.gmra.mrb[0].mxu1 %vm589_vm2, %v3386_v6  ;;  %v3586_v5 = vld [vmem:[#allocation2 + $0xd3] ss:$2 sm:$0xff] }
 0x29c   : > { %5467 = vmatprep.mubr.msk.f32.mxu1 %vm6044_vm0, %v6045_v4  ;;  %5743 = vmatpush3.bf16.msra.mxu1 %v5742_v63  ;;  %v3587_v51 = vld [vmem:[#allocation2 + $0xe3] ss:$2 sm:$0xff] }
 0x29d   : > { %5744 = vmatprep.subr.bf16.mxu1 %v6043_v2 }
 0x29f   : > { %5468 = vmatmul.mubr.msk.f32.gmra.mrb[98].mxu1 %vm589_vm2, %v3387_v9 }
 0x2a0   : > { %5470 = vmatprep.mubr.msk.f32.mxu1 %vm6044_vm0, %v6045_v4  ;;  %5746 = vmatpush3.bf16.msra.mxu1 %v5745_v8  ;;  %v3589_v8 = vld [vmem:[#allocation2 + $0xf3] ss:$2 sm:$0x7f] }
 0x2a2   : > { %v1422_v10 = vpop.f32.mrb[104].mxu0  ;;  %v2757_v11 = vpop.f32.mrb[50].mxu1 }
 0x2a3   : > { %v4870_v13 = vpop.f32.mrb[105].mxu0  ;;  %v5249_v54 = vpop.f32.mrb[51].mxu1  ;;  %5471 = vmatmul.mubr.msk.f32.gmra.mrb[4].mxu1 %vm589_vm2, %v3388_v12 }
 0x2a4   : > { %5473 = vmatprep.mubr.msk.f32.mxu1 %vm6044_vm0, %v6045_v4 }
 0x2a7   : > { %5474 = vmatmul.mubr.msk.f32.gmra.mrb[100].mxu1 %vm589_vm2, %v3389_v14 }
 0x2a8   : > { %5476 = vmatprep.mubr.msk.f32.mxu1 %vm6044_vm0, %v6045_v4 }
 0x2aa   : > { %v1431_v2 = vpop.f32.mrb[106].mxu0  ;;  %v2766_v15 = vpop.f32.mrb[52].mxu1 }
 0x2ab   : > { %v4876_v17 = vpop.f32.mrb[107].mxu0  ;;  %v5255_v18 = vpop.f32.mrb[53].mxu1  ;;  %5477 = vmatmul.mubr.msk.f32.gmra.mrb[8].mxu1 %vm589_vm2, %v3390_v16 }
 0x2ac   : > { %5479 = vmatprep.mubr.msk.f32.mxu1 %vm6044_vm0, %v6045_v4 }
 0x2af   : > { %5480 = vmatmul.mubr.msk.f32.gmra.mrb[102].mxu1 %vm589_vm2, %v3391_v19 }
 0x2b0   : > { %5482 = vmatprep.mubr.msk.f32.mxu1 %vm6044_vm0, %v6045_v4 }
 0x2b2   : > { %v1440_v20 = vpop.f32.mrb[108].mxu0  ;;  %v2775_v21 = vpop.f32.mrb[54].mxu1 }
 0x2b3   : > { %v4882_v23 = vpop.f32.mrb[109].mxu0  ;;  %v5261_v24 = vpop.f32.mrb[55].mxu1  ;;  %5483 = vmatmul.mubr.msk.f32.gmra.mrb[12].mxu1 %vm589_vm2, %v3392_v22 }
 0x2b4   : > { %5485 = vmatprep.mubr.msk.f32.mxu1 %vm6044_vm0, %v6045_v4 }
 0x2b7   : > { %5486 = vmatmul.mubr.msk.f32.gmra.mrb[104].mxu1 %vm589_vm2, %v3393_v25 }
 0x2b8   : > { %5488 = vmatprep.mubr.msk.f32.mxu1 %vm6044_vm0, %v6045_v4 }
 0x2ba   : > { %v1449_v26 = vpop.f32.mrb[110].mxu0  ;;  %v2784_v27 = vpop.f32.mrb[56].mxu1 }
 0x2bb   : > { %v4888_v29 = vpop.f32.mrb[111].mxu0  ;;  %v5267_v30 = vpop.f32.mrb[57].mxu1  ;;  %5489 = vmatmul.mubr.msk.f32.gmra.mrb[16].mxu1 %vm589_vm2, %v3394_v28 }
 0x2bc   : > { %5491 = vmatprep.mubr.msk.f32.mxu1 %vm6044_vm0, %v6045_v4 }
 0x2bf   : > { %5492 = vmatmul.mubr.msk.f32.gmra.mrb[106].mxu1 %vm589_vm2, %v3395_v31 }
 0x2c0   : > { %5494 = vmatprep.mubr.msk.f32.mxu1 %vm6044_vm0, %v6045_v4 }
 0x2c2   : > { %v2793_v33 = vpop.f32.mrb[58].mxu1 }
 0x2c3   : > { %v5273_v34 = vpop.f32.mrb[59].mxu1  ;;  %5495 = vmatmul.mubr.msk.f32.gmra.mrb[20].mxu1 %vm589_vm2, %v3397_v32 }
 0x2c4   : > { %5513 = vmatprep.mubr.msk.f32.mxu1 %vm6044_vm0, %v6045_v4 }
 0x2c6   : > { %v1596_v35 = vpop.f32.mrb[112].mxu0 }
 0x2c7   : > { %v4913_v37 = vpop.f32.mrb[113].mxu0  ;;  %5514 = vmatmul.mubr.msk.f32.vlgmr.msra.gmra.mrb[22].mxu1 %vm589_vm2, %v3576_v36 }
 0x2c8   : > { %5516 = vmatprep.mubr.msk.f32.mxu1 %vm6044_vm0, %v6045_v4 }
 0x2cb   : > { %5517 = vmatmul.mubr.msk.f32.gmra.mrb[108].mxu1 %vm589_vm2, %v3577_v38 }
 0x2cc   : > { %5519 = vmatprep.mubr.msk.f32.mxu1 %vm6044_vm0, %v6045_v4 }
 0x2ce   : > { %v1605_v39 = vpop.f32.mrb[114].mxu0  ;;  %v2940_v40 = vpop.f32.mrb[60].mxu1 }
 0x2cf   : > { %v4919_v42 = vpop.f32.mrb[115].mxu0  ;;  %v5298_v43 = vpop.f32.mrb[61].mxu1  ;;  %5520 = vmatmul.mubr.msk.f32.gmra.mrb[0].mxu1 %vm589_vm2, %v3578_v41 }
 0x2d0   : > { %5522 = vmatprep.mubr.msk.f32.mxu1 %vm6044_vm0, %v6045_v4 }
 0x2d3   : > { %5523 = vmatmul.mubr.msk.f32.gmra.mrb[110].mxu1 %vm589_vm2, %v3579_v44 }
 0x2d4   : > { %5525 = vmatprep.mubr.msk.f32.mxu1 %vm6044_vm0, %v6045_v4 }
 0x2d6   : > { %v1614_v46 = vpop.f32.mrb[116].mxu0  ;;  %v2949_v47 = vpop.f32.mrb[62].mxu1 }
 0x2d7   : > { %v4925_v50 = vpop.f32.mrb[117].mxu0  ;;  %v5304_v52 = vpop.f32.mrb[63].mxu1  ;;  %5526 = vmatmul.mubr.msk.f32.gmra.mrb[4].mxu1 %vm589_vm2, %v3580_v49 }
 0x2d8   : > { %5528 = vmatprep.mubr.msk.f32.mxu1 %vm6044_vm0, %v6045_v4 }
 0x2db   : > { %5529 = vmatmul.mubr.msk.f32.gmra.mrb[112].mxu1 %vm589_vm2, %v3581_v53 }
 0x2dc   : > { %5531 = vmatprep.mubr.msk.f32.mxu1 %vm6044_vm0, %v6045_v4 }
 0x2de   : > { %v1623_v55 = vpop.f32.mrb[118].mxu0  ;;  %v2958_v56 = vpop.f32.mrb[64].mxu1 }
 0x2df   : > { %v4931_v57 = vpop.f32.mrb[119].mxu0  ;;  %v5310_v58 = vpop.f32.mrb[65].mxu1  ;;  %5532 = vmatmul.mubr.msk.f32.gmra.mrb[8].mxu1 %vm589_vm2, %v3582_v45 }
 0x2e0   : > { %5534 = vmatprep.mubr.msk.f32.mxu1 %vm6044_vm0, %v6045_v4 }
 0x2e3   : > { %5535 = vmatmul.mubr.msk.f32.gmra.mrb[114].mxu1 %vm589_vm2, %v3583_v59 }
 0x2e4   : > { %5537 = vmatprep.mubr.msk.f32.mxu1 %vm6044_vm0, %v6045_v4 }
 0x2e6   : > { %v1632_v60 = vpop.f32.mrb[120].mxu0  ;;  %v2967_v48 = vpop.f32.mrb[66].mxu1 }
 0x2e7   : > { %v4937_v62 = vpop.f32.mrb[121].mxu0  ;;  %v5316_v63 = vpop.f32.mrb[67].mxu1  ;;  %5538 = vmatmul.mubr.msk.f32.gmra.mrb[12].mxu1 %vm589_vm2, %v3584_v61 }
 0x2e8   : > { %5540 = vmatprep.mubr.msk.f32.mxu1 %vm6044_vm0, %v6045_v4 }
 0x2eb   : > { %5541 = vmatmul.mubr.msk.f32.gmra.mrb[116].mxu1 %vm589_vm2, %v3585_v0 }
 0x2ec   : > { %5543 = vmatprep.mubr.msk.f32.mxu1 %vm6044_vm0, %v6045_v4 }
 0x2ee   : > { %v1641_v1 = vpop.f32.mrb[122].mxu0  ;;  %v2976_v3 = vpop.f32.mrb[68].mxu1 }
 0x2ef   : > { %v4943_v6 = vpop.f32.mrb[123].mxu0  ;;  %v5322_v7 = vpop.f32.mrb[69].mxu1  ;;  %5544 = vmatmul.mubr.msk.f32.gmra.mrb[16].mxu1 %vm589_vm2, %v3586_v5 }
 0x2f0   : > { %5546 = vmatprep.mubr.msk.f32.mxu1 %vm6044_vm0, %v6045_v4 }
 0x2f3   : > { %5547 = vmatmul.mubr.msk.f32.gmra.mrb[118].mxu1 %vm589_vm2, %v3587_v51 }
 0x2f4   : > { %5549 = vmatprep.mubr.msk.f32.mxu1 %vm6044_vm0, %v6045_v4  ;;  %vm3842_vm0 = vsmask.f32 2304 }
 0x2f5   : > { %vm3843_vm1 = vmand %vm3841_vm15, %vm3842_vm0 }
 0x2f6   : > { %v2985_v9 = vpop.f32.mrb[70].mxu1 }
 0x2f7   : > { %v5328_v10 = vpop.f32.mrb[71].mxu1  ;;  %5550 = vmatmul.mubr.msk.f32.gmra.mrb[20].mxu1 %vm589_vm2, %v3589_v8  ;;  %vm3862_vm2 = vcmask 1043458  }
 0x2f8   : > { %vm3864_vm4 = vmand %vm3862_vm2, %vm3863_vm3 }
 0x2fa   : > { %v1788_v11 = vpop.f32.mrb[124].mxu0 }
 0x2fb   : > { %v4968_v12 = vpop.f32.mrb[125].mxu0 }
 0x302   : > { %v1797_v13 = vpop.f32.mrb[126].mxu0  ;;  %v3132_v54 = vpop.f32.mrb[72].mxu1 }
 0x303   : > { %v4974_v14 = vpop.f32.mrb[127].mxu0  ;;  %v5353_v2 = vpop.f32.mrb[73].mxu1 }
 0x30a   : > { %v1806_v15 = vpop.f32.mrb[128].mxu0  ;;  %v3141_v16 = vpop.f32.mrb[74].mxu1 }
 0x30b   : > { %v4980_v17 = vpop.f32.mrb[129].mxu0  ;;  %v5359_v18 = vpop.f32.mrb[75].mxu1 }
 0x312   : > { %v1815_v19 = vpop.f32.mrb[130].mxu0  ;;  %v3150_v20 = vpop.f32.mrb[76].mxu1 }
 0x313   : > { %v4986_v21 = vpop.f32.mrb[131].mxu0  ;;  %v5365_v22 = vpop.f32.mrb[77].mxu1 }
 0x31a   : > { %v1824_v4 = vpop.f32.mrb[132].mxu0  ;;  %v3159_v23 = vpop.f32.mrb[78].mxu1 }
 0x31b   : > { %v4992_v24 = vpop.f32.mrb[133].mxu0  ;;  %v5371_v25 = vpop.f32.mrb[79].mxu1 }
 0x322   : > { %v1833_v26 = vpop.f32.mrb[134].mxu0  ;;  %v3168_v27 = vpop.f32.mrb[80].mxu1 }
 0x323   : > { %v4998_v28 = vpop.f32.mrb[135].mxu0  ;;  %v5377_v29 = vpop.f32.mrb[81].mxu1 }
 0x32a   : > { %v3177_v30 = vpop.f32.mrb[82].mxu1 }
 0x32b   : > { %v5383_v31 = vpop.f32.mrb[83].mxu1 }
 0x32e   : > { %v1980_v32 = vpop.f32.mrb[136].mxu0 }
 0x32f   : > { %v5023_v33 = vpop.f32.mrb[137].mxu0 }
 0x332   : > { %v1984_v34 = vpop.f32.mrb[54].mxu0 }
 0x333   : > { %v5026_v35 = vpop.f32.mrb[55].mxu0 }
 0x336   : > { %v1989_v36 = vpop.f32.mrb[138].mxu0  ;;  %v3324_v37 = vpop.f32.mrb[84].mxu1 }
 0x337   : > { %v5029_v38 = vpop.f32.mrb[139].mxu0  ;;  %v5408_v39 = vpop.f32.mrb[85].mxu1 }
 0x338   : > { %v3807_v39 = vld [vmem:[%s7398_s4] sm:$0xf] }
 0x33a   : > { %v7384_v40 = vpop.f32.mrb[58].mxu0 }
 0x33b   : > { %v5032_v41 = vpop.f32.mrb[59].mxu0 }
 0x33e   : > { %v1998_v42 = vpop.f32.mrb[140].mxu0  ;;  %v3333_v43 = vpop.f32.mrb[86].mxu1 }
 0x33f   : > { %v5035_v44 = vpop.f32.mrb[141].mxu0  ;;  %v5414_v46 = vpop.f32.mrb[87].mxu1 }
 0x342   : > { %v7386_v47 = vpop.f32.mrb[62].mxu0 }
 0x343   : > { %v5038_v49 = vpop.f32.mrb[63].mxu0 }
 0x346   : > { %v2007_v50 = vpop.f32.mrb[142].mxu0  ;;  %v3342_v52 = vpop.f32.mrb[88].mxu1 }
 0x347   : > { %v5041_v53 = vpop.f32.mrb[143].mxu0  ;;  %v5420_v55 = vpop.f32.mrb[89].mxu1 }
 0x34a   : > { %v7388_v56 = vpop.f32.mrb[66].mxu0 }
 0x34b   : > { %v5044_v45 = vpop.f32.mrb[67].mxu0 }
 0x34e   : > { %v2016_v57 = vpop.f32.mrb[144].mxu0  ;;  %v3351_v58 = vpop.f32.mrb[90].mxu1 }
 0x34f   : > { %v5047_v59 = vpop.f32.mrb[145].mxu0  ;;  %v5426_v60 = vpop.f32.mrb[91].mxu1 }
 0x352   : > { %v7390_v48 = vpop.f32.mrb[70].mxu0 }
 0x353   : > { %v5050_v61 = vpop.f32.mrb[71].mxu0 }
 0x356   : > { %v2025_v62 = vpop.f32.mrb[146].mxu0  ;;  %v3360_v63 = vpop.f32.mrb[92].mxu1 }
 0x357   : > { %v5053_v0 = vpop.f32.mrb[147].mxu0  ;;  %v5432_v1 = vpop.f32.mrb[93].mxu1 }
 0x35a   : > { %v7392_v3 = vpop.f32.mrb[74].mxu0 }
 0x35b   : > { %v5056_v5 = vpop.f32.mrb[75].mxu0 }
 0x35e   : > { %v2167_v6 = vpop.f32.mrb[50].mxu0  ;;  %v3369_v7 = vpop.f32.mrb[94].mxu1 }
 0x35f   : > { %v5075_v51 = vpop.f32.mrb[51].mxu0  ;;  %v5438_v8 = vpop.f32.mrb[95].mxu1 }
 0x362   : > { %v2172_v9 = vpop.f32.mrb[148].mxu0 }
 0x363   : > { %v5078_v10 = vpop.f32.mrb[149].mxu0 }
 0x36a   : > { %v3516_v11 = vpop.f32.mrb[96].mxu1 }
 0x36b   : > { %v5463_v12 = vpop.f32.mrb[97].mxu1 }
 0x372   : > { %v3525_v13 = vpop.f32.mrb[98].mxu1 }
 0x373   : > { %v5469_v54 = vpop.f32.mrb[99].mxu1 }
 0x37a   : > { %v3534_v14 = vpop.f32.mrb[100].mxu1 }
 0x37b   : > { %v5475_v2 = vpop.f32.mrb[101].mxu1 }
 0x382   : > { %v3543_v15 = vpop.f32.mrb[102].mxu1 }
 0x383   : > { %v5481_v16 = vpop.f32.mrb[103].mxu1 }
 0x38a   : > { %v3552_v17 = vpop.f32.mrb[104].mxu1 }
 0x38b   : > { %v5487_v18 = vpop.f32.mrb[105].mxu1 }
 0x392   : > { %v3561_v19 = vpop.f32.mrb[106].mxu1 }
 0x393   : > { %v5493_v20 = vpop.f32.mrb[107].mxu1 }
 0x39a   : > { %v3703_v21 = vpop.f32.mrb[22].mxu1 }
 0x39b   : > { %v5755_v22 = vadd.f32 %v3703_v21, %v2167_v6  ;;  %v5515_v4 = vpop.f32.mrb[23].mxu1 }
 0x39d   : > { %v3775_v23 = vmul.f32 0.70710677, %v5755_v22  ;;  %v3768_v33 = vmul.f32 0.5, %v5755_v22 }
 0x39e   : > { %v3708_v24 = vpop.f32.mrb[108].mxu1 }
 0x39f   : > { %6021 = verf.f32 %v3775_v23  ;;  %v5518_v25 = vpop.f32.mrb[109].mxu1 }
 0x3a2   : > { %v3712_v26 = vpop.f32.mrb[0].mxu1 }
 0x3a3   : > { %v5756_v27 = vadd.f32 %v3712_v26, %v1984_v34  ;;  %v5521_v28 = vpop.f32.mrb[1].mxu1 }
 0x3a5   : > { %v3776_v29 = vmul.f32 0.70710677, %v5756_v27  ;;  %v3769_v50 = vmul.f32 0.5, %v5756_v27 }
 0x3a6   : > { %v3717_v30 = vpop.f32.mrb[110].mxu1 }
 0x3a7   : > { %6023 = verf.f32 %v3776_v29  ;;  %v5524_v31 = vpop.f32.mrb[111].mxu1 }
 0x3a9   : > { %v6022_v32 = vpop.eup %6021 }
 0x3aa   : > { %v3789_v35 = vadd.f32 1.0, %v6022_v32  ;;  %v3721_v36 = vpop.f32.mrb[4].mxu1 }
 0x3ab   : > { %v5757_v34 = vadd.f32 %v3721_v36, %v7384_v40  ;;  %v5527_v37 = vpop.f32.mrb[5].mxu1 }
 0x3ac   : > { %v3796_v38 = vmul.f32 %v3789_v35, %v3768_v33 }
 0x3ad   : > { %v3777_v41 = vmul.f32 0.70710677, %v5757_v34  ;;  %v3770_v5 = vmul.f32 0.5, %v5757_v34 }
 0x3ae   : > { %v3803_v42 = vpack.c.bf16 %v3796_v38, %v3796_v38  ;;  %v3726_v43 = vpop.f32.mrb[112].mxu1 }
 0x3af   : > { %6025 = verf.f32 %v3777_v41  ;;  %v5530_v44 = vpop.f32.mrb[113].mxu1 }
 0x3b0   : > { %v3808_v46 = vsel %vm3806_vm11, %v3803_v42, %v3807_v39  ;;  %vm3915_vm11 = vcmask 1040384  }
 0x3b1   : > { %v6024_v49 = vpop.eup %6023  ;;  %3809 = vst [vmem:[%s7398_s4] sm:$0xf] %v3808_v46  ;;  %vm3917_vm13 = vmand %vm3915_vm11, %vm3916_vm12 }
 0x3b2   : > { %v3790_v52 = vadd.f32 1.0, %v6024_v49  ;;  %v3730_v53 = vpop.f32.mrb[8].mxu1 }
 0x3b3   : > { %v5758_v55 = vadd.f32 %v3730_v53, %v7386_v47  ;;  %v5533_v45 = vpop.f32.mrb[9].mxu1 }
 0x3b4   : > { %v3797_v57 = vmul.f32 %v3790_v52, %v3769_v50 }
 0x3b5   : > { %v3778_v40 = vmul.f32 0.70710677, %v5758_v55  ;;  %v3771_v18 = vmul.f32 0.5, %v5758_v55 }
 0x3b6   : > { %v4224_v58 = vpack.c.bf16 %v3797_v57, %v3797_v57  ;;  %v3735_v59 = vpop.f32.mrb[114].mxu1 }
 0x3b7   : > { %6027 = verf.f32 %v3778_v40  ;;  %v5536_v60 = vpop.f32.mrb[115].mxu1 }
 0x3b8   : > { %v3815_v61 = vshll.u32 %v4224_v58, 16  ;;  %v3818_v62 = vshrl.u32 %v4224_v58, 16  ;;  %v3828_v7 = vld [vmem:[%s7398_s4] sm:$0x8] }
 0x3b9   : > { %v6026_v63 = vpop.eup %6025 }
 0x3ba   : > { %v3817_v0 = vrot.slane %v3815_v61, 5  ;;  %v3820_v1 = vrot.slane %v3818_v62, 4  ;;  %v3791_v6 = vadd.f32 1.0, %v6026_v63  ;;  %v3739_v47 = vpop.f32.mrb[12].mxu1 }
 0x3bb   : > { %v5759_v51 = vadd.f32 %v3739_v47, %v7388_v56  ;;  %v5539_v8 = vpop.f32.mrb[13].mxu1  ;;  %v3844_v56 = vld [vmem:[%s7398_s4 + $0x8] sm:$0x7] }
 0x3bc   : > { %v3821_v9 = vor.u32 %v3820_v1, %v3817_v0  ;;  %v3829_v10 = vsel %vm3827_vm14, %v3817_v0, %v3828_v7  ;;  %v3798_v11 = vmul.f32 %v3791_v6, %v3770_v5  ;;  %v3918_v8 = vld [vmem:[%s7398_s4 + $0x18] sm:$0x1] }
 0x3bd   : > { %3830 = vst [vmem:[%s7398_s4] sm:$0x8] %v3829_v10  ;;  %v3779_v12 = vmul.f32 0.70710677, %v5759_v51  ;;  %v3772_v33 = vmul.f32 0.5, %v5759_v51 }
 0x3be   : > { %v3822_v13 = vrot.slane %v3821_v9, 4  ;;  %v4225_v54 = vpack.c.bf16 %v3798_v11, %v3798_v11  ;;  %v3744_v14 = vpop.f32.mrb[116].mxu1 }
 0x3bf   : > { %6029 = verf.f32 %v3779_v12  ;;  %v5542_v2 = vpop.f32.mrb[117].mxu1 }
 0x3c0   : > { %3831 = vst [vmem:[%s7398_s4 + $0x4] sm:$0x7] %v3822_v13  ;;  %v3836_v15 = vrot.slane %v4225_v54, 5 }
 0x3c1   : > { %v6028_v16 = vpop.eup %6027 }
 0x3c2   : > { %v3837_v17 = vrot.slane %v3836_v15, 4  ;;  %3840 = vst [vmem:[%s7398_s4 + $0x4] sm:$0x8] %v3836_v15  ;;  %v3792_v19 = vadd.f32 1.0, %v6028_v16  ;;  %v3748_v20 = vpop.f32.mrb[16].mxu1 }
 0x3c3   : > { %v5760_v21 = vadd.f32 %v3748_v20, %v7390_v48  ;;  %v5545_v22 = vpop.f32.mrb[17].mxu1 }
 0x3c4   : > { %v3845_v4 = vsel %vm3843_vm1, %v3837_v17, %v3844_v56  ;;  %v3799_v23 = vmul.f32 %v3792_v19, %v3771_v18 }
 0x3c5   : > { %3846 = vst [vmem:[%s7398_s4 + $0x8] sm:$0x7] %v3845_v4  ;;  %v3780_v24 = vmul.f32 0.70710677, %v5760_v21  ;;  %v3773_v52 = vmul.f32 0.5, %v5760_v21 }
 0x3c6   : > { %v4226_v25 = vpack.c.bf16 %v3799_v23, %v3799_v23  ;;  %v3753_v26 = vpop.f32.mrb[118].mxu1 }
 0x3c7   : > { %6031 = verf.f32 %v3780_v24  ;;  %v5548_v27 = vpop.f32.mrb[119].mxu1 }
 0x3c8   : > { %v3852_v28 = vshrl.u32 %v4226_v25, 16  ;;  %v3855_v29 = vshll.u32 %v4226_v25, 16 }
 0x3c9   : > { %v6030_v30 = vpop.eup %6029 }
 0x3ca   : > { %v3854_v31 = vrot.slane %v3852_v28, 5  ;;  %v3857_v32 = vrot.slane %v3855_v29, 6  ;;  %v3793_v48 = vadd.f32 1.0, %v6030_v30  ;;  %v3757_v35 = vpop.f32.mrb[20].mxu1 }
 0x3cb   : > { %v5761_v36 = vadd.f32 %v3757_v35, %v7392_v3  ;;  %v5551_v34 = vpop.f32.mrb[21].mxu1  ;;  %v3881_v3 = vld [vmem:[%s7398_s4 + $0x10] sm:$0x3] }
 0x3cc   : > { %v3858_v37 = vor.u32 %v3857_v32, %v3854_v31  ;;  %v3865_v38 = vld [vmem:[%s7398_s4 + $0x8] sm:$0xc]  ;;  %v3800_v39 = vmul.f32 %v3793_v48, %v3772_v33 }
 0x3cd   : > { %v3781_v41 = vmul.f32 0.70710677, %v5761_v36  ;;  %v3774_v62 = vmul.f32 0.5, %v5761_v36 }
 0x3ce   : > { %v3859_v42 = vrot.slane %v3858_v37, 4  ;;  %v3866_v43 = vsel %vm3864_vm4, %v3858_v37, %v3865_v38  ;;  %v4227_v44 = vpack.c.bf16 %v3800_v39, %v3800_v39 }
 0x3cf   : > { %3867 = vst [vmem:[%s7398_s4 + $0x8] sm:$0xc] %v3866_v43  ;;  %6033 = verf.f32 %v3781_v41 }
 0x3d0   : > { %3868 = vst [vmem:[%s7398_s4 + $0xc] sm:$0x3] %v3859_v42  ;;  %v3873_v46 = vrot.slane %v4227_v44, 6 }
 0x3d1   : > { %v6032_v49 = vpop.eup %6031 }
 0x3d2   : > { %v3874_v50 = vrot.slane %v3873_v46, 4  ;;  %3877 = vst [vmem:[%s7398_s4 + $0xc] sm:$0xc] %v3873_v46  ;;  %v3794_v53 = vadd.f32 1.0, %v6032_v49 }
 0x3d4   : > { %v3882_v55 = vsel %vm3880_vm7, %v3874_v50, %v3881_v3  ;;  %v3801_v45 = vmul.f32 %v3794_v53, %v3773_v52 }
 0x3d5   : > { %3883 = vst [vmem:[%s7398_s4 + $0x10] sm:$0x3] %v3882_v55 }
 0x3d6   : > { %v4228_v57 = vpack.c.bf16 %v3801_v45, %v3801_v45 }
 0x3d8   : > { %v3889_v40 = vshrl.u32 %v4228_v57, 16  ;;  %v3892_v58 = vshll.u32 %v4228_v57, 16 }
 0x3d9   : > { %v6034_v59 = vpop.eup %6033 }
 0x3da   : > { %v3891_v60 = vrot.slane %v3889_v40, 6  ;;  %v3894_v61 = vrot.slane %v3892_v58, 7  ;;  %v3795_v63 = vadd.f32 1.0, %v6034_v59 }
 0x3dc   : > { %v3895_v0 = vor.u32 %v3894_v61, %v3891_v60  ;;  %v3902_v1 = vld [vmem:[%s7398_s4 + $0x10] sm:$0xe]  ;;  %v3802_v5 = vmul.f32 %v3795_v63, %v3774_v62 }
 0x3de   : > { %v3896_v6 = vrot.slane %v3895_v0, 4  ;;  %v3903_v47 = vsel %vm3901_vm10, %v3895_v0, %v3902_v1  ;;  %v4229_v7 = vpack.c.bf16 %v3802_v5, %v3802_v5 }
 0x3df   : > { %3904 = vst [vmem:[%s7398_s4 + $0x10] sm:$0xe] %v3903_v47 }
 0x3e0   : > { %3905 = vst [vmem:[%s7398_s4 + $0x14] sm:$0x1] %v3896_v6  ;;  %v3910_v51 = vrot.slane %v4229_v7, 7 }
 0x3e2   : > { %v3911_v9 = vrot.slane %v3910_v51, 4  ;;  %3914 = vst [vmem:[%s7398_s4 + $0x14] sm:$0xe] %v3910_v51 }
 0x3e4   : > { %v3919_v10 = vsel %vm3917_vm13, %v3911_v9, %v3918_v8 }
 0x3e5   : > { %3920 = vst [vmem:[%s7398_s4 + $0x18] sm:$0x1] %v3919_v10 }
 0x3e6 PF: > { %s13_s12 = sadd.s32 1, %s6041_s12  }
 0x3e7   : > { %p10_p4 = scmp.ge.s32.totalorder %s13_s12, 4  }
 0x3e9   :  { %12 = sbr.rel (!%p10_p4) target bundleno = 1 (0x1), region = 125 }

// kernel: ms_joint_processor_forward.4
= control target key start
LH: loop header
LB: loop body
LE: loop exit
PB: predicated region body
PF: predicated region fallthrough
CT: control target
= control target key end

     0   :  { %s10409_s15 = smov 0   ;;  %s12531_s0 = inlined_call_operand.vmem [shape: f32[2,256,48], index: 0, kind: input, shape index: {}]   ;;  %s12532_s1 = inlined_call_operand.vmem [shape: f32[48,32], index: 1, kind: input, shape index: {}]   ;;  %s12533_s2 = inlined_call_operand.vmem [shape: f32[512,64], index: 2, kind: input, shape index: {}]   ;;  %s12534_s3 = inlined_call_operand.vmem [shape: f32[1024,128], index: 3, kind: input, shape index: {}]   ;;  %s12535_s4 = inlined_call_operand.vmem [shape: bf16[2,16,128], index: 4, kind: output, shape index: {}]  }
   0x1 LB: > { %s6915_s16 = sadd.s32 4294967295, %s10379_s15   ;;  %p6919_p0 = scmp.ge.s32.totalorder %s10379_s15, 1  ;;  %s10379_s15 = sphi %s10409_s15, %s14_s15  }
   0x2   : > { %p162_p1 = scmp.lt.s32.totalorder %s10379_s15, 3 }
   0x4   : > { %p163_p2 = pnand %p6919_p0, %p162_p1 }
   0x5   : > { %v230_v0 = vld [vmem:[%s12532_s1] sm:$0xff] (!%p163_p2)  ;;  %v231_v1 = vld [vmem:[%s12532_s1 + $0x8] sm:$0xff] (!%p163_p2)  ;;  %v232_v2 = vld [vmem:[%s12532_s1 + $0x10] sm:$0xff] (!%p163_p2)  ;;  %p188_p3 = scmp.lt.s32.totalorder (!%p163_p2), %s6915_s16, 1  ;;  %vm236_vm0 = vcmask (!%p163_p2), 392192   ;;  %vm718_vm1 = vcmask (!%p163_p2), 261120  }
   0x6   : > { %166 = sbr.rel (%p163_p2) target bundleno = 1761 (0x6e1), region = 36  ;;  %v9404_v3 = vpack.c.bf16 (!%p163_p2), %v231_v1, %v230_v0  ;;  %v233_v4 = vld [vmem:[%s12532_s1 + $0x18] sm:$0xff] (!%p163_p2)  ;;  %v234_v6 = vld [vmem:[%s12532_s1 + $0x20] sm:$0xff] (!%p163_p2)  ;;  %v235_v7 = vld [vmem:[%s12532_s1 + $0x28] sm:$0xff] (!%p163_p2)  ;;  %v10381_v44 = vmov (!%p163_p2), 0.0   ;;  %v10382_v45 = vmov (!%p163_p2), 0.0|0.0  }
   0x7   : > { %v9408_v5 = vpack.c.bf16 (!%p163_p2), %v233_v4, %v232_v2  ;;  %v9412_v8 = vpack.c.bf16 (!%p163_p2), %v235_v7, %v234_v6  ;;  %v864_v41 = vld [vmem:[%s12533_s2 + $0x20] sm:$0xff] (!%p163_p2)  ;;  %v865_v42 = vld [vmem:[%s12533_s2 + $0x28] sm:$0xff] (!%p163_p2)  ;;  %722 = vst.msk [vmem:[#allocation2 + $0x18] sm:$0xff] (!%p163_p2), %vm718_vm1, %v10381_v44  ;;  %723 = vst.msk [vmem:[#allocation2 + $0x20] sm:$0xff] (!%p163_p2), %vm718_vm1, %v10381_v44  ;;  %9446 = vmatprep.subr.bf16.mxu1 (!%p163_p2), %v10382_v45  ;;  %vm10383_vm2 = vmmov (!%p163_p2), 0   ;;  %vm759_vm3 = vcmask (!%p163_p2), 257024  }
   0x8   : > { %9405 = vmatprep.subr.bf16.mxu0 (!%p163_p2), %v9404_v3  ;;  %v9417_v43 = vpack.c.bf16 (!%p163_p2), %v865_v42, %v864_v41  ;;  %719 = vst.msk [vmem:[#allocation2] sm:$0xff] (!%p163_p2), %vm718_vm1, %v10381_v44  ;;  %720 = vst.msk [vmem:[#allocation2 + $0x8] sm:$0xff] (!%p163_p2), %vm718_vm1, %v10381_v44  ;;  %v2016_v46 = vld [vmem:[%s12533_s2 + $0xa0] sm:$0xff] (!%p163_p2)  ;;  %v2017_v47 = vld [vmem:[%s12533_s2 + $0xa8] sm:$0xff] (!%p163_p2)  ;;  %8267 = vmatprep.mubr.msk.f32.mxu1 (!%p163_p2), %vm10383_vm2, %v10381_v44  ;;  %vm4738_vm4 = vcmask (!%p163_p2), 523264   ;;  %vm4751_vm5 = vcmask (!%p163_p2), 519168  }
   0x9   : > { %9407 = vmatpush3.bf16.msra.mxu0 (!%p163_p2), %v9404_v3  ;;  %721 = vst.msk [vmem:[#allocation2 + $0x10] sm:$0xff] (!%p163_p2), %vm718_vm1, %v10381_v44  ;;  %724 = vst.msk [vmem:[#allocation2 + $0x28] sm:$0xff] (!%p163_p2), %vm718_vm1, %v10381_v44  ;;  %v866_v48 = vld [vmem:[%s12533_s2 + $0x30] sm:$0xff] (!%p163_p2)  ;;  %v9447_v49 = vpack.c.bf16 (!%p163_p2), %v2017_v47, %v2016_v46  ;;  %v867_v50 = vld [vmem:[%s12533_s2 + $0x38] sm:$0xff] (!%p163_p2)  ;;  %vm4754_vm6 = vcmask (!%p163_p2), 523266   ;;  %vm4756_vm7 = vcmask (!%p163_p2), 517120  }
   0xa   : > { %9409 = vmatprep.subr.bf16.mxu0 (!%p163_p2), %v9408_v5  ;;  %725 = vst.msk [vmem:[#allocation2 + $0x30] sm:$0xff] (!%p163_p2), %vm718_vm1, %v10381_v44  ;;  %726 = vst.msk [vmem:[#allocation2 + $0x38] sm:$0xff] (!%p163_p2), %vm718_vm1, %v10381_v44  ;;  %v9420_v51 = vpack.c.bf16 (!%p163_p2), %v867_v50, %v866_v48  ;;  %v2018_v52 = vld [vmem:[%s12533_s2 + $0xb0] sm:$0xff] (!%p163_p2)  ;;  %v2019_v53 = vld [vmem:[%s12533_s2 + $0xb8] sm:$0xff] (!%p163_p2)  ;;  %vm4758_vm8 = vcmask (!%p163_p2), 523268   ;;  %vm4761_vm9 = vcmask (!%p163_p2), 523270  }
   0xb   : > { %727 = vst.msk [vmem:[#allocation2 + $0x40] sm:$0xff] (!%p163_p2), %vm718_vm1, %v10381_v44  ;;  %728 = vst.msk [vmem:[#allocation2 + $0x48] sm:$0xff] (!%p163_p2), %vm718_vm1, %v10381_v44  ;;  %9448 = vmatpush3.bf16.msra.mxu1 (!%p163_p2), %v9447_v49  ;;  %v9450_v55 = vpack.c.bf16 (!%p163_p2), %v2019_v53, %v2018_v52  ;;  %v826_v56 = vld [vmem:[%s12533_s2] sm:$0xff] (!%p163_p2)  ;;  %v827_v57 = vld [vmem:[%s12533_s2 + $0x8] sm:$0xff] (!%p163_p2)  ;;  %vm4763_vm10 = vcmask (!%p163_p2), 521216   ;;  %vm6851_vm11 = vcmask (!%p163_p2), 1042432  }
   0xc   : > { %729 = vst.msk [vmem:[#allocation2 + $0x50] sm:$0xff] (!%p163_p2), %vm718_vm1, %v10381_v44  ;;  %730 = vst.msk [vmem:[#allocation2 + $0x58] sm:$0xff] (!%p163_p2), %vm718_vm1, %v10381_v44  ;;  %9449 = vmatprep.subr.bf16.mxu1 (!%p163_p2), %v10382_v45  ;;  %v9423_v58 = vpack.c.bf16 (!%p163_p2), %v827_v57, %v826_v56  ;;  %v828_v59 = vld [vmem:[%s12533_s2 + $0x10] sm:$0xff] (!%p163_p2)  ;;  %v829_v60 = vld [vmem:[%s12533_s2 + $0x18] sm:$0xff] (!%p163_p2)  ;;  %vm6852_vm12 = vcmask (!%p163_p2), 1046532  }
   0xd   : > { %s12537_s16 = smov (!%p188_p3, %s6915_s16), 1  ;;  %9411 = vmatpush3.bf16.msra.mxu0 %v9408_v5  ;;  %731 = vst.msk [vmem:[#allocation2 + $0x60] sm:$0xff] %vm718_vm1, %v10381_v44  ;;  %732 = vst.msk [vmem:[#allocation2 + $0x68] sm:$0xff] %vm718_vm1, %v10381_v44  ;;  %v9426_v61 = vpack.c.bf16 %v829_v60, %v828_v59  ;;  %v2266_v42 = vld [vmem:[%s12533_s2 + $0xc0] sm:$0xff]  ;;  %v2269_v56 = vld [vmem:[%s12533_s2 + $0xd8] sm:$0xff] }
   0xe   : > { %s7316_s29 = sshll.u32 %s12537_s16, 8  ;;  %9413 = vmatprep.subr.bf16.mxu0 %v9412_v8  ;;  %733 = vst.msk [vmem:[#allocation2 + $0x70] sm:$0xff] %vm718_vm1, %v10381_v44  ;;  %734 = vst.msk [vmem:[#allocation2 + $0x78] sm:$0xff] %vm718_vm1, %v10381_v44  ;;  %s7317_s7 = sshll.u32 %s12537_s16, 3 }
   0xf   : > { %s10441_s6 = scalar_lea.vmem %s12531_s0, %s7316_s29  ;;  %735 = vst.msk [vmem:[#allocation2 + $0x80] sm:$0xff] %vm718_vm1, %v10381_v44  ;;  %736 = vst.msk [vmem:[#allocation2 + $0x88] sm:$0xff] %vm718_vm1, %v10381_v44  ;;  %v831_v54 = vld [vmem:[#allocation2 + $0x1] ss:$2 sm:$0xff]  ;;  %9451 = vmatpush3.bf16.msra.mxu1 %v9450_v55  ;;  %v2268_v55 = vld [vmem:[%s12533_s2 + $0xd0] sm:$0xff]  ;;  %s12522_s10 = scalar_lea.vmem %s12535_s4, %s7317_s7 }
  0x10   : > { %v198_v9 = vld [vmem:[%s10441_s6] sm:$0xff]  ;;  %v199_v10 = vld [vmem:[%s10441_s6 + $0x8] sm:$0xff]  ;;  %v200_v11 = vld [vmem:[%s10441_s6 + $0x10] sm:$0xff]  ;;  %737 = vst.msk [vmem:[#allocation2 + $0x90] sm:$0xff] %vm718_vm1, %v10381_v44  ;;  %9452 = vmatprep.subr.bf16.mxu1 %v10382_v45 }
  0x11   : > { %7916 = vmatprep.mubr.msk.f32.mxu0 %vm236_vm0, %v198_v9  ;;  %9415 = vmatpush3.bf16.msra.mxu0 %v9412_v8  ;;  %v201_v12 = vld [vmem:[%s10441_s6 + $0x18] sm:$0xff]  ;;  %v202_v13 = vld [vmem:[%s10441_s6 + $0x20] sm:$0xff]  ;;  %v203_v14 = vld [vmem:[%s10441_s6 + $0x28] sm:$0xff]  ;;  %738 = vst.msk [vmem:[#allocation2 + $0x98] sm:$0xff] %vm718_vm1, %v10381_v44 }
  0x12   : > { %v204_v15 = vld [vmem:[%s10441_s6 + $0x30] sm:$0xff]  ;;  %v205_v16 = vld [vmem:[%s10441_s6 + $0x38] sm:$0xff]  ;;  %v206_v17 = vld [vmem:[%s10441_s6 + $0x40] sm:$0xff]  ;;  %739 = vst.msk [vmem:[#allocation2 + $0xa0] sm:$0xff] %vm718_vm1, %v10381_v44  ;;  %9416 = vmatprep.subr.bf16.mxu0 %v10382_v45 }
  0x13   : > { %v207_v18 = vld [vmem:[%s10441_s6 + $0x48] sm:$0xff]  ;;  %v208_v19 = vld [vmem:[%s10441_s6 + $0x50] sm:$0xff]  ;;  %v209_v20 = vld [vmem:[%s10441_s6 + $0x58] sm:$0xff]  ;;  %740 = vst.msk [vmem:[#allocation2 + $0xa8] sm:$0xff] %vm718_vm1, %v10381_v44 }
  0x14   : > { %7917 = vmatmul.mubr.msk.f32.vlgmr.msra.gmra.mrb[0].mxu0 %vm236_vm0, %v199_v10  ;;  %v210_v21 = vld [vmem:[%s10441_s6 + $0x60] sm:$0xff]  ;;  %v211_v22 = vld [vmem:[%s10441_s6 + $0x68] sm:$0xff]  ;;  %v212_v23 = vld [vmem:[%s10441_s6 + $0x70] sm:$0xff]  ;;  %741 = vst.msk [vmem:[#allocation2 + $0xb0] sm:$0xff] %vm718_vm1, %v10381_v44 }
  0x15   : > { %7919 = vmatprep.mubr.msk.f32.mxu0 %vm236_vm0, %v200_v11  ;;  %v213_v24 = vld [vmem:[%s10441_s6 + $0x78] sm:$0xff]  ;;  %v214_v25 = vld [vmem:[%s10441_s6 + $0x80] sm:$0xff]  ;;  %v215_v26 = vld [vmem:[%s10441_s6 + $0x88] sm:$0xff]  ;;  %742 = vst.msk [vmem:[#allocation2 + $0xb8] sm:$0xff] %vm718_vm1, %v10381_v44  ;;  %9418 = vmatpush3.bf16.msra.mxu0 %v9417_v43 }
  0x16   : > { %v216_v27 = vld [vmem:[%s10441_s6 + $0x90] sm:$0xff]  ;;  %v217_v28 = vld [vmem:[%s10441_s6 + $0x98] sm:$0xff]  ;;  %v218_v29 = vld [vmem:[%s10441_s6 + $0xa0] sm:$0xff]  ;;  %743 = vst.msk [vmem:[#allocation2 + $0xc0] sm:$0xff] %vm718_vm1, %v10381_v44  ;;  %9419 = vmatprep.subr.bf16.mxu0 %v10382_v45 }
  0x17   : > { %v219_v30 = vld [vmem:[%s10441_s6 + $0xa8] sm:$0xff]  ;;  %v220_v31 = vld [vmem:[%s10441_s6 + $0xb0] sm:$0xff]  ;;  %v221_v32 = vld [vmem:[%s10441_s6 + $0xb8] sm:$0xff]  ;;  %744 = vst.msk [vmem:[#allocation2 + $0xc8] sm:$0xff] %vm718_vm1, %v10381_v44 }
  0x18   : > { %7920 = vmatmul.mubr.msk.f32.gmra.mrb[2].mxu0 %vm236_vm0, %v201_v12  ;;  %v222_v33 = vld [vmem:[%s10441_s6 + $0xc0] sm:$0xff]  ;;  %v223_v34 = vld [vmem:[%s10441_s6 + $0xc8] sm:$0xff]  ;;  %v224_v35 = vld [vmem:[%s10441_s6 + $0xd0] sm:$0xff]  ;;  %745 = vst.msk [vmem:[#allocation2 + $0xd0] sm:$0xff] %vm718_vm1, %v10381_v44 }
  0x19   : > { %7922 = vmatprep.mubr.msk.f32.mxu0 %vm236_vm0, %v202_v13  ;;  %v225_v36 = vld [vmem:[%s10441_s6 + $0xd8] sm:$0xff]  ;;  %v226_v37 = vld [vmem:[%s10441_s6 + $0xe0] sm:$0xff]  ;;  %v227_v38 = vld [vmem:[%s10441_s6 + $0xe8] sm:$0xff]  ;;  %746 = vst.msk [vmem:[#allocation2 + $0xd8] sm:$0xff] %vm718_vm1, %v10381_v44  ;;  %9421 = vmatpush3.bf16.msra.mxu0 %v9420_v51 }
  0x1a   : > { %v228_v39 = vld [vmem:[%s10441_s6 + $0xf0] sm:$0xff]  ;;  %v229_v40 = vld [vmem:[%s10441_s6 + $0xf8] sm:$0xff]  ;;  %747 = vst.msk [vmem:[#allocation2 + $0xe0] sm:$0xff] %vm718_vm1, %v10381_v44  ;;  %748 = vst.msk [vmem:[#allocation2 + $0xe8] sm:$0xff] %vm718_vm1, %v10381_v44  ;;  %9422 = vmatprep.subr.bf16.mxu0 %v10382_v45 }
  0x1b   : > { %749 = vst.msk [vmem:[#allocation2 + $0xf0] sm:$0xff] %vm718_vm1, %v10381_v44  ;;  %750 = vst.msk [vmem:[#allocation2 + $0xf8] sm:$0xff] %vm718_vm1, %v10381_v44  ;;  %v2267_v43 = vld [vmem:[%s12533_s2 + $0xc8] sm:$0xff] }
  0x1c   : > { %7923 = vmatmul.mubr.msk.f32.gmra.mrb[4].mxu0 %vm236_vm0, %v203_v14  ;;  %751 = vst.msk [vmem:[#allocation2 + $0x100] sm:$0xff] %vm718_vm1, %v10381_v44  ;;  %752 = vst.msk [vmem:[#allocation2 + $0x108] sm:$0xff] %vm718_vm1, %v10381_v44 }
  0x1d   : > { %7925 = vmatprep.mubr.msk.f32.mxu0 %vm236_vm0, %v204_v15  ;;  %753 = vst.msk [vmem:[#allocation2 + $0x110] sm:$0xff] %vm718_vm1, %v10381_v44  ;;  %754 = vst.msk [vmem:[#allocation2 + $0x118] sm:$0xff] %vm718_vm1, %v10381_v44 }
  0x1e   : > { %755 = vst.msk [vmem:[#allocation2 + $0x120] sm:$0xff] %vm718_vm1, %v10381_v44  ;;  %756 = vst.msk [vmem:[#allocation2 + $0x128] sm:$0xff] %vm718_vm1, %v10381_v44 }
  0x1f   : > { %757 = vst.msk [vmem:[#allocation2 + $0x130] sm:$0xff] %vm718_vm1, %v10381_v44  ;;  %758 = vst.msk [vmem:[#allocation2 + $0x138] sm:$0xff] %vm718_vm1, %v10381_v44 }
  0x20   : > { %7926 = vmatmul.mubr.msk.f32.gmra.mrb[6].mxu0 %vm236_vm0, %v205_v16  ;;  %760 = vst.msk [vmem:[#allocation2 + $0x140] sm:$0xf] %vm759_vm3, %v10381_v44  ;;  %vm6853_vm13 = vmor %vm6851_vm11, %vm6852_vm12 }
  0x21   : > { %7928 = vmatprep.mubr.msk.f32.mxu0 %vm236_vm0, %v206_v17  ;;  %4740 = vst.msk [vmem:[#allocation3 + $0x8] sm:$0xff] %vm4738_vm4, %v10381_v44  ;;  %4741 = vst.msk [vmem:[#allocation3 + $0x10] sm:$0xff] %vm4738_vm4, %v10381_v44 }
  0x22   : > { %4739 = vst.msk [vmem:[#allocation3] sm:$0xff] %vm4738_vm4, %v10381_v44  ;;  %4742 = vst.msk [vmem:[#allocation3 + $0x18] sm:$0xff] %vm4738_vm4, %v10381_v44 }
  0x23   : > { %4743 = vst.msk [vmem:[#allocation3 + $0x20] sm:$0xff] %vm4738_vm4, %v10381_v44  ;;  %4744 = vst.msk [vmem:[#allocation3 + $0x28] sm:$0xff] %vm4738_vm4, %v10381_v44 }
  0x24   : > { %7929 = vmatmul.mubr.msk.f32.gmra.mrb[8].mxu0 %vm236_vm0, %v207_v18  ;;  %4745 = vst.msk [vmem:[#allocation3 + $0x30] sm:$0xff] %vm4738_vm4, %v10381_v44  ;;  %4746 = vst.msk [vmem:[#allocation3 + $0x38] sm:$0xff] %vm4738_vm4, %v10381_v44 }
  0x25   : > { %7931 = vmatprep.mubr.msk.f32.mxu0 %vm236_vm0, %v208_v19  ;;  %4747 = vst.msk [vmem:[#allocation3 + $0x40] sm:$0xff] %vm4738_vm4, %v10381_v44  ;;  %4748 = vst.msk [vmem:[#allocation3 + $0x48] sm:$0xff] %vm4738_vm4, %v10381_v44 }
  0x26   : > { %4749 = vst.msk [vmem:[#allocation3 + $0x50] sm:$0xff] %vm4738_vm4, %v10381_v44  ;;  %4750 = vst.msk [vmem:[#allocation3 + $0x58] sm:$0xff] %vm4738_vm4, %v10381_v44 }
  0x27   : > { %4752 = vst.msk [vmem:[#allocation3 + $0x60] sm:$0xf] %vm4751_vm5, %v10381_v44 }
  0x28   : > { %7932 = vmatmul.mubr.msk.f32.gmra.mrb[10].mxu0 %vm236_vm0, %v209_v20 }
  0x29   : > { %7934 = vmatprep.mubr.msk.f32.mxu0 %vm236_vm0, %v210_v21 }
  0x2c   : > { %7935 = vmatmul.mubr.msk.f32.gmra.mrb[12].mxu0 %vm236_vm0, %v211_v22 }
  0x2d   : > { %7937 = vmatprep.mubr.msk.f32.mxu0 %vm236_vm0, %v212_v23 }
  0x30   : > { %7938 = vmatmul.mubr.msk.f32.gmra.mrb[14].mxu0 %vm236_vm0, %v213_v24 }
  0x31   : > { %7940 = vmatprep.mubr.msk.f32.mxu0 %vm236_vm0, %v214_v25 }
  0x34   : > { %7941 = vmatmul.mubr.msk.f32.gmra.mrb[16].mxu0 %vm236_vm0, %v215_v26 }
  0x35   : > { %7943 = vmatprep.mubr.msk.f32.mxu0 %vm236_vm0, %v216_v27 }
  0x38   : > { %7944 = vmatmul.mubr.msk.f32.gmra.mrb[18].mxu0 %vm236_vm0, %v217_v28 }
  0x39   : > { %7946 = vmatprep.mubr.msk.f32.mxu0 %vm236_vm0, %v218_v29 }
  0x3c   : > { %7947 = vmatmul.mubr.msk.f32.gmra.mrb[20].mxu0 %vm236_vm0, %v219_v30 }
  0x3d   : > { %7949 = vmatprep.mubr.msk.f32.mxu0 %vm236_vm0, %v220_v31 }
  0x40   : > { %7950 = vmatmul.mubr.msk.f32.gmra.mrb[22].mxu0 %vm236_vm0, %v221_v32 }
  0x41   : > { %7952 = vmatprep.mubr.msk.f32.mxu0 %vm236_vm0, %v222_v33 }
  0x44   : > { %7953 = vmatmul.mubr.msk.f32.gmra.mrb[24].mxu0 %vm236_vm0, %v223_v34 }
  0x45   : > { %7955 = vmatprep.mubr.msk.f32.mxu0 %vm236_vm0, %v224_v35 }
  0x48   : > { %7956 = vmatmul.mubr.msk.f32.gmra.mrb[26].mxu0 %vm236_vm0, %v225_v36 }
  0x49   : > { %7958 = vmatprep.mubr.msk.f32.mxu0 %vm236_vm0, %v226_v37 }
  0x4c   : > { %7959 = vmatmul.mubr.msk.f32.gmra.mrb[28].mxu0 %vm236_vm0, %v227_v38 }
  0x4d   : > { %7961 = vmatprep.mubr.msk.f32.mxu0 %vm236_vm0, %v228_v39 }
  0x50   : > { %7962 = vmatmul.mubr.msk.f32.gmra.mrb[30].mxu0 %vm236_vm0, %v229_v40 }
  0x51   : > { %7972 = vmatprep.mubr.msk.f32.mxu0 %vm10383_vm2, %v10381_v44 }
  0x54   : > { %7973 = vmatmul.mubr.msk.f32.vlgmr.msra.gmra.mrb[32].mxu0 %vm718_vm1, %v831_v54  ;;  %v9453_v54 = vpack.c.bf16 %v2267_v43, %v2266_v42 }
  0x55   : > { %7975 = vmatprep.mubr.msk.f32.mxu0 %vm10383_vm2, %v10381_v44  ;;  %9424 = vmatpush3.bf16.msra.mxu0 %v9423_v58 }
  0x56   : > { %9425 = vmatprep.subr.bf16.mxu0 %v10382_v45 }
  0x59   : > { %9427 = vmatpush3.bf16.msra.mxu0 %v9426_v61 }
  0x5a   : > { %9428 = vmatprep.subr.bf16.mxu0 %v10382_v45 }
  0xe7   : > { %v7918_v62 = vpop.f32.mrb[0].mxu0 }
  0xe8   : > { %v591_v63 = vmul.f32 0.70710677, %v7918_v62  ;;  %v399_v0 = vpop.f32.mrb[1].mxu0  ;;  %v559_v15 = vmul.f32 0.5, %v7918_v62 }
  0xe9   : > { %v590_v1 = vmul.f32 0.70710677, %v399_v0  ;;  %v558_v18 = vmul.f32 0.5, %v399_v0 }
  0xea   : > { %10271 = verf.f32 %v591_v63 }
  0xeb   : > { %10273 = verf.f32 %v590_v1  ;;  %v7921_v2 = vpop.f32.mrb[2].mxu0 }
  0xec   : > { %v593_v3 = vmul.f32 0.70710677, %v7921_v2  ;;  %v409_v4 = vpop.f32.mrb[3].mxu0  ;;  %v561_v27 = vmul.f32 0.5, %v7921_v2 }
  0xed   : > { %v592_v5 = vmul.f32 0.70710677, %v409_v4  ;;  %v560_v30 = vmul.f32 0.5, %v409_v4 }
  0xee   : > { %10275 = verf.f32 %v593_v3 }
  0xef   : > { %10277 = verf.f32 %v592_v5  ;;  %v7924_v6 = vpop.f32.mrb[4].mxu0 }
  0xf0   : > { %v595_v7 = vmul.f32 0.70710677, %v7924_v6  ;;  %v419_v8 = vpop.f32.mrb[5].mxu0  ;;  %v563_v39 = vmul.f32 0.5, %v7924_v6 }
  0xf1   : > { %v594_v9 = vmul.f32 0.70710677, %v419_v8  ;;  %v562_v46 = vmul.f32 0.5, %v419_v8 }
  0xf2   : > { %10279 = verf.f32 %v595_v7  ;;  %v9456_v7 = vpack.c.bf16 %v2269_v56, %v2268_v55 }
  0xf3   : > { %10281 = verf.f32 %v594_v9  ;;  %v7927_v10 = vpop.f32.mrb[6].mxu0 }
  0xf4   : > { %v10272_v11 = vpop.eup %10271  ;;  %v597_v12 = vmul.f32 0.70710677, %v7927_v10  ;;  %v429_v13 = vpop.f32.mrb[7].mxu0  ;;  %v565_v58 = vmul.f32 0.5, %v7927_v10 }
  0xf5   : > { %v10274_v14 = vpop.eup %10273  ;;  %v655_v16 = vadd.f32 1.0, %v10272_v11  ;;  %v596_v17 = vmul.f32 0.70710677, %v429_v13  ;;  %v564_v62 = vmul.f32 0.5, %v429_v13 }
  0xf6   : > { %v654_v19 = vadd.f32 1.0, %v10274_v14  ;;  %10283 = verf.f32 %v597_v12 }
  0xf7   : > { %v687_v20 = vmul.f32 %v655_v16, %v559_v15  ;;  %10285 = verf.f32 %v596_v17  ;;  %v10638_v21 = vpop.f32.mrb[8].mxu0 }
  0xf8   : > { %v10276_v22 = vpop.eup %10275  ;;  %v686_v23 = vmul.f32 %v654_v19, %v558_v18  ;;  %v599_v24 = vmul.f32 0.70710677, %v10638_v21  ;;  %v10641_v25 = vpop.f32.mrb[9].mxu0  ;;  %v567_v9 = vmul.f32 0.5, %v10638_v21 }
  0xf9   : > { %v10278_v26 = vpop.eup %10277  ;;  %762 = vst.msk [vmem:[#allocation2 + $0x1b] sm:$0xff] %vm718_vm1, %v687_v20  ;;  %v657_v28 = vadd.f32 1.0, %v10276_v22  ;;  %v598_v29 = vmul.f32 0.70710677, %v10641_v25  ;;  %v566_v13 = vmul.f32 0.5, %v10641_v25 }
  0xfa   : > { %761 = vst.msk [vmem:[#allocation2 + $0x13] sm:$0xff] %vm718_vm1, %v686_v23  ;;  %v656_v31 = vadd.f32 1.0, %v10278_v26  ;;  %10287 = verf.f32 %v599_v24 }
  0xfb   : > { %v689_v32 = vmul.f32 %v657_v28, %v561_v27  ;;  %10289 = verf.f32 %v598_v29  ;;  %v10646_v33 = vpop.f32.mrb[10].mxu0 }
  0xfc   : > { %v10280_v34 = vpop.eup %10279  ;;  %v688_v35 = vmul.f32 %v656_v31, %v560_v30  ;;  %v601_v36 = vmul.f32 0.70710677, %v10646_v33  ;;  %v10649_v37 = vpop.f32.mrb[11].mxu0  ;;  %v569_v23 = vmul.f32 0.5, %v10646_v33 }
  0xfd   : > { %v10282_v38 = vpop.eup %10281  ;;  %764 = vst.msk [vmem:[#allocation2 + $0x2d] sm:$0xff] %vm718_vm1, %v689_v32  ;;  %v659_v40 = vadd.f32 1.0, %v10280_v34  ;;  %v600_v41 = vmul.f32 0.70710677, %v10649_v37  ;;  %v568_v27 = vmul.f32 0.5, %v10649_v37 }
  0xfe   : > { %763 = vst.msk [vmem:[#allocation2 + $0x25] sm:$0xff] %vm718_vm1, %v688_v35  ;;  %v658_v47 = vadd.f32 1.0, %v10282_v38  ;;  %10291 = verf.f32 %v601_v36 }
  0xff   : > { %v691_v48 = vmul.f32 %v659_v40, %v563_v39  ;;  %10293 = verf.f32 %v600_v41  ;;  %v10660_v49 = vpop.f32.mrb[12].mxu0 }
 0x100   : > { %v10284_v50 = vpop.eup %10283  ;;  %v690_v51 = vmul.f32 %v658_v47, %v562_v46  ;;  %v603_v52 = vmul.f32 0.70710677, %v10660_v49  ;;  %v10663_v53 = vpop.f32.mrb[13].mxu0  ;;  %v571_v37 = vmul.f32 0.5, %v10660_v49 }
 0x101   : > { %v10286_v57 = vpop.eup %10285  ;;  %766 = vst.msk [vmem:[#allocation2 + $0x3f] sm:$0xff] %vm718_vm1, %v691_v48  ;;  %v661_v59 = vadd.f32 1.0, %v10284_v50  ;;  %v602_v60 = vmul.f32 0.70710677, %v10663_v53  ;;  %v833_v61 = vld [vmem:[#allocation2 + $0x11] ss:$2 sm:$0xff] }
 0x102   : > { %765 = vst.msk [vmem:[#allocation2 + $0x37] sm:$0xff] %vm718_vm1, %v690_v51  ;;  %v660_v63 = vadd.f32 1.0, %v10286_v57  ;;  %10295 = verf.f32 %v603_v52  ;;  %7976 = vmatmul.mubr.msk.f32.gmra.mrb[34].mxu0 %vm718_vm1, %v833_v61  ;;  %v1998_v0 = vld [vmem:[#allocation2 + $0x13] ss:$2 sm:$0xff]  ;;  %v570_v41 = vmul.f32 0.5, %v10663_v53 }
 0x103   : > { %v693_v1 = vmul.f32 %v661_v59, %v565_v58  ;;  %10297 = verf.f32 %v602_v60  ;;  %8268 = vmatmul.mubr.msk.f32.vlgmr.msra.gmra.mrb[0].mxu1 %vm718_vm1, %v1998_v0  ;;  %v10676_v2 = vpop.f32.mrb[14].mxu0  ;;  %7978 = vmatprep.mubr.msk.f32.mxu0 %vm10383_vm2, %v10381_v44 }
 0x104   : > { %v10288_v3 = vpop.eup %10287  ;;  %v692_v4 = vmul.f32 %v660_v63, %v564_v62  ;;  %9454 = vmatpush3.bf16.msra.mxu1 %v9453_v54  ;;  %v605_v5 = vmul.f32 0.70710677, %v10676_v2  ;;  %v10681_v6 = vpop.f32.mrb[15].mxu0  ;;  %8270 = vmatprep.mubr.msk.f32.mxu1 %vm10383_vm2, %v10381_v44  ;;  %v573_v53 = vmul.f32 0.5, %v10676_v2 }
 0x105   : > { %v10290_v8 = vpop.eup %10289  ;;  %768 = vst.msk [vmem:[#allocation2 + $0x51] sm:$0xff] %vm718_vm1, %v693_v1  ;;  %v663_v10 = vadd.f32 1.0, %v10288_v3  ;;  %v604_v11 = vmul.f32 0.70710677, %v10681_v6  ;;  %v835_v12 = vld [vmem:[#allocation2 + $0x21] ss:$2 sm:$0xff]  ;;  %9455 = vmatprep.subr.bf16.mxu1 %v10382_v45 }
 0x106   : > { %767 = vst.msk [vmem:[#allocation2 + $0x49] sm:$0xff] %vm718_vm1, %v692_v4  ;;  %v662_v14 = vadd.f32 1.0, %v10290_v8  ;;  %10299 = verf.f32 %v605_v5  ;;  %7979 = vmatmul.mubr.msk.f32.gmra.mrb[36].mxu0 %vm718_vm1, %v835_v12  ;;  %v1999_v15 = vld [vmem:[#allocation2 + $0x23] ss:$2 sm:$0xff]  ;;  %v572_v57 = vmul.f32 0.5, %v10681_v6 }
 0x107   : > { %v695_v16 = vmul.f32 %v663_v10, %v567_v9  ;;  %10301 = verf.f32 %v604_v11  ;;  %8271 = vmatmul.mubr.msk.f32.gmra.mrb[2].mxu1 %vm718_vm1, %v1999_v15  ;;  %v10693_v17 = vpop.f32.mrb[16].mxu0  ;;  %7981 = vmatprep.mubr.msk.f32.mxu0 %vm10383_vm2, %v10381_v44 }
 0x108   : > { %v10292_v18 = vpop.eup %10291  ;;  %v694_v19 = vmul.f32 %v662_v14, %v566_v13  ;;  %v607_v20 = vmul.f32 0.70710677, %v10693_v17  ;;  %v10698_v21 = vpop.f32.mrb[17].mxu0  ;;  %8273 = vmatprep.mubr.msk.f32.mxu1 %vm10383_vm2, %v10381_v44  ;;  %9457 = vmatpush3.bf16.msra.mxu1 %v9456_v7  ;;  %v575_v3 = vmul.f32 0.5, %v10693_v17 }
 0x109   : > { %v10294_v22 = vpop.eup %10293  ;;  %770 = vst.msk [vmem:[#allocation2 + $0x63] sm:$0xff] %vm718_vm1, %v695_v16  ;;  %v665_v24 = vadd.f32 1.0, %v10292_v18  ;;  %v606_v25 = vmul.f32 0.70710677, %v10698_v21  ;;  %v837_v26 = vld [vmem:[#allocation2 + $0x31] ss:$2 sm:$0xff]  ;;  %9458 = vmatprep.subr.bf16.mxu1 %v10382_v45 }
 0x10a   : > { %769 = vst.msk [vmem:[#allocation2 + $0x5b] sm:$0xff] %vm718_vm1, %v694_v19  ;;  %v664_v28 = vadd.f32 1.0, %v10294_v22  ;;  %10303 = verf.f32 %v607_v20  ;;  %7982 = vmatmul.mubr.msk.f32.gmra.mrb[38].mxu0 %vm718_vm1, %v837_v26  ;;  %v2000_v29 = vld [vmem:[#allocation2 + $0x33] ss:$2 sm:$0xff]  ;;  %v574_v7 = vmul.f32 0.5, %v10698_v21 }
 0x10b   : > { %v697_v30 = vmul.f32 %v665_v24, %v569_v23  ;;  %10305 = verf.f32 %v606_v25  ;;  %8274 = vmatmul.mubr.msk.f32.gmra.mrb[4].mxu1 %vm718_vm1, %v2000_v29  ;;  %v10710_v31 = vpop.f32.mrb[18].mxu0  ;;  %7984 = vmatprep.mubr.msk.f32.mxu0 %vm10383_vm2, %v10381_v44 }
 0x10c   : > { %v10296_v32 = vpop.eup %10295  ;;  %v696_v33 = vmul.f32 %v664_v28, %v568_v27  ;;  %v609_v34 = vmul.f32 0.70710677, %v10710_v31  ;;  %v10715_v35 = vpop.f32.mrb[19].mxu0  ;;  %8276 = vmatprep.mubr.msk.f32.mxu1 %vm10383_vm2, %v10381_v44  ;;  %v577_v17 = vmul.f32 0.5, %v10710_v31 }
 0x10d   : > { %v10298_v36 = vpop.eup %10297  ;;  %772 = vst.msk [vmem:[#allocation2 + $0x75] sm:$0xff] %vm718_vm1, %v697_v30  ;;  %v667_v38 = vadd.f32 1.0, %v10296_v32  ;;  %v608_v39 = vmul.f32 0.70710677, %v10715_v35  ;;  %v839_v40 = vld [vmem:[#allocation2 + $0x41] ss:$2 sm:$0xff] }
 0x10e   : > { %771 = vst.msk [vmem:[#allocation2 + $0x6d] sm:$0xff] %vm718_vm1, %v696_v33  ;;  %v666_v42 = vadd.f32 1.0, %v10298_v36  ;;  %10307 = verf.f32 %v609_v34  ;;  %7985 = vmatmul.mubr.msk.f32.gmra.mrb[40].mxu0 %vm718_vm1, %v839_v40  ;;  %v2001_v43 = vld [vmem:[#allocation2 + $0x43] ss:$2 sm:$0xff]  ;;  %v576_v21 = vmul.f32 0.5, %v10715_v35 }
 0x10f   : > { %v699_v46 = vmul.f32 %v667_v38, %v571_v37  ;;  %10309 = verf.f32 %v608_v39  ;;  %8277 = vmatmul.mubr.msk.f32.gmra.mrb[6].mxu1 %vm718_vm1, %v2001_v43  ;;  %v10726_v47 = vpop.f32.mrb[20].mxu0  ;;  %7987 = vmatprep.mubr.msk.f32.mxu0 %vm10383_vm2, %v10381_v44 }
 0x110   : > { %v10300_v48 = vpop.eup %10299  ;;  %v698_v49 = vmul.f32 %v666_v42, %v570_v41  ;;  %v611_v50 = vmul.f32 0.70710677, %v10726_v47  ;;  %v10731_v51 = vpop.f32.mrb[21].mxu0  ;;  %8279 = vmatprep.mubr.msk.f32.mxu1 %vm10383_vm2, %v10381_v44  ;;  %v579_v32 = vmul.f32 0.5, %v10726_v47 }
 0x111   : > { %v10302_v52 = vpop.eup %10301  ;;  %774 = vst.msk [vmem:[#allocation2 + $0x87] sm:$0xff] %vm718_vm1, %v699_v46  ;;  %v669_v54 = vadd.f32 1.0, %v10300_v48  ;;  %v610_v55 = vmul.f32 0.70710677, %v10731_v51  ;;  %v841_v56 = vld [vmem:[#allocation2 + $0x51] ss:$2 sm:$0xff] }
 0x112   : > { %773 = vst.msk [vmem:[#allocation2 + $0x7f] sm:$0xff] %vm718_vm1, %v698_v49  ;;  %v668_v58 = vadd.f32 1.0, %v10302_v52  ;;  %10311 = verf.f32 %v611_v50  ;;  %7988 = vmatmul.mubr.msk.f32.gmra.mrb[42].mxu0 %vm718_vm1, %v841_v56  ;;  %v2002_v59 = vld [vmem:[#allocation2 + $0x53] ss:$2 sm:$0xff]  ;;  %v578_v36 = vmul.f32 0.5, %v10731_v51 }
 0x113   : > { %v701_v60 = vmul.f32 %v669_v54, %v573_v53  ;;  %10313 = verf.f32 %v610_v55  ;;  %8280 = vmatmul.mubr.msk.f32.gmra.mrb[8].mxu1 %vm718_vm1, %v2002_v59  ;;  %v10742_v61 = vpop.f32.mrb[22].mxu0  ;;  %7990 = vmatprep.mubr.msk.f32.mxu0 %vm10383_vm2, %v10381_v44 }
 0x114   : > { %v10304_v62 = vpop.eup %10303  ;;  %v700_v63 = vmul.f32 %v668_v58, %v572_v57  ;;  %v613_v0 = vmul.f32 0.70710677, %v10742_v61  ;;  %v10747_v1 = vpop.f32.mrb[23].mxu0  ;;  %8282 = vmatprep.mubr.msk.f32.mxu1 %vm10383_vm2, %v10381_v44  ;;  %v581_v47 = vmul.f32 0.5, %v10742_v61 }
 0x115   : > { %v10306_v2 = vpop.eup %10305  ;;  %776 = vst.msk [vmem:[#allocation2 + $0x99] sm:$0xff] %vm718_vm1, %v701_v60  ;;  %v671_v4 = vadd.f32 1.0, %v10304_v62  ;;  %v612_v5 = vmul.f32 0.70710677, %v10747_v1  ;;  %v843_v6 = vld [vmem:[#allocation2 + $0x61] ss:$2 sm:$0xff] }
 0x116   : > { %775 = vst.msk [vmem:[#allocation2 + $0x91] sm:$0xff] %vm718_vm1, %v700_v63  ;;  %v670_v8 = vadd.f32 1.0, %v10306_v2  ;;  %10315 = verf.f32 %v613_v0  ;;  %7991 = vmatmul.mubr.msk.f32.gmra.mrb[44].mxu0 %vm718_vm1, %v843_v6  ;;  %v2003_v9 = vld [vmem:[#allocation2 + $0x63] ss:$2 sm:$0xff]  ;;  %v580_v51 = vmul.f32 0.5, %v10747_v1 }
 0x117   : > { %v703_v10 = vmul.f32 %v671_v4, %v575_v3  ;;  %10317 = verf.f32 %v612_v5  ;;  %8283 = vmatmul.mubr.msk.f32.gmra.mrb[10].mxu1 %vm718_vm1, %v2003_v9  ;;  %v10758_v11 = vpop.f32.mrb[24].mxu0  ;;  %7993 = vmatprep.mubr.msk.f32.mxu0 %vm10383_vm2, %v10381_v44 }
 0x118   : > { %v10308_v12 = vpop.eup %10307  ;;  %v702_v13 = vmul.f32 %v670_v8, %v574_v7  ;;  %v615_v14 = vmul.f32 0.70710677, %v10758_v11  ;;  %v10763_v15 = vpop.f32.mrb[25].mxu0  ;;  %8285 = vmatprep.mubr.msk.f32.mxu1 %vm10383_vm2, %v10381_v44  ;;  %v583_v61 = vmul.f32 0.5, %v10758_v11 }
 0x119   : > { %v10310_v16 = vpop.eup %10309  ;;  %778 = vst.msk [vmem:[#allocation2 + $0xab] sm:$0xff] %vm718_vm1, %v703_v10  ;;  %v673_v18 = vadd.f32 1.0, %v10308_v12  ;;  %v614_v19 = vmul.f32 0.70710677, %v10763_v15  ;;  %v845_v20 = vld [vmem:[#allocation2 + $0x71] ss:$2 sm:$0xff] }
 0x11a   : > { %777 = vst.msk [vmem:[#allocation2 + $0xa3] sm:$0xff] %vm718_vm1, %v702_v13  ;;  %v672_v22 = vadd.f32 1.0, %v10310_v16  ;;  %10319 = verf.f32 %v615_v14  ;;  %7994 = vmatmul.mubr.msk.f32.gmra.mrb[46].mxu0 %vm718_vm1, %v845_v20  ;;  %v2004_v23 = vld [vmem:[#allocation2 + $0x73] ss:$2 sm:$0xff]  ;;  %v582_v1 = vmul.f32 0.5, %v10763_v15 }
 0x11b   : > { %v705_v24 = vmul.f32 %v673_v18, %v577_v17  ;;  %10321 = verf.f32 %v614_v19  ;;  %8286 = vmatmul.mubr.msk.f32.gmra.mrb[12].mxu1 %vm718_vm1, %v2004_v23  ;;  %v10774_v25 = vpop.f32.mrb[26].mxu0  ;;  %7996 = vmatprep.mubr.msk.f32.mxu0 %vm10383_vm2, %v10381_v44  ;;  %v847_v30 = vld [vmem:[#allocation2 + $0x81] ss:$2 sm:$0xff] }
 0x11c   : > { %v10312_v26 = vpop.eup %10311  ;;  %v704_v27 = vmul.f32 %v672_v22, %v576_v21  ;;  %v617_v28 = vmul.f32 0.70710677, %v10774_v25  ;;  %v10779_v29 = vpop.f32.mrb[27].mxu0  ;;  %8288 = vmatprep.mubr.msk.f32.mxu1 %vm10383_vm2, %v10381_v44  ;;  %v585_v8 = vmul.f32 0.5, %v10774_v25 }
 0x11d   : > { %v10314_v31 = vpop.eup %10313  ;;  %780 = vst.msk [vmem:[#allocation2 + $0xbd] sm:$0xff] %vm718_vm1, %v705_v24  ;;  %v675_v33 = vadd.f32 1.0, %v10312_v26  ;;  %v616_v34 = vmul.f32 0.70710677, %v10779_v29  ;;  %v2005_v35 = vld [vmem:[#allocation2 + $0x83] ss:$2 sm:$0xff] }
 0x11e   : > { %779 = vst.msk [vmem:[#allocation2 + $0xb5] sm:$0xff] %vm718_vm1, %v704_v27  ;;  %v674_v37 = vadd.f32 1.0, %v10314_v31  ;;  %10323 = verf.f32 %v617_v28  ;;  %7997 = vmatmul.mubr.msk.f32.gmra.mrb[48].mxu0 %vm718_vm1, %v847_v30  ;;  %v849_v50 = vld [vmem:[#allocation2 + $0x91] ss:$2 sm:$0xff]  ;;  %v584_v11 = vmul.f32 0.5, %v10779_v29 }
 0x11f   : > { %v707_v38 = vmul.f32 %v675_v33, %v579_v32  ;;  %10325 = verf.f32 %v616_v34  ;;  %8289 = vmatmul.mubr.msk.f32.gmra.mrb[14].mxu1 %vm718_vm1, %v2005_v35  ;;  %v10790_v39 = vpop.f32.mrb[28].mxu0  ;;  %7999 = vmatprep.mubr.msk.f32.mxu0 %vm10383_vm2, %v10381_v44  ;;  %v2006_v53 = vld [vmem:[#allocation2 + $0x93] ss:$2 sm:$0xff] }
 0x120   : > { %v10316_v40 = vpop.eup %10315  ;;  %v706_v41 = vmul.f32 %v674_v37, %v578_v36  ;;  %v619_v42 = vmul.f32 0.70710677, %v10790_v39  ;;  %v10795_v43 = vpop.f32.mrb[29].mxu0  ;;  %8291 = vmatprep.mubr.msk.f32.mxu1 %vm10383_vm2, %v10381_v44  ;;  %v587_v18 = vmul.f32 0.5, %v10790_v39 }
 0x121   : > { %v10318_v46 = vpop.eup %10317  ;;  %782 = vst.msk [vmem:[#allocation2 + $0xcf] sm:$0xff] %vm718_vm1, %v707_v38  ;;  %v677_v48 = vadd.f32 1.0, %v10316_v40  ;;  %v618_v49 = vmul.f32 0.70710677, %v10795_v43  ;;  %v851_v0 = vld [vmem:[#allocation2 + $0xa1] ss:$2 sm:$0xff] }
 0x122   : > { %781 = vst.msk [vmem:[#allocation2 + $0xc7] sm:$0xff] %vm718_vm1, %v706_v41  ;;  %v676_v52 = vadd.f32 1.0, %v10318_v46  ;;  %10327 = verf.f32 %v619_v42  ;;  %8000 = vmatmul.mubr.msk.f32.gmra.mrb[50].mxu0 %vm718_vm1, %v849_v50  ;;  %v2007_v3 = vld [vmem:[#allocation2 + $0xa3] ss:$2 sm:$0xff]  ;;  %v586_v21 = vmul.f32 0.5, %v10795_v43 }
 0x123   : > { %v709_v54 = vmul.f32 %v677_v48, %v581_v47  ;;  %10329 = verf.f32 %v618_v49  ;;  %8292 = vmatmul.mubr.msk.f32.gmra.mrb[16].mxu1 %vm718_vm1, %v2006_v53  ;;  %v7963_v55 = vpop.f32.mrb[30].mxu0  ;;  %8002 = vmatprep.mubr.msk.f32.mxu0 %vm10383_vm2, %v10381_v44  ;;  %v1298_v41 = vld [vmem:[%s12533_s2 + $0x40] sm:$0xff]  ;;  %v1299_v42 = vld [vmem:[%s12533_s2 + $0x48] sm:$0xff] }
 0x124   : > { %v10320_v56 = vpop.eup %10319  ;;  %v708_v57 = vmul.f32 %v676_v52, %v580_v51  ;;  %v621_v58 = vmul.f32 0.70710677, %v7963_v55  ;;  %v549_v59 = vpop.f32.mrb[31].mxu0  ;;  %8294 = vmatprep.mubr.msk.f32.mxu1 %vm10383_vm2, %v10381_v44  ;;  %v589_v25 = vmul.f32 0.5, %v7963_v55  ;;  %v793_v46 = vld [vmem:[#allocation2] ss:$2 sm:$0xff]  ;;  %v9429_v47 = vpack.c.bf16 %v1299_v42, %v1298_v41 }
 0x125   : > { %v10322_v60 = vpop.eup %10321  ;;  %784 = vst.msk [vmem:[#allocation2 + $0xe1] sm:$0xff] %vm718_vm1, %v709_v54  ;;  %v679_v62 = vadd.f32 1.0, %v10320_v56  ;;  %v620_v63 = vmul.f32 0.70710677, %v549_v59  ;;  %v853_v10 = vld [vmem:[#allocation2 + $0xb1] ss:$2 sm:$0xff] }
 0x126   : > { %783 = vst.msk [vmem:[#allocation2 + $0xd9] sm:$0xff] %vm718_vm1, %v708_v57  ;;  %v678_v2 = vadd.f32 1.0, %v10322_v60  ;;  %10331 = verf.f32 %v621_v58  ;;  %8003 = vmatmul.mubr.msk.f32.gmra.mrb[52].mxu0 %vm718_vm1, %v851_v0  ;;  %v2008_v13 = vld [vmem:[#allocation2 + $0xb3] ss:$2 sm:$0xff]  ;;  %v588_v28 = vmul.f32 0.5, %v549_v59  ;;  %v2517_v49 = vld [vmem:[%s12533_s2 + $0xe8] sm:$0xff] }
 0x127   : > { %v711_v4 = vmul.f32 %v679_v62, %v583_v61  ;;  %10333 = verf.f32 %v620_v63  ;;  %8295 = vmatmul.mubr.msk.f32.gmra.mrb[18].mxu1 %vm718_vm1, %v2007_v3  ;;  %8005 = vmatprep.mubr.msk.f32.mxu0 %vm10383_vm2, %v10381_v44  ;;  %v2516_v48 = vld [vmem:[%s12533_s2 + $0xe0] sm:$0xff]  ;;  %v1300_v51 = vld [vmem:[%s12533_s2 + $0x50] sm:$0xff]  ;;  %v1301_v52 = vld [vmem:[%s12533_s2 + $0x58] sm:$0xff] }
 0x128   : > { %v10324_v5 = vpop.eup %10323  ;;  %v710_v6 = vmul.f32 %v678_v2, %v582_v1  ;;  %8297 = vmatprep.mubr.msk.f32.mxu1 %vm10383_vm2, %v10381_v44  ;;  %v9459_v53 = vpack.c.bf16 %v2517_v49, %v2516_v48  ;;  %v795_v54 = vld [vmem:[#allocation2 + $0x10] ss:$2 sm:$0xff]  ;;  %v9432_v57 = vpack.c.bf16 %v1301_v52, %v1300_v51  ;;  %v797_v60 = vld [vmem:[#allocation2 + $0x20] ss:$2 sm:$0xff]  ;;  %v2489_v49 = vld [vmem:[#allocation2 + $0x45] ss:$2 sm:$0xff] }
 0x129   : > { %v10326_v7 = vpop.eup %10325  ;;  %786 = vst.msk [vmem:[#allocation2 + $0xf3] sm:$0xff] %vm718_vm1, %v711_v4  ;;  %v681_v9 = vadd.f32 1.0, %v10324_v5  ;;  %v855_v20 = vld [vmem:[#allocation2 + $0xc1] ss:$2 sm:$0xff]  ;;  %v2518_v55 = vld [vmem:[%s12533_s2 + $0xf0] sm:$0xff]  ;;  %v2519_v56 = vld [vmem:[%s12533_s2 + $0xf8] sm:$0xff] }
 0x12a   : > { %785 = vst.msk [vmem:[#allocation2 + $0xeb] sm:$0xff] %vm718_vm1, %v710_v6  ;;  %v680_v12 = vadd.f32 1.0, %v10326_v7  ;;  %8006 = vmatmul.mubr.msk.f32.gmra.mrb[54].mxu0 %vm718_vm1, %v853_v10  ;;  %v2009_v23 = vld [vmem:[#allocation2 + $0xc3] ss:$2 sm:$0xff]  ;;  %v2233_v58 = vld [vmem:[#allocation2 + $0x14] ss:$2 sm:$0xff]  ;;  %v9462_v59 = vpack.c.bf16 %v2519_v56, %v2518_v55 }
 0x12b   : > { %v713_v14 = vmul.f32 %v681_v9, %v585_v8  ;;  %8298 = vmatmul.mubr.msk.f32.gmra.mrb[20].mxu1 %vm718_vm1, %v2008_v13  ;;  %8008 = vmatprep.mubr.msk.f32.mxu0 %vm10383_vm2, %v10381_v44  ;;  %v2235_v61 = vld [vmem:[#allocation2 + $0x24] ss:$2 sm:$0xff]  ;;  %v2237_v63 = vld [vmem:[#allocation2 + $0x34] ss:$2 sm:$0xff]  ;;  %v2491_v51 = vld [vmem:[#allocation2 + $0x55] ss:$2 sm:$0xff] }
 0x12c   : > { %v10328_v15 = vpop.eup %10327  ;;  %v712_v16 = vmul.f32 %v680_v12, %v584_v11  ;;  %8300 = vmatprep.mubr.msk.f32.mxu1 %vm10383_vm2, %v10381_v44  ;;  %v799_v62 = vld [vmem:[#allocation2 + $0x30] ss:$2 sm:$0xff]  ;;  %v801_v0 = vld [vmem:[#allocation2 + $0x40] ss:$2 sm:$0xff]  ;;  %v2495_v55 = vld [vmem:[#allocation2 + $0x75] ss:$2 sm:$0xff] }
 0x12d   : > { %v10330_v17 = vpop.eup %10329  ;;  %788 = vst.msk [vmem:[#allocation2 + $0x105] sm:$0xff] %vm718_vm1, %v713_v14  ;;  %v683_v19 = vadd.f32 1.0, %v10328_v15  ;;  %v857_v31 = vld [vmem:[#allocation2 + $0xd1] ss:$2 sm:$0xff]  ;;  %v2239_v1 = vld [vmem:[#allocation2 + $0x44] ss:$2 sm:$0xff] }
 0x12e   : > { %787 = vst.msk [vmem:[#allocation2 + $0xfd] sm:$0xff] %vm718_vm1, %v712_v16  ;;  %v682_v22 = vadd.f32 1.0, %v10330_v17  ;;  %8009 = vmatmul.mubr.msk.f32.gmra.mrb[56].mxu0 %vm718_vm1, %v855_v20  ;;  %v2010_v33 = vld [vmem:[#allocation2 + $0xd3] ss:$2 sm:$0xff]  ;;  %v803_v2 = vld [vmem:[#allocation2 + $0x50] ss:$2 sm:$0xff] }
 0x12f   : > { %v715_v24 = vmul.f32 %v683_v19, %v587_v18  ;;  %8301 = vmatmul.mubr.msk.f32.gmra.mrb[22].mxu1 %vm718_vm1, %v2009_v23  ;;  %8011 = vmatprep.mubr.msk.f32.mxu0 %vm10383_vm2, %v10381_v44  ;;  %v2241_v3 = vld [vmem:[#allocation2 + $0x54] ss:$2 sm:$0xff]  ;;  %v2243_v5 = vld [vmem:[#allocation2 + $0x64] ss:$2 sm:$0xff] }
 0x130   : > { %v10332_v26 = vpop.eup %10331  ;;  %v714_v27 = vmul.f32 %v682_v22, %v586_v21  ;;  %8303 = vmatprep.mubr.msk.f32.mxu1 %vm10383_vm2, %v10381_v44  ;;  %v805_v4 = vld [vmem:[#allocation2 + $0x60] ss:$2 sm:$0xff]  ;;  %v807_v6 = vld [vmem:[#allocation2 + $0x70] ss:$2 sm:$0xff] }
 0x131   : > { %v10334_v29 = vpop.eup %10333  ;;  %790 = vst.msk [vmem:[#allocation2 + $0x117] sm:$0xff] %vm718_vm1, %v715_v24  ;;  %v685_v30 = vadd.f32 1.0, %v10332_v26  ;;  %v859_v36 = vld [vmem:[#allocation2 + $0xe1] ss:$2 sm:$0xff]  ;;  %v2245_v7 = vld [vmem:[#allocation2 + $0x74] ss:$2 sm:$0xff] }
 0x132   : > { %789 = vst.msk [vmem:[#allocation2 + $0x10f] sm:$0xff] %vm718_vm1, %v714_v27  ;;  %v684_v32 = vadd.f32 1.0, %v10334_v29  ;;  %8012 = vmatmul.mubr.msk.f32.gmra.mrb[58].mxu0 %vm718_vm1, %v857_v31  ;;  %v2011_v37 = vld [vmem:[#allocation2 + $0xe3] ss:$2 sm:$0xff]  ;;  %v809_v8 = vld [vmem:[#allocation2 + $0x80] ss:$2 sm:$0xff] }
 0x133   : > { %v717_v34 = vmul.f32 %v685_v30, %v589_v25  ;;  %8304 = vmatmul.mubr.msk.f32.gmra.mrb[24].mxu1 %vm718_vm1, %v2010_v33  ;;  %8014 = vmatprep.mubr.msk.f32.mxu0 %vm10383_vm2, %v10381_v44  ;;  %v2247_v9 = vld [vmem:[#allocation2 + $0x84] ss:$2 sm:$0xff]  ;;  %v2249_v11 = vld [vmem:[#allocation2 + $0x94] ss:$2 sm:$0xff] }
 0x134   : > { %v716_v35 = vmul.f32 %v684_v32, %v588_v28  ;;  %8306 = vmatprep.mubr.msk.f32.mxu1 %vm10383_vm2, %v10381_v44  ;;  %v811_v10 = vld [vmem:[#allocation2 + $0x90] ss:$2 sm:$0xff]  ;;  %v813_v12 = vld [vmem:[#allocation2 + $0xa0] ss:$2 sm:$0xff] }
 0x135   : > { %792 = vst.msk [vmem:[#allocation2 + $0x129] sm:$0xff] %vm718_vm1, %v717_v34  ;;  %v861_v38 = vld [vmem:[#allocation2 + $0xf1] ss:$2 sm:$0xff]  ;;  %v863_v40 = vld [vmem:[#allocation2 + $0x101] ss:$2 sm:$0x3f] }
 0x136   : > { %791 = vst.msk [vmem:[#allocation2 + $0x121] sm:$0xff] %vm718_vm1, %v716_v35  ;;  %8015 = vmatmul.mubr.msk.f32.gmra.mrb[60].mxu0 %vm718_vm1, %v859_v36  ;;  %v2012_v39 = vld [vmem:[#allocation2 + $0xf3] ss:$2 sm:$0xff]  ;;  %v2251_v13 = vld [vmem:[#allocation2 + $0xa4] ss:$2 sm:$0xff] }
 0x137   : > { %8307 = vmatmul.mubr.msk.f32.gmra.mrb[26].mxu1 %vm718_vm1, %v2011_v37  ;;  %8017 = vmatprep.mubr.msk.f32.mxu0 %vm10383_vm2, %v10381_v44  ;;  %v815_v14 = vld [vmem:[#allocation2 + $0xb0] ss:$2 sm:$0xff]  ;;  %v817_v16 = vld [vmem:[#allocation2 + $0xc0] ss:$2 sm:$0xff] }
 0x138   : > { %8309 = vmatprep.mubr.msk.f32.mxu1 %vm10383_vm2, %v10381_v44  ;;  %v2253_v15 = vld [vmem:[#allocation2 + $0xb4] ss:$2 sm:$0xff]  ;;  %v2255_v17 = vld [vmem:[#allocation2 + $0xc4] ss:$2 sm:$0xff] }
 0x139   : > { %v2013_v43 = vld [vmem:[#allocation2 + $0x103] ss:$2 sm:$0xff]  ;;  %v2015_v50 = vld [vmem:[#allocation2 + $0x113] ss:$2 sm:$0x3f] }
 0x13a   : > { %8018 = vmatmul.mubr.msk.f32.gmra.mrb[62].mxu0 %vm718_vm1, %v861_v38  ;;  %v819_v18 = vld [vmem:[#allocation2 + $0xd0] ss:$2 sm:$0xff]  ;;  %v821_v20 = vld [vmem:[#allocation2 + $0xe0] ss:$2 sm:$0xff] }
 0x13b   : > { %8310 = vmatmul.mubr.msk.f32.gmra.mrb[28].mxu1 %vm718_vm1, %v2012_v39  ;;  %8020 = vmatprep.mubr.msk.f32.mxu0 %vm10383_vm2, %v10381_v44  ;;  %v2257_v19 = vld [vmem:[#allocation2 + $0xd4] ss:$2 sm:$0xff]  ;;  %v2259_v21 = vld [vmem:[#allocation2 + $0xe4] ss:$2 sm:$0xff] }
 0x13c   : > { %8312 = vmatprep.mubr.msk.f32.mxu1 %vm10383_vm2, %v10381_v44  ;;  %v823_v22 = vld [vmem:[#allocation2 + $0xf0] ss:$2 sm:$0xff]  ;;  %v825_v24 = vld [vmem:[#allocation2 + $0x100] ss:$2 sm:$0x3f] }
 0x13d   : > { %v2261_v23 = vld [vmem:[#allocation2 + $0xf4] ss:$2 sm:$0xff]  ;;  %v1549_v26 = vld [vmem:[%s12533_s2 + $0x68] sm:$0xff] }
 0x13e   : > { %8021 = vmatmul.mubr.msk.f32.gmra.mrb[64].mxu0 %vm718_vm1, %v863_v40  ;;  %v1548_v25 = vld [vmem:[%s12533_s2 + $0x60] sm:$0xff]  ;;  %v2751_v31 = vld [vmem:[%s12533_s2 + $0x108] sm:$0xff]  ;;  %v2265_v32 = vld [vmem:[#allocation2 + $0x114] ss:$2 sm:$0x3f] }
 0x13f   : > { %8313 = vmatmul.mubr.msk.f32.gmra.mrb[30].mxu1 %vm718_vm1, %v2013_v43  ;;  %8031 = vmatprep.mubr.msk.f32.mxu0 %vm10383_vm2, %v10381_v44  ;;  %v2263_v27 = vld [vmem:[#allocation2 + $0x104] ss:$2 sm:$0xff]  ;;  %v9435_v29 = vpack.c.bf16 %v1549_v26, %v1548_v25  ;;  %v1551_v34 = vld [vmem:[%s12533_s2 + $0x78] sm:$0xff]  ;;  %v2485_v43 = vld [vmem:[#allocation2 + $0x25] ss:$2 sm:$0xff] }
 0x140   : > { %8315 = vmatprep.mubr.msk.f32.mxu1 %vm10383_vm2, %v10381_v44  ;;  %v1265_v28 = vld [vmem:[#allocation2 + $0x2] ss:$2 sm:$0xff]  ;;  %v1267_v36 = vld [vmem:[#allocation2 + $0x12] ss:$2 sm:$0xff]  ;;  %v2483_v40 = vld [vmem:[#allocation2 + $0x15] ss:$2 sm:$0xff] }
 0x141   : > { %v2750_v30 = vld [vmem:[%s12533_s2 + $0x100] sm:$0xff]  ;;  %v1550_v33 = vld [vmem:[%s12533_s2 + $0x70] sm:$0xff]  ;;  %v2753_v38 = vld [vmem:[%s12533_s2 + $0x118] sm:$0xff] }
 0x142   : > { %8032 = vmatmul.mubr.msk.f32.vlgmr.msra.gmra.mrb[32].mxu0 %vm718_vm1, %v793_v46  ;;  %v9465_v35 = vpack.c.bf16 %v2751_v31, %v2750_v30  ;;  %v2752_v37 = vld [vmem:[%s12533_s2 + $0x110] sm:$0xff]  ;;  %v9438_v39 = vpack.c.bf16 %v1551_v34, %v1550_v33 }
 0x143   : > { %8316 = vmatmul.mubr.msk.f32.gmra.mrb[32].mxu1 %vm718_vm1, %v2015_v50  ;;  %8034 = vmatprep.mubr.msk.f32.mxu0 %vm10383_vm2, %v10381_v44  ;;  %v9468_v41 = vpack.c.bf16 %v2753_v38, %v2752_v37  ;;  %v1269_v42 = vld [vmem:[#allocation2 + $0x22] ss:$2 sm:$0xff]  ;;  %v1271_v46 = vld [vmem:[#allocation2 + $0x32] ss:$2 sm:$0xff]  ;;  %v1519_v26 = vld [vmem:[#allocation2 + $0x23] ss:$2 sm:$0xff] }
 0x144   : > { %8326 = vmatprep.mubr.msk.f32.mxu1 %vm10383_vm2, %v10381_v44  ;;  %9430 = vmatpush3.bf16.msra.mxu0 %v9429_v47  ;;  %v2487_v47 = vld [vmem:[#allocation2 + $0x35] ss:$2 sm:$0xff]  ;;  %v1273_v48 = vld [vmem:[#allocation2 + $0x42] ss:$2 sm:$0xff]  ;;  %v1275_v50 = vld [vmem:[#allocation2 + $0x52] ss:$2 sm:$0xff] }
 0x145   : > { %9431 = vmatprep.subr.bf16.mxu0 %v10382_v45  ;;  %v1277_v52 = vld [vmem:[#allocation2 + $0x62] ss:$2 sm:$0xff]  ;;  %v1527_v38 = vld [vmem:[#allocation2 + $0x63] ss:$2 sm:$0xff] }
 0x146   : > { %8035 = vmatmul.mubr.msk.f32.gmra.mrb[66].mxu0 %vm718_vm1, %v795_v54  ;;  %v1279_v54 = vld [vmem:[#allocation2 + $0x72] ss:$2 sm:$0xff]  ;;  %v1281_v56 = vld [vmem:[#allocation2 + $0x82] ss:$2 sm:$0xff] }
 0x147   : > { %8327 = vmatmul.mubr.msk.f32.vlgmr.msra.gmra.mrb[0].mxu1 %vm718_vm1, %v2233_v58  ;;  %8037 = vmatprep.mubr.msk.f32.mxu0 %vm10383_vm2, %v10381_v44  ;;  %v1283_v58 = vld [vmem:[#allocation2 + $0x92] ss:$2 sm:$0xff] }
 0x148   : > { %9460 = vmatpush3.bf16.msra.mxu1 %v9459_v53  ;;  %8329 = vmatprep.mubr.msk.f32.mxu1 %vm10383_vm2, %v10381_v44  ;;  %v2493_v53 = vld [vmem:[#allocation2 + $0x65] ss:$2 sm:$0xff]  ;;  %v2734_v31 = vld [vmem:[#allocation2 + $0x44] ss:$2 sm:$0xff]  ;;  %v2735_v34 = vld [vmem:[#allocation2 + $0x54] ss:$2 sm:$0xff] }
 0x149   : > { %9461 = vmatprep.subr.bf16.mxu1 %v10382_v45  ;;  %9433 = vmatpush3.bf16.msra.mxu0 %v9432_v57  ;;  %v2497_v57 = vld [vmem:[#allocation2 + $0x85] ss:$2 sm:$0xff]  ;;  %v2736_v37 = vld [vmem:[#allocation2 + $0x64] ss:$2 sm:$0xff] }
 0x14a   : > { %8038 = vmatmul.mubr.msk.f32.gmra.mrb[36].mxu0 %vm718_vm1, %v797_v60  ;;  %9434 = vmatprep.subr.bf16.mxu0 %v10382_v45  ;;  %v1285_v60 = vld [vmem:[#allocation2 + $0xa2] ss:$2 sm:$0xff] }
 0x14b   : > { %8330 = vmatmul.mubr.msk.f32.gmra.mrb[34].mxu1 %vm718_vm1, %v2235_v61  ;;  %8040 = vmatprep.mubr.msk.f32.mxu0 %vm10383_vm2, %v10381_v44  ;;  %v2501_v61 = vld [vmem:[#allocation2 + $0xa5] ss:$2 sm:$0xff] }
 0x14c   : > { %8332 = vmatprep.mubr.msk.f32.mxu1 %vm10383_vm2, %v10381_v44  ;;  %9463 = vmatpush3.bf16.msra.mxu1 %v9462_v59  ;;  %v2499_v59 = vld [vmem:[#allocation2 + $0x95] ss:$2 sm:$0xff] }
 0x14d   : > { %9464 = vmatprep.subr.bf16.mxu1 %v10382_v45 }
 0x14e   : > { %8041 = vmatmul.mubr.msk.f32.gmra.mrb[38].mxu0 %vm718_vm1, %v799_v62  ;;  %v1287_v62 = vld [vmem:[#allocation2 + $0xb2] ss:$2 sm:$0xff] }
 0x14f   : > { %8333 = vmatmul.mubr.msk.f32.gmra.mrb[4].mxu1 %vm718_vm1, %v2237_v63  ;;  %8043 = vmatprep.mubr.msk.f32.mxu0 %vm10383_vm2, %v10381_v44  ;;  %v2503_v63 = vld [vmem:[#allocation2 + $0xb5] ss:$2 sm:$0xff] }
 0x150   : > { %8335 = vmatprep.mubr.msk.f32.mxu1 %vm10383_vm2, %v10381_v44 }
 0x152   : > { %8044 = vmatmul.mubr.msk.f32.gmra.mrb[40].mxu0 %vm718_vm1, %v801_v0  ;;  %v1289_v0 = vld [vmem:[#allocation2 + $0xc2] ss:$2 sm:$0xff] }
 0x153   : > { %8336 = vmatmul.mubr.msk.f32.gmra.mrb[6].mxu1 %vm718_vm1, %v2239_v1  ;;  %8046 = vmatprep.mubr.msk.f32.mxu0 %vm10383_vm2, %v10381_v44  ;;  %v2505_v1 = vld [vmem:[#allocation2 + $0xc5] ss:$2 sm:$0xff] }
 0x154   : > { %8338 = vmatprep.mubr.msk.f32.mxu1 %vm10383_vm2, %v10381_v44 }
 0x156   : > { %8047 = vmatmul.mubr.msk.f32.gmra.mrb[42].mxu0 %vm718_vm1, %v803_v2  ;;  %v1291_v2 = vld [vmem:[#allocation2 + $0xd2] ss:$2 sm:$0xff] }
 0x157   : > { %8339 = vmatmul.mubr.msk.f32.gmra.mrb[8].mxu1 %vm718_vm1, %v2241_v3  ;;  %8049 = vmatprep.mubr.msk.f32.mxu0 %vm10383_vm2, %v10381_v44  ;;  %v2507_v3 = vld [vmem:[#allocation2 + $0xd5] ss:$2 sm:$0xff] }
 0x158   : > { %8341 = vmatprep.mubr.msk.f32.mxu1 %vm10383_vm2, %v10381_v44 }
 0x15a   : > { %8050 = vmatmul.mubr.msk.f32.gmra.mrb[44].mxu0 %vm718_vm1, %v805_v4  ;;  %v1293_v4 = vld [vmem:[#allocation2 + $0xe2] ss:$2 sm:$0xff] }
 0x15b   : > { %8342 = vmatmul.mubr.msk.f32.gmra.mrb[10].mxu1 %vm718_vm1, %v2243_v5  ;;  %8052 = vmatprep.mubr.msk.f32.mxu0 %vm10383_vm2, %v10381_v44  ;;  %v2509_v5 = vld [vmem:[#allocation2 + $0xe5] ss:$2 sm:$0xff] }
 0x15c   : > { %8344 = vmatprep.mubr.msk.f32.mxu1 %vm10383_vm2, %v10381_v44 }
 0x15e   : > { %8053 = vmatmul.mubr.msk.f32.gmra.mrb[46].mxu0 %vm718_vm1, %v807_v6  ;;  %v1295_v6 = vld [vmem:[#allocation2 + $0xf2] ss:$2 sm:$0xff] }
 0x15f   : > { %8345 = vmatmul.mubr.msk.f32.gmra.mrb[12].mxu1 %vm718_vm1, %v2245_v7  ;;  %8055 = vmatprep.mubr.msk.f32.mxu0 %vm10383_vm2, %v10381_v44  ;;  %v2511_v7 = vld [vmem:[#allocation2 + $0xf5] ss:$2 sm:$0xff] }
 0x160   : > { %8347 = vmatprep.mubr.msk.f32.mxu1 %vm10383_vm2, %v10381_v44 }
 0x162   : > { %8056 = vmatmul.mubr.msk.f32.gmra.mrb[68].mxu0 %vm718_vm1, %v809_v8  ;;  %v1297_v8 = vld [vmem:[#allocation2 + $0x102] ss:$2 sm:$0x3f] }
 0x163   : > { %8348 = vmatmul.mubr.msk.f32.gmra.mrb[14].mxu1 %vm718_vm1, %v2247_v9  ;;  %8058 = vmatprep.mubr.msk.f32.mxu0 %vm10383_vm2, %v10381_v44  ;;  %v1782_v9 = vld [vmem:[%s12533_s2 + $0x80] sm:$0xff] }
 0x164   : > { %8350 = vmatprep.mubr.msk.f32.mxu1 %vm10383_vm2, %v10381_v44 }
 0x166   : > { %8059 = vmatmul.mubr.msk.f32.gmra.mrb[50].mxu0 %vm718_vm1, %v811_v10  ;;  %v1783_v10 = vld [vmem:[%s12533_s2 + $0x88] sm:$0xff] }
 0x167   : > { %8351 = vmatmul.mubr.msk.f32.gmra.mrb[36].mxu1 %vm718_vm1, %v2249_v11  ;;  %8061 = vmatprep.mubr.msk.f32.mxu0 %vm10383_vm2, %v10381_v44  ;;  %v2513_v11 = vld [vmem:[#allocation2 + $0x105] ss:$2 sm:$0xff] }
 0x168   : > { %8353 = vmatprep.mubr.msk.f32.mxu1 %vm10383_vm2, %v10381_v44 }
 0x16a   : > { %8062 = vmatmul.mubr.msk.f32.gmra.mrb[70].mxu0 %vm718_vm1, %v813_v12  ;;  %v1515_v12 = vld [vmem:[#allocation2 + $0x3] ss:$2 sm:$0xff] }
 0x16b   : > { %8354 = vmatmul.mubr.msk.f32.gmra.mrb[18].mxu1 %vm718_vm1, %v2251_v13  ;;  %8064 = vmatprep.mubr.msk.f32.mxu0 %vm10383_vm2, %v10381_v44  ;;  %v9441_v13 = vpack.c.bf16 %v1783_v10, %v1782_v9  ;;  %v2749_v9 = vld [vmem:[#allocation2 + $0x124] ss:$2 sm:$0x3f] }
 0x16c   : > { %8356 = vmatprep.mubr.msk.f32.mxu1 %vm10383_vm2, %v10381_v44 }
 0x16e   : > { %8065 = vmatmul.mubr.msk.f32.gmra.mrb[54].mxu0 %vm718_vm1, %v815_v14  ;;  %v2984_v14 = vld [vmem:[%s12533_s2 + $0x120] sm:$0xff] }
 0x16f   : > { %8357 = vmatmul.mubr.msk.f32.gmra.mrb[38].mxu1 %vm718_vm1, %v2253_v15  ;;  %8067 = vmatprep.mubr.msk.f32.mxu0 %vm10383_vm2, %v10381_v44  ;;  %v2985_v15 = vld [vmem:[%s12533_s2 + $0x128] sm:$0xff] }
 0x170   : > { %8359 = vmatprep.mubr.msk.f32.mxu1 %vm10383_vm2, %v10381_v44 }
 0x172   : > { %8068 = vmatmul.mubr.msk.f32.gmra.mrb[56].mxu0 %vm718_vm1, %v817_v16  ;;  %v2515_v16 = vld [vmem:[#allocation2 + $0x115] ss:$2 sm:$0x3f] }
 0x173   : > { %8360 = vmatmul.mubr.msk.f32.gmra.mrb[22].mxu1 %vm718_vm1, %v2255_v17  ;;  %8070 = vmatprep.mubr.msk.f32.mxu0 %vm10383_vm2, %v10381_v44  ;;  %v1784_v17 = vld [vmem:[%s12533_s2 + $0x90] sm:$0xff] }
 0x174   : > { %8362 = vmatprep.mubr.msk.f32.mxu1 %vm10383_vm2, %v10381_v44 }
 0x176   : > { %8071 = vmatmul.mubr.msk.f32.gmra.mrb[58].mxu0 %vm718_vm1, %v819_v18  ;;  %v1785_v18 = vld [vmem:[%s12533_s2 + $0x98] sm:$0xff] }
 0x177   : > { %8363 = vmatmul.mubr.msk.f32.gmra.mrb[24].mxu1 %vm718_vm1, %v2257_v19  ;;  %8073 = vmatprep.mubr.msk.f32.mxu0 %vm10383_vm2, %v10381_v44  ;;  %v9471_v19 = vpack.c.bf16 %v2985_v15, %v2984_v14  ;;  %v2966_v14 = vld [vmem:[#allocation2 + $0x25] ss:$2 sm:$0xff] }
 0x178   : > { %8365 = vmatprep.mubr.msk.f32.mxu1 %vm10383_vm2, %v10381_v44 }
 0x17a   : > { %8074 = vmatmul.mubr.msk.f32.gmra.mrb[60].mxu0 %vm718_vm1, %v821_v20  ;;  %v1517_v20 = vld [vmem:[#allocation2 + $0x13] ss:$2 sm:$0xff] }
 0x17b   : > { %8366 = vmatmul.mubr.msk.f32.gmra.mrb[26].mxu1 %vm718_vm1, %v2259_v21  ;;  %8076 = vmatprep.mubr.msk.f32.mxu0 %vm10383_vm2, %v10381_v44  ;;  %v2986_v21 = vld [vmem:[%s12533_s2 + $0x130] sm:$0xff] }
 0x17c   : > { %8368 = vmatprep.mubr.msk.f32.mxu1 %vm10383_vm2, %v10381_v44 }
 0x17e   : > { %8077 = vmatmul.mubr.msk.f32.gmra.mrb[62].mxu0 %vm718_vm1, %v823_v22  ;;  %v2987_v22 = vld [vmem:[%s12533_s2 + $0x138] sm:$0xff] }
 0x17f   : > { %8369 = vmatmul.mubr.msk.f32.gmra.mrb[28].mxu1 %vm718_vm1, %v2261_v23  ;;  %8079 = vmatprep.mubr.msk.f32.mxu0 %vm10383_vm2, %v10381_v44  ;;  %v9444_v23 = vpack.c.bf16 %v1785_v18, %v1784_v17  ;;  %v9474_v25 = vpack.c.bf16 %v2987_v22, %v2986_v21  ;;  %v2967_v17 = vld [vmem:[#allocation2 + $0x35] ss:$2 sm:$0xff]  ;;  %v2968_v21 = vld [vmem:[#allocation2 + $0x45] ss:$2 sm:$0xff]  ;;  %v1768_v22 = vld [vmem:[#allocation2 + $0x52] ss:$2 sm:$0xff] }
 0x180   : > { %8371 = vmatprep.mubr.msk.f32.mxu1 %vm10383_vm2, %v10381_v44 }
 0x182   : > { %8080 = vmatmul.mubr.msk.f32.gmra.mrb[64].mxu0 %vm718_vm1, %v825_v24  ;;  %v2732_v24 = vld [vmem:[#allocation2 + $0x24] ss:$2 sm:$0xff] }
 0x183   : > { %8372 = vmatmul.mubr.msk.f32.gmra.mrb[30].mxu1 %vm718_vm1, %v2263_v27  ;;  %8090 = vmatprep.mubr.msk.f32.mxu0 %vm10383_vm2, %v10381_v44  ;;  %v2733_v27 = vld [vmem:[#allocation2 + $0x34] ss:$2 sm:$0xff] }
 0x184   : > { %8374 = vmatprep.mubr.msk.f32.mxu1 %vm10383_vm2, %v10381_v44 }
 0x186   : > { %8091 = vmatmul.mubr.msk.f32.vlgmr.msra.gmra.mrb[32].mxu0 %vm718_vm1, %v1265_v28 }
 0x187   : > { %8375 = vmatmul.mubr.msk.f32.gmra.mrb[32].mxu1 %vm718_vm1, %v2265_v32  ;;  %8093 = vmatprep.mubr.msk.f32.mxu0 %vm10383_vm2, %v10381_v44  ;;  %v1523_v32 = vld [vmem:[#allocation2 + $0x43] ss:$2 sm:$0xff] }
 0x188   : > { %8385 = vmatprep.mubr.msk.f32.mxu1 %vm10383_vm2, %v10381_v44  ;;  %9436 = vmatpush3.bf16.msra.mxu0 %v9435_v29  ;;  %v1521_v29 = vld [vmem:[#allocation2 + $0x33] ss:$2 sm:$0xff] }
 0x189   : > { %9437 = vmatprep.subr.bf16.mxu0 %v10382_v45 }
 0x18a   : > { %8094 = vmatmul.mubr.msk.f32.gmra.mrb[72].mxu0 %vm718_vm1, %v1267_v36  ;;  %v1525_v36 = vld [vmem:[#allocation2 + $0x53] ss:$2 sm:$0xff] }
 0x18b   : > { %8386 = vmatmul.mubr.msk.f32.vlgmr.msra.gmra.mrb[0].mxu1 %vm718_vm1, %v2483_v40  ;;  %8096 = vmatprep.mubr.msk.f32.mxu0 %vm10383_vm2, %v10381_v44  ;;  %v1529_v40 = vld [vmem:[#allocation2 + $0x73] ss:$2 sm:$0xff] }
 0x18c   : > { %9466 = vmatpush3.bf16.msra.mxu1 %v9465_v35  ;;  %8388 = vmatprep.mubr.msk.f32.mxu1 %vm10383_vm2, %v10381_v44 }
 0x18d   : > { %9467 = vmatprep.subr.bf16.mxu1 %v10382_v45  ;;  %9439 = vmatpush3.bf16.msra.mxu0 %v9438_v39  ;;  %v2737_v39 = vld [vmem:[#allocation2 + $0x74] ss:$2 sm:$0xff] }
 0x18e   : > { %8097 = vmatmul.mubr.msk.f32.gmra.mrb[36].mxu0 %vm718_vm1, %v1269_v42  ;;  %9440 = vmatprep.subr.bf16.mxu0 %v10382_v45  ;;  %v1531_v42 = vld [vmem:[#allocation2 + $0x83] ss:$2 sm:$0xff] }
 0x18f   : > { %8389 = vmatmul.mubr.msk.f32.gmra.mrb[40].mxu1 %vm718_vm1, %v2485_v43  ;;  %8099 = vmatprep.mubr.msk.f32.mxu0 %vm10383_vm2, %v10381_v44  ;;  %v2739_v43 = vld [vmem:[#allocation2 + $0x94] ss:$2 sm:$0xff] }
 0x190   : > { %8391 = vmatprep.mubr.msk.f32.mxu1 %vm10383_vm2, %v10381_v44  ;;  %9469 = vmatpush3.bf16.msra.mxu1 %v9468_v41  ;;  %v2738_v41 = vld [vmem:[#allocation2 + $0x84] ss:$2 sm:$0xff] }
 0x191   : > { %9470 = vmatprep.subr.bf16.mxu1 %v10382_v45 }
 0x192   : > { %8100 = vmatmul.mubr.msk.f32.gmra.mrb[38].mxu0 %vm718_vm1, %v1271_v46  ;;  %v1533_v46 = vld [vmem:[#allocation2 + $0x93] ss:$2 sm:$0xff] }
 0x193   : > { %8392 = vmatmul.mubr.msk.f32.gmra.mrb[4].mxu1 %vm718_vm1, %v2487_v47  ;;  %8102 = vmatprep.mubr.msk.f32.mxu0 %vm10383_vm2, %v10381_v44  ;;  %v2740_v47 = vld [vmem:[#allocation2 + $0xa4] ss:$2 sm:$0xff] }
 0x194   : > { %8394 = vmatprep.mubr.msk.f32.mxu1 %vm10383_vm2, %v10381_v44 }
 0x196   : > { %8103 = vmatmul.mubr.msk.f32.gmra.mrb[40].mxu0 %vm718_vm1, %v1273_v48 }
 0x197   : > { %8395 = vmatmul.mubr.msk.f32.gmra.mrb[6].mxu1 %vm718_vm1, %v2489_v49  ;;  %8105 = vmatprep.mubr.msk.f32.mxu0 %vm10383_vm2, %v10381_v44  ;;  %v1535_v49 = vld [vmem:[#allocation2 + $0xa3] ss:$2 sm:$0xff] }
 0x198   : > { %8397 = vmatprep.mubr.msk.f32.mxu1 %vm10383_vm2, %v10381_v44 }
 0x19a   : > { %8106 = vmatmul.mubr.msk.f32.gmra.mrb[42].mxu0 %vm718_vm1, %v1275_v50 }
 0x19b   : > { %8398 = vmatmul.mubr.msk.f32.gmra.mrb[8].mxu1 %vm718_vm1, %v2491_v51  ;;  %8108 = vmatprep.mubr.msk.f32.mxu0 %vm10383_vm2, %v10381_v44  ;;  %v2741_v51 = vld [vmem:[#allocation2 + $0xb4] ss:$2 sm:$0xff] }
 0x19c   : > { %8400 = vmatprep.mubr.msk.f32.mxu1 %vm10383_vm2, %v10381_v44 }
 0x19e   : > { %8109 = vmatmul.mubr.msk.f32.gmra.mrb[44].mxu0 %vm718_vm1, %v1277_v52  ;;  %v1537_v52 = vld [vmem:[#allocation2 + $0xb3] ss:$2 sm:$0xff] }
 0x19f   : > { %8401 = vmatmul.mubr.msk.f32.gmra.mrb[10].mxu1 %vm718_vm1, %v2493_v53  ;;  %8111 = vmatprep.mubr.msk.f32.mxu0 %vm10383_vm2, %v10381_v44 }
 0x1a0   : > { %8403 = vmatprep.mubr.msk.f32.mxu1 %vm10383_vm2, %v10381_v44 }
 0x1a2   : > { %8112 = vmatmul.mubr.msk.f32.gmra.mrb[46].mxu0 %vm718_vm1, %v1279_v54  ;;  %v2742_v54 = vld [vmem:[#allocation2 + $0xc4] ss:$2 sm:$0xff] }
 0x1a3   : > { %8404 = vmatmul.mubr.msk.f32.gmra.mrb[12].mxu1 %vm718_vm1, %v2495_v55  ;;  %8114 = vmatprep.mubr.msk.f32.mxu0 %vm10383_vm2, %v10381_v44 }
 0x1a4   : > { %8406 = vmatprep.mubr.msk.f32.mxu1 %vm10383_vm2, %v10381_v44 }
 0x1a6   : > { %8115 = vmatmul.mubr.msk.f32.gmra.mrb[74].mxu0 %vm718_vm1, %v1281_v56 }
 0x1a7   : > { %8407 = vmatmul.mubr.msk.f32.gmra.mrb[14].mxu1 %vm718_vm1, %v2497_v57  ;;  %8117 = vmatprep.mubr.msk.f32.mxu0 %vm10383_vm2, %v10381_v44  ;;  %v1539_v57 = vld [vmem:[#allocation2 + $0xc3] ss:$2 sm:$0xff] }
 0x1a8   : > { %8409 = vmatprep.mubr.msk.f32.mxu1 %vm10383_vm2, %v10381_v44 }
 0x1aa   : > { %8118 = vmatmul.mubr.msk.f32.gmra.mrb[50].mxu0 %vm718_vm1, %v1283_v58 }
 0x1ab   : > { %8410 = vmatmul.mubr.msk.f32.gmra.mrb[42].mxu1 %vm718_vm1, %v2499_v59  ;;  %8120 = vmatprep.mubr.msk.f32.mxu0 %vm10383_vm2, %v10381_v44  ;;  %v2743_v59 = vld [vmem:[#allocation2 + $0xd4] ss:$2 sm:$0xff] }
 0x1ac   : > { %8412 = vmatprep.mubr.msk.f32.mxu1 %vm10383_vm2, %v10381_v44 }
 0x1ae   : > { %8121 = vmatmul.mubr.msk.f32.gmra.mrb[76].mxu0 %vm718_vm1, %v1285_v60  ;;  %v1541_v60 = vld [vmem:[#allocation2 + $0xd3] ss:$2 sm:$0xff] }
 0x1af   : > { %8413 = vmatmul.mubr.msk.f32.gmra.mrb[18].mxu1 %vm718_vm1, %v2501_v61  ;;  %8123 = vmatprep.mubr.msk.f32.mxu0 %vm10383_vm2, %v10381_v44 }
 0x1b0   : > { %8415 = vmatprep.mubr.msk.f32.mxu1 %vm10383_vm2, %v10381_v44 }
 0x1b2   : > { %8124 = vmatmul.mubr.msk.f32.gmra.mrb[54].mxu0 %vm718_vm1, %v1287_v62  ;;  %v2744_v62 = vld [vmem:[#allocation2 + $0xe4] ss:$2 sm:$0xff] }
 0x1b3   : > { %8416 = vmatmul.mubr.msk.f32.gmra.mrb[44].mxu1 %vm718_vm1, %v2503_v63  ;;  %8126 = vmatprep.mubr.msk.f32.mxu0 %vm10383_vm2, %v10381_v44 }
 0x1b4   : > { %8418 = vmatprep.mubr.msk.f32.mxu1 %vm10383_vm2, %v10381_v44 }
 0x1b6   : > { %8127 = vmatmul.mubr.msk.f32.gmra.mrb[56].mxu0 %vm718_vm1, %v1289_v0  ;;  %v1543_v0 = vld [vmem:[#allocation2 + $0xe3] ss:$2 sm:$0xff] }
 0x1b7   : > { %8419 = vmatmul.mubr.msk.f32.gmra.mrb[22].mxu1 %vm718_vm1, %v2505_v1  ;;  %8129 = vmatprep.mubr.msk.f32.mxu0 %vm10383_vm2, %v10381_v44  ;;  %v2745_v1 = vld [vmem:[#allocation2 + $0xf4] ss:$2 sm:$0xff] }
 0x1b8   : > { %8421 = vmatprep.mubr.msk.f32.mxu1 %vm10383_vm2, %v10381_v44 }
 0x1ba   : > { %8130 = vmatmul.mubr.msk.f32.gmra.mrb[58].mxu0 %vm718_vm1, %v1291_v2  ;;  %v1545_v2 = vld [vmem:[#allocation2 + $0xf3] ss:$2 sm:$0xff] }
 0x1bb   : > { %8422 = vmatmul.mubr.msk.f32.gmra.mrb[24].mxu1 %vm718_vm1, %v2507_v3  ;;  %8132 = vmatprep.mubr.msk.f32.mxu0 %vm10383_vm2, %v10381_v44  ;;  %v2746_v3 = vld [vmem:[#allocation2 + $0x104] ss:$2 sm:$0xff] }
 0x1bc   : > { %8424 = vmatprep.mubr.msk.f32.mxu1 %vm10383_vm2, %v10381_v44 }
 0x1be   : > { %8133 = vmatmul.mubr.msk.f32.gmra.mrb[60].mxu0 %vm718_vm1, %v1293_v4  ;;  %v1547_v4 = vld [vmem:[#allocation2 + $0x103] ss:$2 sm:$0x3f] }
 0x1bf   : > { %8425 = vmatmul.mubr.msk.f32.gmra.mrb[26].mxu1 %vm718_vm1, %v2509_v5  ;;  %8135 = vmatprep.mubr.msk.f32.mxu0 %vm10383_vm2, %v10381_v44  ;;  %v2747_v5 = vld [vmem:[#allocation2 + $0x114] ss:$2 sm:$0xff] }
 0x1c0   : > { %8427 = vmatprep.mubr.msk.f32.mxu1 %vm10383_vm2, %v10381_v44 }
 0x1c2   : > { %8136 = vmatmul.mubr.msk.f32.gmra.mrb[62].mxu0 %vm718_vm1, %v1295_v6  ;;  %v1764_v6 = vld [vmem:[#allocation2 + $0x12] ss:$2 sm:$0xff] }
 0x1c3   : > { %8428 = vmatmul.mubr.msk.f32.gmra.mrb[28].mxu1 %vm718_vm1, %v2511_v7  ;;  %8138 = vmatprep.mubr.msk.f32.mxu0 %vm10383_vm2, %v10381_v44  ;;  %v3234_v7 = vld [vmem:[%s12533_s2 + $0x140] sm:$0xff] }
 0x1c4   : > { %8430 = vmatprep.mubr.msk.f32.mxu1 %vm10383_vm2, %v10381_v44 }
 0x1c6   : > { %8139 = vmatmul.mubr.msk.f32.gmra.mrb[64].mxu0 %vm718_vm1, %v1297_v8  ;;  %v3235_v8 = vld [vmem:[%s12533_s2 + $0x148] sm:$0xff] }
 0x1c7   : > { %8431 = vmatmul.mubr.msk.f32.gmra.mrb[30].mxu1 %vm718_vm1, %v2513_v11  ;;  %8149 = vmatprep.mubr.msk.f32.mxu0 %vm10383_vm2, %v10381_v44  ;;  %v9477_v10 = vpack.c.bf16 %v3235_v8, %v3234_v7  ;;  %v1765_v11 = vld [vmem:[#allocation2 + $0x22] ss:$2 sm:$0xff] }
 0x1c8   : > { %8433 = vmatprep.mubr.msk.f32.mxu1 %vm10383_vm2, %v10381_v44  ;;  %v3205_v7 = vld [vmem:[#allocation2 + $0x46] ss:$2 sm:$0xff] }
 0x1ca   : > { %8150 = vmatmul.mubr.msk.f32.vlgmr.msra.gmra.mrb[32].mxu0 %vm718_vm1, %v1515_v12  ;;  %v3236_v12 = vld [vmem:[%s12533_s2 + $0x150] sm:$0xff] }
 0x1cb   : > { %8434 = vmatmul.mubr.msk.f32.gmra.mrb[32].mxu1 %vm718_vm1, %v2515_v16  ;;  %8152 = vmatprep.mubr.msk.f32.mxu0 %vm10383_vm2, %v10381_v44  ;;  %v1766_v16 = vld [vmem:[#allocation2 + $0x32] ss:$2 sm:$0xff] }
 0x1cc   : > { %8444 = vmatprep.mubr.msk.f32.mxu1 %vm10383_vm2, %v10381_v44  ;;  %9442 = vmatpush3.bf16.msra.mxu0 %v9441_v13  ;;  %v3237_v13 = vld [vmem:[%s12533_s2 + $0x158] sm:$0xff] }
 0x1cd   : > { %9443 = vmatprep.subr.bf16.mxu0 %v10382_v45  ;;  %v9480_v15 = vpack.c.bf16 %v3237_v13, %v3236_v12  ;;  %v3211_v12 = vld [vmem:[#allocation2 + $0x76] ss:$2 sm:$0xff]  ;;  %v3213_v13 = vld [vmem:[#allocation2 + $0x86] ss:$2 sm:$0xff] }
 0x1ce   : > { %8153 = vmatmul.mubr.msk.f32.gmra.mrb[78].mxu0 %vm718_vm1, %v1517_v20 }
 0x1cf   : > { %8445 = vmatmul.mubr.msk.f32.vlgmr.msra.gmra.mrb[0].mxu1 %vm718_vm1, %v2732_v24  ;;  %8155 = vmatprep.mubr.msk.f32.mxu0 %vm10383_vm2, %v10381_v44  ;;  %v2969_v24 = vld [vmem:[#allocation2 + $0x55] ss:$2 sm:$0xff] }
 0x1d0   : > { %9472 = vmatpush3.bf16.msra.mxu1 %v9471_v19  ;;  %8447 = vmatprep.mubr.msk.f32.mxu1 %vm10383_vm2, %v10381_v44  ;;  %v1767_v19 = vld [vmem:[#allocation2 + $0x42] ss:$2 sm:$0xff] }
 0x1d1   : > { %9473 = vmatprep.subr.bf16.mxu1 %v10382_v45  ;;  %9445 = vmatpush3.bf16.msra.mxu0 %v9444_v23 }
 0x1d2   : > { %8156 = vmatmul.mubr.msk.f32.gmra.mrb[36].mxu0 %vm718_vm1, %v1519_v26  ;;  %9512 = vmatprep.subr.bf16.mxu0 %v10382_v45  ;;  %v1769_v26 = vld [vmem:[#allocation2 + $0x62] ss:$2 sm:$0xff] }
 0x1d3   : > { %8448 = vmatmul.mubr.msk.f32.gmra.mrb[46].mxu1 %vm718_vm1, %v2733_v27  ;;  %8158 = vmatprep.mubr.msk.f32.mxu0 %vm10383_vm2, %v10381_v44  ;;  %v2970_v27 = vld [vmem:[#allocation2 + $0x65] ss:$2 sm:$0xff] }
 0x1d4   : > { %8450 = vmatprep.mubr.msk.f32.mxu1 %vm10383_vm2, %v10381_v44  ;;  %9475 = vmatpush3.bf16.msra.mxu1 %v9474_v25 }
 0x1d5   : > { %v990_v28 = vpop.f32.mrb[34].mxu0  ;;  %9476 = vmatprep.subr.bf16.mxu1 %v10382_v45 }
 0x1d6   : > { %v7977_v30 = vpop.f32.mrb[35].mxu0  ;;  %8159 = vmatmul.mubr.msk.f32.gmra.mrb[38].mxu0 %vm718_vm1, %v1521_v29  ;;  %v1770_v28 = vld [vmem:[#allocation2 + $0x72] ss:$2 sm:$0xff]  ;;  %v2971_v29 = vld [vmem:[#allocation2 + $0x75] ss:$2 sm:$0xff] }
 0x1d7   : > { %8451 = vmatmul.mubr.msk.f32.gmra.mrb[4].mxu1 %vm718_vm1, %v2734_v31  ;;  %8161 = vmatprep.mubr.msk.f32.mxu0 %vm10383_vm2, %v10381_v44  ;;  %v1771_v30 = vld [vmem:[#allocation2 + $0x82] ss:$2 sm:$0xff]  ;;  %v2972_v31 = vld [vmem:[#allocation2 + $0x85] ss:$2 sm:$0xff] }
 0x1d8   : > { %8453 = vmatprep.mubr.msk.f32.mxu1 %vm10383_vm2, %v10381_v44 }
 0x1da   : > { %v2142_v33 = vpop.f32.mrb[2].mxu1  ;;  %8162 = vmatmul.mubr.msk.f32.gmra.mrb[40].mxu0 %vm718_vm1, %v1523_v32  ;;  %v1772_v32 = vld [vmem:[#allocation2 + $0x92] ss:$2 sm:$0xff] }
 0x1db   : > { %v8272_v35 = vpop.f32.mrb[3].mxu1  ;;  %8454 = vmatmul.mubr.msk.f32.gmra.mrb[6].mxu1 %vm718_vm1, %v2735_v34  ;;  %8164 = vmatprep.mubr.msk.f32.mxu0 %vm10383_vm2, %v10381_v44  ;;  %v2973_v33 = vld [vmem:[#allocation2 + $0x95] ss:$2 sm:$0xff]  ;;  %v1773_v34 = vld [vmem:[#allocation2 + $0xa2] ss:$2 sm:$0xff] }
 0x1dc   : > { %8456 = vmatprep.mubr.msk.f32.mxu1 %vm10383_vm2, %v10381_v44  ;;  %v2974_v35 = vld [vmem:[#allocation2 + $0xa5] ss:$2 sm:$0xff] }
 0x1de   : > { %8165 = vmatmul.mubr.msk.f32.gmra.mrb[42].mxu0 %vm718_vm1, %v1525_v36 }
 0x1df   : > { %8457 = vmatmul.mubr.msk.f32.gmra.mrb[8].mxu1 %vm718_vm1, %v2736_v37  ;;  %8167 = vmatprep.mubr.msk.f32.mxu0 %vm10383_vm2, %v10381_v44  ;;  %v1774_v37 = vld [vmem:[#allocation2 + $0xb2] ss:$2 sm:$0xff] }
 0x1e0   : > { %8459 = vmatprep.mubr.msk.f32.mxu1 %vm10383_vm2, %v10381_v44 }
 0x1e2   : > { %8168 = vmatmul.mubr.msk.f32.gmra.mrb[44].mxu0 %vm718_vm1, %v1527_v38 }
 0x1e3   : > { %8460 = vmatmul.mubr.msk.f32.gmra.mrb[10].mxu1 %vm718_vm1, %v2737_v39  ;;  %8170 = vmatprep.mubr.msk.f32.mxu0 %vm10383_vm2, %v10381_v44  ;;  %v2975_v39 = vld [vmem:[#allocation2 + $0xb5] ss:$2 sm:$0xff] }
 0x1e4   : > { %8462 = vmatprep.mubr.msk.f32.mxu1 %vm10383_vm2, %v10381_v44 }
 0x1e6   : > { %8171 = vmatmul.mubr.msk.f32.gmra.mrb[46].mxu0 %vm718_vm1, %v1529_v40  ;;  %v1775_v40 = vld [vmem:[#allocation2 + $0xc2] ss:$2 sm:$0xff] }
 0x1e7   : > { %8463 = vmatmul.mubr.msk.f32.gmra.mrb[12].mxu1 %vm718_vm1, %v2738_v41  ;;  %8173 = vmatprep.mubr.msk.f32.mxu0 %vm10383_vm2, %v10381_v44 }
 0x1e8   : > { %8465 = vmatprep.mubr.msk.f32.mxu1 %vm10383_vm2, %v10381_v44 }
 0x1ea   : > { %8174 = vmatmul.mubr.msk.f32.gmra.mrb[80].mxu0 %vm718_vm1, %v1531_v42  ;;  %v2976_v42 = vld [vmem:[#allocation2 + $0xc5] ss:$2 sm:$0xff] }
 0x1eb   : > { %8466 = vmatmul.mubr.msk.f32.gmra.mrb[14].mxu1 %vm718_vm1, %v2739_v43  ;;  %8176 = vmatprep.mubr.msk.f32.mxu0 %vm10383_vm2, %v10381_v44 }
 0x1ec   : > { %8468 = vmatprep.mubr.msk.f32.mxu1 %vm10383_vm2, %v10381_v44 }
 0x1ee   : > { %8177 = vmatmul.mubr.msk.f32.gmra.mrb[50].mxu0 %vm718_vm1, %v1533_v46 }
 0x1ef   : > { %8469 = vmatmul.mubr.msk.f32.gmra.mrb[48].mxu1 %vm718_vm1, %v2740_v47  ;;  %8179 = vmatprep.mubr.msk.f32.mxu0 %vm10383_vm2, %v10381_v44  ;;  %v1776_v47 = vld [vmem:[#allocation2 + $0xd2] ss:$2 sm:$0xff] }
 0x1f0   : > { %8471 = vmatprep.mubr.msk.f32.mxu1 %vm10383_vm2, %v10381_v44 }
 0x1f1   : > { %v1024_v48 = vpop.f32.mrb[48].mxu0 }
 0x1f2   : > { %v7998_v50 = vpop.f32.mrb[49].mxu0  ;;  %8180 = vmatmul.mubr.msk.f32.gmra.mrb[82].mxu0 %vm718_vm1, %v1535_v49  ;;  %v2977_v49 = vld [vmem:[#allocation2 + $0xd5] ss:$2 sm:$0xff] }
 0x1f3   : > { %8472 = vmatmul.mubr.msk.f32.gmra.mrb[18].mxu1 %vm718_vm1, %v2741_v51  ;;  %8182 = vmatprep.mubr.msk.f32.mxu0 %vm10383_vm2, %v10381_v44  ;;  %v1777_v50 = vld [vmem:[#allocation2 + $0xe2] ss:$2 sm:$0xff] }
 0x1f4   : > { %8474 = vmatprep.mubr.msk.f32.mxu1 %vm10383_vm2, %v10381_v44 }
 0x1f6   : > { %v2176_v53 = vpop.f32.mrb[16].mxu1  ;;  %8183 = vmatmul.mubr.msk.f32.gmra.mrb[54].mxu0 %vm718_vm1, %v1537_v52  ;;  %v2978_v52 = vld [vmem:[#allocation2 + $0xe5] ss:$2 sm:$0xff] }
 0x1f7   : > { %v8293_v55 = vpop.f32.mrb[17].mxu1  ;;  %8475 = vmatmul.mubr.msk.f32.gmra.mrb[50].mxu1 %vm718_vm1, %v2742_v54  ;;  %8185 = vmatprep.mubr.msk.f32.mxu0 %vm10383_vm2, %v10381_v44  ;;  %v1778_v54 = vld [vmem:[#allocation2 + $0xf2] ss:$2 sm:$0xff] }
 0x1f8   : > { %8477 = vmatprep.mubr.msk.f32.mxu1 %vm10383_vm2, %v10381_v44  ;;  %v2979_v55 = vld [vmem:[#allocation2 + $0xf5] ss:$2 sm:$0xff] }
 0x1f9   : > { %v1033_v56 = vpop.f32.mrb[52].mxu0 }
 0x1fa   : > { %v8004_v58 = vpop.f32.mrb[53].mxu0  ;;  %8186 = vmatmul.mubr.msk.f32.gmra.mrb[56].mxu0 %vm718_vm1, %v1539_v57  ;;  %v1779_v56 = vld [vmem:[#allocation2 + $0x102] ss:$2 sm:$0xff]  ;;  %v2980_v57 = vld [vmem:[#allocation2 + $0x105] ss:$2 sm:$0xff] }
 0x1fb   : > { %8478 = vmatmul.mubr.msk.f32.gmra.mrb[22].mxu1 %vm718_vm1, %v2743_v59  ;;  %8188 = vmatprep.mubr.msk.f32.mxu0 %vm10383_vm2, %v10381_v44  ;;  %v1781_v58 = vld [vmem:[#allocation2 + $0x112] ss:$2 sm:$0x3f]  ;;  %v2981_v59 = vld [vmem:[#allocation2 + $0x115] ss:$2 sm:$0xff] }
 0x1fc   : > { %8480 = vmatprep.mubr.msk.f32.mxu1 %vm10383_vm2, %v10381_v44 }
 0x1fe   : > { %v2185_v61 = vpop.f32.mrb[20].mxu1  ;;  %8189 = vmatmul.mubr.msk.f32.gmra.mrb[58].mxu0 %vm718_vm1, %v1541_v60  ;;  %v3484_v60 = vld [vmem:[%s12533_s2 + $0x160] sm:$0xff] }
 0x1ff   : > { %v8299_v63 = vpop.f32.mrb[21].mxu1  ;;  %8481 = vmatmul.mubr.msk.f32.gmra.mrb[24].mxu1 %vm718_vm1, %v2744_v62  ;;  %8191 = vmatprep.mubr.msk.f32.mxu0 %vm10383_vm2, %v10381_v44  ;;  %v3485_v61 = vld [vmem:[%s12533_s2 + $0x168] sm:$0xff] }
 0x200   : > { %8483 = vmatprep.mubr.msk.f32.mxu1 %vm10383_vm2, %v10381_v44  ;;  %v2983_v62 = vld [vmem:[#allocation2 + $0x125] ss:$2 sm:$0x3f]  ;;  %v9483_v63 = vpack.c.bf16 %v3485_v61, %v3484_v60 }
 0x201   : > { %v3473_v61 = vld [vmem:[#allocation2 + $0xd7] ss:$2 sm:$0xff] }
 0x202   : > { %8192 = vmatmul.mubr.msk.f32.gmra.mrb[60].mxu0 %vm718_vm1, %v1543_v0  ;;  %v3486_v0 = vld [vmem:[%s12533_s2 + $0x170] sm:$0xff] }
 0x203   : > { %8484 = vmatmul.mubr.msk.f32.gmra.mrb[26].mxu1 %vm718_vm1, %v2745_v1  ;;  %8194 = vmatprep.mubr.msk.f32.mxu0 %vm10383_vm2, %v10381_v44  ;;  %v3487_v1 = vld [vmem:[%s12533_s2 + $0x178] sm:$0xff] }
 0x204   : > { %8486 = vmatprep.mubr.msk.f32.mxu1 %vm10383_vm2, %v10381_v44 }
 0x206   : > { %8195 = vmatmul.mubr.msk.f32.gmra.mrb[62].mxu0 %vm718_vm1, %v1545_v2  ;;  %v3201_v2 = vld [vmem:[#allocation2 + $0x26] ss:$2 sm:$0xff] }
 0x207   : > { %8487 = vmatmul.mubr.msk.f32.gmra.mrb[28].mxu1 %vm718_vm1, %v2746_v3  ;;  %8197 = vmatprep.mubr.msk.f32.mxu0 %vm10383_vm2, %v10381_v44  ;;  %v9486_v3 = vpack.c.bf16 %v3487_v1, %v3486_v0  ;;  %v3477_v1 = vld [vmem:[#allocation2 + $0xf7] ss:$2 sm:$0xff] }
 0x208   : > { %8489 = vmatprep.mubr.msk.f32.mxu1 %vm10383_vm2, %v10381_v44 }
 0x20a   : > { %8198 = vmatmul.mubr.msk.f32.gmra.mrb[64].mxu0 %vm718_vm1, %v1547_v4  ;;  %v3203_v4 = vld [vmem:[#allocation2 + $0x36] ss:$2 sm:$0xff] }
 0x20b   : > { %8490 = vmatmul.mubr.msk.f32.gmra.mrb[30].mxu1 %vm718_vm1, %v2747_v5  ;;  %8208 = vmatprep.mubr.msk.f32.mxu0 %vm10383_vm2, %v10381_v44 }
 0x20c   : > { %8492 = vmatprep.mubr.msk.f32.mxu1 %vm10383_vm2, %v10381_v44 }
 0x20e   : > { %8209 = vmatmul.mubr.msk.f32.vlgmr.msra.gmra.mrb[32].mxu0 %vm718_vm1, %v1764_v6 }
 0x20f   : > { %8493 = vmatmul.mubr.msk.f32.gmra.mrb[32].mxu1 %vm718_vm1, %v2749_v9  ;;  %8211 = vmatprep.mubr.msk.f32.mxu0 %vm10383_vm2, %v10381_v44  ;;  %v3207_v9 = vld [vmem:[#allocation2 + $0x56] ss:$2 sm:$0xff] }
 0x210   : > { %8503 = vmatprep.mubr.msk.f32.mxu1 %vm10383_vm2, %v10381_v44 }
 0x212   : > { %8212 = vmatmul.mubr.msk.f32.gmra.mrb[84].mxu0 %vm718_vm1, %v1765_v11  ;;  %v3209_v11 = vld [vmem:[#allocation2 + $0x66] ss:$2 sm:$0xff] }
 0x213   : > { %8504 = vmatmul.mubr.msk.f32.vlgmr.msra.gmra.mrb[0].mxu1 %vm718_vm1, %v2966_v14  ;;  %8214 = vmatprep.mubr.msk.f32.mxu0 %vm10383_vm2, %v10381_v44  ;;  %v3215_v14 = vld [vmem:[#allocation2 + $0x96] ss:$2 sm:$0xff] }
 0x214   : > { %9478 = vmatpush3.bf16.msra.mxu1 %v9477_v10  ;;  %8506 = vmatprep.mubr.msk.f32.mxu1 %vm10383_vm2, %v10381_v44 }
 0x215   : > { %9479 = vmatprep.subr.bf16.mxu1 %v10382_v45 }
 0x216   : > { %8215 = vmatmul.mubr.msk.f32.gmra.mrb[36].mxu0 %vm718_vm1, %v1766_v16 }
 0x217   : > { %8507 = vmatmul.mubr.msk.f32.gmra.mrb[52].mxu1 %vm718_vm1, %v2967_v17  ;;  %8217 = vmatprep.mubr.msk.f32.mxu0 %vm10383_vm2, %v10381_v44 }
 0x218   : > { %8509 = vmatprep.mubr.msk.f32.mxu1 %vm10383_vm2, %v10381_v44  ;;  %9481 = vmatpush3.bf16.msra.mxu1 %v9480_v15  ;;  %v3217_v15 = vld [vmem:[#allocation2 + $0xa6] ss:$2 sm:$0xff] }
 0x219   : > { %v1188_v18 = vpop.f32.mrb[66].mxu0  ;;  %9482 = vmatprep.subr.bf16.mxu1 %v10382_v45 }
 0x21a   : > { %v8036_v20 = vpop.f32.mrb[67].mxu0  ;;  %8218 = vmatmul.mubr.msk.f32.gmra.mrb[38].mxu0 %vm718_vm1, %v1767_v19  ;;  %v3219_v18 = vld [vmem:[#allocation2 + $0xb6] ss:$2 sm:$0xff] }
 0x21b   : > { %8510 = vmatmul.mubr.msk.f32.gmra.mrb[4].mxu1 %vm718_vm1, %v2968_v21  ;;  %8220 = vmatprep.mubr.msk.f32.mxu0 %vm10383_vm2, %v10381_v44  ;;  %v3221_v20 = vld [vmem:[#allocation2 + $0xc6] ss:$2 sm:$0xff] }
 0x21c   : > { %8512 = vmatprep.mubr.msk.f32.mxu1 %vm10383_vm2, %v10381_v44 }
 0x21e   : > { %v2392_v23 = vpop.f32.mrb[34].mxu1  ;;  %8221 = vmatmul.mubr.msk.f32.gmra.mrb[40].mxu0 %vm718_vm1, %v1768_v22 }
 0x21f   : > { %v8331_v25 = vpop.f32.mrb[35].mxu1  ;;  %8513 = vmatmul.mubr.msk.f32.gmra.mrb[6].mxu1 %vm718_vm1, %v2969_v24  ;;  %8223 = vmatprep.mubr.msk.f32.mxu0 %vm10383_vm2, %v10381_v44  ;;  %v3223_v24 = vld [vmem:[#allocation2 + $0xd6] ss:$2 sm:$0xff] }
 0x220   : > { %8515 = vmatprep.mubr.msk.f32.mxu1 %vm10383_vm2, %v10381_v44 }
 0x222   : > { %8224 = vmatmul.mubr.msk.f32.gmra.mrb[42].mxu0 %vm718_vm1, %v1769_v26  ;;  %v3225_v26 = vld [vmem:[#allocation2 + $0xe6] ss:$2 sm:$0xff] }
 0x223   : > { %8516 = vmatmul.mubr.msk.f32.gmra.mrb[8].mxu1 %vm718_vm1, %v2970_v27  ;;  %8226 = vmatprep.mubr.msk.f32.mxu0 %vm10383_vm2, %v10381_v44 }
 0x224   : > { %8518 = vmatprep.mubr.msk.f32.mxu1 %vm10383_vm2, %v10381_v44 }
 0x226   : > { %8227 = vmatmul.mubr.msk.f32.gmra.mrb[44].mxu0 %vm718_vm1, %v1770_v28  ;;  %v3227_v28 = vld [vmem:[#allocation2 + $0xf6] ss:$2 sm:$0xff] }
 0x227   : > { %8519 = vmatmul.mubr.msk.f32.gmra.mrb[10].mxu1 %vm718_vm1, %v2971_v29  ;;  %8229 = vmatprep.mubr.msk.f32.mxu0 %vm10383_vm2, %v10381_v44  ;;  %v3229_v29 = vld [vmem:[#allocation2 + $0x106] ss:$2 sm:$0xff] }
 0x228   : > { %8521 = vmatprep.mubr.msk.f32.mxu1 %vm10383_vm2, %v10381_v44 }
 0x22a   : > { %8230 = vmatmul.mubr.msk.f32.gmra.mrb[46].mxu0 %vm718_vm1, %v1771_v30  ;;  %v3231_v30 = vld [vmem:[#allocation2 + $0x116] ss:$2 sm:$0xff] }
 0x22b   : > { %8522 = vmatmul.mubr.msk.f32.gmra.mrb[12].mxu1 %vm718_vm1, %v2972_v31  ;;  %8232 = vmatprep.mubr.msk.f32.mxu0 %vm10383_vm2, %v10381_v44  ;;  %v3718_v31 = vld [vmem:[%s12533_s2 + $0x180] sm:$0xff] }
 0x22c   : > { %8524 = vmatprep.mubr.msk.f32.mxu1 %vm10383_vm2, %v10381_v44 }
 0x22e   : > { %8233 = vmatmul.mubr.msk.f32.gmra.mrb[86].mxu0 %vm718_vm1, %v1772_v32  ;;  %v3719_v32 = vld [vmem:[%s12533_s2 + $0x188] sm:$0xff] }
 0x22f   : > { %8525 = vmatmul.mubr.msk.f32.gmra.mrb[14].mxu1 %vm718_vm1, %v2973_v33  ;;  %8235 = vmatprep.mubr.msk.f32.mxu0 %vm10383_vm2, %v10381_v44  ;;  %v3233_v33 = vld [vmem:[#allocation2 + $0x126] ss:$2 sm:$0x3f] }
 0x230   : > { %8527 = vmatprep.mubr.msk.f32.mxu1 %vm10383_vm2, %v10381_v44 }
 0x232   : > { %8236 = vmatmul.mubr.msk.f32.gmra.mrb[50].mxu0 %vm718_vm1, %v1773_v34  ;;  %v9489_v34 = vpack.c.bf16 %v3719_v32, %v3718_v31  ;;  %v3706_v31 = vld [vmem:[#allocation2 + $0x96] ss:$2 sm:$0xff] }
 0x233   : > { %8528 = vmatmul.mubr.msk.f32.gmra.mrb[54].mxu1 %vm718_vm1, %v2974_v35  ;;  %8238 = vmatprep.mubr.msk.f32.mxu0 %vm10383_vm2, %v10381_v44  ;;  %v3720_v35 = vld [vmem:[%s12533_s2 + $0x190] sm:$0xff] }
 0x234   : > { %8530 = vmatprep.mubr.msk.f32.mxu1 %vm10383_vm2, %v10381_v44 }
 0x235   : > { %v1222_v36 = vpop.f32.mrb[68].mxu0 }
 0x236   : > { %v8057_v38 = vpop.f32.mrb[69].mxu0  ;;  %8239 = vmatmul.mubr.msk.f32.gmra.mrb[88].mxu0 %vm718_vm1, %v1774_v37  ;;  %v3721_v36 = vld [vmem:[%s12533_s2 + $0x198] sm:$0xff]  ;;  %v3451_v37 = vld [vmem:[#allocation2 + $0x27] ss:$2 sm:$0xff] }
 0x237   : > { %8531 = vmatmul.mubr.msk.f32.gmra.mrb[18].mxu1 %vm718_vm1, %v2975_v39  ;;  %8241 = vmatprep.mubr.msk.f32.mxu0 %vm10383_vm2, %v10381_v44  ;;  %v9492_v38 = vpack.c.bf16 %v3721_v36, %v3720_v35  ;;  %v3453_v39 = vld [vmem:[#allocation2 + $0x37] ss:$2 sm:$0xff] }
 0x238   : > { %8533 = vmatprep.mubr.msk.f32.mxu1 %vm10383_vm2, %v10381_v44 }
 0x23a   : > { %v2426_v41 = vpop.f32.mrb[36].mxu1  ;;  %8242 = vmatmul.mubr.msk.f32.gmra.mrb[54].mxu0 %vm718_vm1, %v1775_v40 }
 0x23b   : > { %v8352_v43 = vpop.f32.mrb[37].mxu1  ;;  %8534 = vmatmul.mubr.msk.f32.gmra.mrb[56].mxu1 %vm718_vm1, %v2976_v42  ;;  %8244 = vmatprep.mubr.msk.f32.mxu0 %vm10383_vm2, %v10381_v44  ;;  %v3455_v42 = vld [vmem:[#allocation2 + $0x47] ss:$2 sm:$0xff] }
 0x23c   : > { %8536 = vmatprep.mubr.msk.f32.mxu1 %vm10383_vm2, %v10381_v44 }
 0x23d   : > { %v1231_v46 = vpop.f32.mrb[70].mxu0 }
 0x23e   : > { %v8063_v48 = vpop.f32.mrb[71].mxu0  ;;  %8245 = vmatmul.mubr.msk.f32.gmra.mrb[56].mxu0 %vm718_vm1, %v1776_v47  ;;  %v3457_v46 = vld [vmem:[#allocation2 + $0x57] ss:$2 sm:$0xff] }
 0x23f   : > { %8537 = vmatmul.mubr.msk.f32.gmra.mrb[22].mxu1 %vm718_vm1, %v2977_v49  ;;  %8247 = vmatprep.mubr.msk.f32.mxu0 %vm10383_vm2, %v10381_v44  ;;  %v3459_v48 = vld [vmem:[#allocation2 + $0x67] ss:$2 sm:$0xff]  ;;  %v3461_v49 = vld [vmem:[#allocation2 + $0x77] ss:$2 sm:$0xff] }
 0x240   : > { %8539 = vmatprep.mubr.msk.f32.mxu1 %vm10383_vm2, %v10381_v44 }
 0x242   : > { %v2435_v51 = vpop.f32.mrb[38].mxu1  ;;  %8248 = vmatmul.mubr.msk.f32.gmra.mrb[58].mxu0 %vm718_vm1, %v1777_v50  ;;  %v3463_v50 = vld [vmem:[#allocation2 + $0x87] ss:$2 sm:$0xff] }
 0x243   : > { %v8358_v53 = vpop.f32.mrb[39].mxu1  ;;  %8540 = vmatmul.mubr.msk.f32.gmra.mrb[24].mxu1 %vm718_vm1, %v2978_v52  ;;  %8250 = vmatprep.mubr.msk.f32.mxu0 %vm10383_vm2, %v10381_v44  ;;  %v3465_v51 = vld [vmem:[#allocation2 + $0x97] ss:$2 sm:$0xff]  ;;  %v3467_v52 = vld [vmem:[#allocation2 + $0xa7] ss:$2 sm:$0xff] }
 0x244   : > { %8542 = vmatprep.mubr.msk.f32.mxu1 %vm10383_vm2, %v10381_v44 }
 0x246   : > { %8251 = vmatmul.mubr.msk.f32.gmra.mrb[60].mxu0 %vm718_vm1, %v1778_v54 }
 0x247   : > { %8543 = vmatmul.mubr.msk.f32.gmra.mrb[26].mxu1 %vm718_vm1, %v2979_v55  ;;  %8253 = vmatprep.mubr.msk.f32.mxu0 %vm10383_vm2, %v10381_v44  ;;  %v3469_v55 = vld [vmem:[#allocation2 + $0xb7] ss:$2 sm:$0xff] }
 0x248   : > { %8545 = vmatprep.mubr.msk.f32.mxu1 %vm10383_vm2, %v10381_v44 }
 0x24a   : > { %8254 = vmatmul.mubr.msk.f32.gmra.mrb[62].mxu0 %vm718_vm1, %v1779_v56 }
 0x24b   : > { %8546 = vmatmul.mubr.msk.f32.gmra.mrb[28].mxu1 %vm718_vm1, %v2980_v57  ;;  %8256 = vmatprep.mubr.msk.f32.mxu0 %vm10383_vm2, %v10381_v44  ;;  %v3471_v57 = vld [vmem:[#allocation2 + $0xc7] ss:$2 sm:$0xff] }
 0x24c   : > { %8548 = vmatprep.mubr.msk.f32.mxu1 %vm10383_vm2, %v10381_v44 }
 0x24e   : > { %8257 = vmatmul.mubr.msk.f32.gmra.mrb[64].mxu0 %vm718_vm1, %v1781_v58 }
 0x24f   : > { %8549 = vmatmul.mubr.msk.f32.gmra.mrb[30].mxu1 %vm718_vm1, %v2981_v59  ;;  %8924 = vmatprep.mubr.msk.f32.mxu0 %vm10383_vm2, %v10381_v44 }
 0x250   : > { %8551 = vmatprep.mubr.msk.f32.mxu1 %vm10383_vm2, %v10381_v44 }
 0x253   : > { %8552 = vmatmul.mubr.msk.f32.gmra.mrb[32].mxu1 %vm718_vm1, %v2983_v62 }
 0x254   : > { %8562 = vmatprep.mubr.msk.f32.mxu1 %vm10383_vm2, %v10381_v44 }
 0x257   : > { %8563 = vmatmul.mubr.msk.f32.vlgmr.msra.gmra.mrb[0].mxu1 %vm718_vm1, %v3201_v2  ;;  %v3479_v2 = vld [vmem:[#allocation2 + $0x107] ss:$2 sm:$0xff] }
 0x258   : > { %9484 = vmatpush3.bf16.msra.mxu1 %v9483_v63  ;;  %8565 = vmatprep.mubr.msk.f32.mxu1 %vm10383_vm2, %v10381_v44  ;;  %v3475_v63 = vld [vmem:[#allocation2 + $0xe7] ss:$2 sm:$0xff] }
 0x259   : > { %9485 = vmatprep.subr.bf16.mxu1 %v10382_v45 }
 0x25b   : > { %8566 = vmatmul.mubr.msk.f32.gmra.mrb[58].mxu1 %vm718_vm1, %v3203_v4  ;;  %v3952_v4 = vld [vmem:[%s12533_s2 + $0x1a0] sm:$0xff] }
 0x25c   : > { %8568 = vmatprep.mubr.msk.f32.mxu1 %vm10383_vm2, %v10381_v44  ;;  %9487 = vmatpush3.bf16.msra.mxu1 %v9486_v3  ;;  %v3481_v3 = vld [vmem:[#allocation2 + $0x117] ss:$2 sm:$0xff] }
 0x25d   : > { %v1424_v5 = vpop.f32.mrb[72].mxu0  ;;  %9488 = vmatprep.subr.bf16.mxu1 %v10382_v45 }
 0x25e   : > { %v8095_v6 = vpop.f32.mrb[73].mxu0  ;;  %v3953_v5 = vld [vmem:[%s12533_s2 + $0x1a8] sm:$0xff] }
 0x25f   : > { %8569 = vmatmul.mubr.msk.f32.gmra.mrb[4].mxu1 %vm718_vm1, %v3205_v7  ;;  %v3483_v6 = vld [vmem:[#allocation2 + $0x127] ss:$2 sm:$0x3f]  ;;  %v9495_v7 = vpack.c.bf16 %v3953_v5, %v3952_v4 }
 0x260   : > { %8571 = vmatprep.mubr.msk.f32.mxu1 %vm10383_vm2, %v10381_v44  ;;  %v4203_v4 = vld [vmem:[%s12533_s2 + $0x1c8] sm:$0xff] }
 0x262   : > { %v2642_v8 = vpop.f32.mrb[40].mxu1 }
 0x263   : > { %v8390_v10 = vpop.f32.mrb[41].mxu1  ;;  %8572 = vmatmul.mubr.msk.f32.gmra.mrb[6].mxu1 %vm718_vm1, %v3207_v9  ;;  %v3954_v8 = vld [vmem:[%s12533_s2 + $0x1b0] sm:$0xff]  ;;  %v3955_v9 = vld [vmem:[%s12533_s2 + $0x1b8] sm:$0xff] }
 0x264   : > { %8574 = vmatprep.mubr.msk.f32.mxu1 %vm10383_vm2, %v10381_v44  ;;  %v3700_v10 = vld [vmem:[#allocation2 + $0x36] ss:$2 sm:$0xff] }
 0x267   : > { %8575 = vmatmul.mubr.msk.f32.gmra.mrb[8].mxu1 %vm718_vm1, %v3209_v11  ;;  %v9498_v11 = vpack.c.bf16 %v3955_v9, %v3954_v8  ;;  %v4204_v8 = vld [vmem:[%s12533_s2 + $0x1d0] sm:$0xff]  ;;  %v4205_v9 = vld [vmem:[%s12533_s2 + $0x1d8] sm:$0xff] }
 0x268   : > { %8577 = vmatprep.mubr.msk.f32.mxu1 %vm10383_vm2, %v10381_v44 }
 0x26b   : > { %8578 = vmatmul.mubr.msk.f32.gmra.mrb[10].mxu1 %vm718_vm1, %v3211_v12 }
 0x26c   : > { %8580 = vmatprep.mubr.msk.f32.mxu1 %vm10383_vm2, %v10381_v44 }
 0x26f   : > { %8581 = vmatmul.mubr.msk.f32.gmra.mrb[12].mxu1 %vm718_vm1, %v3213_v13 }
 0x270   : > { %8583 = vmatprep.mubr.msk.f32.mxu1 %vm10383_vm2, %v10381_v44 }
 0x273   : > { %8584 = vmatmul.mubr.msk.f32.gmra.mrb[14].mxu1 %vm718_vm1, %v3215_v14  ;;  %v3701_v14 = vld [vmem:[#allocation2 + $0x46] ss:$2 sm:$0xff] }
 0x274   : > { %8586 = vmatprep.mubr.msk.f32.mxu1 %vm10383_vm2, %v10381_v44 }
 0x277   : > { %8587 = vmatmul.mubr.msk.f32.gmra.mrb[60].mxu1 %vm718_vm1, %v3217_v15 }
 0x278   : > { %8589 = vmatprep.mubr.msk.f32.mxu1 %vm10383_vm2, %v10381_v44 }
 0x279   : > { %v1458_v16 = vpop.f32.mrb[74].mxu0 }
 0x27a   : > { %v8116_v17 = vpop.f32.mrb[75].mxu0 }
 0x27b   : > { %8590 = vmatmul.mubr.msk.f32.gmra.mrb[18].mxu1 %vm718_vm1, %v3219_v18  ;;  %v3702_v17 = vld [vmem:[#allocation2 + $0x56] ss:$2 sm:$0xff] }
 0x27c   : > { %8592 = vmatprep.mubr.msk.f32.mxu1 %vm10383_vm2, %v10381_v44 }
 0x27e   : > { %v2676_v19 = vpop.f32.mrb[42].mxu1 }
 0x27f   : > { %v8411_v21 = vpop.f32.mrb[43].mxu1  ;;  %8593 = vmatmul.mubr.msk.f32.gmra.mrb[62].mxu1 %vm718_vm1, %v3221_v20 }
 0x280   : > { %8595 = vmatprep.mubr.msk.f32.mxu1 %vm10383_vm2, %v10381_v44  ;;  %v3703_v21 = vld [vmem:[#allocation2 + $0x66] ss:$2 sm:$0xff] }
 0x281   : > { %v1467_v22 = vpop.f32.mrb[76].mxu0 }
 0x282   : > { %v8122_v23 = vpop.f32.mrb[77].mxu0 }
 0x283   : > { %8596 = vmatmul.mubr.msk.f32.gmra.mrb[22].mxu1 %vm718_vm1, %v3223_v24 }
 0x284   : > { %8598 = vmatprep.mubr.msk.f32.mxu1 %vm10383_vm2, %v10381_v44 }
 0x286   : > { %v2685_v25 = vpop.f32.mrb[44].mxu1 }
 0x287   : > { %v8417_v27 = vpop.f32.mrb[45].mxu1  ;;  %8599 = vmatmul.mubr.msk.f32.gmra.mrb[24].mxu1 %vm718_vm1, %v3225_v26  ;;  %v3704_v25 = vld [vmem:[#allocation2 + $0x76] ss:$2 sm:$0xff] }
 0x288   : > { %8601 = vmatprep.mubr.msk.f32.mxu1 %vm10383_vm2, %v10381_v44 }
 0x28b   : > { %8602 = vmatmul.mubr.msk.f32.gmra.mrb[26].mxu1 %vm718_vm1, %v3227_v28  ;;  %v3705_v28 = vld [vmem:[#allocation2 + $0x86] ss:$2 sm:$0xff] }
 0x28c   : > { %8604 = vmatprep.mubr.msk.f32.mxu1 %vm10383_vm2, %v10381_v44 }
 0x28f   : > { %8605 = vmatmul.mubr.msk.f32.gmra.mrb[28].mxu1 %vm718_vm1, %v3229_v29 }
 0x290   : > { %8607 = vmatprep.mubr.msk.f32.mxu1 %vm10383_vm2, %v10381_v44 }
 0x293   : > { %8608 = vmatmul.mubr.msk.f32.gmra.mrb[30].mxu1 %vm718_vm1, %v3231_v30 }
 0x294   : > { %8610 = vmatprep.mubr.msk.f32.mxu1 %vm10383_vm2, %v10381_v44 }
 0x297   : > { %8611 = vmatmul.mubr.msk.f32.gmra.mrb[32].mxu1 %vm718_vm1, %v3233_v33 }
 0x298   : > { %8621 = vmatprep.mubr.msk.f32.mxu1 %vm10383_vm2, %v10381_v44 }
 0x29b   : > { %8622 = vmatmul.mubr.msk.f32.vlgmr.msra.gmra.mrb[0].mxu1 %vm718_vm1, %v3451_v37  ;;  %v3708_v37 = vld [vmem:[#allocation2 + $0xb6] ss:$2 sm:$0xff] }
 0x29c   : > { %9490 = vmatpush3.bf16.msra.mxu1 %v9489_v34  ;;  %8624 = vmatprep.mubr.msk.f32.mxu1 %vm10383_vm2, %v10381_v44  ;;  %v3707_v34 = vld [vmem:[#allocation2 + $0xa6] ss:$2 sm:$0xff] }
 0x29d   : > { %9491 = vmatprep.subr.bf16.mxu1 %v10382_v45 }
 0x29f   : > { %8625 = vmatmul.mubr.msk.f32.gmra.mrb[64].mxu1 %vm718_vm1, %v3453_v39 }
 0x2a0   : > { %8627 = vmatprep.mubr.msk.f32.mxu1 %vm10383_vm2, %v10381_v44  ;;  %9493 = vmatpush3.bf16.msra.mxu1 %v9492_v38 }
 0x2a1   : > { %v1674_v40 = vpop.f32.mrb[78].mxu0  ;;  %9494 = vmatprep.subr.bf16.mxu1 %v10382_v45 }
 0x2a2   : > { %v8154_v41 = vpop.f32.mrb[79].mxu0  ;;  %v3709_v40 = vld [vmem:[#allocation2 + $0xc6] ss:$2 sm:$0xff] }
 0x2a3   : > { %8628 = vmatmul.mubr.msk.f32.gmra.mrb[4].mxu1 %vm718_vm1, %v3455_v42 }
 0x2a4   : > { %8630 = vmatprep.mubr.msk.f32.mxu1 %vm10383_vm2, %v10381_v44 }
 0x2a6   : > { %v2876_v43 = vpop.f32.mrb[46].mxu1 }
 0x2a7   : > { %v8449_v47 = vpop.f32.mrb[47].mxu1  ;;  %8631 = vmatmul.mubr.msk.f32.gmra.mrb[6].mxu1 %vm718_vm1, %v3457_v46  ;;  %v3710_v46 = vld [vmem:[#allocation2 + $0xd6] ss:$2 sm:$0xff] }
 0x2a8   : > { %8633 = vmatprep.mubr.msk.f32.mxu1 %vm10383_vm2, %v10381_v44 }
 0x2ab   : > { %8634 = vmatmul.mubr.msk.f32.gmra.mrb[8].mxu1 %vm718_vm1, %v3459_v48 }
 0x2ac   : > { %8636 = vmatprep.mubr.msk.f32.mxu1 %vm10383_vm2, %v10381_v44 }
 0x2af   : > { %8637 = vmatmul.mubr.msk.f32.gmra.mrb[10].mxu1 %vm718_vm1, %v3461_v49 }
 0x2b0   : > { %8639 = vmatprep.mubr.msk.f32.mxu1 %vm10383_vm2, %v10381_v44 }
 0x2b3   : > { %8640 = vmatmul.mubr.msk.f32.gmra.mrb[12].mxu1 %vm718_vm1, %v3463_v50  ;;  %v3711_v50 = vld [vmem:[#allocation2 + $0xe6] ss:$2 sm:$0xff] }
 0x2b4   : > { %8642 = vmatprep.mubr.msk.f32.mxu1 %vm10383_vm2, %v10381_v44 }
 0x2b7   : > { %8643 = vmatmul.mubr.msk.f32.gmra.mrb[14].mxu1 %vm718_vm1, %v3465_v51 }
 0x2b8   : > { %8645 = vmatprep.mubr.msk.f32.mxu1 %vm10383_vm2, %v10381_v44 }
 0x2bb   : > { %8646 = vmatmul.mubr.msk.f32.gmra.mrb[66].mxu1 %vm718_vm1, %v3467_v52 }
 0x2bc   : > { %8648 = vmatprep.mubr.msk.f32.mxu1 %vm10383_vm2, %v10381_v44 }
 0x2bd   : > { %v1708_v53 = vpop.f32.mrb[80].mxu0 }
 0x2be   : > { %v8175_v54 = vpop.f32.mrb[81].mxu0 }
 0x2bf   : > { %8649 = vmatmul.mubr.msk.f32.gmra.mrb[18].mxu1 %vm718_vm1, %v3469_v55  ;;  %v3712_v54 = vld [vmem:[#allocation2 + $0xf6] ss:$2 sm:$0xff] }
 0x2c0   : > { %8651 = vmatprep.mubr.msk.f32.mxu1 %vm10383_vm2, %v10381_v44 }
 0x2c2   : > { %v2910_v56 = vpop.f32.mrb[48].mxu1 }
 0x2c3   : > { %v8470_v58 = vpop.f32.mrb[49].mxu1  ;;  %8652 = vmatmul.mubr.msk.f32.gmra.mrb[68].mxu1 %vm718_vm1, %v3471_v57 }
 0x2c4   : > { %8654 = vmatprep.mubr.msk.f32.mxu1 %vm10383_vm2, %v10381_v44  ;;  %v3713_v58 = vld [vmem:[#allocation2 + $0x106] ss:$2 sm:$0xff] }
 0x2c5   : > { %v1717_v59 = vpop.f32.mrb[82].mxu0 }
 0x2c6   : > { %v8181_v60 = vpop.f32.mrb[83].mxu0 }
 0x2c7   : > { %8655 = vmatmul.mubr.msk.f32.gmra.mrb[22].mxu1 %vm718_vm1, %v3473_v61  ;;  %v3714_v61 = vld [vmem:[#allocation2 + $0x116] ss:$2 sm:$0xff] }
 0x2c8   : > { %8657 = vmatprep.mubr.msk.f32.mxu1 %vm10383_vm2, %v10381_v44 }
 0x2ca   : > { %v2919_v62 = vpop.f32.mrb[50].mxu1 }
 0x2cb   : > { %v8476_v0 = vpop.f32.mrb[51].mxu1  ;;  %8658 = vmatmul.mubr.msk.f32.gmra.mrb[24].mxu1 %vm718_vm1, %v3475_v63 }
 0x2cc   : > { %8660 = vmatprep.mubr.msk.f32.mxu1 %vm10383_vm2, %v10381_v44  ;;  %v3715_v0 = vld [vmem:[#allocation2 + $0x126] ss:$2 sm:$0xff] }
 0x2cf   : > { %8661 = vmatmul.mubr.msk.f32.gmra.mrb[26].mxu1 %vm718_vm1, %v3477_v1  ;;  %v3717_v1 = vld [vmem:[#allocation2 + $0x136] ss:$2 sm:$0x3f] }
 0x2d0   : > { %8663 = vmatprep.mubr.msk.f32.mxu1 %vm10383_vm2, %v10381_v44 }
 0x2d3   : > { %8664 = vmatmul.mubr.msk.f32.gmra.mrb[28].mxu1 %vm718_vm1, %v3479_v2 }
 0x2d4   : > { %8666 = vmatprep.mubr.msk.f32.mxu1 %vm10383_vm2, %v10381_v44 }
 0x2d7   : > { %8667 = vmatmul.mubr.msk.f32.gmra.mrb[30].mxu1 %vm718_vm1, %v3481_v3  ;;  %v4202_v3 = vld [vmem:[%s12533_s2 + $0x1c0] sm:$0xff] }
 0x2d8   : > { %8669 = vmatprep.mubr.msk.f32.mxu1 %vm10383_vm2, %v10381_v44 }
 0x2db   : > { %8670 = vmatmul.mubr.msk.f32.gmra.mrb[32].mxu1 %vm718_vm1, %v3483_v6  ;;  %v9501_v6 = vpack.c.bf16 %v4203_v4, %v4202_v3  ;;  %v4187_v3 = vld [vmem:[#allocation2 + $0xc8] ss:$2 sm:$0xff] }
 0x2dc   : > { %8680 = vmatprep.mubr.msk.f32.mxu1 %vm10383_vm2, %v10381_v44 }
 0x2df   : > { %8681 = vmatmul.mubr.msk.f32.vlgmr.msra.gmra.mrb[0].mxu1 %vm718_vm1, %v3700_v10 }
 0x2e0   : > { %9496 = vmatpush3.bf16.msra.mxu1 %v9495_v7  ;;  %8683 = vmatprep.mubr.msk.f32.mxu1 %vm10383_vm2, %v10381_v44 }
 0x2e1   : > { %v11523_v12 = vpop.f32.mrb[32].mxu0  ;;  %9497 = vmatprep.subr.bf16.mxu1 %v10382_v45 }
 0x2e2   : > { %v8210_v13 = vpop.f32.mrb[33].mxu0 }
 0x2e3   : > { %8684 = vmatmul.mubr.msk.f32.gmra.mrb[70].mxu1 %vm718_vm1, %v3701_v14  ;;  %v9504_v13 = vpack.c.bf16 %v4205_v9, %v4204_v8  ;;  %v3935_v14 = vld [vmem:[#allocation2 + $0x47] ss:$2 sm:$0xff]  ;;  %v4191_v8 = vld [vmem:[#allocation2 + $0xe8] ss:$2 sm:$0xff] }
 0x2e4   : > { %8686 = vmatprep.mubr.msk.f32.mxu1 %vm10383_vm2, %v10381_v44  ;;  %9499 = vmatpush3.bf16.msra.mxu1 %v9498_v11  ;;  %v3934_v11 = vld [vmem:[#allocation2 + $0x37] ss:$2 sm:$0xff] }
 0x2e5   : > { %v1908_v15 = vpop.f32.mrb[84].mxu0  ;;  %9500 = vmatprep.subr.bf16.mxu1 %v10382_v45 }
 0x2e6   : > { %v8213_v16 = vpop.f32.mrb[85].mxu0  ;;  %v3936_v15 = vld [vmem:[#allocation2 + $0x57] ss:$2 sm:$0xff] }
 0x2e7   : > { %8687 = vmatmul.mubr.msk.f32.gmra.mrb[4].mxu1 %vm718_vm1, %v3702_v17  ;;  %v3937_v17 = vld [vmem:[#allocation2 + $0x67] ss:$2 sm:$0xff] }
 0x2e8   : > { %8689 = vmatprep.mubr.msk.f32.mxu1 %vm10383_vm2, %v10381_v44 }
 0x2e9   : > { %v11533_v18 = vpop.f32.mrb[36].mxu0 }
 0x2ea   : > { %v3110_v19 = vpop.f32.mrb[52].mxu1  ;;  %v8216_v20 = vpop.f32.mrb[37].mxu0 }
 0x2eb   : > { %v8508_v22 = vpop.f32.mrb[53].mxu1  ;;  %8690 = vmatmul.mubr.msk.f32.gmra.mrb[6].mxu1 %vm718_vm1, %v3703_v21  ;;  %v3938_v20 = vld [vmem:[#allocation2 + $0x77] ss:$2 sm:$0xff]  ;;  %v3939_v21 = vld [vmem:[#allocation2 + $0x87] ss:$2 sm:$0xff] }
 0x2ec   : > { %8692 = vmatprep.mubr.msk.f32.mxu1 %vm10383_vm2, %v10381_v44  ;;  %v3940_v22 = vld [vmem:[#allocation2 + $0x97] ss:$2 sm:$0xff] }
 0x2ed   : > { %v11538_v23 = vpop.f32.mrb[38].mxu0 }
 0x2ee   : > { %v8219_v24 = vpop.f32.mrb[39].mxu0 }
 0x2ef   : > { %8693 = vmatmul.mubr.msk.f32.gmra.mrb[8].mxu1 %vm718_vm1, %v3704_v25  ;;  %v3941_v24 = vld [vmem:[#allocation2 + $0xa7] ss:$2 sm:$0xff]  ;;  %v3942_v25 = vld [vmem:[#allocation2 + $0xb7] ss:$2 sm:$0xff] }
 0x2f0   : > { %8695 = vmatprep.mubr.msk.f32.mxu1 %vm10383_vm2, %v10381_v44 }
 0x2f1   : > { %v11543_v26 = vpop.f32.mrb[40].mxu0 }
 0x2f2   : > { %v8222_v27 = vpop.f32.mrb[41].mxu0 }
 0x2f3   : > { %8696 = vmatmul.mubr.msk.f32.gmra.mrb[10].mxu1 %vm718_vm1, %v3705_v28  ;;  %v3943_v27 = vld [vmem:[#allocation2 + $0xc7] ss:$2 sm:$0xff] }
 0x2f4   : > { %8698 = vmatprep.mubr.msk.f32.mxu1 %vm10383_vm2, %v10381_v44 }
 0x2f5   : > { %v11548_v29 = vpop.f32.mrb[42].mxu0 }
 0x2f6   : > { %v8225_v30 = vpop.f32.mrb[43].mxu0 }
 0x2f7   : > { %8699 = vmatmul.mubr.msk.f32.gmra.mrb[12].mxu1 %vm718_vm1, %v3706_v31  ;;  %v3944_v30 = vld [vmem:[#allocation2 + $0xd7] ss:$2 sm:$0xff] }
 0x2f8   : > { %8701 = vmatprep.mubr.msk.f32.mxu1 %vm10383_vm2, %v10381_v44 }
 0x2f9   : > { %v11553_v32 = vpop.f32.mrb[44].mxu0 }
 0x2fa   : > { %v8228_v33 = vpop.f32.mrb[45].mxu0 }
 0x2fb   : > { %8702 = vmatmul.mubr.msk.f32.gmra.mrb[14].mxu1 %vm718_vm1, %v3707_v34  ;;  %v3945_v33 = vld [vmem:[#allocation2 + $0xe7] ss:$2 sm:$0xff] }
 0x2fc   : > { %8704 = vmatprep.mubr.msk.f32.mxu1 %vm10383_vm2, %v10381_v44 }
 0x2fd   : > { %v11558_v35 = vpop.f32.mrb[46].mxu0 }
 0x2fe   : > { %v8231_v36 = vpop.f32.mrb[47].mxu0 }
 0x2ff   : > { %8705 = vmatmul.mubr.msk.f32.gmra.mrb[72].mxu1 %vm718_vm1, %v3708_v37  ;;  %v3946_v36 = vld [vmem:[#allocation2 + $0xf7] ss:$2 sm:$0xff] }
 0x300   : > { %8707 = vmatprep.mubr.msk.f32.mxu1 %vm10383_vm2, %v10381_v44 }
 0x301   : > { %v1942_v38 = vpop.f32.mrb[86].mxu0 }
 0x302   : > { %v8234_v39 = vpop.f32.mrb[87].mxu0  ;;  %v3947_v38 = vld [vmem:[#allocation2 + $0x107] ss:$2 sm:$0xff] }
 0x303   : > { %8708 = vmatmul.mubr.msk.f32.gmra.mrb[18].mxu1 %vm718_vm1, %v3709_v40  ;;  %v3948_v39 = vld [vmem:[#allocation2 + $0x117] ss:$2 sm:$0xff]  ;;  %v3949_v40 = vld [vmem:[#allocation2 + $0x127] ss:$2 sm:$0xff] }
 0x304   : > { %8710 = vmatprep.mubr.msk.f32.mxu1 %vm10383_vm2, %v10381_v44 }
 0x305   : > { %v11566_v41 = vpop.f32.mrb[50].mxu0 }
 0x306   : > { %v3144_v42 = vpop.f32.mrb[54].mxu1  ;;  %v8237_v43 = vpop.f32.mrb[51].mxu0 }
 0x307   : > { %v8529_v47 = vpop.f32.mrb[55].mxu1  ;;  %8711 = vmatmul.mubr.msk.f32.gmra.mrb[74].mxu1 %vm718_vm1, %v3710_v46  ;;  %v3951_v42 = vld [vmem:[#allocation2 + $0x137] ss:$2 sm:$0x3f]  ;;  %v4453_v46 = vld [vmem:[%s12533_s2 + $0x1e8] sm:$0xff] }
 0x308   : > { %8713 = vmatprep.mubr.msk.f32.mxu1 %vm10383_vm2, %v10381_v44  ;;  %v4452_v43 = vld [vmem:[%s12533_s2 + $0x1e0] sm:$0xff] }
 0x309   : > { %v1951_v48 = vpop.f32.mrb[88].mxu0  ;;  %v9507_v47 = vpack.c.bf16 %v4453_v46, %v4452_v43  ;;  %v4445_v43 = vld [vmem:[#allocation2 + $0x109] ss:$2 sm:$0xff]  ;;  %v4447_v46 = vld [vmem:[#allocation2 + $0x119] ss:$2 sm:$0xff] }
 0x30a   : > { %v8240_v49 = vpop.f32.mrb[89].mxu0  ;;  %v4454_v48 = vld [vmem:[%s12533_s2 + $0x1f0] sm:$0xff] }
 0x30b   : > { %8714 = vmatmul.mubr.msk.f32.gmra.mrb[22].mxu1 %vm718_vm1, %v3711_v50  ;;  %v4455_v49 = vld [vmem:[%s12533_s2 + $0x1f8] sm:$0xff] }
 0x30c   : > { %8716 = vmatprep.mubr.msk.f32.mxu1 %vm10383_vm2, %v10381_v44  ;;  %v4169_v50 = vld [vmem:[#allocation2 + $0x38] ss:$2 sm:$0xff] }
 0x30d   : > { %v11574_v51 = vpop.f32.mrb[54].mxu0 }
 0x30e   : > { %v3153_v52 = vpop.f32.mrb[56].mxu1  ;;  %v8243_v53 = vpop.f32.mrb[55].mxu0 }
 0x30f   : > { %v8535_v55 = vpop.f32.mrb[57].mxu1  ;;  %8717 = vmatmul.mubr.msk.f32.gmra.mrb[24].mxu1 %vm718_vm1, %v3712_v54  ;;  %v9510_v52 = vpack.c.bf16 %v4455_v49, %v4454_v48  ;;  %v4171_v53 = vld [vmem:[#allocation2 + $0x48] ss:$2 sm:$0xff]  ;;  %v4173_v54 = vld [vmem:[#allocation2 + $0x58] ss:$2 sm:$0xff] }
 0x310   : > { %8719 = vmatprep.mubr.msk.f32.mxu1 %vm10383_vm2, %v10381_v44  ;;  %v4800_v48 = vld [vmem:[%s12534_s3 + $0x48] sm:$0xff] }
 0x311   : > { %v11579_v56 = vpop.f32.mrb[56].mxu0 }
 0x312   : > { %v8246_v57 = vpop.f32.mrb[57].mxu0 }
 0x313   : > { %8720 = vmatmul.mubr.msk.f32.gmra.mrb[26].mxu1 %vm718_vm1, %v3713_v58  ;;  %v4175_v57 = vld [vmem:[#allocation2 + $0x68] ss:$2 sm:$0xff] }
 0x314   : > { %8722 = vmatprep.mubr.msk.f32.mxu1 %vm10383_vm2, %v10381_v44 }
 0x315   : > { %v11584_v59 = vpop.f32.mrb[58].mxu0 }
 0x316   : > { %v8249_v60 = vpop.f32.mrb[59].mxu0 }
 0x317   : > { %8723 = vmatmul.mubr.msk.f32.gmra.mrb[28].mxu1 %vm718_vm1, %v3714_v61  ;;  %v4177_v60 = vld [vmem:[#allocation2 + $0x78] ss:$2 sm:$0xff]  ;;  %v4179_v61 = vld [vmem:[#allocation2 + $0x88] ss:$2 sm:$0xff] }
 0x318   : > { %8725 = vmatprep.mubr.msk.f32.mxu1 %vm10383_vm2, %v10381_v44 }
 0x319   : > { %v11589_v62 = vpop.f32.mrb[60].mxu0 }
 0x31a   : > { %v8252_v63 = vpop.f32.mrb[61].mxu0 }
 0x31b   : > { %8726 = vmatmul.mubr.msk.f32.gmra.mrb[30].mxu1 %vm718_vm1, %v3715_v0  ;;  %v4181_v63 = vld [vmem:[#allocation2 + $0x98] ss:$2 sm:$0xff]  ;;  %v4183_v0 = vld [vmem:[#allocation2 + $0xa8] ss:$2 sm:$0xff] }
 0x31c   : > { %8728 = vmatprep.mubr.msk.f32.mxu1 %vm10383_vm2, %v10381_v44 }
 0x31d   : > { %v11594_v2 = vpop.f32.mrb[62].mxu0 }
 0x31e   : > { %v8255_v5 = vpop.f32.mrb[63].mxu0 }
 0x31f   : > { %8729 = vmatmul.mubr.msk.f32.gmra.mrb[32].mxu1 %vm718_vm1, %v3717_v1  ;;  %v4185_v1 = vld [vmem:[#allocation2 + $0xb8] ss:$2 sm:$0xff] }
 0x320   : > { %8739 = vmatprep.mubr.msk.f32.mxu1 %vm10383_vm2, %v10381_v44  ;;  %v4189_v5 = vld [vmem:[#allocation2 + $0xd8] ss:$2 sm:$0xff] }
 0x321   : > { %v11605_v7 = vpop.f32.mrb[64].mxu0 }
 0x322   : > { %v8258_v10 = vpop.f32.mrb[65].mxu0 }
 0x323   : > { %8740 = vmatmul.mubr.msk.f32.vlgmr.msra.gmra.mrb[0].mxu1 %vm718_vm1, %v3934_v11  ;;  %v4193_v10 = vld [vmem:[#allocation2 + $0xf8] ss:$2 sm:$0xff] }
 0x324   : > { %9502 = vmatpush3.bf16.msra.mxu1 %v9501_v6  ;;  %8742 = vmatprep.mubr.msk.f32.mxu1 %vm10383_vm2, %v10381_v44 }
 0x325   : > { %9503 = vmatprep.subr.bf16.mxu1 %v10382_v45 }
 0x327   : > { %8743 = vmatmul.mubr.msk.f32.gmra.mrb[76].mxu1 %vm718_vm1, %v3935_v14  ;;  %v4197_v14 = vld [vmem:[#allocation2 + $0x118] ss:$2 sm:$0xff] }
 0x328   : > { %8745 = vmatprep.mubr.msk.f32.mxu1 %vm10383_vm2, %v10381_v44  ;;  %9505 = vmatpush3.bf16.msra.mxu1 %v9504_v13  ;;  %v4195_v13 = vld [vmem:[#allocation2 + $0x108] ss:$2 sm:$0xff] }
 0x329   : > { %9506 = vmatprep.subr.bf16.mxu1 %v10382_v45 }
 0x32b   : > { %8746 = vmatmul.mubr.msk.f32.gmra.mrb[4].mxu1 %vm718_vm1, %v3936_v15  ;;  %v4199_v15 = vld [vmem:[#allocation2 + $0x128] ss:$2 sm:$0xff] }
 0x32c   : > { %8748 = vmatprep.mubr.msk.f32.mxu1 %vm10383_vm2, %v10381_v44 }
 0x32e   : > { %v3360_v16 = vpop.f32.mrb[58].mxu1 }
 0x32f   : > { %v8567_v19 = vpop.f32.mrb[59].mxu1  ;;  %8749 = vmatmul.mubr.msk.f32.gmra.mrb[6].mxu1 %vm718_vm1, %v3937_v17  ;;  %v4201_v16 = vld [vmem:[#allocation2 + $0x138] ss:$2 sm:$0x3f]  ;;  %v4419_v17 = vld [vmem:[#allocation2 + $0x39] ss:$2 sm:$0xff] }
 0x330   : > { %8751 = vmatprep.mubr.msk.f32.mxu1 %vm10383_vm2, %v10381_v44  ;;  %v4421_v19 = vld [vmem:[#allocation2 + $0x49] ss:$2 sm:$0xff] }
 0x333   : > { %8752 = vmatmul.mubr.msk.f32.gmra.mrb[8].mxu1 %vm718_vm1, %v3938_v20  ;;  %v4423_v20 = vld [vmem:[#allocation2 + $0x59] ss:$2 sm:$0xff] }
 0x334   : > { %8754 = vmatprep.mubr.msk.f32.mxu1 %vm10383_vm2, %v10381_v44 }
 0x337   : > { %8755 = vmatmul.mubr.msk.f32.gmra.mrb[10].mxu1 %vm718_vm1, %v3939_v21 }
 0x338   : > { %8757 = vmatprep.mubr.msk.f32.mxu1 %vm10383_vm2, %v10381_v44 }
 0x33b   : > { %8758 = vmatmul.mubr.msk.f32.gmra.mrb[12].mxu1 %vm718_vm1, %v3940_v22  ;;  %v4425_v22 = vld [vmem:[#allocation2 + $0x69] ss:$2 sm:$0xff] }
 0x33c   : > { %8760 = vmatprep.mubr.msk.f32.mxu1 %vm10383_vm2, %v10381_v44 }
 0x33f   : > { %8761 = vmatmul.mubr.msk.f32.gmra.mrb[14].mxu1 %vm718_vm1, %v3941_v24 }
 0x340   : > { %8763 = vmatprep.mubr.msk.f32.mxu1 %vm10383_vm2, %v10381_v44 }
 0x343   : > { %8764 = vmatmul.mubr.msk.f32.gmra.mrb[78].mxu1 %vm718_vm1, %v3942_v25  ;;  %v4427_v25 = vld [vmem:[#allocation2 + $0x79] ss:$2 sm:$0xff] }
 0x344   : > { %8766 = vmatprep.mubr.msk.f32.mxu1 %vm10383_vm2, %v10381_v44 }
 0x347   : > { %8767 = vmatmul.mubr.msk.f32.gmra.mrb[18].mxu1 %vm718_vm1, %v3943_v27  ;;  %v4429_v27 = vld [vmem:[#allocation2 + $0x89] ss:$2 sm:$0xff] }
 0x348   : > { %8769 = vmatprep.mubr.msk.f32.mxu1 %vm10383_vm2, %v10381_v44 }
 0x34a   : > { %v3394_v28 = vpop.f32.mrb[60].mxu1 }
 0x34b   : > { %v8588_v31 = vpop.f32.mrb[61].mxu1  ;;  %8770 = vmatmul.mubr.msk.f32.gmra.mrb[80].mxu1 %vm718_vm1, %v3944_v30  ;;  %v4431_v28 = vld [vmem:[#allocation2 + $0x99] ss:$2 sm:$0xff]  ;;  %v4433_v30 = vld [vmem:[#allocation2 + $0xa9] ss:$2 sm:$0xff] }
 0x34c   : > { %8772 = vmatprep.mubr.msk.f32.mxu1 %vm10383_vm2, %v10381_v44  ;;  %v4435_v31 = vld [vmem:[#allocation2 + $0xb9] ss:$2 sm:$0xff] }
 0x34f   : > { %8773 = vmatmul.mubr.msk.f32.gmra.mrb[22].mxu1 %vm718_vm1, %v3945_v33  ;;  %v4437_v33 = vld [vmem:[#allocation2 + $0xc9] ss:$2 sm:$0xff] }
 0x350   : > { %8775 = vmatprep.mubr.msk.f32.mxu1 %vm10383_vm2, %v10381_v44 }
 0x352   : > { %v3403_v34 = vpop.f32.mrb[62].mxu1 }
 0x353   : > { %v8594_v37 = vpop.f32.mrb[63].mxu1  ;;  %8776 = vmatmul.mubr.msk.f32.gmra.mrb[24].mxu1 %vm718_vm1, %v3946_v36  ;;  %v4439_v36 = vld [vmem:[#allocation2 + $0xd9] ss:$2 sm:$0xff] }
 0x354   : > { %8778 = vmatprep.mubr.msk.f32.mxu1 %vm10383_vm2, %v10381_v44 }
 0x357   : > { %8779 = vmatmul.mubr.msk.f32.gmra.mrb[26].mxu1 %vm718_vm1, %v3947_v38  ;;  %v4441_v38 = vld [vmem:[#allocation2 + $0xe9] ss:$2 sm:$0xff] }
 0x358   : > { %8781 = vmatprep.mubr.msk.f32.mxu1 %vm10383_vm2, %v10381_v44 }
 0x35b   : > { %8782 = vmatmul.mubr.msk.f32.gmra.mrb[28].mxu1 %vm718_vm1, %v3948_v39 }
 0x35c   : > { %8784 = vmatprep.mubr.msk.f32.mxu1 %vm10383_vm2, %v10381_v44 }
 0x35f   : > { %8785 = vmatmul.mubr.msk.f32.gmra.mrb[30].mxu1 %vm718_vm1, %v3949_v40  ;;  %v4443_v40 = vld [vmem:[#allocation2 + $0xf9] ss:$2 sm:$0xff] }
 0x360   : > { %8787 = vmatprep.mubr.msk.f32.mxu1 %vm10383_vm2, %v10381_v44 }
 0x363   : > { %8788 = vmatmul.mubr.msk.f32.gmra.mrb[32].mxu1 %vm718_vm1, %v3951_v42 }
 0x364   : > { %8798 = vmatprep.mubr.msk.f32.mxu1 %vm10383_vm2, %v10381_v44 }
 0x367   : > { %8799 = vmatmul.mubr.msk.f32.vlgmr.msra.gmra.mrb[0].mxu1 %vm718_vm1, %v4169_v50  ;;  %v4449_v50 = vld [vmem:[#allocation2 + $0x129] ss:$2 sm:$0xff] }
 0x368   : > { %9508 = vmatpush3.bf16.msra.mxu1 %v9507_v47  ;;  %8801 = vmatprep.mubr.msk.f32.mxu1 %vm10383_vm2, %v10381_v44  ;;  %v4799_v47 = vld [vmem:[%s12534_s3 + $0x40] sm:$0xff] }
 0x369   : > { %9509 = vmatprep.subr.bf16.mxu1 %v10382_v45  ;;  %v9513_v49 = vpack.c.bf16 %v4800_v48, %v4799_v47  ;;  %v4782_v48 = vld [vmem:[%s12534_s3 + $0x8] sm:$0xff] }
 0x36b   : > { %8802 = vmatmul.mubr.msk.f32.gmra.mrb[82].mxu1 %vm718_vm1, %v4171_v53  ;;  %9514 = vmatpush3.bf16.msra.mxu0 %v9513_v49 }
 0x36c   : > { %8804 = vmatprep.mubr.msk.f32.mxu1 %vm10383_vm2, %v10381_v44  ;;  %9511 = vmatpush3.bf16.msra.mxu1 %v9510_v52  ;;  %v4451_v52 = vld [vmem:[#allocation2 + $0x139] ss:$2 sm:$0x3f] }
 0x36d   : > { %9515 = vmatprep.subr.bf16.mxu0 %v10382_v45 }
 0x36f   : > { %8805 = vmatmul.mubr.msk.f32.gmra.mrb[4].mxu1 %vm718_vm1, %v4173_v54 }
 0x370   : > { %8807 = vmatprep.mubr.msk.f32.mxu1 %vm10383_vm2, %v10381_v44 }
 0x372   : > { %v3610_v55 = vpop.f32.mrb[64].mxu1 }
 0x373   : > { %v8626_v58 = vpop.f32.mrb[65].mxu1  ;;  %8808 = vmatmul.mubr.msk.f32.gmra.mrb[6].mxu1 %vm718_vm1, %v4175_v57 }
 0x374   : > { %8810 = vmatprep.mubr.msk.f32.mxu1 %vm10383_vm2, %v10381_v44  ;;  %v4801_v58 = vld [vmem:[%s12534_s3 + $0x50] sm:$0xff] }
 0x377   : > { %8811 = vmatmul.mubr.msk.f32.gmra.mrb[8].mxu1 %vm718_vm1, %v4177_v60  ;;  %v4802_v60 = vld [vmem:[%s12534_s3 + $0x58] sm:$0xff] }
 0x378   : > { %8813 = vmatprep.mubr.msk.f32.mxu1 %vm10383_vm2, %v10381_v44 }
 0x37b   : > { %8814 = vmatmul.mubr.msk.f32.gmra.mrb[10].mxu1 %vm718_vm1, %v4179_v61  ;;  %v9516_v61 = vpack.c.bf16 %v4802_v60, %v4801_v58  ;;  %v4783_v58 = vld [vmem:[%s12534_s3 + $0x10] sm:$0xff]  ;;  %v4784_v60 = vld [vmem:[%s12534_s3 + $0x18] sm:$0xff] }
 0x37c   : > { %8816 = vmatprep.mubr.msk.f32.mxu1 %vm10383_vm2, %v10381_v44 }
 0x37d   : > { %9517 = vmatpush3.bf16.msra.mxu0 %v9516_v61 }
 0x37e   : > { %9518 = vmatprep.subr.bf16.mxu0 %v10382_v45 }
 0x37f   : > { %8817 = vmatmul.mubr.msk.f32.gmra.mrb[12].mxu1 %vm718_vm1, %v4181_v63 }
 0x380   : > { %8819 = vmatprep.mubr.msk.f32.mxu1 %vm10383_vm2, %v10381_v44 }
 0x383   : > { %8820 = vmatmul.mubr.msk.f32.gmra.mrb[14].mxu1 %vm718_vm1, %v4183_v0 }
 0x384   : > { %8822 = vmatprep.mubr.msk.f32.mxu1 %vm10383_vm2, %v10381_v44 }
 0x387   : > { %8823 = vmatmul.mubr.msk.f32.gmra.mrb[84].mxu1 %vm718_vm1, %v4185_v1  ;;  %v4803_v1 = vld [vmem:[%s12534_s3 + $0x60] sm:$0xff] }
 0x388   : > { %8825 = vmatprep.mubr.msk.f32.mxu1 %vm10383_vm2, %v10381_v44 }
 0x38b   : > { %8826 = vmatmul.mubr.msk.f32.gmra.mrb[18].mxu1 %vm718_vm1, %v4187_v3  ;;  %v4804_v3 = vld [vmem:[%s12534_s3 + $0x68] sm:$0xff] }
 0x38c   : > { %8828 = vmatprep.mubr.msk.f32.mxu1 %vm10383_vm2, %v10381_v44 }
 0x38e   : > { %v3644_v4 = vpop.f32.mrb[66].mxu1 }
 0x38f   : > { %v8647_v6 = vpop.f32.mrb[67].mxu1  ;;  %8829 = vmatmul.mubr.msk.f32.gmra.mrb[86].mxu1 %vm718_vm1, %v4189_v5  ;;  %v9519_v4 = vpack.c.bf16 %v4804_v3, %v4803_v1  ;;  %v4805_v5 = vld [vmem:[%s12534_s3 + $0x70] sm:$0xff] }
 0x390   : > { %8831 = vmatprep.mubr.msk.f32.mxu1 %vm10383_vm2, %v10381_v44  ;;  %v4806_v6 = vld [vmem:[%s12534_s3 + $0x78] sm:$0xff] }
 0x391   : > { %9520 = vmatpush3.bf16.msra.mxu0 %v9519_v4 }
 0x392   : > { %9521 = vmatprep.subr.bf16.mxu0 %v10382_v45 }
 0x393   : > { %8832 = vmatmul.mubr.msk.f32.gmra.mrb[22].mxu1 %vm718_vm1, %v4191_v8  ;;  %v9522_v8 = vpack.c.bf16 %v4806_v6, %v4805_v5  ;;  %v9528_v6 = vpack.c.bf16 %v4784_v60, %v4783_v58 }
 0x394   : > { %8834 = vmatprep.mubr.msk.f32.mxu1 %vm10383_vm2, %v10381_v44 }
 0x395   : > { %9523 = vmatpush3.bf16.msra.mxu0 %v9522_v8 }
 0x396   : > { %v3653_v9 = vpop.f32.mrb[68].mxu1  ;;  %9524 = vmatprep.subr.bf16.mxu0 %v10382_v45 }
 0x397   : > { %v8653_v11 = vpop.f32.mrb[69].mxu1  ;;  %8835 = vmatmul.mubr.msk.f32.gmra.mrb[24].mxu1 %vm718_vm1, %v4193_v10 }
 0x398   : > { %8837 = vmatprep.mubr.msk.f32.mxu1 %vm10383_vm2, %v10381_v44 }
 0x39b   : > { %8838 = vmatmul.mubr.msk.f32.gmra.mrb[26].mxu1 %vm718_vm1, %v4195_v13 }
 0x39c   : > { %8840 = vmatprep.mubr.msk.f32.mxu1 %vm10383_vm2, %v10381_v44 }
 0x39f   : > { %8841 = vmatmul.mubr.msk.f32.gmra.mrb[28].mxu1 %vm718_vm1, %v4197_v14 }
 0x3a0   : > { %8843 = vmatprep.mubr.msk.f32.mxu1 %vm10383_vm2, %v10381_v44 }
 0x3a3   : > { %8844 = vmatmul.mubr.msk.f32.gmra.mrb[30].mxu1 %vm718_vm1, %v4199_v15 }
 0x3a4   : > { %8846 = vmatprep.mubr.msk.f32.mxu1 %vm10383_vm2, %v10381_v44 }
 0x3a7   : > { %8847 = vmatmul.mubr.msk.f32.gmra.mrb[32].mxu1 %vm718_vm1, %v4201_v16 }
 0x3a8   : > { %8857 = vmatprep.mubr.msk.f32.mxu1 %vm10383_vm2, %v10381_v44 }
 0x3ab   : > { %8858 = vmatmul.mubr.msk.f32.vlgmr.msra.gmra.mrb[0].mxu1 %vm718_vm1, %v4419_v17 }
 0x3ac   : > { %8860 = vmatprep.mubr.msk.f32.mxu1 %vm10383_vm2, %v10381_v44 }
 0x3af   : > { %8861 = vmatmul.mubr.msk.f32.gmra.mrb[88].mxu1 %vm718_vm1, %v4421_v19 }
 0x3b0   : > { %8863 = vmatprep.mubr.msk.f32.mxu1 %vm10383_vm2, %v10381_v44 }
 0x3b3   : > { %8864 = vmatmul.mubr.msk.f32.gmra.mrb[4].mxu1 %vm718_vm1, %v4423_v20 }
 0x3b4   : > { %8866 = vmatprep.mubr.msk.f32.mxu1 %vm10383_vm2, %v10381_v44 }
 0x3b6   : > { %v3844_v21 = vpop.f32.mrb[70].mxu1 }
 0x3b7   : > { %v8685_v24 = vpop.f32.mrb[71].mxu1  ;;  %8867 = vmatmul.mubr.msk.f32.gmra.mrb[6].mxu1 %vm718_vm1, %v4425_v22 }
 0x3b8   : > { %8869 = vmatprep.mubr.msk.f32.mxu1 %vm10383_vm2, %v10381_v44 }
 0x3bb   : > { %8870 = vmatmul.mubr.msk.f32.gmra.mrb[8].mxu1 %vm718_vm1, %v4427_v25 }
 0x3bc   : > { %8872 = vmatprep.mubr.msk.f32.mxu1 %vm10383_vm2, %v10381_v44 }
 0x3bf   : > { %8873 = vmatmul.mubr.msk.f32.gmra.mrb[10].mxu1 %vm718_vm1, %v4429_v27 }
 0x3c0   : > { %8875 = vmatprep.mubr.msk.f32.mxu1 %vm10383_vm2, %v10381_v44 }
 0x3c3   : > { %8876 = vmatmul.mubr.msk.f32.gmra.mrb[12].mxu1 %vm718_vm1, %v4431_v28 }
 0x3c4   : > { %8878 = vmatprep.mubr.msk.f32.mxu1 %vm10383_vm2, %v10381_v44 }
 0x3c7   : > { %8879 = vmatmul.mubr.msk.f32.gmra.mrb[14].mxu1 %vm718_vm1, %v4433_v30 }
 0x3c8   : > { %8881 = vmatprep.mubr.msk.f32.mxu1 %vm10383_vm2, %v10381_v44 }
 0x3cb   : > { %8882 = vmatmul.mubr.msk.f32.gmra.mrb[90].mxu1 %vm718_vm1, %v4435_v31 }
 0x3cc   : > { %8884 = vmatprep.mubr.msk.f32.mxu1 %vm10383_vm2, %v10381_v44 }
 0x3cf   : > { %8885 = vmatmul.mubr.msk.f32.gmra.mrb[18].mxu1 %vm718_vm1, %v4437_v33 }
 0x3d0   : > { %8887 = vmatprep.mubr.msk.f32.mxu1 %vm10383_vm2, %v10381_v44 }
 0x3d2   : > { %v3878_v34 = vpop.f32.mrb[72].mxu1 }
 0x3d3   : > { %v8706_v37 = vpop.f32.mrb[73].mxu1  ;;  %8888 = vmatmul.mubr.msk.f32.gmra.mrb[92].mxu1 %vm718_vm1, %v4439_v36 }
 0x3d4   : > { %8890 = vmatprep.mubr.msk.f32.mxu1 %vm10383_vm2, %v10381_v44 }
 0x3d7   : > { %8891 = vmatmul.mubr.msk.f32.gmra.mrb[22].mxu1 %vm718_vm1, %v4441_v38 }
 0x3d8   : > { %8893 = vmatprep.mubr.msk.f32.mxu1 %vm10383_vm2, %v10381_v44 }
 0x3da   : > { %v3887_v39 = vpop.f32.mrb[74].mxu1 }
 0x3db   : > { %v8712_v42 = vpop.f32.mrb[75].mxu1  ;;  %8894 = vmatmul.mubr.msk.f32.gmra.mrb[24].mxu1 %vm718_vm1, %v4443_v40 }
 0x3dc   : > { %8896 = vmatprep.mubr.msk.f32.mxu1 %vm10383_vm2, %v10381_v44 }
 0x3df   : > { %8897 = vmatmul.mubr.msk.f32.gmra.mrb[26].mxu1 %vm718_vm1, %v4445_v43 }
 0x3e0   : > { %8899 = vmatprep.mubr.msk.f32.mxu1 %vm10383_vm2, %v10381_v44 }
 0x3e3   : > { %8900 = vmatmul.mubr.msk.f32.gmra.mrb[28].mxu1 %vm718_vm1, %v4447_v46 }
 0x3e4   : > { %8902 = vmatprep.mubr.msk.f32.mxu1 %vm10383_vm2, %v10381_v44 }
 0x3e7   : > { %8903 = vmatmul.mubr.msk.f32.gmra.mrb[30].mxu1 %vm718_vm1, %v4449_v50 }
 0x3e8   : > { %8905 = vmatprep.mubr.msk.f32.mxu1 %vm10383_vm2, %v10381_v44 }
 0x3eb   : > { %8906 = vmatmul.mubr.msk.f32.gmra.mrb[32].mxu1 %vm718_vm1, %v4451_v52 }
 0x3fa   : > { %v4078_v53 = vpop.f32.mrb[76].mxu1 }
 0x3fb   : > { %v8744_v54 = vpop.f32.mrb[77].mxu1 }
 0x416   : > { %v4112_v55 = vpop.f32.mrb[78].mxu1 }
 0x417   : > { %v8765_v57 = vpop.f32.mrb[79].mxu1 }
 0x41e   : > { %v4121_v63 = vpop.f32.mrb[80].mxu1 }
 0x41f   : > { %v8771_v0 = vpop.f32.mrb[81].mxu1 }
 0x43e   : > { %v4328_v9 = vpop.f32.mrb[82].mxu1 }
 0x43f   : > { %v8803_v10 = vpop.f32.mrb[83].mxu1  ;;  %v4785_v9 = vld [vmem:[%s12534_s3 + $0x20] sm:$0xff] }
 0x440   : > { %v4786_v10 = vld [vmem:[%s12534_s3 + $0x28] sm:$0xff] }
 0x45a   : > { %v4362_v11 = vpop.f32.mrb[84].mxu1 }
 0x45b   : > { %v8824_v13 = vpop.f32.mrb[85].mxu1 }
 0x462   : > { %v4371_v14 = vpop.f32.mrb[86].mxu1 }
 0x463   : > { %v8830_v15 = vpop.f32.mrb[87].mxu1 }
 0x47e   : > { %v4573_v16 = vpop.f32.mrb[0].mxu1 }
 0x47f   : > { %v9704_v17 = vadd.f32 %v4573_v16, %v11523_v12  ;;  %v8859_v19 = vpop.f32.mrb[1].mxu1 }
 0x481   : > { %v4682_v20 = vmul.f32 0.70710677, %v9704_v17  ;;  %v4668_v37 = vmul.f32 0.5, %v9704_v17  ;;  %v9531_v17 = vpack.c.bf16 %v4786_v10, %v4785_v9 }
 0x482   : > { %v4578_v21 = vpop.f32.mrb[88].mxu1 }
 0x483   : > { %10335 = verf.f32 %v4682_v20  ;;  %v8862_v22 = vpop.f32.mrb[89].mxu1  ;;  %v4787_v20 = vld [vmem:[%s12534_s3 + $0x30] sm:$0xff]  ;;  %v4788_v21 = vld [vmem:[%s12534_s3 + $0x38] sm:$0xff] }
 0x486   : > { %v4582_v24 = vpop.f32.mrb[4].mxu1 }
 0x487   : > { %v9705_v25 = vadd.f32 %v4582_v24, %v11533_v18  ;;  %v8865_v27 = vpop.f32.mrb[5].mxu1 }
 0x489   : > { %v4683_v28 = vmul.f32 0.70710677, %v9705_v25  ;;  %v4669_v50 = vmul.f32 0.5, %v9705_v25 }
 0x48a   : > { %v4587_v30 = vpop.f32.mrb[6].mxu1 }
 0x48b   : > { %10337 = verf.f32 %v4683_v28  ;;  %v9706_v31 = vadd.f32 %v4587_v30, %v11538_v23  ;;  %v8868_v33 = vpop.f32.mrb[7].mxu1  ;;  %v4781_v23 = vld [vmem:[%s12534_s3] sm:$0xff] }
 0x48d   : > { %v10336_v34 = vpop.eup %10335  ;;  %v4684_v36 = vmul.f32 0.70710677, %v9706_v31  ;;  %v4670_v1 = vmul.f32 0.5, %v9706_v31  ;;  %v9534_v31 = vpack.c.bf16 %v4788_v21, %v4787_v20 }
 0x48e   : > { %v4710_v38 = vadd.f32 1.0, %v10336_v34  ;;  %v4592_v12 = vpop.f32.mrb[8].mxu1 }
 0x48f   : > { %10339 = verf.f32 %v4684_v36  ;;  %v9707_v39 = vadd.f32 %v4592_v12, %v11543_v26  ;;  %v8871_v40 = vpop.f32.mrb[9].mxu1 }
 0x490   : > { %v4724_v42 = vmul.f32 %v4710_v38, %v4668_v37 }
 0x491   : > { %v4685_v43 = vmul.f32 0.70710677, %v9707_v39 }
 0x492   : > { %4753 = vst.msk [vmem:[#allocation3 + $0xb] sm:$0xff] %vm4738_vm4, %v4724_v42  ;;  %v4597_v18 = vpop.f32.mrb[10].mxu1 }
 0x493   : > { %10341 = verf.f32 %v4685_v43  ;;  %v9708_v46 = vadd.f32 %v4597_v18, %v11548_v29  ;;  %v8874_v47 = vpop.f32.mrb[11].mxu1  ;;  %v9525_v29 = vpack.c.bf16 %v4782_v48, %v4781_v23 }
 0x495   : > { %v10338_v49 = vpop.eup %10337  ;;  %v4686_v26 = vmul.f32 0.70710677, %v9708_v46  ;;  %v4672_v24 = vmul.f32 0.5, %v9708_v46 }
 0x496   : > { %v4711_v52 = vadd.f32 1.0, %v10338_v49  ;;  %v4602_v53 = vpop.f32.mrb[12].mxu1 }
 0x497   : > { %10343 = verf.f32 %v4686_v26  ;;  %v9709_v54 = vadd.f32 %v4602_v53, %v11553_v32  ;;  %v8877_v55 = vpop.f32.mrb[13].mxu1 }
 0x498   : > { %v4725_v57 = vmul.f32 %v4711_v52, %v4669_v50 }
 0x499   : > { %v10340_v61 = vpop.eup %10339  ;;  %v4687_v63 = vmul.f32 0.70710677, %v9709_v54  ;;  %v4790_v0 = vld [vmem:[#allocation3 + $0x1] ss:$2 sm:$0xff]  ;;  %v4673_v37 = vmul.f32 0.5, %v9709_v54 }
 0x49a   : > { %4755 = vst.msk [vmem:[#allocation3 + $0x13] sm:$0xfc] %vm4754_vm6, %v4725_v57  ;;  %v4712_v3 = vadd.f32 1.0, %v10340_v61  ;;  %v4607_v4 = vpop.f32.mrb[14].mxu1  ;;  %8925 = vmatmul.mubr.msk.f32.vlgmr.msra.gmra.mrb[90].mxu0 %vm4738_vm4, %v4790_v0 }
 0x49b   : > { %10345 = verf.f32 %v4687_v63  ;;  %v9710_v32 = vadd.f32 %v4607_v4, %v11558_v35  ;;  %v8880_v5 = vpop.f32.mrb[15].mxu1  ;;  %8927 = vmatprep.mubr.msk.f32.mxu0 %vm10383_vm2, %v10381_v44  ;;  %9526 = vmatpush3.bf16.msra.mxu0 %v9525_v29  ;;  %v4671_v35 = vmul.f32 0.5, %v9707_v39 }
 0x49c   : > { %v4726_v8 = vmul.f32 %v4712_v3, %v4670_v1  ;;  %9527 = vmatprep.subr.bf16.mxu0 %v10382_v45 }
 0x49d   : > { %v10342_v11 = vpop.eup %10341  ;;  %v4688_v13 = vmul.f32 0.70710677, %v9710_v32  ;;  %v4674_v43 = vmul.f32 0.5, %v9710_v32 }
 0x49e   : > { %4757 = vst.msk [vmem:[#allocation3 + $0x1b] sm:$0x3] %vm4756_vm7, %v4726_v8  ;;  %v4713_v14 = vadd.f32 1.0, %v10342_v11  ;;  %v4612_v15 = vpop.f32.mrb[90].mxu1 }
 0x49f   : > { %10347 = verf.f32 %v4688_v13  ;;  %v8883_v16 = vpop.f32.mrb[91].mxu1  ;;  %9529 = vmatpush3.bf16.msra.mxu0 %v9528_v6 }
 0x4a0   : > { %v4727_v19 = vmul.f32 %v4713_v14, %v4671_v35  ;;  %9530 = vmatprep.subr.bf16.mxu0 %v10382_v45 }
 0x4a1   : > { %v10344_v22 = vpop.eup %10343 }
 0x4a2   : > { %4759 = vst.msk [vmem:[#allocation3 + $0x1b] sm:$0xf0] %vm4758_vm8, %v4727_v19  ;;  %v4714_v25 = vadd.f32 1.0, %v10344_v22  ;;  %v4616_v27 = vpop.f32.mrb[18].mxu1 }
 0x4a3   : > { %v9711_v28 = vadd.f32 %v4616_v27, %v11566_v41  ;;  %v8886_v30 = vpop.f32.mrb[19].mxu1  ;;  %9532 = vmatpush3.bf16.msra.mxu0 %v9531_v17 }
 0x4a4   : > { %v4728_v33 = vmul.f32 %v4714_v25, %v4672_v24  ;;  %9533 = vmatprep.subr.bf16.mxu0 %v10382_v45  ;;  %v5028_v30 = vld [vmem:[%s12534_s3 + $0x88] sm:$0xff] }
 0x4a5   : > { %v10346_v34 = vpop.eup %10345  ;;  %v4689_v36 = vmul.f32 0.70710677, %v9711_v28  ;;  %v4675_v55 = vmul.f32 0.5, %v9711_v28  ;;  %v5027_v28 = vld [vmem:[%s12534_s3 + $0x80] sm:$0xff] }
 0x4a6   : > { %4760 = vst.msk [vmem:[#allocation3 + $0x23] sm:$0xf] %vm4751_vm5, %v4728_v33  ;;  %v4715_v38 = vadd.f32 1.0, %v10346_v34  ;;  %v4621_v12 = vpop.f32.mrb[92].mxu1 }
 0x4a7   : > { %10349 = verf.f32 %v4689_v36  ;;  %v8889_v39 = vpop.f32.mrb[93].mxu1  ;;  %9535 = vmatpush3.bf16.msra.mxu0 %v9534_v31  ;;  %v5029_v12 = vld [vmem:[%s12534_s3 + $0x90] sm:$0xff] }
 0x4a8   : > { %v4729_v40 = vmul.f32 %v4715_v38, %v4673_v37  ;;  %9536 = vmatprep.subr.bf16.mxu0 %v10382_v45  ;;  %v9537_v37 = vpack.c.bf16 %v5028_v30, %v5027_v28  ;;  %v5030_v39 = vld [vmem:[%s12534_s3 + $0x98] sm:$0xff]  ;;  %v5413_v30 = vld [vmem:[%s12534_s3 + $0x150] sm:$0xff] }
 0x4a9   : > { %v10348_v41 = vpop.eup %10347  ;;  %v4792_v42 = vld [vmem:[#allocation3 + $0x11] ss:$2 sm:$0xff] }
 0x4aa   : > { %4762 = vst.msk [vmem:[#allocation3 + $0x23] sm:$0xc0] %vm4761_vm9, %v4729_v40  ;;  %v4716_v18 = vadd.f32 1.0, %v10348_v41  ;;  %v4625_v46 = vpop.f32.mrb[22].mxu1  ;;  %8928 = vmatmul.mubr.msk.f32.gmra.mrb[92].mxu0 %vm4738_vm4, %v4792_v42  ;;  %v4772_v41 = vld [vmem:[#allocation3] ss:$2 sm:$0xff] }
 0x4ab   : > { %v9712_v47 = vadd.f32 %v4625_v46, %v11574_v51  ;;  %v8892_v23 = vpop.f32.mrb[23].mxu1  ;;  %8930 = vmatprep.mubr.msk.f32.mxu0 %vm10383_vm2, %v10381_v44 }
 0x4ac   : > { %v4730_v48 = vmul.f32 %v4716_v18, %v4674_v43  ;;  %v9540_v18 = vpack.c.bf16 %v5030_v39, %v5029_v12  ;;  %v5032_v23 = vld [vmem:[%s12534_s3 + $0xa8] sm:$0xff]  ;;  %v5417_v39 = vld [vmem:[%s12534_s3 + $0x170] sm:$0xff] }
 0x4ad   : > { %v4690_v49 = vmul.f32 0.70710677, %v9712_v47  ;;  %v4676_v32 = vmul.f32 0.5, %v9712_v47  ;;  %v5031_v47 = vld [vmem:[%s12534_s3 + $0xa0] sm:$0xff] }
 0x4ae   : > { %4764 = vst.msk [vmem:[#allocation3 + $0x2b] sm:$0x3f] %vm4763_vm10, %v4730_v48  ;;  %v4630_v26 = vpop.f32.mrb[24].mxu1  ;;  %v4774_v48 = vld [vmem:[#allocation3 + $0x10] ss:$2 sm:$0xff] }
 0x4af   : > { %10351 = verf.f32 %v4690_v49  ;;  %v9713_v50 = vadd.f32 %v4630_v26, %v11579_v56  ;;  %v8895_v52 = vpop.f32.mrb[25].mxu1  ;;  %v9543_v49 = vpack.c.bf16 %v5032_v23, %v5031_v47  ;;  %v5033_v26 = vld [vmem:[%s12534_s3 + $0xb0] sm:$0xff] }
 0x4b1   : > { %v10350_v53 = vpop.eup %10349  ;;  %v4691_v54 = vmul.f32 0.70710677, %v9713_v50  ;;  %v4677_v13 = vmul.f32 0.5, %v9713_v50  ;;  %v5034_v50 = vld [vmem:[%s12534_s3 + $0xb8] sm:$0xff] }
 0x4b2   : > { %v4717_v29 = vadd.f32 1.0, %v10350_v53  ;;  %v4635_v57 = vpop.f32.mrb[26].mxu1  ;;  %v9546_v53 = vpack.c.bf16 %v5034_v50, %v5033_v26  ;;  %v5402_v26 = vld [vmem:[#allocation3 + $0xb] ss:$2 sm:$0xff] }
 0x4b3   : > { %10353 = verf.f32 %v4691_v54  ;;  %v9714_v51 = vadd.f32 %v4635_v57, %v11584_v59  ;;  %v8898_v58 = vpop.f32.mrb[27].mxu1 }
 0x4b4   : > { %v4731_v60 = vmul.f32 %v4717_v29, %v4675_v55  ;;  %v5155_v55 = vld [vmem:[%s12534_s3 + $0xc0] sm:$0xff]  ;;  %v5156_v29 = vld [vmem:[%s12534_s3 + $0xc8] sm:$0xff]  ;;  %v5157_v58 = vld [vmem:[%s12534_s3 + $0xd0] sm:$0xff] }
 0x4b5   : > { %v4692_v61 = vmul.f32 0.70710677, %v9714_v51  ;;  %v4794_v63 = vld [vmem:[#allocation3 + $0x21] ss:$2 sm:$0xff]  ;;  %v4678_v20 = vmul.f32 0.5, %v9714_v51  ;;  %v9549_v51 = vpack.c.bf16 %v5156_v29, %v5155_v55 }
 0x4b6   : > { %4765 = vst.msk [vmem:[#allocation3 + $0x33] sm:$0xff] %vm4738_vm4, %v4731_v60  ;;  %v4640_v0 = vpop.f32.mrb[28].mxu1  ;;  %8931 = vmatmul.mubr.msk.f32.gmra.mrb[94].mxu0 %vm4738_vm4, %v4794_v63  ;;  %v4776_v52 = vld [vmem:[#allocation3 + $0x20] ss:$2 sm:$0xff]  ;;  %v5158_v60 = vld [vmem:[%s12534_s3 + $0xd8] sm:$0xff] }
 0x4b7   : > { %10355 = verf.f32 %v4692_v61  ;;  %v9715_v56 = vadd.f32 %v4640_v0, %v11589_v62  ;;  %v8901_v1 = vpop.f32.mrb[29].mxu1  ;;  %8933 = vmatprep.mubr.msk.f32.mxu0 %vm10383_vm2, %v10381_v44  ;;  %v5018_v61 = vld [vmem:[#allocation3 + $0x2] ss:$2 sm:$0xff]  ;;  %v9552_v63 = vpack.c.bf16 %v5158_v60, %v5157_v58  ;;  %v5159_v0 = vld [vmem:[%s12534_s3 + $0xe0] sm:$0xff] }
 0x4b8   : > { %v5020_v1 = vld [vmem:[#allocation3 + $0x12] ss:$2 sm:$0xff]  ;;  %v5545_v29 = vld [vmem:[%s12534_s3 + $0x1b0] sm:$0xff] }
 0x4b9   : > { %v10352_v3 = vpop.eup %10351  ;;  %v4693_v4 = vmul.f32 0.70710677, %v9715_v56  ;;  %v4679_v25 = vmul.f32 0.5, %v9715_v56  ;;  %v5160_v56 = vld [vmem:[%s12534_s3 + $0xe8] sm:$0xff] }
 0x4ba   : > { %v4718_v59 = vadd.f32 1.0, %v10352_v3  ;;  %v4645_v5 = vpop.f32.mrb[30].mxu1  ;;  %v9555_v3 = vpack.c.bf16 %v5160_v56, %v5159_v0 }
 0x4bb   : > { %10357 = verf.f32 %v4693_v4  ;;  %v9716_v6 = vadd.f32 %v4645_v5, %v11594_v2  ;;  %v8904_v8 = vpop.f32.mrb[31].mxu1  ;;  %v5161_v4 = vld [vmem:[%s12534_s3 + $0xf0] sm:$0xff] }
 0x4bc   : > { %v4732_v9 = vmul.f32 %v4718_v59, %v4676_v32  ;;  %v5162_v32 = vld [vmem:[%s12534_s3 + $0xf8] sm:$0xff]  ;;  %v5283_v8 = vld [vmem:[%s12534_s3 + $0x100] sm:$0xff] }
 0x4bd   : > { %v10354_v10 = vpop.eup %10353  ;;  %v4694_v11 = vmul.f32 0.70710677, %v9716_v6  ;;  %v4680_v34 = vmul.f32 0.5, %v9716_v6  ;;  %v5022_v59 = vld [vmem:[#allocation3 + $0x22] ss:$2 sm:$0xff]  ;;  %v9558_v5 = vpack.c.bf16 %v5162_v32, %v5161_v4 }
 0x4be   : > { %4766 = vst.msk [vmem:[#allocation3 + $0x3b] sm:$0xfc] %vm4754_vm6, %v4732_v9  ;;  %v4719_v62 = vadd.f32 1.0, %v10354_v10  ;;  %v4650_v35 = vpop.f32.mrb[32].mxu1  ;;  %v5284_v9 = vld [vmem:[%s12534_s3 + $0x108] sm:$0xff] }
 0x4bf   : > { %10359 = verf.f32 %v4694_v11  ;;  %v9717_v14 = vadd.f32 %v4650_v35, %v11605_v7  ;;  %v8907_v15 = vpop.f32.mrb[33].mxu1  ;;  %v9561_v11 = vpack.c.bf16 %v5284_v9, %v5283_v8  ;;  %v5146_v35 = vld [vmem:[#allocation3 + $0x3] ss:$2 sm:$0xff]  ;;  %v5530_v4 = vld [vmem:[#allocation3 + $0xc] ss:$2 sm:$0xff] }
 0x4c0   : > { %v4733_v16 = vmul.f32 %v4719_v62, %v4677_v13  ;;  %v5285_v13 = vld [vmem:[%s12534_s3 + $0x110] sm:$0xff]  ;;  %v5286_v62 = vld [vmem:[%s12534_s3 + $0x118] sm:$0xff]  ;;  %v5287_v15 = vld [vmem:[%s12534_s3 + $0x120] sm:$0xff] }
 0x4c1   : > { %v10356_v17 = vpop.eup %10355  ;;  %v4695_v19 = vmul.f32 0.70710677, %v9717_v14  ;;  %v4681_v42 = vmul.f32 0.5, %v9717_v14  ;;  %v9564_v14 = vpack.c.bf16 %v5286_v62, %v5285_v13  ;;  %v5673_v9 = vld [vmem:[%s12534_s3 + $0x1f0] sm:$0xff] }
 0x4c2   : > { %4767 = vst.msk [vmem:[#allocation3 + $0x43] sm:$0x3] %vm4756_vm7, %v4733_v16  ;;  %v4720_v2 = vadd.f32 1.0, %v10356_v17  ;;  %v5288_v16 = vld [vmem:[%s12534_s3 + $0x128] sm:$0xff] }
 0x4c3   : > { %10361 = verf.f32 %v4695_v19  ;;  %v5148_v17 = vld [vmem:[#allocation3 + $0x13] ss:$2 sm:$0xff]  ;;  %v9567_v19 = vpack.c.bf16 %v5288_v16, %v5287_v15 }
 0x4c4   : > { %v4734_v21 = vmul.f32 %v4720_v2, %v4678_v20  ;;  %v5289_v20 = vld [vmem:[%s12534_s3 + $0x130] sm:$0xff]  ;;  %v5290_v2 = vld [vmem:[%s12534_s3 + $0x138] sm:$0xff] }
 0x4c5   : > { %v10358_v22 = vpop.eup %10357  ;;  %v4796_v24 = vld [vmem:[#allocation3 + $0x31] ss:$2 sm:$0xff]  ;;  %v4778_v54 = vld [vmem:[#allocation3 + $0x30] ss:$2 sm:$0xff] }
 0x4c6   : > { %4768 = vst.msk [vmem:[#allocation3 + $0x43] sm:$0xf0] %vm4758_vm8, %v4734_v21  ;;  %v4721_v27 = vadd.f32 1.0, %v10358_v22  ;;  %8934 = vmatmul.mubr.msk.f32.gmra.mrb[96].mxu0 %vm4738_vm4, %v4796_v24  ;;  %v4780_v57 = vld [vmem:[#allocation3 + $0x40] ss:$2 sm:$0x3]  ;;  %v9570_v22 = vpack.c.bf16 %v5290_v2, %v5289_v20 }
 0x4c7   : > { %8936 = vmatprep.mubr.msk.f32.mxu0 %vm10383_vm2, %v10381_v44  ;;  %v5024_v6 = vld [vmem:[#allocation3 + $0x32] ss:$2 sm:$0xff]  ;;  %v5150_v21 = vld [vmem:[#allocation3 + $0x23] ss:$2 sm:$0xff]  ;;  %v5152_v24 = vld [vmem:[#allocation3 + $0x33] ss:$2 sm:$0xff] }
 0x4c8   : > { %v4735_v7 = vmul.f32 %v4721_v27, %v4679_v25  ;;  %v5411_v25 = vld [vmem:[%s12534_s3 + $0x140] sm:$0xff]  ;;  %v5412_v27 = vld [vmem:[%s12534_s3 + $0x148] sm:$0xff] }
 0x4c9   : > { %v10360_v31 = vpop.eup %10359  ;;  %v4798_v33 = vld [vmem:[#allocation3 + $0x41] ss:$2 sm:$0x3]  ;;  %v5026_v10 = vld [vmem:[#allocation3 + $0x42] ss:$2 sm:$0x3]  ;;  %v9573_v28 = vpack.c.bf16 %v5412_v27, %v5411_v25 }
 0x4ca   : > { %4769 = vst.msk [vmem:[#allocation3 + $0x4b] sm:$0xf] %vm4751_vm5, %v4735_v7  ;;  %v4722_v36 = vadd.f32 1.0, %v10360_v31  ;;  %8937 = vmatmul.mubr.msk.f32.gmra.mrb[98].mxu0 %vm4738_vm4, %v4798_v33  ;;  %v5154_v7 = vld [vmem:[#allocation3 + $0x43] ss:$2 sm:$0x3] }
 0x4cb   : > { %8955 = vmatprep.mubr.msk.f32.mxu0 %vm10383_vm2, %v10381_v44  ;;  %v5414_v31 = vld [vmem:[%s12534_s3 + $0x158] sm:$0xff]  ;;  %v5801_v27 = vld [vmem:[%s12534_s3 + $0x230] sm:$0xff] }
 0x4cc   : > { %v4736_v38 = vmul.f32 %v4722_v36, %v4680_v34  ;;  %v5274_v33 = vld [vmem:[#allocation3 + $0xa] ss:$2 sm:$0xff]  ;;  %v9576_v34 = vpack.c.bf16 %v5414_v31, %v5413_v30  ;;  %v5658_v20 = vld [vmem:[#allocation3 + $0xd] ss:$2 sm:$0xff] }
 0x4cd   : > { %v10362_v40 = vpop.eup %10361  ;;  %v5415_v36 = vld [vmem:[%s12534_s3 + $0x160] sm:$0xff] }
 0x4ce   : > { %4770 = vst.msk [vmem:[#allocation3 + $0x4b] sm:$0xc0] %vm4761_vm9, %v4736_v38  ;;  %v4723_v43 = vadd.f32 1.0, %v10362_v40  ;;  %8956 = vmatmul.mubr.msk.f32.vlgmr.msra.gmra.mrb[90].mxu0 %vm4738_vm4, %v4772_v41  ;;  %v5276_v38 = vld [vmem:[#allocation3 + $0x1a] ss:$2 sm:$0xff]  ;;  %v5418_v40 = vld [vmem:[%s12534_s3 + $0x178] sm:$0xff] }
 0x4cf   : > { %9538 = vmatpush3.bf16.msra.mxu0 %v9537_v37  ;;  %8958 = vmatprep.mubr.msk.f32.mxu0 %vm10383_vm2, %v10381_v44  ;;  %v5416_v37 = vld [vmem:[%s12534_s3 + $0x168] sm:$0xff]  ;;  %v5278_v41 = vld [vmem:[#allocation3 + $0x2a] ss:$2 sm:$0xff] }
 0x4d0   : > { %v4737_v46 = vmul.f32 %v4723_v43, %v4681_v42  ;;  %9539 = vmatprep.subr.bf16.mxu0 %v10382_v45  ;;  %v9579_v12 = vpack.c.bf16 %v5416_v37, %v5415_v36  ;;  %v9582_v42 = vpack.c.bf16 %v5418_v40, %v5417_v39  ;;  %v5280_v43 = vld [vmem:[#allocation3 + $0x3a] ss:$2 sm:$0xff]  ;;  %v5408_v60 = vld [vmem:[#allocation3 + $0x3b] ss:$2 sm:$0xff] }
 0x4d1   : > { %v5282_v47 = vld [vmem:[#allocation3 + $0x4a] ss:$2 sm:$0x3]  ;;  %v5410_v0 = vld [vmem:[#allocation3 + $0x4b] ss:$2 sm:$0x3] }
 0x4d2   : > { %4771 = vst.msk [vmem:[#allocation3 + $0x53] sm:$0x3f] %vm4763_vm10, %v4737_v46  ;;  %8959 = vmatmul.mubr.msk.f32.gmra.mrb[92].mxu0 %vm4738_vm4, %v4774_v48  ;;  %v5540_v46 = vld [vmem:[%s12534_s3 + $0x188] sm:$0xff]  ;;  %v5541_v48 = vld [vmem:[%s12534_s3 + $0x190] sm:$0xff] }
 0x4d3   : > { %9541 = vmatpush3.bf16.msra.mxu0 %v9540_v18  ;;  %8961 = vmatprep.mubr.msk.f32.mxu0 %vm10383_vm2, %v10381_v44  ;;  %v5539_v18 = vld [vmem:[%s12534_s3 + $0x180] sm:$0xff]  ;;  %v5538_v15 = vld [vmem:[#allocation3 + $0x4c] ss:$2 sm:$0x3] }
 0x4d4   : > { %9542 = vmatprep.subr.bf16.mxu0 %v10382_v45  ;;  %v9585_v23 = vpack.c.bf16 %v5540_v46, %v5539_v18  ;;  %v5536_v62 = vld [vmem:[#allocation3 + $0x3c] ss:$2 sm:$0xff]  ;;  %v5664_v31 = vld [vmem:[#allocation3 + $0x3d] ss:$2 sm:$0xff] }
 0x4d5   : > { %v5666_v36 = vld [vmem:[#allocation3 + $0x4d] ss:$2 sm:$0x3]  ;;  %v5786_v39 = vld [vmem:[#allocation3 + $0x14] ss:$2 sm:$0xff] }
 0x4d6   : > { %8962 = vmatmul.mubr.msk.f32.gmra.mrb[94].mxu0 %vm4738_vm4, %v4776_v52  ;;  %v5543_v52 = vld [vmem:[%s12534_s3 + $0x1a0] sm:$0xff]  ;;  %v5929_v46 = vld [vmem:[%s12534_s3 + $0x270] sm:$0xff] }
 0x4d7   : > { %9544 = vmatpush3.bf16.msra.mxu0 %v9543_v49  ;;  %8964 = vmatprep.mubr.msk.f32.mxu0 %vm10383_vm2, %v10381_v44  ;;  %v5542_v49 = vld [vmem:[%s12534_s3 + $0x198] sm:$0xff] }
 0x4d8   : > { %9545 = vmatprep.subr.bf16.mxu0 %v10382_v45  ;;  %v9588_v50 = vpack.c.bf16 %v5542_v49, %v5541_v48  ;;  %v5792_v49 = vld [vmem:[#allocation3 + $0x44] ss:$2 sm:$0xff] }
 0x4da   : > { %8965 = vmatmul.mubr.msk.f32.gmra.mrb[96].mxu0 %vm4738_vm4, %v4778_v54  ;;  %v5404_v54 = vld [vmem:[#allocation3 + $0x1b] ss:$2 sm:$0xff] }
 0x4db   : > { %8967 = vmatprep.mubr.msk.f32.mxu0 %vm10383_vm2, %v10381_v44  ;;  %9547 = vmatpush3.bf16.msra.mxu0 %v9546_v53  ;;  %v5544_v53 = vld [vmem:[%s12534_s3 + $0x1a8] sm:$0xff] }
 0x4dc   : > { %9548 = vmatprep.subr.bf16.mxu0 %v10382_v45  ;;  %v9591_v55 = vpack.c.bf16 %v5544_v53, %v5543_v52  ;;  %v5794_v52 = vld [vmem:[#allocation3 + $0x54] ss:$2 sm:$0x3] }
 0x4de   : > { %8968 = vmatmul.mubr.msk.f32.gmra.mrb[98].mxu0 %vm4738_vm4, %v4780_v57  ;;  %v5546_v57 = vld [vmem:[%s12534_s3 + $0x1b8] sm:$0xff] }
 0x4df   : > { %8986 = vmatprep.mubr.msk.f32.mxu0 %vm10383_vm2, %v10381_v44  ;;  %v9594_v58 = vpack.c.bf16 %v5546_v57, %v5545_v29  ;;  %v5914_v29 = vld [vmem:[#allocation3 + $0x15] ss:$2 sm:$0xff] }
 0x4e2   : > { %8987 = vmatmul.mubr.msk.f32.vlgmr.msra.gmra.mrb[90].mxu0 %vm4738_vm4, %v5018_v61  ;;  %v5667_v61 = vld [vmem:[%s12534_s3 + $0x1c0] sm:$0xff] }
 0x4e3   : > { %9550 = vmatpush3.bf16.msra.mxu0 %v9549_v51  ;;  %8989 = vmatprep.mubr.msk.f32.mxu0 %vm10383_vm2, %v10381_v44  ;;  %v5406_v51 = vld [vmem:[#allocation3 + $0x2b] ss:$2 sm:$0xff] }
 0x4e4   : > { %9551 = vmatprep.subr.bf16.mxu0 %v10382_v45 }
 0x4e6   : > { %8990 = vmatmul.mubr.msk.f32.gmra.mrb[92].mxu0 %vm4738_vm4, %v5020_v1  ;;  %v5669_v1 = vld [vmem:[%s12534_s3 + $0x1d0] sm:$0xff] }
 0x4e7   : > { %9553 = vmatpush3.bf16.msra.mxu0 %v9552_v63  ;;  %8992 = vmatprep.mubr.msk.f32.mxu0 %vm10383_vm2, %v10381_v44  ;;  %v5668_v63 = vld [vmem:[%s12534_s3 + $0x1c8] sm:$0xff] }
 0x4e8   : > { %9554 = vmatprep.subr.bf16.mxu0 %v10382_v45  ;;  %v9597_v56 = vpack.c.bf16 %v5668_v63, %v5667_v61  ;;  %v6057_v63 = vld [vmem:[%s12534_s3 + $0x2b0] sm:$0xff] }
 0x4ea   : > { %8993 = vmatmul.mubr.msk.f32.gmra.mrb[94].mxu0 %vm4738_vm4, %v5022_v59  ;;  %v5671_v59 = vld [vmem:[%s12534_s3 + $0x1e0] sm:$0xff] }
 0x4eb   : > { %9556 = vmatpush3.bf16.msra.mxu0 %v9555_v3  ;;  %8995 = vmatprep.mubr.msk.f32.mxu0 %vm10383_vm2, %v10381_v44  ;;  %v5670_v3 = vld [vmem:[%s12534_s3 + $0x1d8] sm:$0xff] }
 0x4ec   : > { %9557 = vmatprep.subr.bf16.mxu0 %v10382_v45  ;;  %v9600_v32 = vpack.c.bf16 %v5670_v3, %v5669_v1  ;;  %v5920_v3 = vld [vmem:[#allocation3 + $0x45] ss:$2 sm:$0xff] }
 0x4ee   : > { %8996 = vmatmul.mubr.msk.f32.gmra.mrb[96].mxu0 %vm4738_vm4, %v5024_v6  ;;  %v5532_v6 = vld [vmem:[#allocation3 + $0x1c] ss:$2 sm:$0xff] }
 0x4ef   : > { %8998 = vmatprep.mubr.msk.f32.mxu0 %vm10383_vm2, %v10381_v44  ;;  %9559 = vmatpush3.bf16.msra.mxu0 %v9558_v5  ;;  %v5672_v5 = vld [vmem:[%s12534_s3 + $0x1e8] sm:$0xff] }
 0x4f0   : > { %9560 = vmatprep.subr.bf16.mxu0 %v10382_v45  ;;  %v9603_v8 = vpack.c.bf16 %v5672_v5, %v5671_v59  ;;  %v5922_v59 = vld [vmem:[#allocation3 + $0x55] ss:$2 sm:$0x3] }
 0x4f2   : > { %8999 = vmatmul.mubr.msk.f32.gmra.mrb[98].mxu0 %vm4738_vm4, %v5026_v10  ;;  %v5674_v10 = vld [vmem:[%s12534_s3 + $0x1f8] sm:$0xff] }
 0x4f3   : > { %9017 = vmatprep.mubr.msk.f32.mxu0 %vm10383_vm2, %v10381_v44  ;;  %v9606_v13 = vpack.c.bf16 %v5674_v10, %v5673_v9  ;;  %v6042_v9 = vld [vmem:[#allocation3 + $0x16] ss:$2 sm:$0xff] }
 0x4f6   : > { %9018 = vmatmul.mubr.msk.f32.vlgmr.msra.gmra.mrb[90].mxu0 %vm4738_vm4, %v5146_v35  ;;  %v5795_v35 = vld [vmem:[%s12534_s3 + $0x200] sm:$0xff] }
 0x4f7   : > { %9562 = vmatpush3.bf16.msra.mxu0 %v9561_v11  ;;  %9020 = vmatprep.mubr.msk.f32.mxu0 %vm10383_vm2, %v10381_v44  ;;  %v5534_v11 = vld [vmem:[#allocation3 + $0x2c] ss:$2 sm:$0xff] }
 0x4f8   : > { %9563 = vmatprep.subr.bf16.mxu0 %v10382_v45 }
 0x4fa   : > { %9021 = vmatmul.mubr.msk.f32.gmra.mrb[92].mxu0 %vm4738_vm4, %v5148_v17  ;;  %v5797_v17 = vld [vmem:[%s12534_s3 + $0x210] sm:$0xff] }
 0x4fb   : > { %9565 = vmatpush3.bf16.msra.mxu0 %v9564_v14  ;;  %9023 = vmatprep.mubr.msk.f32.mxu0 %vm10383_vm2, %v10381_v44  ;;  %v5796_v14 = vld [vmem:[%s12534_s3 + $0x208] sm:$0xff] }
 0x4fc   : > { %9566 = vmatprep.subr.bf16.mxu0 %v10382_v45  ;;  %v9609_v16 = vpack.c.bf16 %v5796_v14, %v5795_v35  ;;  %v6185_v14 = vld [vmem:[%s12534_s3 + $0x2f0] sm:$0xff] }
 0x4fe   : > { %9024 = vmatmul.mubr.msk.f32.gmra.mrb[94].mxu0 %vm4738_vm4, %v5150_v21  ;;  %v5799_v21 = vld [vmem:[%s12534_s3 + $0x220] sm:$0xff] }
 0x4ff   : > { %9568 = vmatpush3.bf16.msra.mxu0 %v9567_v19  ;;  %9026 = vmatprep.mubr.msk.f32.mxu0 %vm10383_vm2, %v10381_v44  ;;  %v5798_v19 = vld [vmem:[%s12534_s3 + $0x218] sm:$0xff] }
 0x500   : > { %9569 = vmatprep.subr.bf16.mxu0 %v10382_v45  ;;  %v9612_v2 = vpack.c.bf16 %v5798_v19, %v5797_v17  ;;  %v6048_v19 = vld [vmem:[#allocation3 + $0x46] ss:$2 sm:$0xff] }
 0x502   : > { %9027 = vmatmul.mubr.msk.f32.gmra.mrb[96].mxu0 %vm4738_vm4, %v5152_v24  ;;  %v5660_v24 = vld [vmem:[#allocation3 + $0x1d] ss:$2 sm:$0xff] }
 0x503   : > { %9029 = vmatprep.mubr.msk.f32.mxu0 %vm10383_vm2, %v10381_v44  ;;  %9571 = vmatpush3.bf16.msra.mxu0 %v9570_v22  ;;  %v5800_v22 = vld [vmem:[%s12534_s3 + $0x228] sm:$0xff] }
 0x504   : > { %9572 = vmatprep.subr.bf16.mxu0 %v10382_v45  ;;  %v9615_v25 = vpack.c.bf16 %v5800_v22, %v5799_v21  ;;  %v6050_v21 = vld [vmem:[#allocation3 + $0x56] ss:$2 sm:$0x3] }
 0x506   : > { %9030 = vmatmul.mubr.msk.f32.gmra.mrb[98].mxu0 %vm4738_vm4, %v5154_v7  ;;  %v5802_v7 = vld [vmem:[%s12534_s3 + $0x238] sm:$0xff] }
 0x507   : > { %9048 = vmatprep.mubr.msk.f32.mxu0 %vm10383_vm2, %v10381_v44  ;;  %v9618_v30 = vpack.c.bf16 %v5802_v7, %v5801_v27  ;;  %v6170_v27 = vld [vmem:[#allocation3 + $0x17] ss:$2 sm:$0xff] }
 0x50a   : > { %9049 = vmatmul.mubr.msk.f32.vlgmr.msra.gmra.mrb[90].mxu0 %vm4738_vm4, %v5274_v33  ;;  %v5923_v33 = vld [vmem:[%s12534_s3 + $0x240] sm:$0xff] }
 0x50b   : > { %9574 = vmatpush3.bf16.msra.mxu0 %v9573_v28  ;;  %9051 = vmatprep.mubr.msk.f32.mxu0 %vm10383_vm2, %v10381_v44  ;;  %v5662_v28 = vld [vmem:[#allocation3 + $0x2d] ss:$2 sm:$0xff] }
 0x50c   : > { %9575 = vmatprep.subr.bf16.mxu0 %v10382_v45 }
 0x50e   : > { %9052 = vmatmul.mubr.msk.f32.gmra.mrb[92].mxu0 %vm4738_vm4, %v5276_v38  ;;  %v5925_v38 = vld [vmem:[%s12534_s3 + $0x250] sm:$0xff] }
 0x50f   : > { %9577 = vmatpush3.bf16.msra.mxu0 %v9576_v34  ;;  %9054 = vmatprep.mubr.msk.f32.mxu0 %vm10383_vm2, %v10381_v44  ;;  %v5924_v34 = vld [vmem:[%s12534_s3 + $0x248] sm:$0xff] }
 0x510   : > { %9578 = vmatprep.subr.bf16.mxu0 %v10382_v45  ;;  %v9621_v37 = vpack.c.bf16 %v5924_v34, %v5923_v33  ;;  %v6313_v34 = vld [vmem:[%s12534_s3 + $0x330] sm:$0xff] }
 0x512   : > { %9055 = vmatmul.mubr.msk.f32.gmra.mrb[94].mxu0 %vm4738_vm4, %v5278_v41  ;;  %v5927_v41 = vld [vmem:[%s12534_s3 + $0x260] sm:$0xff] }
 0x513   : > { %9580 = vmatpush3.bf16.msra.mxu0 %v9579_v12  ;;  %9057 = vmatprep.mubr.msk.f32.mxu0 %vm10383_vm2, %v10381_v44  ;;  %v5926_v12 = vld [vmem:[%s12534_s3 + $0x258] sm:$0xff] }
 0x514   : > { %9581 = vmatprep.subr.bf16.mxu0 %v10382_v45  ;;  %v9624_v40 = vpack.c.bf16 %v5926_v12, %v5925_v38  ;;  %v6176_v12 = vld [vmem:[#allocation3 + $0x47] ss:$2 sm:$0xff] }
 0x516   : > { %9058 = vmatmul.mubr.msk.f32.gmra.mrb[96].mxu0 %vm4738_vm4, %v5280_v43  ;;  %v5788_v43 = vld [vmem:[#allocation3 + $0x24] ss:$2 sm:$0xff] }
 0x517   : > { %9060 = vmatprep.mubr.msk.f32.mxu0 %vm10383_vm2, %v10381_v44  ;;  %9583 = vmatpush3.bf16.msra.mxu0 %v9582_v42  ;;  %v5928_v42 = vld [vmem:[%s12534_s3 + $0x268] sm:$0xff] }
 0x518   : > { %9584 = vmatprep.subr.bf16.mxu0 %v10382_v45  ;;  %v9627_v18 = vpack.c.bf16 %v5928_v42, %v5927_v41  ;;  %v6178_v41 = vld [vmem:[#allocation3 + $0x57] ss:$2 sm:$0x3] }
 0x51a   : > { %9061 = vmatmul.mubr.msk.f32.gmra.mrb[98].mxu0 %vm4738_vm4, %v5282_v47  ;;  %v5930_v47 = vld [vmem:[%s12534_s3 + $0x278] sm:$0xff] }
 0x51b   : > { %9079 = vmatprep.mubr.msk.f32.mxu0 %vm10383_vm2, %v10381_v44  ;;  %v9630_v48 = vpack.c.bf16 %v5930_v47, %v5929_v46  ;;  %v6298_v46 = vld [vmem:[#allocation3 + $0x1e] ss:$2 sm:$0xff] }
 0x51e   : > { %9080 = vmatmul.mubr.msk.f32.vlgmr.msra.gmra.mrb[90].mxu0 %vm4738_vm4, %v5402_v26  ;;  %v6051_v26 = vld [vmem:[%s12534_s3 + $0x280] sm:$0xff] }
 0x51f   : > { %9586 = vmatpush3.bf16.msra.mxu0 %v9585_v23  ;;  %9082 = vmatprep.mubr.msk.f32.mxu0 %vm10383_vm2, %v10381_v44  ;;  %v5790_v23 = vld [vmem:[#allocation3 + $0x34] ss:$2 sm:$0xff] }
 0x520   : > { %9587 = vmatprep.subr.bf16.mxu0 %v10382_v45 }
 0x522   : > { %9083 = vmatmul.mubr.msk.f32.gmra.mrb[92].mxu0 %vm4738_vm4, %v5404_v54  ;;  %v6053_v54 = vld [vmem:[%s12534_s3 + $0x290] sm:$0xff] }
 0x523   : > { %9589 = vmatpush3.bf16.msra.mxu0 %v9588_v50  ;;  %9085 = vmatprep.mubr.msk.f32.mxu0 %vm10383_vm2, %v10381_v44  ;;  %v6052_v50 = vld [vmem:[%s12534_s3 + $0x288] sm:$0xff] }
 0x524   : > { %9590 = vmatprep.subr.bf16.mxu0 %v10382_v45  ;;  %v9633_v53 = vpack.c.bf16 %v6052_v50, %v6051_v26  ;;  %v6441_v50 = vld [vmem:[%s12534_s3 + $0x370] sm:$0xff] }
 0x526   : > { %9086 = vmatmul.mubr.msk.f32.gmra.mrb[94].mxu0 %vm4738_vm4, %v5406_v51  ;;  %v6055_v51 = vld [vmem:[%s12534_s3 + $0x2a0] sm:$0xff] }
 0x527   : > { %9592 = vmatpush3.bf16.msra.mxu0 %v9591_v55  ;;  %9088 = vmatprep.mubr.msk.f32.mxu0 %vm10383_vm2, %v10381_v44  ;;  %v6054_v55 = vld [vmem:[%s12534_s3 + $0x298] sm:$0xff] }
 0x528   : > { %9593 = vmatprep.subr.bf16.mxu0 %v10382_v45  ;;  %v9636_v57 = vpack.c.bf16 %v6054_v55, %v6053_v54  ;;  %v6304_v55 = vld [vmem:[#allocation3 + $0x4e] ss:$2 sm:$0xff] }
 0x52a   : > { %9089 = vmatmul.mubr.msk.f32.gmra.mrb[96].mxu0 %vm4738_vm4, %v5408_v60  ;;  %v5916_v60 = vld [vmem:[#allocation3 + $0x25] ss:$2 sm:$0xff] }
 0x52b   : > { %9091 = vmatprep.mubr.msk.f32.mxu0 %vm10383_vm2, %v10381_v44  ;;  %9595 = vmatpush3.bf16.msra.mxu0 %v9594_v58  ;;  %v6056_v58 = vld [vmem:[%s12534_s3 + $0x2a8] sm:$0xff] }
 0x52c   : > { %9596 = vmatprep.subr.bf16.mxu0 %v10382_v45  ;;  %v9639_v61 = vpack.c.bf16 %v6056_v58, %v6055_v51  ;;  %v6561_v51 = vld [vmem:[%s12534_s3 + $0x388] sm:$0xff] }
 0x52e   : > { %9092 = vmatmul.mubr.msk.f32.gmra.mrb[98].mxu0 %vm4738_vm4, %v5410_v0  ;;  %v6058_v0 = vld [vmem:[%s12534_s3 + $0x2b8] sm:$0xff] }
 0x52f   : > { %9110 = vmatprep.mubr.msk.f32.mxu0 %vm10383_vm2, %v10381_v44  ;;  %v9642_v1 = vpack.c.bf16 %v6058_v0, %v6057_v63  ;;  %v6426_v63 = vld [vmem:[#allocation3 + $0x1f] ss:$2 sm:$0xff] }
 0x532   : > { %9111 = vmatmul.mubr.msk.f32.vlgmr.msra.gmra.mrb[90].mxu0 %vm4738_vm4, %v5530_v4  ;;  %v6179_v4 = vld [vmem:[%s12534_s3 + $0x2c0] sm:$0xff] }
 0x533   : > { %9598 = vmatpush3.bf16.msra.mxu0 %v9597_v56  ;;  %9113 = vmatprep.mubr.msk.f32.mxu0 %vm10383_vm2, %v10381_v44  ;;  %v5918_v56 = vld [vmem:[#allocation3 + $0x35] ss:$2 sm:$0xff] }
 0x534   : > { %9599 = vmatprep.subr.bf16.mxu0 %v10382_v45 }
 0x536   : > { %9114 = vmatmul.mubr.msk.f32.gmra.mrb[92].mxu0 %vm4738_vm4, %v5532_v6  ;;  %v6181_v6 = vld [vmem:[%s12534_s3 + $0x2d0] sm:$0xff] }
 0x537   : > { %9601 = vmatpush3.bf16.msra.mxu0 %v9600_v32  ;;  %9116 = vmatprep.mubr.msk.f32.mxu0 %vm10383_vm2, %v10381_v44  ;;  %v6180_v32 = vld [vmem:[%s12534_s3 + $0x2c8] sm:$0xff] }
 0x538   : > { %9602 = vmatprep.subr.bf16.mxu0 %v10382_v45  ;;  %v9645_v5 = vpack.c.bf16 %v6180_v32, %v6179_v4  ;;  %v6566_v32 = vld [vmem:[%s12534_s3 + $0x3b0] sm:$0xff] }
 0x53a   : > { %9117 = vmatmul.mubr.msk.f32.gmra.mrb[94].mxu0 %vm4738_vm4, %v5534_v11  ;;  %v6183_v11 = vld [vmem:[%s12534_s3 + $0x2e0] sm:$0xff] }
 0x53b   : > { %9604 = vmatpush3.bf16.msra.mxu0 %v9603_v8  ;;  %9119 = vmatprep.mubr.msk.f32.mxu0 %vm10383_vm2, %v10381_v44  ;;  %v6182_v8 = vld [vmem:[%s12534_s3 + $0x2d8] sm:$0xff] }
 0x53c   : > { %9605 = vmatprep.subr.bf16.mxu0 %v10382_v45  ;;  %v9648_v10 = vpack.c.bf16 %v6182_v8, %v6181_v6  ;;  %v6432_v8 = vld [vmem:[#allocation3 + $0x4f] ss:$2 sm:$0xff] }
 0x53e   : > { %9120 = vmatmul.mubr.msk.f32.gmra.mrb[96].mxu0 %vm4738_vm4, %v5536_v62  ;;  %v6044_v62 = vld [vmem:[#allocation3 + $0x26] ss:$2 sm:$0xff] }
 0x53f   : > { %9122 = vmatprep.mubr.msk.f32.mxu0 %vm10383_vm2, %v10381_v44  ;;  %9607 = vmatpush3.bf16.msra.mxu0 %v9606_v13  ;;  %v6184_v13 = vld [vmem:[%s12534_s3 + $0x2e8] sm:$0xff] }
 0x540   : > { %9608 = vmatprep.subr.bf16.mxu0 %v10382_v45  ;;  %v9651_v35 = vpack.c.bf16 %v6184_v13, %v6183_v11  ;;  %v6686_v11 = vld [vmem:[%s12534_s3 + $0x3c8] sm:$0xff] }
 0x542   : > { %9123 = vmatmul.mubr.msk.f32.gmra.mrb[98].mxu0 %vm4738_vm4, %v5538_v15  ;;  %v6186_v15 = vld [vmem:[%s12534_s3 + $0x2f8] sm:$0xff] }
 0x543   : > { %9141 = vmatprep.mubr.msk.f32.mxu0 %vm10383_vm2, %v10381_v44  ;;  %v9654_v17 = vpack.c.bf16 %v6186_v15, %v6185_v14  ;;  %v6553_v14 = vld [vmem:[#allocation3 + $0x20] ss:$2 sm:$0xff] }
 0x546   : > { %9142 = vmatmul.mubr.msk.f32.vlgmr.msra.gmra.mrb[90].mxu0 %vm4738_vm4, %v5658_v20  ;;  %v6307_v20 = vld [vmem:[%s12534_s3 + $0x300] sm:$0xff] }
 0x547   : > { %9610 = vmatpush3.bf16.msra.mxu0 %v9609_v16  ;;  %9144 = vmatprep.mubr.msk.f32.mxu0 %vm10383_vm2, %v10381_v44  ;;  %v6046_v16 = vld [vmem:[#allocation3 + $0x36] ss:$2 sm:$0xff] }
 0x548   : > { %9611 = vmatprep.subr.bf16.mxu0 %v10382_v45 }
 0x54a   : > { %9145 = vmatmul.mubr.msk.f32.gmra.mrb[92].mxu0 %vm4738_vm4, %v5660_v24  ;;  %v6309_v24 = vld [vmem:[%s12534_s3 + $0x310] sm:$0xff] }
 0x54b   : > { %9613 = vmatpush3.bf16.msra.mxu0 %v9612_v2  ;;  %9147 = vmatprep.mubr.msk.f32.mxu0 %vm10383_vm2, %v10381_v44  ;;  %v6308_v2 = vld [vmem:[%s12534_s3 + $0x308] sm:$0xff] }
 0x54c   : > { %9614 = vmatprep.subr.bf16.mxu0 %v10382_v45  ;;  %v9657_v22 = vpack.c.bf16 %v6308_v2, %v6307_v20  ;;  %v6691_v2 = vld [vmem:[%s12534_s3 + $0x3f0] sm:$0xff] }
 0x54e   : > { %9148 = vmatmul.mubr.msk.f32.gmra.mrb[94].mxu0 %vm4738_vm4, %v5662_v28  ;;  %v6311_v28 = vld [vmem:[%s12534_s3 + $0x320] sm:$0xff] }
 0x54f   : > { %9616 = vmatpush3.bf16.msra.mxu0 %v9615_v25  ;;  %9150 = vmatprep.mubr.msk.f32.mxu0 %vm10383_vm2, %v10381_v44  ;;  %v6310_v25 = vld [vmem:[%s12534_s3 + $0x318] sm:$0xff] }
 0x550   : > { %9617 = vmatprep.subr.bf16.mxu0 %v10382_v45  ;;  %v9660_v7 = vpack.c.bf16 %v6310_v25, %v6309_v24  ;;  %v6557_v25 = vld [vmem:[#allocation3 + $0x50] ss:$2 sm:$0xff] }
 0x552   : > { %9151 = vmatmul.mubr.msk.f32.gmra.mrb[96].mxu0 %vm4738_vm4, %v5664_v31  ;;  %v6172_v31 = vld [vmem:[#allocation3 + $0x27] ss:$2 sm:$0xff] }
 0x553   : > { %9153 = vmatprep.mubr.msk.f32.mxu0 %vm10383_vm2, %v10381_v44  ;;  %9619 = vmatpush3.bf16.msra.mxu0 %v9618_v30  ;;  %v6312_v30 = vld [vmem:[%s12534_s3 + $0x328] sm:$0xff] }
 0x554   : > { %9620 = vmatprep.subr.bf16.mxu0 %v10382_v45  ;;  %v9663_v33 = vpack.c.bf16 %v6312_v30, %v6311_v28  ;;  %v6680_v28 = vld [vmem:[#allocation3 + $0x41] ss:$2 sm:$0xff]  ;;  %v6682_v30 = vld [vmem:[#allocation3 + $0x51] ss:$2 sm:$0xff] }
 0x556   : > { %9154 = vmatmul.mubr.msk.f32.gmra.mrb[98].mxu0 %vm4738_vm4, %v5666_v36  ;;  %v6314_v36 = vld [vmem:[%s12534_s3 + $0x338] sm:$0xff] }
 0x557   : > { %9172 = vmatprep.mubr.msk.f32.mxu0 %vm10383_vm2, %v10381_v44  ;;  %v9666_v38 = vpack.c.bf16 %v6314_v36, %v6313_v34 }
 0x55a   : > { %9173 = vmatmul.mubr.msk.f32.vlgmr.msra.gmra.mrb[90].mxu0 %vm4738_vm4, %v5786_v39  ;;  %v6435_v39 = vld [vmem:[%s12534_s3 + $0x340] sm:$0xff] }
 0x55b   : > { %9622 = vmatpush3.bf16.msra.mxu0 %v9621_v37  ;;  %9175 = vmatprep.mubr.msk.f32.mxu0 %vm10383_vm2, %v10381_v44  ;;  %v6174_v37 = vld [vmem:[#allocation3 + $0x37] ss:$2 sm:$0xff] }
 0x55c   : > { %9623 = vmatprep.subr.bf16.mxu0 %v10382_v45 }
 0x55e   : > { %9176 = vmatmul.mubr.msk.f32.gmra.mrb[92].mxu0 %vm4738_vm4, %v5788_v43  ;;  %v6437_v43 = vld [vmem:[%s12534_s3 + $0x350] sm:$0xff] }
 0x55f   : > { %9625 = vmatpush3.bf16.msra.mxu0 %v9624_v40  ;;  %9178 = vmatprep.mubr.msk.f32.mxu0 %vm10383_vm2, %v10381_v44  ;;  %v6436_v40 = vld [vmem:[%s12534_s3 + $0x348] sm:$0xff] }
 0x560   : > { %9626 = vmatprep.subr.bf16.mxu0 %v10382_v45  ;;  %v9669_v42 = vpack.c.bf16 %v6436_v40, %v6435_v39 }
 0x562   : > { %9179 = vmatmul.mubr.msk.f32.gmra.mrb[94].mxu0 %vm4738_vm4, %v5790_v23  ;;  %v6439_v23 = vld [vmem:[%s12534_s3 + $0x360] sm:$0xff] }
 0x563   : > { %9628 = vmatpush3.bf16.msra.mxu0 %v9627_v18  ;;  %9181 = vmatprep.mubr.msk.f32.mxu0 %vm10383_vm2, %v10381_v44  ;;  %v6438_v18 = vld [vmem:[%s12534_s3 + $0x358] sm:$0xff] }
 0x564   : > { %9629 = vmatprep.subr.bf16.mxu0 %v10382_v45  ;;  %v9672_v47 = vpack.c.bf16 %v6438_v18, %v6437_v43 }
 0x566   : > { %9182 = vmatmul.mubr.msk.f32.gmra.mrb[96].mxu0 %vm4738_vm4, %v5792_v49  ;;  %v6300_v49 = vld [vmem:[#allocation3 + $0x2e] ss:$2 sm:$0xff] }
 0x567   : > { %9184 = vmatprep.mubr.msk.f32.mxu0 %vm10383_vm2, %v10381_v44  ;;  %9631 = vmatpush3.bf16.msra.mxu0 %v9630_v48  ;;  %v6440_v48 = vld [vmem:[%s12534_s3 + $0x368] sm:$0xff] }
 0x568   : > { %9632 = vmatprep.subr.bf16.mxu0 %v10382_v45  ;;  %v9675_v26 = vpack.c.bf16 %v6440_v48, %v6439_v23 }
 0x56a   : > { %9185 = vmatmul.mubr.msk.f32.gmra.mrb[98].mxu0 %vm4738_vm4, %v5794_v52  ;;  %v6442_v52 = vld [vmem:[%s12534_s3 + $0x378] sm:$0xff] }
 0x56b   : > { %9203 = vmatprep.mubr.msk.f32.mxu0 %vm10383_vm2, %v10381_v44  ;;  %v9678_v54 = vpack.c.bf16 %v6442_v52, %v6441_v50 }
 0x56e   : > { %9204 = vmatmul.mubr.msk.f32.vlgmr.msra.gmra.mrb[90].mxu0 %vm4738_vm4, %v5914_v29  ;;  %v6306_v29 = vld [vmem:[#allocation3 + $0x5e] ss:$2 sm:$0x3] }
 0x56f   : > { %9634 = vmatpush3.bf16.msra.mxu0 %v9633_v53  ;;  %9206 = vmatprep.mubr.msk.f32.mxu0 %vm10383_vm2, %v10381_v44  ;;  %v6302_v53 = vld [vmem:[#allocation3 + $0x3e] ss:$2 sm:$0xff] }
 0x570   : > { %9635 = vmatprep.subr.bf16.mxu0 %v10382_v45 }
 0x572   : > { %9207 = vmatmul.mubr.msk.f32.gmra.mrb[92].mxu0 %vm4738_vm4, %v5916_v60  ;;  %v6562_v60 = vld [vmem:[%s12534_s3 + $0x390] sm:$0xff] }
 0x573   : > { %9637 = vmatpush3.bf16.msra.mxu0 %v9636_v57  ;;  %9209 = vmatprep.mubr.msk.f32.mxu0 %vm10383_vm2, %v10381_v44  ;;  %v6560_v57 = vld [vmem:[%s12534_s3 + $0x380] sm:$0xff] }
 0x574   : > { %9638 = vmatprep.subr.bf16.mxu0 %v10382_v45  ;;  %v9681_v58 = vpack.c.bf16 %v6561_v51, %v6560_v57 }
 0x576   : > { %9210 = vmatmul.mubr.msk.f32.gmra.mrb[94].mxu0 %vm4738_vm4, %v5918_v56  ;;  %v6564_v56 = vld [vmem:[%s12534_s3 + $0x3a0] sm:$0xff] }
 0x577   : > { %9640 = vmatpush3.bf16.msra.mxu0 %v9639_v61  ;;  %9212 = vmatprep.mubr.msk.f32.mxu0 %vm10383_vm2, %v10381_v44  ;;  %v6563_v61 = vld [vmem:[%s12534_s3 + $0x398] sm:$0xff] }
 0x578   : > { %9641 = vmatprep.subr.bf16.mxu0 %v10382_v45  ;;  %v9684_v0 = vpack.c.bf16 %v6563_v61, %v6562_v60 }
 0x57a   : > { %9213 = vmatmul.mubr.msk.f32.gmra.mrb[96].mxu0 %vm4738_vm4, %v5920_v3  ;;  %v6428_v3 = vld [vmem:[#allocation3 + $0x2f] ss:$2 sm:$0xff] }
 0x57b   : > { %9215 = vmatprep.mubr.msk.f32.mxu0 %vm10383_vm2, %v10381_v44  ;;  %9643 = vmatpush3.bf16.msra.mxu0 %v9642_v1  ;;  %v6565_v1 = vld [vmem:[%s12534_s3 + $0x3a8] sm:$0xff] }
 0x57c   : > { %9644 = vmatprep.subr.bf16.mxu0 %v10382_v45  ;;  %v9687_v4 = vpack.c.bf16 %v6565_v1, %v6564_v56 }
 0x57e   : > { %9216 = vmatmul.mubr.msk.f32.gmra.mrb[98].mxu0 %vm4738_vm4, %v5922_v59  ;;  %v6567_v59 = vld [vmem:[%s12534_s3 + $0x3b8] sm:$0xff] }
 0x57f   : > { %9234 = vmatprep.mubr.msk.f32.mxu0 %vm10383_vm2, %v10381_v44  ;;  %v9690_v6 = vpack.c.bf16 %v6567_v59, %v6566_v32 }
 0x582   : > { %9235 = vmatmul.mubr.msk.f32.vlgmr.msra.gmra.mrb[90].mxu0 %vm4738_vm4, %v6042_v9  ;;  %v6434_v9 = vld [vmem:[#allocation3 + $0x5f] ss:$2 sm:$0x3] }
 0x583   : > { %9646 = vmatpush3.bf16.msra.mxu0 %v9645_v5  ;;  %9237 = vmatprep.mubr.msk.f32.mxu0 %vm10383_vm2, %v10381_v44  ;;  %v6430_v5 = vld [vmem:[#allocation3 + $0x3f] ss:$2 sm:$0xff] }
 0x584   : > { %9647 = vmatprep.subr.bf16.mxu0 %v10382_v45 }
 0x586   : > { %9238 = vmatmul.mubr.msk.f32.gmra.mrb[92].mxu0 %vm4738_vm4, %v6044_v62  ;;  %v6687_v62 = vld [vmem:[%s12534_s3 + $0x3d0] sm:$0xff] }
 0x587   : > { %9649 = vmatpush3.bf16.msra.mxu0 %v9648_v10  ;;  %9240 = vmatprep.mubr.msk.f32.mxu0 %vm10383_vm2, %v10381_v44  ;;  %v6685_v10 = vld [vmem:[%s12534_s3 + $0x3c0] sm:$0xff] }
 0x588   : > { %9650 = vmatprep.subr.bf16.mxu0 %v10382_v45  ;;  %v9693_v13 = vpack.c.bf16 %v6686_v11, %v6685_v10 }
 0x58a   : > { %9241 = vmatmul.mubr.msk.f32.gmra.mrb[94].mxu0 %vm4738_vm4, %v6046_v16  ;;  %v6689_v16 = vld [vmem:[%s12534_s3 + $0x3e0] sm:$0xff] }
 0x58b   : > { %9652 = vmatpush3.bf16.msra.mxu0 %v9651_v35  ;;  %9243 = vmatprep.mubr.msk.f32.mxu0 %vm10383_vm2, %v10381_v44  ;;  %v6688_v35 = vld [vmem:[%s12534_s3 + $0x3d8] sm:$0xff] }
 0x58c   : > { %9653 = vmatprep.subr.bf16.mxu0 %v10382_v45  ;;  %v9696_v15 = vpack.c.bf16 %v6688_v35, %v6687_v62 }
 0x58e   : > { %9244 = vmatmul.mubr.msk.f32.gmra.mrb[96].mxu0 %vm4738_vm4, %v6048_v19  ;;  %v6554_v19 = vld [vmem:[#allocation3 + $0x30] ss:$2 sm:$0xff] }
 0x58f   : > { %9246 = vmatprep.mubr.msk.f32.mxu0 %vm10383_vm2, %v10381_v44  ;;  %9655 = vmatpush3.bf16.msra.mxu0 %v9654_v17  ;;  %v6690_v17 = vld [vmem:[%s12534_s3 + $0x3e8] sm:$0xff] }
 0x590   : > { %9656 = vmatprep.subr.bf16.mxu0 %v10382_v45  ;;  %v9699_v20 = vpack.c.bf16 %v6690_v17, %v6689_v16 }
 0x592   : > { %9247 = vmatmul.mubr.msk.f32.gmra.mrb[98].mxu0 %vm4738_vm4, %v6050_v21  ;;  %v6692_v21 = vld [vmem:[%s12534_s3 + $0x3f8] sm:$0xff] }
 0x593   : > { %9265 = vmatprep.mubr.msk.f32.mxu0 %vm10383_vm2, %v10381_v44  ;;  %v9702_v24 = vpack.c.bf16 %v6692_v21, %v6691_v2 }
 0x596   : > { %9266 = vmatmul.mubr.msk.f32.vlgmr.msra.gmra.mrb[90].mxu0 %vm4738_vm4, %v6170_v27  ;;  %v6559_v27 = vld [vmem:[#allocation3 + $0x60] ss:$2 sm:$0x3] }
 0x597   : > { %9658 = vmatpush3.bf16.msra.mxu0 %v9657_v22  ;;  %9268 = vmatprep.mubr.msk.f32.mxu0 %vm10383_vm2, %v10381_v44  ;;  %v6555_v22 = vld [vmem:[#allocation3 + $0x40] ss:$2 sm:$0xff] }
 0x598   : > { %9659 = vmatprep.subr.bf16.mxu0 %v10382_v45 }
 0x59a   : > { %9269 = vmatmul.mubr.msk.f32.gmra.mrb[92].mxu0 %vm4738_vm4, %v6172_v31  ;;  %v6684_v31 = vld [vmem:[#allocation3 + $0x61] ss:$2 sm:$0x3] }
 0x59b   : > { %9661 = vmatpush3.bf16.msra.mxu0 %v9660_v7  ;;  %9271 = vmatprep.mubr.msk.f32.mxu0 %vm10383_vm2, %v10381_v44  ;;  %v6678_v7 = vld [vmem:[#allocation3 + $0x21] ss:$2 sm:$0xff] }
 0x59c   : > { %9662 = vmatprep.subr.bf16.mxu0 %v10382_v45 }
 0x59e   : > { %9272 = vmatmul.mubr.msk.f32.gmra.mrb[94].mxu0 %vm4738_vm4, %v6174_v37 }
 0x59f   : > { %9664 = vmatpush3.bf16.msra.mxu0 %v9663_v33  ;;  %9274 = vmatprep.mubr.msk.f32.mxu0 %vm10383_vm2, %v10381_v44 }
 0x5a0   : > { %9665 = vmatprep.subr.bf16.mxu0 %v10382_v45 }
 0x5a2   : > { %9275 = vmatmul.mubr.msk.f32.gmra.mrb[96].mxu0 %vm4738_vm4, %v6176_v12 }
 0x5a3   : > { %9277 = vmatprep.mubr.msk.f32.mxu0 %vm10383_vm2, %v10381_v44  ;;  %9667 = vmatpush3.bf16.msra.mxu0 %v9666_v38 }
 0x5a4   : > { %9668 = vmatprep.subr.bf16.mxu0 %v10382_v45 }
 0x5a6   : > { %9278 = vmatmul.mubr.msk.f32.gmra.mrb[98].mxu0 %vm4738_vm4, %v6178_v41 }
 0x5a7   : > { %9296 = vmatprep.mubr.msk.f32.mxu0 %vm10383_vm2, %v10381_v44 }
 0x5aa   : > { %9297 = vmatmul.mubr.msk.f32.vlgmr.msra.gmra.mrb[90].mxu0 %vm4738_vm4, %v6298_v46 }
 0x5ab   : > { %9670 = vmatpush3.bf16.msra.mxu0 %v9669_v42  ;;  %9299 = vmatprep.mubr.msk.f32.mxu0 %vm10383_vm2, %v10381_v44 }
 0x5ac   : > { %9671 = vmatprep.subr.bf16.mxu0 %v10382_v45 }
 0x5ae   : > { %9300 = vmatmul.mubr.msk.f32.gmra.mrb[92].mxu0 %vm4738_vm4, %v6300_v49 }
 0x5af   : > { %9673 = vmatpush3.bf16.msra.mxu0 %v9672_v47  ;;  %9302 = vmatprep.mubr.msk.f32.mxu0 %vm10383_vm2, %v10381_v44 }
 0x5b0   : > { %9674 = vmatprep.subr.bf16.mxu0 %v10382_v45 }
 0x5b2   : > { %9303 = vmatmul.mubr.msk.f32.gmra.mrb[94].mxu0 %vm4738_vm4, %v6302_v53 }
 0x5b3   : > { %9676 = vmatpush3.bf16.msra.mxu0 %v9675_v26  ;;  %9305 = vmatprep.mubr.msk.f32.mxu0 %vm10383_vm2, %v10381_v44 }
 0x5b4   : > { %9677 = vmatprep.subr.bf16.mxu0 %v10382_v45 }
 0x5b6   : > { %9306 = vmatmul.mubr.msk.f32.gmra.mrb[96].mxu0 %vm4738_vm4, %v6304_v55 }
 0x5b7   : > { %9308 = vmatprep.mubr.msk.f32.mxu0 %vm10383_vm2, %v10381_v44  ;;  %9679 = vmatpush3.bf16.msra.mxu0 %v9678_v54 }
 0x5b8   : > { %9680 = vmatprep.subr.bf16.mxu0 %v10382_v45 }
 0x5ba   : > { %9309 = vmatmul.mubr.msk.f32.gmra.mrb[98].mxu0 %vm4738_vm4, %v6306_v29 }
 0x5bb   : > { %9327 = vmatprep.mubr.msk.f32.mxu0 %vm10383_vm2, %v10381_v44 }
 0x5be   : > { %9328 = vmatmul.mubr.msk.f32.vlgmr.msra.gmra.mrb[90].mxu0 %vm4738_vm4, %v6426_v63 }
 0x5bf   : > { %9682 = vmatpush3.bf16.msra.mxu0 %v9681_v58  ;;  %9330 = vmatprep.mubr.msk.f32.mxu0 %vm10383_vm2, %v10381_v44 }
 0x5c0   : > { %9683 = vmatprep.subr.bf16.mxu0 %v10382_v45 }
 0x5c2   : > { %9331 = vmatmul.mubr.msk.f32.gmra.mrb[92].mxu0 %vm4738_vm4, %v6428_v3 }
 0x5c3   : > { %9685 = vmatpush3.bf16.msra.mxu0 %v9684_v0  ;;  %9333 = vmatprep.mubr.msk.f32.mxu0 %vm10383_vm2, %v10381_v44 }
 0x5c4   : > { %9686 = vmatprep.subr.bf16.mxu0 %v10382_v45 }
 0x5c6   : > { %9334 = vmatmul.mubr.msk.f32.gmra.mrb[94].mxu0 %vm4738_vm4, %v6430_v5 }
 0x5c7   : > { %9688 = vmatpush3.bf16.msra.mxu0 %v9687_v4  ;;  %9336 = vmatprep.mubr.msk.f32.mxu0 %vm10383_vm2, %v10381_v44 }
 0x5c8   : > { %9689 = vmatprep.subr.bf16.mxu0 %v10382_v45 }
 0x5ca   : > { %9337 = vmatmul.mubr.msk.f32.gmra.mrb[96].mxu0 %vm4738_vm4, %v6432_v8 }
 0x5cb   : > { %9339 = vmatprep.mubr.msk.f32.mxu0 %vm10383_vm2, %v10381_v44  ;;  %9691 = vmatpush3.bf16.msra.mxu0 %v9690_v6 }
 0x5cc   : > { %9692 = vmatprep.subr.bf16.mxu0 %v10382_v45 }
 0x5ce   : > { %9340 = vmatmul.mubr.msk.f32.gmra.mrb[98].mxu0 %vm4738_vm4, %v6434_v9 }
 0x5cf   : > { %9358 = vmatprep.mubr.msk.f32.mxu0 %vm10383_vm2, %v10381_v44 }
 0x5d2   : > { %9359 = vmatmul.mubr.msk.f32.vlgmr.msra.gmra.mrb[90].mxu0 %vm4738_vm4, %v6553_v14 }
 0x5d3   : > { %9694 = vmatpush3.bf16.msra.mxu0 %v9693_v13  ;;  %9361 = vmatprep.mubr.msk.f32.mxu0 %vm10383_vm2, %v10381_v44 }
 0x5d4   : > { %9695 = vmatprep.subr.bf16.mxu0 %v10382_v45 }
 0x5d6   : > { %9362 = vmatmul.mubr.msk.f32.gmra.mrb[92].mxu0 %vm4738_vm4, %v6554_v19 }
 0x5d7   : > { %9697 = vmatpush3.bf16.msra.mxu0 %v9696_v15  ;;  %9364 = vmatprep.mubr.msk.f32.mxu0 %vm10383_vm2, %v10381_v44 }
 0x5d8   : > { %9698 = vmatprep.subr.bf16.mxu0 %v10382_v45 }
 0x5da   : > { %9365 = vmatmul.mubr.msk.f32.gmra.mrb[94].mxu0 %vm4738_vm4, %v6555_v22 }
 0x5db   : > { %9700 = vmatpush3.bf16.msra.mxu0 %v9699_v20  ;;  %9367 = vmatprep.mubr.msk.f32.mxu0 %vm10383_vm2, %v10381_v44 }
 0x5dc   : > { %9701 = vmatprep.subr.bf16.mxu0 %v10382_v45  ;;  %v6679_v45 = vld [vmem:[#allocation3 + $0x31] ss:$2 sm:$0xff] }
 0x5de   : > { %9368 = vmatmul.mubr.msk.f32.gmra.mrb[96].mxu0 %vm4738_vm4, %v6557_v25 }
 0x5df   : > { %9370 = vmatprep.mubr.msk.f32.mxu0 %vm10383_vm2, %v10381_v44  ;;  %9703 = vmatpush3.bf16.msra.mxu0 %v9702_v24 }
 0x5e2   : > { %9371 = vmatmul.mubr.msk.f32.gmra.mrb[98].mxu0 %vm4738_vm4, %v6559_v27 }
 0x5e3   : > { %9389 = vmatprep.mubr.msk.f32.mxu0 %vm10383_vm2, %v10381_v44 }
 0x5e6   : > { %9390 = vmatmul.mubr.msk.f32.vlgmr.msra.gmra.mrb[90].mxu0 %vm4738_vm4, %v6678_v7 }
 0x5e7   : > { %9392 = vmatprep.mubr.msk.f32.mxu0 %vm10383_vm2, %v10381_v44 }
 0x5ea   : > { %9393 = vmatmul.mubr.msk.f32.gmra.mrb[92].mxu0 %vm4738_vm4, %v6679_v45 }
 0x5eb   : > { %9395 = vmatprep.mubr.msk.f32.mxu0 %vm10383_vm2, %v10381_v44 }
 0x5ee   : > { %9396 = vmatmul.mubr.msk.f32.gmra.mrb[94].mxu0 %vm4738_vm4, %v6680_v28 }
 0x5ef   : > { %9398 = vmatprep.mubr.msk.f32.mxu0 %vm10383_vm2, %v10381_v44 }
 0x5f2   : > { %9399 = vmatmul.mubr.msk.f32.gmra.mrb[96].mxu0 %vm4738_vm4, %v6682_v30 }
 0x5f3   : > { %9401 = vmatprep.mubr.msk.f32.mxu0 %vm10383_vm2, %v10381_v44 }
 0x5f6   : > { %9402 = vmatmul.mubr.msk.f32.gmra.mrb[98].mxu0 %vm4738_vm4, %v6684_v31 }
 0x6b9   : > { %v6774_v33 = vpop.f32.mrb[90].mxu0 }
 0x6ba   : > { %v6808_v34 = vmul.f32 0.70710677, %v6774_v33  ;;  %v9391_v36 = vpop.f32.mrb[91].mxu0  ;;  %v6803_v46 = vmul.f32 0.5, %v6774_v33 }
 0x6bc   : > { %10363 = verf.f32 %v6808_v34 }
 0x6bd   : > { %v6779_v37 = vpop.f32.mrb[92].mxu0 }
 0x6be   : > { %v6809_v38 = vmul.f32 0.70710677, %v6779_v37  ;;  %v9394_v12 = vpop.f32.mrb[93].mxu0  ;;  %v6804_v53 = vmul.f32 0.5, %v6779_v37 }
 0x6c0   : > { %10365 = verf.f32 %v6809_v38 }
 0x6c1   : > { %v6784_v39 = vpop.f32.mrb[94].mxu0 }
 0x6c2   : > { %v6810_v40 = vmul.f32 0.70710677, %v6784_v39  ;;  %v9397_v41 = vpop.f32.mrb[95].mxu0  ;;  %v6805_v51 = vmul.f32 0.5, %v6784_v39 }
 0x6c4   : > { %10367 = verf.f32 %v6810_v40 }
 0x6c5   : > { %v6789_v42 = vpop.f32.mrb[96].mxu0 }
 0x6c6   : > { %v10364_v43 = vpop.eup %10363  ;;  %v6811_v18 = vmul.f32 0.70710677, %v6789_v42  ;;  %v9400_v44 = vpop.f32.mrb[97].mxu0  ;;  %v6806_v56 = vmul.f32 0.5, %v6789_v42 }
 0x6c7   : > { %v6818_v47 = vadd.f32 1.0, %v10364_v43 }
 0x6c8   : > { %10369 = verf.f32 %v6811_v18 }
 0x6c9   : > { %v6823_v23 = vmul.f32 %v6818_v47, %v6803_v46  ;;  %v6794_v48 = vpop.f32.mrb[98].mxu0 }
 0x6ca   : > { %v10366_v49 = vpop.eup %10365  ;;  %v6812_v26 = vmul.f32 0.70710677, %v6794_v48  ;;  %v9403_v50 = vpop.f32.mrb[99].mxu0  ;;  %v6807_v59 = vmul.f32 0.5, %v6794_v48 }
 0x6cb   : > { %v6828_v52 = vpack.c.bf16 %v6823_v23, %v6823_v23  ;;  %v6819_v54 = vadd.f32 1.0, %v10366_v49 }
 0x6cc   : > { %10371 = verf.f32 %v6812_v26 }
 0x6cd   : > { %6829 = vst [vmem:[%s12522_s10] sm:$0x3] %v6828_v52  ;;  %v6824_v55 = vmul.f32 %v6819_v54, %v6804_v53 }
 0x6ce   : > { %v10368_v29 = vpop.eup %10367 }
 0x6cf   : > { %v7318_v57 = vpack.c.bf16 %v6824_v55, %v6824_v55  ;;  %v6820_v58 = vadd.f32 1.0, %v10368_v29 }
 0x6d1   : > { %v6834_v60 = vrot.slane %v7318_v57, 7  ;;  %v6825_v61 = vmul.f32 %v6820_v58, %v6805_v51 }
 0x6d2   : > { %v10370_v63 = vpop.eup %10369 }
 0x6d3   : > { %6836 = vst [vmem:[%s12522_s10] sm:$0xc] %v6834_v60  ;;  %v7319_v0 = vpack.c.bf16 %v6825_v61, %v6825_v61  ;;  %v6821_v1 = vadd.f32 1.0, %v10370_v63 }
 0x6d5   : > { %v7310_v3 = vrot.slane %v7319_v0, 10  ;;  %v6826_v4 = vmul.f32 %v6821_v1, %v6806_v56 }
 0x6d6   : > { %v10372_v32 = vpop.eup %10371 }
 0x6d7   : > { %6844 = vst [vmem:[%s12522_s10 + $0x4] sm:$0x3] %v7310_v3  ;;  %v6822_v5 = vadd.f32 1.0, %v10372_v32  ;;  %v7320_v6 = vpack.c.bf16 %v6826_v4, %v6826_v4 }
 0x6d9   : > { %v6827_v8 = vmul.f32 %v6822_v5, %v6807_v59  ;;  %v7313_v10 = vrot.slane %v7320_v6, 9 }
 0x6db   : > { %v7321_v9 = vpack.c.bf16 %v6827_v8, %v6827_v8 }
 0x6dd   : > { %v6856_v11 = vrot.slane %v7321_v9, 5 }
 0x6df   : > { %v6857_v13 = vsel %vm6853_vm13, %v7313_v10, %v6856_v11 }
 0x6e0   : > { %6859 = vst [vmem:[%s12522_s10 + $0x4] sm:$0xc] %v6857_v13 }
 0x6e1 PF: > { %s14_s15 = sadd.s32 1, %s10379_s15  }
 0x6e2   : > { %p11_p4 = scmp.ge.s32.totalorder %s14_s15, 4  }
 0x6e4   :  { %13 = sbr.rel (!%p11_p4) target bundleno = 1 (0x1), region = 314 }

// kernel: ms_joint_processor_forward.5
= control target key start
LH: loop header
LB: loop body
LE: loop exit
PB: predicated region body
PF: predicated region fallthrough
CT: control target
= control target key end

     0   :  { %v1077_v29 = vlaneseq  ;;  %v7826_v35 = vmov 1966171168   ;;  %s9577_s0 = inlined_call_operand.vmem [shape: bf16[2,6272], index: 0, kind: input, shape index: {}]   ;;  %s9578_s1 = inlined_call_operand.vmem [shape: bf16[2,2048], index: 1, kind: input, shape index: {}]   ;;  %s9579_s2 = inlined_call_operand.vmem [shape: bf16[6272,64], index: 2, kind: input, shape index: {}]   ;;  %s9580_s3 = inlined_call_operand.vmem [shape: bf16[2048,64], index: 3, kind: input, shape index: {}]   ;;  %s9581_s4 = inlined_call_operand.vmem [shape: f32[1,64], index: 4, kind: input, shape index: {}]   ;;  %s9582_s5 = inlined_call_operand.hbm [shape: f32[2,64], index: 5, kind: output, shape index: {}]  }
   0x1   :  { %v7274_v0 = vld [vmem:[%s9580_s3 + $0x40] sm:$0xff]   ;;  %v7278_v4 = vld [vmem:[%s9580_s3 + $0x48] sm:$0xff]   ;;  %v7282_v8 = vld [vmem:[%s9580_s3 + $0x50] sm:$0xff]   ;;  %v1075_v36 = vunpack.c.l.s4 %v7826_v35 }
   0x2   :  { %v7275_v1 = vld [vmem:[%s9580_s3 + $0xc0] sm:$0xff]   ;;  %6537 = vmatprep.subr.bf16.mxu0 %v7274_v0  ;;  %v7279_v5 = vld [vmem:[%s9580_s3 + $0xc8] sm:$0xff]   ;;  %v7283_v9 = vld [vmem:[%s9580_s3 + $0xd0] sm:$0xff]   ;;  %v1078_v33 = vshrl.u32 %v1077_v29, 7 }
   0x3   :  { %v7276_v2 = vld [vmem:[%s9580_s3] sm:$0xff]   ;;  %6559 = vmatprep.subr.bf16.mxu1 %v7275_v1  ;;  %v7280_v6 = vld [vmem:[%s9580_s3 + $0x8] sm:$0xff]   ;;  %v7284_v10 = vld [vmem:[%s9580_s3 + $0x10] sm:$0xff]   ;;  %v1076_v39 = vunpack.c.0.s8 %v1075_v36 }
   0x4   :  { %v7277_v3 = vld [vmem:[%s9580_s3 + $0x80] sm:$0xff]   ;;  %6538 = vmatpush3.bf16.msra.mxu0 %v7276_v2  ;;  %v7281_v7 = vld [vmem:[%s9580_s3 + $0x88] sm:$0xff]   ;;  %v7285_v11 = vld [vmem:[%s9580_s3 + $0x90] sm:$0xff]  }
   0x5   :  { %6560 = vmatpush3.bf16.msra.mxu1 %v7277_v3  ;;  %6539 = vmatprep.subr.bf16.mxu0 %v7278_v4  ;;  %v7286_v12 = vld [vmem:[%s9580_s3 + $0x58] sm:$0xff]   ;;  %v7290_v16 = vld [vmem:[%s9580_s3 + $0x60] sm:$0xff]   ;;  %v7294_v20 = vld [vmem:[%s9580_s3 + $0x68] sm:$0xff]   ;;  %v7965_v41 = vsub.s32 %v1076_v39, %v1078_v33 }
   0x6   :  { %6561 = vmatprep.subr.bf16.mxu1 %v7279_v5  ;;  %v7287_v13 = vld [vmem:[%s9580_s3 + $0xd8] sm:$0xff]   ;;  %v7291_v17 = vld [vmem:[%s9580_s3 + $0xe0] sm:$0xff]   ;;  %v7295_v21 = vld [vmem:[%s9580_s3 + $0xe8] sm:$0xff]  }
   0x7   :  { %v7288_v14 = vld [vmem:[%s9580_s3 + $0x18] sm:$0xff]   ;;  %v7292_v18 = vld [vmem:[%s9580_s3 + $0x20] sm:$0xff]   ;;  %v7296_v22 = vld [vmem:[%s9580_s3 + $0x28] sm:$0xff]  }
   0x8   :  { %6540 = vmatpush3.bf16.msra.mxu0 %v7280_v6  ;;  %v7289_v15 = vld [vmem:[%s9580_s3 + $0x98] sm:$0xff]   ;;  %v7293_v19 = vld [vmem:[%s9580_s3 + $0xa0] sm:$0xff]   ;;  %v7297_v23 = vld [vmem:[%s9580_s3 + $0xa8] sm:$0xff]  }
   0x9   :  { %6562 = vmatpush3.bf16.msra.mxu1 %v7281_v7  ;;  %6541 = vmatprep.subr.bf16.mxu0 %v7282_v8  ;;  %v7298_v24 = vld [vmem:[%s9580_s3 + $0x70] sm:$0xff]   ;;  %v7302_v28 = vld [vmem:[%s9580_s3 + $0x78] sm:$0xff]   ;;  %v7307_v34 = vld [vmem:[%s9580_s3 + $0x140] sm:$0xff]  }
   0xa   :  { %6563 = vmatprep.subr.bf16.mxu1 %v7283_v9  ;;  %v7299_v25 = vld [vmem:[%s9580_s3 + $0xf0] sm:$0xff]   ;;  %v7303_v30 = vld [vmem:[%s9580_s3 + $0xf8] sm:$0xff]   ;;  %v813_v37 = vld [vmem:[%s9578_s1] sm:$0xff] }
   0xb   :  { %v7300_v26 = vld [vmem:[%s9580_s3 + $0x30] sm:$0xff]   ;;  %v7304_v31 = vld [vmem:[%s9580_s3 + $0x38] sm:$0xff]   ;;  %v1073_v38 = vcombine.high %v813_v37, %v813_v37  ;;  %v7309_v40 = vld [vmem:[%s9580_s3 + $0x1c0] sm:$0xff]   ;;  %v1080_v42 = vrot.slane %v813_v37, %v7965_v41 }
   0xc   :  { %6542 = vmatpush3.bf16.msra.mxu0 %v7284_v10  ;;  %v7301_v27 = vld [vmem:[%s9580_s3 + $0xb0] sm:$0xff]   ;;  %v7305_v32 = vld [vmem:[%s9580_s3 + $0xb8] sm:$0xff]   ;;  %v7308_v47 = vld [vmem:[%s9580_s3 + $0x100] sm:$0xff]  }
   0xd   :  { %6564 = vmatpush3.bf16.msra.mxu1 %v7285_v11  ;;  %6543 = vmatprep.subr.bf16.mxu0 %v7286_v12  ;;  %v7969_v43 = vrot.slane %v1073_v38, %v7965_v41  ;;  %v1088_v44 = vcombine.high %v1080_v42, %v1080_v42  ;;  %v1096_v45 = vrot.slane %v1080_v42, %v7965_v41  ;;  %v7310_v49 = vld [vmem:[%s9580_s3 + $0x180] sm:$0xff]   ;;  %v7311_v52 = vld [vmem:[%s9580_s3 + $0x148] sm:$0xff]   ;;  %v7315_v58 = vld [vmem:[%s9580_s3 + $0x150] sm:$0xff]  }
   0xe   :  { %6565 = vmatprep.subr.bf16.mxu1 %v7287_v13  ;;  %v7312_v54 = vld [vmem:[%s9580_s3 + $0x108] sm:$0xff]   ;;  %v7316_v59 = vld [vmem:[%s9580_s3 + $0x110] sm:$0xff]   ;;  %v7319_v62 = vld [vmem:[%s9580_s3 + $0x158] sm:$0xff]  }
   0xf   :  { %v1089_v46 = vcombine.high %v7969_v43, %v7969_v43  ;;  %v1110_v48 = vrot.slane %v1088_v44, %v7965_v41  ;;  %v1118_v51 = vcombine.high %v1096_v45, %v1096_v45  ;;  %v7313_v55 = vld [vmem:[%s9580_s3 + $0x1c8] sm:$0xff]   ;;  %v7317_v60 = vld [vmem:[%s9580_s3 + $0x1d0] sm:$0xff]   ;;  %v7320_v63 = vld [vmem:[%s9580_s3 + $0x118] sm:$0xff]  }
  0x10   :  { %6544 = vmatpush3.bf16.msra.mxu0 %v7288_v14  ;;  %v7314_v57 = vld [vmem:[%s9580_s3 + $0x188] sm:$0xff]   ;;  %v7318_v61 = vld [vmem:[%s9580_s3 + $0x190] sm:$0xff]   ;;  %v7321_v0 = vld [vmem:[%s9580_s3 + $0x1d8] sm:$0xff]  }
  0x11   :  { %6566 = vmatpush3.bf16.msra.mxu1 %v7289_v15  ;;  %6545 = vmatprep.subr.bf16.mxu0 %v7290_v16  ;;  %v1117_v50 = vrot.slane %v1089_v46, %v7965_v41  ;;  %v1120_v53 = vcombine.high %v1110_v48, %v1110_v48  ;;  %v7322_v1 = vld [vmem:[%s9580_s3 + $0x198] sm:$0xff]   ;;  %v7323_v2 = vld [vmem:[%s9580_s3 + $0x160] sm:$0xff]   ;;  %v7327_v6 = vld [vmem:[%s9580_s3 + $0x168] sm:$0xff]  }
  0x12   :  { %6567 = vmatprep.subr.bf16.mxu1 %v7291_v17  ;;  %1987 = vmatprep.mubr.bf16.mxu0 %v1110_v48  ;;  %v7324_v3 = vld [vmem:[%s9580_s3 + $0x120] sm:$0xff]   ;;  %v7328_v7 = vld [vmem:[%s9580_s3 + $0x128] sm:$0xff]   ;;  %v7331_v10 = vld [vmem:[%s9580_s3 + $0x170] sm:$0xff]  }
  0x13   :  { %v1121_v56 = vcombine.high %v1117_v50, %v1117_v50  ;;  %2027 = vmatprep.mubr.bf16.mxu1 %v1120_v53  ;;  %v7325_v4 = vld [vmem:[%s9580_s3 + $0x1e0] sm:$0xff]   ;;  %v7329_v8 = vld [vmem:[%s9580_s3 + $0x1e8] sm:$0xff]   ;;  %v7332_v11 = vld [vmem:[%s9580_s3 + $0x130] sm:$0xff]  }
  0x14   :  { %6546 = vmatpush3.bf16.msra.mxu0 %v7292_v18  ;;  %v7326_v5 = vld [vmem:[%s9580_s3 + $0x1a0] sm:$0xff]   ;;  %v7330_v9 = vld [vmem:[%s9580_s3 + $0x1a8] sm:$0xff]   ;;  %v7333_v12 = vld [vmem:[%s9580_s3 + $0x1f0] sm:$0xff]   ;;  %v1103_v18 = vrot.slane %v7969_v43, %v7965_v41 }
  0x15   :  { %6568 = vmatpush3.bf16.msra.mxu1 %v7293_v19  ;;  %6547 = vmatprep.subr.bf16.mxu0 %v7294_v20  ;;  %v7334_v13 = vld [vmem:[%s9580_s3 + $0x1b0] sm:$0xff]   ;;  %v7335_v14 = vld [vmem:[%s9580_s3 + $0x178] sm:$0xff]   ;;  %v7339_v19 = vld [vmem:[%s9580_s3 + $0x240] sm:$0xff]  }
  0x16   :  { %6569 = vmatprep.subr.bf16.mxu1 %v7295_v21  ;;  %v7336_v15 = vld [vmem:[%s9580_s3 + $0x138] sm:$0xff]   ;;  %v7340_v20 = vld [vmem:[%s9580_s3 + $0x200] sm:$0xff]   ;;  %v7348_v29 = vld [vmem:[%s9580_s3 + $0x210] sm:$0xff]  }
  0x17   :  { %v7337_v16 = vld [vmem:[%s9580_s3 + $0x1f8] sm:$0xff]   ;;  %v7341_v21 = vld [vmem:[%s9580_s3 + $0x2c0] sm:$0xff]   ;;  %v7360_v42 = vld [vmem:[%s9580_s3 + $0x228] sm:$0xff]  }
  0x18   :  { %6548 = vmatpush3.bf16.msra.mxu0 %v7296_v22  ;;  %v7338_v17 = vld [vmem:[%s9580_s3 + $0x1b8] sm:$0xff]   ;;  %v7342_v22 = vld [vmem:[%s9580_s3 + $0x280] sm:$0xff]   ;;  %v7361_v43 = vld [vmem:[%s9580_s3 + $0x2e8] sm:$0xff]  }
  0x19   :  { %6570 = vmatpush3.bf16.msra.mxu1 %v7297_v23  ;;  %6549 = vmatprep.subr.bf16.mxu0 %v7298_v24  ;;  %v1119_v23 = vcombine.high %v1103_v18, %v1103_v18  ;;  %v7343_v24 = vld [vmem:[%s9580_s3 + $0x248] sm:$0xff]   ;;  %v7352_v33 = vld [vmem:[%s9580_s3 + $0x218] sm:$0xff]   ;;  %v7355_v36 = vld [vmem:[%s9580_s3 + $0x260] sm:$0xff]  }
  0x1a   :  { %6571 = vmatprep.subr.bf16.mxu1 %v7299_v25  ;;  %v7344_v25 = vld [vmem:[%s9580_s3 + $0x208] sm:$0xff]   ;;  %v7354_v35 = vld [vmem:[%s9580_s3 + $0x298] sm:$0xff]   ;;  %v7356_v37 = vld [vmem:[%s9580_s3 + $0x220] sm:$0xff]  }
  0x1b   :  { %v7357_v38 = vld [vmem:[%s9580_s3 + $0x2e0] sm:$0xff]   ;;  %v7362_v44 = vld [vmem:[%s9580_s3 + $0x2a8] sm:$0xff]   ;;  %v7363_v46 = vld [vmem:[%s9580_s3 + $0x270] sm:$0xff]  }
  0x1c   :  { %6550 = vmatpush3.bf16.msra.mxu0 %v7300_v26  ;;  %v7345_v26 = vld [vmem:[%s9580_s3 + $0x2c8] sm:$0xff]   ;;  %v7358_v39 = vld [vmem:[%s9580_s3 + $0x2a0] sm:$0xff]   ;;  %v7366_v53 = vld [vmem:[%s9580_s3 + $0x2b0] sm:$0xff]  }
  0x1d   :  { %6572 = vmatpush3.bf16.msra.mxu1 %v7301_v27  ;;  %6551 = vmatprep.subr.bf16.mxu0 %v7302_v28  ;;  %v7346_v27 = vld [vmem:[%s9580_s3 + $0x288] sm:$0xff]   ;;  %v7347_v28 = vld [vmem:[%s9580_s3 + $0x250] sm:$0xff]  }
  0x1e   :  { %6573 = vmatprep.subr.bf16.mxu1 %v7303_v30  ;;  %v7349_v30 = vld [vmem:[%s9580_s3 + $0x2d0] sm:$0xff]  }
  0x20   :  { %6552 = vmatpush3.bf16.msra.mxu0 %v7304_v31  ;;  %v7350_v31 = vld [vmem:[%s9580_s3 + $0x290] sm:$0xff]  }
  0x21   :  { %6574 = vmatpush3.bf16.msra.mxu1 %v7305_v32  ;;  %6581 = vmatprep.subr.bf16.mxu0 %v7307_v34  ;;  %v7351_v32 = vld [vmem:[%s9580_s3 + $0x258] sm:$0xff]  }
  0x22   :  { %6603 = vmatprep.subr.bf16.mxu1 %v7309_v40  ;;  %v7353_v34 = vld [vmem:[%s9580_s3 + $0x2d8] sm:$0xff]   ;;  %v7359_v40 = vld [vmem:[%s9580_s3 + $0x268] sm:$0xff]  }
  0x23   :  { %1988 = vmatmul.mubr.bf16.vlgmr.msra.gmra.mrb[0].mxu0 %v1096_v45  ;;  %v814_v45 = vld [vmem:[%s9578_s1 + $0x8] sm:$0xff] }
  0x24   :  { %6582 = vmatpush3.bf16.msra.mxu0 %v7308_v47  ;;  %2028 = vmatmul.mubr.bf16.vlgmr.msra.gmra.mrb[0].mxu1 %v1118_v51  ;;  %v1129_v47 = vrot.slane %v814_v45, %v7965_v41  ;;  %v1122_v48 = vcombine.high %v814_v45, %v814_v45  ;;  %v7413_v45 = vld [vmem:[%s9579_s2 + $0x10] sm:$0xff]  }
  0x25   :  { %6583 = vmatprep.subr.bf16.mxu0 %v7311_v52  ;;  %6604 = vmatpush3.bf16.msra.mxu1 %v7310_v49  ;;  %v7364_v49 = vld [vmem:[%s9580_s3 + $0x230] sm:$0xff]  }
  0x26   :  { %2067 = vmatprep.mubr.bf16.mxu0 %v1117_v50  ;;  %6605 = vmatprep.subr.bf16.mxu1 %v7313_v55  ;;  %v7365_v50 = vld [vmem:[%s9580_s3 + $0x2f0] sm:$0xff]   ;;  %v1137_v51 = vcombine.high %v1129_v47, %v1129_v47  ;;  %v8154_v52 = vrot.slane %v1122_v48, %v7965_v41  ;;  %v7416_v48 = vld [vmem:[%s9579_s2 + $0x58] sm:$0xff]  }
  0x27   :  { %2107 = vmatprep.mubr.bf16.mxu1 %v1121_v56  ;;  %v7368_v56 = vld [vmem:[%s9580_s3 + $0x238] sm:$0xff]  }
  0x28   :  { %6584 = vmatpush3.bf16.msra.mxu0 %v7312_v54  ;;  %v7367_v54 = vld [vmem:[%s9580_s3 + $0x278] sm:$0xff]   ;;  %v1159_v55 = vrot.slane %v1137_v51, %v7965_v41 }
  0x29   :  { %6585 = vmatprep.subr.bf16.mxu0 %v7315_v58  ;;  %6606 = vmatpush3.bf16.msra.mxu1 %v7314_v57  ;;  %v1138_v57 = vcombine.high %v8154_v52, %v8154_v52  ;;  %v7369_v58 = vld [vmem:[%s9580_s3 + $0x2f8] sm:$0xff]  }
  0x2a   :  { %6607 = vmatprep.subr.bf16.mxu1 %v7317_v60  ;;  %v7370_v60 = vld [vmem:[%s9580_s3 + $0x2b8] sm:$0xff]  }
  0x2b   :  { %v7419_v51 = vld [vmem:[%s9579_s2 + $0x98] sm:$0xff]  }
  0x2c   :  { %6586 = vmatpush3.bf16.msra.mxu0 %v7316_v59  ;;  %v1169_v59 = vcombine.high %v1159_v55, %v1159_v55 }
  0x2d   :  { %6587 = vmatprep.subr.bf16.mxu0 %v7319_v62  ;;  %6608 = vmatpush3.bf16.msra.mxu1 %v7318_v61  ;;  %v1145_v61 = vrot.slane %v1129_v47, %v7965_v41  ;;  %v7371_v62 = vld [vmem:[%s9580_s3 + $0x340] sm:$0xff]   ;;  %v7415_v47 = vld [vmem:[%s9579_s2 + $0x90] sm:$0xff]  }
  0x2e   :  { %6609 = vmatprep.subr.bf16.mxu1 %v7321_v0  ;;  %v1166_v0 = vrot.slane %v1138_v57, %v7965_v41  ;;  %v7425_v57 = vld [vmem:[%s9579_s2 + $0x28] sm:$0xff]  }
  0x30   :  { %6588 = vmatpush3.bf16.msra.mxu0 %v7320_v63  ;;  %v7372_v63 = vld [vmem:[%s9580_s3 + $0x300] sm:$0xff]  }
  0x31   :  { %6589 = vmatprep.subr.bf16.mxu0 %v7323_v2  ;;  %6610 = vmatpush3.bf16.msra.mxu1 %v7322_v1  ;;  %v7373_v1 = vld [vmem:[%s9580_s3 + $0x3c0] sm:$0xff]  }
  0x32   :  { %6611 = vmatprep.subr.bf16.mxu1 %v7325_v4  ;;  %v7374_v2 = vld [vmem:[%s9580_s3 + $0x380] sm:$0xff]   ;;  %v7375_v4 = vld [vmem:[%s9580_s3 + $0x348] sm:$0xff]  }
  0x34   :  { %6590 = vmatpush3.bf16.msra.mxu0 %v7324_v3  ;;  %v1167_v3 = vcombine.high %v1145_v61, %v1145_v61 }
  0x35   :  { %6591 = vmatprep.subr.bf16.mxu0 %v7327_v6  ;;  %6612 = vmatpush3.bf16.msra.mxu1 %v7326_v5  ;;  %v7376_v5 = vld [vmem:[%s9580_s3 + $0x308] sm:$0xff]   ;;  %v1170_v6 = vcombine.high %v1166_v0, %v1166_v0 }
  0x36   :  { %6613 = vmatprep.subr.bf16.mxu1 %v7329_v8  ;;  %v7378_v8 = vld [vmem:[%s9580_s3 + $0x388] sm:$0xff]  }
  0x38   :  { %6592 = vmatpush3.bf16.msra.mxu0 %v7328_v7  ;;  %v7377_v7 = vld [vmem:[%s9580_s3 + $0x3c8] sm:$0xff]  }
  0x39   :  { %6593 = vmatprep.subr.bf16.mxu0 %v7331_v10  ;;  %6614 = vmatpush3.bf16.msra.mxu1 %v7330_v9  ;;  %v7379_v9 = vld [vmem:[%s9580_s3 + $0x350] sm:$0xff]  }
  0x3a   :  { %6615 = vmatprep.subr.bf16.mxu1 %v7333_v12  ;;  %v7380_v10 = vld [vmem:[%s9580_s3 + $0x310] sm:$0xff]  }
  0x3b   :  { %v7382_v12 = vld [vmem:[%s9580_s3 + $0x390] sm:$0xff]  }
  0x3c   :  { %6594 = vmatpush3.bf16.msra.mxu0 %v7332_v11  ;;  %v7381_v11 = vld [vmem:[%s9580_s3 + $0x3d0] sm:$0xff]  }
  0x3d   :  { %6595 = vmatprep.subr.bf16.mxu0 %v7335_v14  ;;  %6616 = vmatpush3.bf16.msra.mxu1 %v7334_v13  ;;  %v7383_v13 = vld [vmem:[%s9580_s3 + $0x358] sm:$0xff]  }
  0x3e   :  { %6617 = vmatprep.subr.bf16.mxu1 %v7337_v16  ;;  %v7384_v14 = vld [vmem:[%s9580_s3 + $0x318] sm:$0xff]  }
  0x3f   :  { %v7386_v16 = vld [vmem:[%s9580_s3 + $0x398] sm:$0xff]  }
  0x40   :  { %6596 = vmatpush3.bf16.msra.mxu0 %v7336_v15  ;;  %v7385_v15 = vld [vmem:[%s9580_s3 + $0x3d8] sm:$0xff]  }
  0x41   :  { %6625 = vmatprep.subr.bf16.mxu0 %v7339_v19  ;;  %6618 = vmatpush3.bf16.msra.mxu1 %v7338_v17  ;;  %v7387_v17 = vld [vmem:[%s9580_s3 + $0x360] sm:$0xff]  }
  0x42   :  { %6647 = vmatprep.subr.bf16.mxu1 %v7341_v21  ;;  %v7389_v19 = vld [vmem:[%s9580_s3 + $0x3e0] sm:$0xff]   ;;  %v7391_v21 = vld [vmem:[%s9580_s3 + $0x368] sm:$0xff]  }
  0x43   :  { %2068 = vmatmul.mubr.bf16.vlgmr.msra.gmra.mrb[4].mxu0 %v1103_v18  ;;  %v7388_v18 = vld [vmem:[%s9580_s3 + $0x320] sm:$0xff]  }
  0x44   :  { %6626 = vmatpush3.bf16.msra.mxu0 %v7340_v20  ;;  %2108 = vmatmul.mubr.bf16.vlgmr.msra.gmra.mrb[4].mxu1 %v1119_v23  ;;  %v7390_v20 = vld [vmem:[%s9580_s3 + $0x3a0] sm:$0xff]   ;;  %v7393_v23 = vld [vmem:[%s9580_s3 + $0x3e8] sm:$0xff]  }
  0x45   :  { %6627 = vmatprep.subr.bf16.mxu0 %v7343_v24  ;;  %6648 = vmatpush3.bf16.msra.mxu1 %v7342_v22  ;;  %v7392_v22 = vld [vmem:[%s9580_s3 + $0x328] sm:$0xff]  }
  0x46   :  { %6649 = vmatprep.subr.bf16.mxu1 %v7345_v26  ;;  %2147 = vmatprep.mubr.bf16.mxu0 %v1159_v55  ;;  %v7394_v24 = vld [vmem:[%s9580_s3 + $0x3a8] sm:$0xff]   ;;  %v7396_v26 = vld [vmem:[%s9580_s3 + $0x330] sm:$0xff]   ;;  %v7423_v55 = vld [vmem:[%s9579_s2 + $0xa0] sm:$0xff]  }
  0x47   :  { %2187 = vmatprep.mubr.bf16.mxu1 %v1169_v59  ;;  %v7427_v59 = vld [vmem:[%s9579_s2 + $0xa8] sm:$0xff]  }
  0x48   :  { %6628 = vmatpush3.bf16.msra.mxu0 %v7344_v25  ;;  %v7395_v25 = vld [vmem:[%s9580_s3 + $0x370] sm:$0xff]  }
  0x49   :  { %6629 = vmatprep.subr.bf16.mxu0 %v7347_v28  ;;  %6650 = vmatpush3.bf16.msra.mxu1 %v7346_v27  ;;  %v7397_v27 = vld [vmem:[%s9580_s3 + $0x3f0] sm:$0xff]  }
  0x4a   :  { %6651 = vmatprep.subr.bf16.mxu1 %v7349_v30  ;;  %v7398_v28 = vld [vmem:[%s9580_s3 + $0x3b0] sm:$0xff]   ;;  %v7400_v30 = vld [vmem:[%s9580_s3 + $0x338] sm:$0xff]  }
  0x4c   :  { %6630 = vmatpush3.bf16.msra.mxu0 %v7348_v29  ;;  %v7399_v29 = vld [vmem:[%s9580_s3 + $0x378] sm:$0xff]  }
  0x4d   :  { %6631 = vmatprep.subr.bf16.mxu0 %v7351_v32  ;;  %6652 = vmatpush3.bf16.msra.mxu1 %v7350_v31  ;;  %v7401_v31 = vld [vmem:[%s9580_s3 + $0x3f8] sm:$0xff]  }
  0x4e   :  { %6653 = vmatprep.subr.bf16.mxu1 %v7353_v34  ;;  %v7403_v32 = vld [vmem:[%s9580_s3 + $0x3b8] sm:$0xff]   ;;  %v7404_v34 = vld [vmem:[%s9579_s2 + $0x40] sm:$0xff]  }
  0x50   :  { %6632 = vmatpush3.bf16.msra.mxu0 %v7352_v33  ;;  %v1152_v33 = vrot.slane %v8154_v52, %v7965_v41  ;;  %v7420_v52 = vld [vmem:[%s9579_s2 + $0x60] sm:$0xff]  }
  0x51   :  { %6633 = vmatprep.subr.bf16.mxu0 %v7355_v36  ;;  %6654 = vmatpush3.bf16.msra.mxu1 %v7354_v35  ;;  %v7405_v35 = vld [vmem:[%s9579_s2] sm:$0xff]  }
  0x52   :  { %6655 = vmatprep.subr.bf16.mxu1 %v7357_v38  ;;  %v7406_v36 = vld [vmem:[%s9579_s2 + $0xc0] sm:$0xff]   ;;  %v1168_v38 = vcombine.high %v1152_v33, %v1152_v33 }
  0x54   :  { %6634 = vmatpush3.bf16.msra.mxu0 %v7356_v37  ;;  %v7407_v37 = vld [vmem:[%s9579_s2 + $0x80] sm:$0xff]  }
  0x55   :  { %6635 = vmatprep.subr.bf16.mxu0 %v7359_v40  ;;  %6656 = vmatpush3.bf16.msra.mxu1 %v7358_v39  ;;  %v7408_v39 = vld [vmem:[%s9579_s2 + $0x48] sm:$0xff]  }
  0x56   :  { %6657 = vmatprep.subr.bf16.mxu1 %v7361_v43  ;;  %v7409_v40 = vld [vmem:[%s9579_s2 + $0x8] sm:$0xff]  }
  0x57   :  { %v7411_v43 = vld [vmem:[%s9579_s2 + $0x88] sm:$0xff]  }
  0x58   :  { %6636 = vmatpush3.bf16.msra.mxu0 %v7360_v42  ;;  %v7410_v42 = vld [vmem:[%s9579_s2 + $0xc8] sm:$0xff]  }
  0x59   :  { %6637 = vmatprep.subr.bf16.mxu0 %v7363_v46  ;;  %6658 = vmatpush3.bf16.msra.mxu1 %v7362_v44  ;;  %v7412_v44 = vld [vmem:[%s9579_s2 + $0x50] sm:$0xff]  }
  0x5a   :  { %6659 = vmatprep.subr.bf16.mxu1 %v7365_v50  ;;  %v7414_v46 = vld [vmem:[%s9579_s2 + $0xd0] sm:$0xff]   ;;  %v7418_v50 = vld [vmem:[%s9579_s2 + $0xd8] sm:$0xff]  }
  0x5c   :  { %6638 = vmatpush3.bf16.msra.mxu0 %v7364_v49  ;;  %v7417_v49 = vld [vmem:[%s9579_s2 + $0x18] sm:$0xff]  }
  0x5d   :  { %6639 = vmatprep.subr.bf16.mxu0 %v7367_v54  ;;  %6660 = vmatpush3.bf16.msra.mxu1 %v7366_v53  ;;  %v7421_v53 = vld [vmem:[%s9579_s2 + $0x20] sm:$0xff]  }
  0x5e   :  { %6661 = vmatprep.subr.bf16.mxu1 %v7369_v58  ;;  %v7422_v54 = vld [vmem:[%s9579_s2 + $0xe0] sm:$0xff]   ;;  %v7426_v58 = vld [vmem:[%s9579_s2 + $0xe8] sm:$0xff]  }
  0x60   :  { %6640 = vmatpush3.bf16.msra.mxu0 %v7368_v56  ;;  %v7424_v56 = vld [vmem:[%s9579_s2 + $0x68] sm:$0xff]  }
  0x61   :  { %6669 = vmatprep.subr.bf16.mxu0 %v7371_v62  ;;  %6662 = vmatpush3.bf16.msra.mxu1 %v7370_v60  ;;  %v22_v60 = vld [vmem:[%s9577_s0] sm:$0xff] }
  0x62   :  { %6691 = vmatprep.subr.bf16.mxu1 %v7373_v1  ;;  %v2289_v62 = vrot.slane %v22_v60, %v7965_v41  ;;  %v7430_v1 = vld [vmem:[%s9579_s2 + $0xf0] sm:$0xff]  }
  0x63   :  { %2148 = vmatmul.mubr.bf16.vlgmr.msra.gmra.mrb[8].mxu0 %v1145_v61  ;;  %v7428_v61 = vld [vmem:[%s9579_s2 + $0x70] sm:$0xff]  }
  0x64   :  { %6670 = vmatpush3.bf16.msra.mxu0 %v7372_v63  ;;  %2227 = vmatprep.mubr.bf16.mxu0 %v1166_v0  ;;  %v2282_v63 = vcombine.high %v22_v60, %v22_v60  ;;  %v7429_v0 = vld [vmem:[%s9579_s2 + $0x30] sm:$0xff]  }
  0x65   :  { %2188 = vmatmul.mubr.bf16.vlgmr.msra.gmra.mrb[8].mxu1 %v1167_v3  ;;  %6671 = vmatprep.subr.bf16.mxu0 %v7375_v4  ;;  %v7431_v4 = vld [vmem:[%s9579_s2 + $0xb0] sm:$0xff]  }
  0x66   :  { %6692 = vmatpush3.bf16.msra.mxu1 %v7374_v2  ;;  %2267 = vmatprep.mubr.bf16.mxu1 %v1170_v6  ;;  %v2297_v2 = vcombine.high %v2289_v62, %v2289_v62  ;;  %v8360_v3 = vrot.slane %v2282_v63, %v7965_v41  ;;  %v7478_v60 = vld [vmem:[%s9579_s2 + $0x210] sm:$0xff]   ;;  %v7481_v63 = vld [vmem:[%s9579_s2 + $0x258] sm:$0xff]  }
  0x67   :  { %6693 = vmatprep.subr.bf16.mxu1 %v7377_v7  ;;  %v7433_v7 = vld [vmem:[%s9579_s2 + $0x38] sm:$0xff]  }
  0x68   :  { %6672 = vmatpush3.bf16.msra.mxu0 %v7376_v5  ;;  %v7432_v5 = vld [vmem:[%s9579_s2 + $0x78] sm:$0xff]   ;;  %v2319_v6 = vrot.slane %v2297_v2, %v7965_v41 }
  0x69   :  { %6673 = vmatprep.subr.bf16.mxu0 %v7379_v9  ;;  %v7434_v9 = vld [vmem:[%s9579_s2 + $0xf8] sm:$0xff]  }
  0x6a   :  { %6694 = vmatpush3.bf16.msra.mxu1 %v7378_v8  ;;  %v2298_v8 = vcombine.high %v8360_v3, %v8360_v3  ;;  %v7484_v2 = vld [vmem:[%s9579_s2 + $0x298] sm:$0xff]  }
  0x6b   :  { %6695 = vmatprep.subr.bf16.mxu1 %v7381_v11  ;;  %v7435_v11 = vld [vmem:[%s9579_s2 + $0xb8] sm:$0xff]  }
  0x6c   :  { %6674 = vmatpush3.bf16.msra.mxu0 %v7380_v10  ;;  %v2329_v10 = vcombine.high %v2319_v6, %v2319_v6 }
  0x6d   :  { %6675 = vmatprep.subr.bf16.mxu0 %v7383_v13  ;;  %v7436_v13 = vld [vmem:[%s9579_s2 + $0x140] sm:$0xff]  }
  0x6e   :  { %6696 = vmatpush3.bf16.msra.mxu1 %v7382_v12  ;;  %v2305_v12 = vrot.slane %v2289_v62, %v7965_v41  ;;  %v7480_v62 = vld [vmem:[%s9579_s2 + $0x290] sm:$0xff]  }
  0x6f   :  { %6697 = vmatprep.subr.bf16.mxu1 %v7385_v15  ;;  %v2326_v15 = vrot.slane %v2298_v8, %v7965_v41  ;;  %v7490_v8 = vld [vmem:[%s9579_s2 + $0x228] sm:$0xff]  }
  0x70   :  { %6676 = vmatpush3.bf16.msra.mxu0 %v7384_v14  ;;  %v7437_v14 = vld [vmem:[%s9579_s2 + $0x100] sm:$0xff]  }
  0x71   :  { %6677 = vmatprep.subr.bf16.mxu0 %v7387_v17  ;;  %v7439_v17 = vld [vmem:[%s9579_s2 + $0x180] sm:$0xff]  }
  0x72   :  { %6698 = vmatpush3.bf16.msra.mxu1 %v7386_v16  ;;  %v7438_v16 = vld [vmem:[%s9579_s2 + $0x1c0] sm:$0xff]  }
  0x73   :  { %6699 = vmatprep.subr.bf16.mxu1 %v7389_v19  ;;  %v7440_v19 = vld [vmem:[%s9579_s2 + $0x148] sm:$0xff]  }
  0x74   :  { %6678 = vmatpush3.bf16.msra.mxu0 %v7388_v18  ;;  %v2327_v18 = vcombine.high %v2305_v12, %v2305_v12 }
  0x75   :  { %6679 = vmatprep.subr.bf16.mxu0 %v7391_v21  ;;  %v2330_v21 = vcombine.high %v2326_v15, %v2326_v15 }
  0x76   :  { %6700 = vmatpush3.bf16.msra.mxu1 %v7390_v20  ;;  %v7441_v20 = vld [vmem:[%s9579_s2 + $0x108] sm:$0xff]  }
  0x77   :  { %6701 = vmatprep.subr.bf16.mxu1 %v7393_v23  ;;  %v7443_v23 = vld [vmem:[%s9579_s2 + $0x188] sm:$0xff]  }
  0x78   :  { %6680 = vmatpush3.bf16.msra.mxu0 %v7392_v22  ;;  %v7442_v22 = vld [vmem:[%s9579_s2 + $0x1c8] sm:$0xff]  }
  0x79   :  { %6681 = vmatprep.subr.bf16.mxu0 %v7395_v25  ;;  %v7445_v25 = vld [vmem:[%s9579_s2 + $0x110] sm:$0xff]  }
  0x7a   :  { %6702 = vmatpush3.bf16.msra.mxu1 %v7394_v24  ;;  %v7444_v24 = vld [vmem:[%s9579_s2 + $0x150] sm:$0xff]  }
  0x7b   :  { %6703 = vmatprep.subr.bf16.mxu1 %v7397_v27  ;;  %v7447_v27 = vld [vmem:[%s9579_s2 + $0x190] sm:$0xff]  }
  0x7c   :  { %6682 = vmatpush3.bf16.msra.mxu0 %v7396_v26  ;;  %v7446_v26 = vld [vmem:[%s9579_s2 + $0x1d0] sm:$0xff]  }
  0x7d   :  { %6683 = vmatprep.subr.bf16.mxu0 %v7399_v29  ;;  %v7449_v29 = vld [vmem:[%s9579_s2 + $0x118] sm:$0xff]  }
  0x7e   :  { %6704 = vmatpush3.bf16.msra.mxu1 %v7398_v28  ;;  %v7448_v28 = vld [vmem:[%s9579_s2 + $0x158] sm:$0xff]  }
  0x7f   :  { %6705 = vmatprep.subr.bf16.mxu1 %v7401_v31  ;;  %v7451_v31 = vld [vmem:[%s9579_s2 + $0x198] sm:$0xff]  }
  0x80   :  { %6684 = vmatpush3.bf16.msra.mxu0 %v7400_v30  ;;  %v7450_v30 = vld [vmem:[%s9579_s2 + $0x1d8] sm:$0xff]  }
  0x81   :  { %6713 = vmatprep.subr.bf16.mxu0 %v7404_v34  ;;  %v7454_v34 = vld [vmem:[%s9579_s2 + $0x1e0] sm:$0xff]  }
  0x82   :  { %6706 = vmatpush3.bf16.msra.mxu1 %v7403_v32  ;;  %v7452_v32 = vld [vmem:[%s9579_s2 + $0x160] sm:$0xff]  }
  0x83   :  { %2228 = vmatmul.mubr.bf16.vlgmr.msra.gmra.mrb[12].mxu0 %v1152_v33  ;;  %6735 = vmatprep.subr.bf16.mxu1 %v7406_v36  ;;  %v7453_v33 = vld [vmem:[%s9579_s2 + $0x120] sm:$0xff]   ;;  %v7456_v36 = vld [vmem:[%s9579_s2 + $0x168] sm:$0xff]  }
  0x84   :  { %6714 = vmatpush3.bf16.msra.mxu0 %v7405_v35  ;;  %5023 = vmatprep.mubr.bf16.mxu0 %v2319_v6  ;;  %v7455_v35 = vld [vmem:[%s9579_s2 + $0x1a0] sm:$0xff]  }
  0x85   :  { %2268 = vmatmul.mubr.bf16.vlgmr.msra.gmra.mrb[12].mxu1 %v1168_v38  ;;  %6715 = vmatprep.subr.bf16.mxu0 %v7408_v39  ;;  %v7458_v38 = vld [vmem:[%s9579_s2 + $0x1e8] sm:$0xff]   ;;  %v7488_v6 = vld [vmem:[%s9579_s2 + $0x2a0] sm:$0xff]  }
  0x86   :  { %6736 = vmatpush3.bf16.msra.mxu1 %v7407_v37  ;;  %5063 = vmatprep.mubr.bf16.mxu1 %v2329_v10  ;;  %v7457_v37 = vld [vmem:[%s9579_s2 + $0x128] sm:$0xff]  }
  0x87   :  { %6737 = vmatprep.subr.bf16.mxu1 %v7410_v42  ;;  %v7459_v39 = vld [vmem:[%s9579_s2 + $0x1a8] sm:$0xff]   ;;  %v7461_v42 = vld [vmem:[%s9579_s2 + $0x130] sm:$0xff]  }
  0x88   :  { %6716 = vmatpush3.bf16.msra.mxu0 %v7409_v40  ;;  %v7460_v40 = vld [vmem:[%s9579_s2 + $0x170] sm:$0xff]   ;;  %v7492_v10 = vld [vmem:[%s9579_s2 + $0x2a8] sm:$0xff]  }
  0x89   :  { %6717 = vmatprep.subr.bf16.mxu0 %v7412_v44  ;;  %v7463_v44 = vld [vmem:[%s9579_s2 + $0x1b0] sm:$0xff]  }
  0x8a   :  { %6738 = vmatpush3.bf16.msra.mxu1 %v7411_v43  ;;  %v7462_v43 = vld [vmem:[%s9579_s2 + $0x1f0] sm:$0xff]  }
  0x8b   :  { %6739 = vmatprep.subr.bf16.mxu1 %v7414_v46  ;;  %v7465_v46 = vld [vmem:[%s9579_s2 + $0x138] sm:$0xff]  }
  0x8c   :  { %6718 = vmatpush3.bf16.msra.mxu0 %v7413_v45  ;;  %v7464_v45 = vld [vmem:[%s9579_s2 + $0x178] sm:$0xff]  }
  0x8d   :  { %6719 = vmatprep.subr.bf16.mxu0 %v7416_v48  ;;  %v7468_v48 = vld [vmem:[%s9579_s2 + $0x1b8] sm:$0xff]  }
  0x8e   :  { %6740 = vmatpush3.bf16.msra.mxu1 %v7415_v47  ;;  %v7466_v47 = vld [vmem:[%s9579_s2 + $0x1f8] sm:$0xff]  }
  0x8f   :  { %6741 = vmatprep.subr.bf16.mxu1 %v7418_v50  ;;  %v7469_v50 = vld [vmem:[%s9579_s2 + $0x240] sm:$0xff]  }
  0x90   :  { %6720 = vmatpush3.bf16.msra.mxu0 %v7417_v49  ;;  %v2312_v49 = vrot.slane %v8360_v3, %v7965_v41  ;;  %v7485_v3 = vld [vmem:[%s9579_s2 + $0x260] sm:$0xff]  }
  0x91   :  { %6721 = vmatprep.subr.bf16.mxu0 %v7420_v52  ;;  %v7471_v52 = vld [vmem:[%s9579_s2 + $0x2c0] sm:$0xff]  }
  0x92   :  { %6742 = vmatpush3.bf16.msra.mxu1 %v7419_v51  ;;  %v7470_v51 = vld [vmem:[%s9579_s2 + $0x200] sm:$0xff]  }
  0x93   :  { %6743 = vmatprep.subr.bf16.mxu1 %v7422_v54  ;;  %v2328_v54 = vcombine.high %v2312_v49, %v2312_v49 }
  0x94   :  { %6722 = vmatpush3.bf16.msra.mxu0 %v7421_v53  ;;  %v7472_v53 = vld [vmem:[%s9579_s2 + $0x280] sm:$0xff]  }
  0x95   :  { %6723 = vmatprep.subr.bf16.mxu0 %v7424_v56  ;;  %v7474_v56 = vld [vmem:[%s9579_s2 + $0x208] sm:$0xff]  }
  0x96   :  { %6744 = vmatpush3.bf16.msra.mxu1 %v7423_v55  ;;  %v7473_v55 = vld [vmem:[%s9579_s2 + $0x248] sm:$0xff]  }
  0x97   :  { %6745 = vmatprep.subr.bf16.mxu1 %v7426_v58  ;;  %v7476_v58 = vld [vmem:[%s9579_s2 + $0x288] sm:$0xff]  }
  0x98   :  { %6724 = vmatpush3.bf16.msra.mxu0 %v7425_v57  ;;  %v7475_v57 = vld [vmem:[%s9579_s2 + $0x2c8] sm:$0xff]  }
  0x99   :  { %6725 = vmatprep.subr.bf16.mxu0 %v7428_v61  ;;  %v7479_v61 = vld [vmem:[%s9579_s2 + $0x2d0] sm:$0xff]  }
  0x9a   :  { %6746 = vmatpush3.bf16.msra.mxu1 %v7427_v59  ;;  %v7477_v59 = vld [vmem:[%s9579_s2 + $0x250] sm:$0xff]  }
  0x9b   :  { %6747 = vmatprep.subr.bf16.mxu1 %v7430_v1  ;;  %v7483_v1 = vld [vmem:[%s9579_s2 + $0x2d8] sm:$0xff]  }
  0x9c   :  { %6726 = vmatpush3.bf16.msra.mxu0 %v7429_v0  ;;  %v7482_v0 = vld [vmem:[%s9579_s2 + $0x218] sm:$0xff]  }
  0x9d   :  { %6727 = vmatprep.subr.bf16.mxu0 %v7432_v5  ;;  %v7487_v5 = vld [vmem:[%s9579_s2 + $0x2e0] sm:$0xff]  }
  0x9e   :  { %6748 = vmatpush3.bf16.msra.mxu1 %v7431_v4  ;;  %v7486_v4 = vld [vmem:[%s9579_s2 + $0x220] sm:$0xff]  }
  0x9f   :  { %6749 = vmatprep.subr.bf16.mxu1 %v7434_v9  ;;  %v7491_v9 = vld [vmem:[%s9579_s2 + $0x2e8] sm:$0xff]  }
  0xa0   :  { %6728 = vmatpush3.bf16.msra.mxu0 %v7433_v7  ;;  %v7489_v7 = vld [vmem:[%s9579_s2 + $0x268] sm:$0xff]  }
  0xa1   :  { %6757 = vmatprep.subr.bf16.mxu0 %v7436_v13  ;;  %v7494_v13 = vld [vmem:[%s9579_s2 + $0x230] sm:$0xff]  }
  0xa2   :  { %6750 = vmatpush3.bf16.msra.mxu1 %v7435_v11  ;;  %v7493_v11 = vld [vmem:[%s9579_s2 + $0x270] sm:$0xff]  }
  0xa3   :  { %5024 = vmatmul.mubr.bf16.vlgmr.msra.gmra.mrb[16].mxu0 %v2305_v12  ;;  %6779 = vmatprep.subr.bf16.mxu1 %v7438_v16  ;;  %v23_v12 = vld [vmem:[%s9577_s0 + $0x8] sm:$0xff]  ;;  %v7495_v16 = vld [vmem:[%s9579_s2 + $0x2f0] sm:$0xff]  }
  0xa4   :  { %6758 = vmatpush3.bf16.msra.mxu0 %v7437_v14  ;;  %5103 = vmatprep.mubr.bf16.mxu0 %v2326_v15  ;;  %v2338_v14 = vrot.slane %v23_v12, %v7965_v41  ;;  %v2331_v15 = vcombine.high %v23_v12, %v23_v12  ;;  %v7534_v12 = vld [vmem:[%s9579_s2 + $0x440] sm:$0xff]  }
  0xa5   :  { %5064 = vmatmul.mubr.bf16.vlgmr.msra.gmra.mrb[16].mxu1 %v2327_v18  ;;  %6759 = vmatprep.subr.bf16.mxu0 %v7440_v19 }
  0xa6   :  { %6780 = vmatpush3.bf16.msra.mxu1 %v7439_v17  ;;  %5143 = vmatprep.mubr.bf16.mxu1 %v2330_v21  ;;  %v7496_v17 = vld [vmem:[%s9579_s2 + $0x2b0] sm:$0xff]   ;;  %v2346_v18 = vcombine.high %v2338_v14, %v2338_v14  ;;  %v8569_v19 = vrot.slane %v2331_v15, %v7965_v41  ;;  %v7498_v21 = vld [vmem:[%s9579_s2 + $0x238] sm:$0xff]   ;;  %v7537_v15 = vld [vmem:[%s9579_s2 + $0x480] sm:$0xff]  }
  0xa7   :  { %6781 = vmatprep.subr.bf16.mxu1 %v7442_v22 }
  0xa8   :  { %6760 = vmatpush3.bf16.msra.mxu0 %v7441_v20  ;;  %v7497_v20 = vld [vmem:[%s9579_s2 + $0x278] sm:$0xff]   ;;  %v2368_v22 = vrot.slane %v2346_v18, %v7965_v41  ;;  %v7539_v18 = vld [vmem:[%s9579_s2 + $0x408] sm:$0xff]  }
  0xa9   :  { %6761 = vmatprep.subr.bf16.mxu0 %v7444_v24  ;;  %v7499_v24 = vld [vmem:[%s9579_s2 + $0x2f8] sm:$0xff]  }
  0xaa   :  { %6782 = vmatpush3.bf16.msra.mxu1 %v7443_v23  ;;  %v2347_v23 = vcombine.high %v8569_v19, %v8569_v19 }
  0xab   :  { %6783 = vmatprep.subr.bf16.mxu1 %v7446_v26  ;;  %v2378_v26 = vcombine.high %v2368_v22, %v2368_v22 }
  0xac   :  { %6762 = vmatpush3.bf16.msra.mxu0 %v7445_v25  ;;  %v7500_v25 = vld [vmem:[%s9579_s2 + $0x2b8] sm:$0xff]  }
  0xad   :  { %6763 = vmatprep.subr.bf16.mxu0 %v7448_v28  ;;  %v7501_v28 = vld [vmem:[%s9579_s2 + $0x340] sm:$0xff]  }
  0xae   :  { %6784 = vmatpush3.bf16.msra.mxu1 %v7447_v27  ;;  %v2354_v27 = vrot.slane %v2338_v14, %v7965_v41  ;;  %v7536_v14 = vld [vmem:[%s9579_s2 + $0x4c0] sm:$0xff]  }
  0xaf   :  { %6785 = vmatprep.subr.bf16.mxu1 %v7450_v30  ;;  %v2375_v30 = vrot.slane %v2347_v23, %v7965_v41  ;;  %v7544_v23 = vld [vmem:[%s9579_s2 + $0x4d0] sm:$0xff]  }
  0xb0   :  { %6764 = vmatpush3.bf16.msra.mxu0 %v7449_v29  ;;  %v7502_v29 = vld [vmem:[%s9579_s2 + $0x300] sm:$0xff]  }
  0xb1   :  { %6765 = vmatprep.subr.bf16.mxu0 %v7452_v32  ;;  %v7504_v32 = vld [vmem:[%s9579_s2 + $0x380] sm:$0xff]  }
  0xb2   :  { %6786 = vmatpush3.bf16.msra.mxu1 %v7451_v31  ;;  %v7503_v31 = vld [vmem:[%s9579_s2 + $0x3c0] sm:$0xff]  }
  0xb3   :  { %6787 = vmatprep.subr.bf16.mxu1 %v7454_v34  ;;  %v7505_v34 = vld [vmem:[%s9579_s2 + $0x348] sm:$0xff]  }
  0xb4   :  { %6766 = vmatpush3.bf16.msra.mxu0 %v7453_v33  ;;  %v2376_v33 = vcombine.high %v2354_v27, %v2354_v27 }
  0xb5   :  { %6767 = vmatprep.subr.bf16.mxu0 %v7456_v36  ;;  %v2379_v36 = vcombine.high %v2375_v30, %v2375_v30 }
  0xb6   :  { %6788 = vmatpush3.bf16.msra.mxu1 %v7455_v35  ;;  %v7506_v35 = vld [vmem:[%s9579_s2 + $0x308] sm:$0xff]  }
  0xb7   :  { %6789 = vmatprep.subr.bf16.mxu1 %v7458_v38  ;;  %v7508_v38 = vld [vmem:[%s9579_s2 + $0x388] sm:$0xff]  }
  0xb8   :  { %6768 = vmatpush3.bf16.msra.mxu0 %v7457_v37  ;;  %v7507_v37 = vld [vmem:[%s9579_s2 + $0x3c8] sm:$0xff]  }
  0xb9   :  { %6769 = vmatprep.subr.bf16.mxu0 %v7460_v40  ;;  %v7510_v40 = vld [vmem:[%s9579_s2 + $0x310] sm:$0xff]  }
  0xba   :  { %6790 = vmatpush3.bf16.msra.mxu1 %v7459_v39  ;;  %v7509_v39 = vld [vmem:[%s9579_s2 + $0x350] sm:$0xff]  }
  0xbb   :  { %6791 = vmatprep.subr.bf16.mxu1 %v7462_v43  ;;  %v7512_v43 = vld [vmem:[%s9579_s2 + $0x390] sm:$0xff]  }
  0xbc   :  { %6770 = vmatpush3.bf16.msra.mxu0 %v7461_v42  ;;  %v7511_v42 = vld [vmem:[%s9579_s2 + $0x3d0] sm:$0xff]  }
  0xbd   :  { %6771 = vmatprep.subr.bf16.mxu0 %v7464_v45  ;;  %v7514_v45 = vld [vmem:[%s9579_s2 + $0x318] sm:$0xff]  }
  0xbe   :  { %6792 = vmatpush3.bf16.msra.mxu1 %v7463_v44  ;;  %v7513_v44 = vld [vmem:[%s9579_s2 + $0x358] sm:$0xff]  }
  0xbf   :  { %6793 = vmatprep.subr.bf16.mxu1 %v7466_v47  ;;  %v7516_v47 = vld [vmem:[%s9579_s2 + $0x398] sm:$0xff]  }
  0xc0   :  { %6772 = vmatpush3.bf16.msra.mxu0 %v7465_v46  ;;  %v7515_v46 = vld [vmem:[%s9579_s2 + $0x3d8] sm:$0xff]  }
  0xc1   :  { %6801 = vmatprep.subr.bf16.mxu0 %v7469_v50  ;;  %v7519_v50 = vld [vmem:[%s9579_s2 + $0x3e0] sm:$0xff]  }
  0xc2   :  { %6794 = vmatpush3.bf16.msra.mxu1 %v7468_v48  ;;  %v7517_v48 = vld [vmem:[%s9579_s2 + $0x360] sm:$0xff]  }
  0xc3   :  { %5104 = vmatmul.mubr.bf16.vlgmr.msra.gmra.mrb[20].mxu0 %v2312_v49  ;;  %6823 = vmatprep.subr.bf16.mxu1 %v7471_v52  ;;  %v7518_v49 = vld [vmem:[%s9579_s2 + $0x320] sm:$0xff]   ;;  %v7521_v52 = vld [vmem:[%s9579_s2 + $0x368] sm:$0xff]  }
  0xc4   :  { %6802 = vmatpush3.bf16.msra.mxu0 %v7470_v51  ;;  %5183 = vmatprep.mubr.bf16.mxu0 %v2368_v22  ;;  %v7520_v51 = vld [vmem:[%s9579_s2 + $0x3a0] sm:$0xff]   ;;  %v7543_v22 = vld [vmem:[%s9579_s2 + $0x410] sm:$0xff]  }
  0xc5   :  { %5144 = vmatmul.mubr.bf16.vlgmr.msra.gmra.mrb[20].mxu1 %v2328_v54  ;;  %6803 = vmatprep.subr.bf16.mxu0 %v7473_v55  ;;  %v7523_v54 = vld [vmem:[%s9579_s2 + $0x3e8] sm:$0xff]  }
  0xc6   :  { %6824 = vmatpush3.bf16.msra.mxu1 %v7472_v53  ;;  %5223 = vmatprep.mubr.bf16.mxu1 %v2378_v26  ;;  %v7522_v53 = vld [vmem:[%s9579_s2 + $0x328] sm:$0xff]   ;;  %v7547_v26 = vld [vmem:[%s9579_s2 + $0x418] sm:$0xff]  }
  0xc7   :  { %6825 = vmatprep.subr.bf16.mxu1 %v7475_v57  ;;  %v7524_v55 = vld [vmem:[%s9579_s2 + $0x3a8] sm:$0xff]  }
  0xc8   :  { %6804 = vmatpush3.bf16.msra.mxu0 %v7474_v56  ;;  %v7525_v56 = vld [vmem:[%s9579_s2 + $0x370] sm:$0xff]  }
  0xc9   :  { %6805 = vmatprep.subr.bf16.mxu0 %v7477_v59 }
  0xca   :  { %6826 = vmatpush3.bf16.msra.mxu1 %v7476_v58  ;;  %v7526_v58 = vld [vmem:[%s9579_s2 + $0x330] sm:$0xff]  }
  0xcb   :  { %6827 = vmatprep.subr.bf16.mxu1 %v7479_v61 }
  0xcc   :  { %6806 = vmatpush3.bf16.msra.mxu0 %v7478_v60  ;;  %v7527_v60 = vld [vmem:[%s9579_s2 + $0x3f0] sm:$0xff]  }
  0xcd   :  { %6807 = vmatprep.subr.bf16.mxu0 %v7481_v63 }
  0xce   :  { %6828 = vmatpush3.bf16.msra.mxu1 %v7480_v62 }
  0xcf   :  { %6829 = vmatprep.subr.bf16.mxu1 %v7483_v1  ;;  %v7529_v1 = vld [vmem:[%s9579_s2 + $0x378] sm:$0xff]  }
  0xd0   :  { %6808 = vmatpush3.bf16.msra.mxu0 %v7482_v0  ;;  %v7528_v0 = vld [vmem:[%s9579_s2 + $0x3b0] sm:$0xff]  }
  0xd1   :  { %6809 = vmatprep.subr.bf16.mxu0 %v7485_v3 }
  0xd2   :  { %6830 = vmatpush3.bf16.msra.mxu1 %v7484_v2 }
  0xd3   :  { %6831 = vmatprep.subr.bf16.mxu1 %v7487_v5  ;;  %v7530_v5 = vld [vmem:[%s9579_s2 + $0x338] sm:$0xff]  }
  0xd4   :  { %6810 = vmatpush3.bf16.msra.mxu0 %v7486_v4 }
  0xd5   :  { %6811 = vmatprep.subr.bf16.mxu0 %v7489_v7  ;;  %v7531_v7 = vld [vmem:[%s9579_s2 + $0x3f8] sm:$0xff]  }
  0xd6   :  { %6832 = vmatpush3.bf16.msra.mxu1 %v7488_v6 }
  0xd7   :  { %6833 = vmatprep.subr.bf16.mxu1 %v7491_v9 }
  0xd8   :  { %6812 = vmatpush3.bf16.msra.mxu0 %v7490_v8 }
  0xd9   :  { %6813 = vmatprep.subr.bf16.mxu0 %v7493_v11  ;;  %v2361_v11 = vrot.slane %v8569_v19, %v7965_v41  ;;  %v7540_v19 = vld [vmem:[%s9579_s2 + $0x4c8] sm:$0xff]  }
  0xda   :  { %6834 = vmatpush3.bf16.msra.mxu1 %v7492_v10  ;;  %v7533_v10 = vld [vmem:[%s9579_s2 + $0x3b8] sm:$0xff]  }
  0xdb   :  { %6835 = vmatprep.subr.bf16.mxu1 %v7495_v16  ;;  %v2377_v16 = vcombine.high %v2361_v11, %v2361_v11 }
  0xdc   :  { %6814 = vmatpush3.bf16.msra.mxu0 %v7494_v13  ;;  %v7535_v13 = vld [vmem:[%s9579_s2 + $0x400] sm:$0xff]  }
  0xdd   :  { %6815 = vmatprep.subr.bf16.mxu0 %v7497_v20  ;;  %v7541_v20 = vld [vmem:[%s9579_s2 + $0x488] sm:$0xff]  }
  0xde   :  { %6836 = vmatpush3.bf16.msra.mxu1 %v7496_v17  ;;  %v7538_v17 = vld [vmem:[%s9579_s2 + $0x448] sm:$0xff]  }
  0xdf   :  { %6837 = vmatprep.subr.bf16.mxu1 %v7499_v24  ;;  %v7545_v24 = vld [vmem:[%s9579_s2 + $0x490] sm:$0xff]  }
  0xe0   :  { %6816 = vmatpush3.bf16.msra.mxu0 %v7498_v21  ;;  %v7542_v21 = vld [vmem:[%s9579_s2 + $0x450] sm:$0xff]  }
  0xe1   :  { %6845 = vmatprep.subr.bf16.mxu0 %v7501_v28  ;;  %v7549_v28 = vld [vmem:[%s9579_s2 + $0x498] sm:$0xff]  }
  0xe2   :  { %6838 = vmatpush3.bf16.msra.mxu1 %v7500_v25  ;;  %v7546_v25 = vld [vmem:[%s9579_s2 + $0x458] sm:$0xff]  }
  0xe3   :  { %5184 = vmatmul.mubr.bf16.vlgmr.msra.gmra.mrb[24].mxu0 %v2354_v27  ;;  %6867 = vmatprep.subr.bf16.mxu1 %v7503_v31  ;;  %v7548_v27 = vld [vmem:[%s9579_s2 + $0x4d8] sm:$0xff]   ;;  %v7552_v31 = vld [vmem:[%s9579_s2 + $0x4e0] sm:$0xff]  }
  0xe4   :  { %6846 = vmatpush3.bf16.msra.mxu0 %v7502_v29  ;;  %5263 = vmatprep.mubr.bf16.mxu0 %v2375_v30  ;;  %v7550_v29 = vld [vmem:[%s9579_s2 + $0x460] sm:$0xff]  }
  0xe5   :  { %5224 = vmatmul.mubr.bf16.vlgmr.msra.gmra.mrb[24].mxu1 %v2376_v33  ;;  %6847 = vmatprep.subr.bf16.mxu0 %v7505_v34  ;;  %v7551_v30 = vld [vmem:[%s9579_s2 + $0x420] sm:$0xff]   ;;  %v7554_v33 = vld [vmem:[%s9579_s2 + $0x468] sm:$0xff]  }
  0xe6   :  { %6868 = vmatpush3.bf16.msra.mxu1 %v7504_v32  ;;  %5303 = vmatprep.mubr.bf16.mxu1 %v2379_v36  ;;  %v7553_v32 = vld [vmem:[%s9579_s2 + $0x4a0] sm:$0xff]   ;;  %v7555_v34 = vld [vmem:[%s9579_s2 + $0x428] sm:$0xff]  }
  0xe7   :  { %6869 = vmatprep.subr.bf16.mxu1 %v7507_v37  ;;  %v7557_v36 = vld [vmem:[%s9579_s2 + $0x4a8] sm:$0xff]   ;;  %v7558_v37 = vld [vmem:[%s9579_s2 + $0x470] sm:$0xff]  }
  0xe8   :  { %6848 = vmatpush3.bf16.msra.mxu0 %v7506_v35  ;;  %v7556_v35 = vld [vmem:[%s9579_s2 + $0x4e8] sm:$0xff]  }
  0xe9   :  { %6849 = vmatprep.subr.bf16.mxu0 %v7509_v39 }
  0xea   :  { %6870 = vmatpush3.bf16.msra.mxu1 %v7508_v38  ;;  %v24_v38 = vld [vmem:[%s9577_s0 + $0x10] sm:$0xff] }
  0xeb   :  { %6871 = vmatprep.subr.bf16.mxu1 %v7511_v42  ;;  %v2387_v42 = vrot.slane %v24_v38, %v7965_v41 }
  0xec   :  { %6850 = vmatpush3.bf16.msra.mxu0 %v7510_v40  ;;  %v7559_v40 = vld [vmem:[%s9579_s2 + $0x430] sm:$0xff]  }
  0xed   :  { %6851 = vmatprep.subr.bf16.mxu0 %v7513_v44 }
  0xee   :  { %6872 = vmatpush3.bf16.msra.mxu1 %v7512_v43  ;;  %v2380_v43 = vcombine.high %v24_v38, %v24_v38  ;;  %v7593_v38 = vld [vmem:[%s9579_s2 + $0x5b0] sm:$0xff]  }
  0xef   :  { %6873 = vmatprep.subr.bf16.mxu1 %v7515_v46 }
  0xf0   :  { %6852 = vmatpush3.bf16.msra.mxu0 %v7514_v45  ;;  %v7560_v45 = vld [vmem:[%s9579_s2 + $0x4f0] sm:$0xff]  }
  0xf1   :  { %6853 = vmatprep.subr.bf16.mxu0 %v7517_v48 }
  0xf2   :  { %6874 = vmatpush3.bf16.msra.mxu1 %v7516_v47 }
  0xf3   :  { %6875 = vmatprep.subr.bf16.mxu1 %v7519_v50  ;;  %v8774_v50 = vrot.slane %v2380_v43, %v7965_v41 }
  0xf4   :  { %6854 = vmatpush3.bf16.msra.mxu0 %v7518_v49  ;;  %v2395_v49 = vcombine.high %v2387_v42, %v2387_v42 }
  0xf5   :  { %6855 = vmatprep.subr.bf16.mxu0 %v7521_v52 }
  0xf6   :  { %v6553_v57 = vpop.f32.mrb[0].mxu0  ;;  %6876 = vmatpush3.bf16.msra.mxu1 %v7520_v51 }
  0xf7   :  { %v6554_v59 = vpop.f32.mrb[1].mxu0  ;;  %6877 = vmatprep.subr.bf16.mxu1 %v7523_v54  ;;  %v6575_v61 = vpop.f32.mrb[0].mxu1  ;;  %v7562_v54 = vld [vmem:[%s9579_s2 + $0x478] sm:$0xff]  }
  0xf8   :  { %v6555_v62 = vadd.f32 %v6554_v59, %v6553_v57  ;;  %v6556_v63 = vpop.f32.mrb[2].mxu0  ;;  %6856 = vmatpush3.bf16.msra.mxu0 %v7522_v53  ;;  %v6576_v2 = vpop.f32.mrb[1].mxu1  ;;  %v7561_v53 = vld [vmem:[%s9579_s2 + $0x4b0] sm:$0xff]   ;;  %v7563_v57 = vld [vmem:[%s9579_s2 + $0x438] sm:$0xff]  }
  0xf9   :  { %v6557_v3 = vpop.f32.mrb[3].mxu0  ;;  %6857 = vmatprep.subr.bf16.mxu0 %v7525_v56  ;;  %v6577_v4 = vadd.f32 %v6576_v2, %v6575_v61  ;;  %v6578_v6 = vpop.f32.mrb[2].mxu1  ;;  %v7564_v59 = vld [vmem:[%s9579_s2 + $0x4f8] sm:$0xff]   ;;  %v2396_v61 = vcombine.high %v8774_v50, %v8774_v50  ;;  %v2403_v2 = vrot.slane %v2387_v42, %v7965_v41 }
  0xfa   :  { %6878 = vmatpush3.bf16.msra.mxu1 %v7524_v55  ;;  %v6579_v8 = vpop.f32.mrb[3].mxu1  ;;  %v7565_v63 = vld [vmem:[%s9579_s2 + $0x4b8] sm:$0xff]   ;;  %v7566_v3 = vld [vmem:[%s9579_s2 + $0x540] sm:$0xff]  }
  0xfb   :  { %6879 = vmatprep.subr.bf16.mxu1 %v7527_v60  ;;  %v8681_v9 = vadd.f32 %v6577_v4, %v6555_v62  ;;  %v7567_v4 = vld [vmem:[%s9579_s2 + $0x500] sm:$0xff]   ;;  %v2425_v8 = vcombine.high %v2403_v2, %v2403_v2 }
  0xfc   :  { %6858 = vmatpush3.bf16.msra.mxu0 %v7526_v58  ;;  %v2417_v58 = vrot.slane %v2395_v49, %v7965_v41  ;;  %v7568_v6 = vld [vmem:[%s9579_s2 + $0x5c0] sm:$0xff]  }
  0xfd   :  { %6859 = vmatprep.subr.bf16.mxu0 %v7529_v1 }
  0xfe   :  { %6880 = vmatpush3.bf16.msra.mxu1 %v7528_v0  ;;  %v2427_v0 = vcombine.high %v2417_v58, %v2417_v58 }
  0xff   :  { %6881 = vmatprep.subr.bf16.mxu1 %v7531_v7  ;;  %v7569_v7 = vld [vmem:[%s9579_s2 + $0x580] sm:$0xff]  }
 0x100   :  { %6860 = vmatpush3.bf16.msra.mxu0 %v7530_v5  ;;  %v2424_v5 = vrot.slane %v2396_v61, %v7965_v41  ;;  %v7607_v61 = vld [vmem:[%s9579_s2 + $0x650] sm:$0xff]  }
 0x101   :  { %6889 = vmatprep.subr.bf16.mxu0 %v7534_v12  ;;  %v7572_v12 = vld [vmem:[%s9579_s2 + $0x5c8] sm:$0xff]  }
 0x102   :  { %6882 = vmatpush3.bf16.msra.mxu1 %v7533_v10  ;;  %v7571_v10 = vld [vmem:[%s9579_s2 + $0x508] sm:$0xff]  }
 0x103   :  { %5264 = vmatmul.mubr.bf16.vlgmr.msra.gmra.mrb[28].mxu0 %v2361_v11  ;;  %6911 = vmatprep.subr.bf16.mxu1 %v7536_v14  ;;  %v2428_v11 = vcombine.high %v2424_v5, %v2424_v5  ;;  %v7574_v14 = vld [vmem:[%s9579_s2 + $0x550] sm:$0xff]  }
 0x104   :  { %6890 = vmatpush3.bf16.msra.mxu0 %v7535_v13  ;;  %5343 = vmatprep.mubr.bf16.mxu0 %v2417_v58  ;;  %v7573_v13 = vld [vmem:[%s9579_s2 + $0x588] sm:$0xff]  }
 0x105   :  { %5304 = vmatmul.mubr.bf16.vlgmr.msra.gmra.mrb[28].mxu1 %v2377_v16  ;;  %6891 = vmatprep.subr.bf16.mxu0 %v7538_v17  ;;  %v7576_v16 = vld [vmem:[%s9579_s2 + $0x5d0] sm:$0xff]   ;;  %v7604_v58 = vld [vmem:[%s9579_s2 + $0x608] sm:$0xff]  }
 0x106   :  { %6912 = vmatpush3.bf16.msra.mxu1 %v7537_v15  ;;  %5383 = vmatprep.mubr.bf16.mxu1 %v2427_v0  ;;  %v7575_v15 = vld [vmem:[%s9579_s2 + $0x510] sm:$0xff]  }
 0x107   :  { %6913 = vmatprep.subr.bf16.mxu1 %v7540_v19  ;;  %v7577_v17 = vld [vmem:[%s9579_s2 + $0x590] sm:$0xff]   ;;  %v7579_v19 = vld [vmem:[%s9579_s2 + $0x518] sm:$0xff]  }
 0x108   :  { %6892 = vmatpush3.bf16.msra.mxu0 %v7539_v18  ;;  %v7578_v18 = vld [vmem:[%s9579_s2 + $0x558] sm:$0xff]   ;;  %v7610_v0 = vld [vmem:[%s9579_s2 + $0x690] sm:$0xff]  }
 0x109   :  { %6893 = vmatprep.subr.bf16.mxu0 %v7542_v21  ;;  %v7581_v21 = vld [vmem:[%s9579_s2 + $0x598] sm:$0xff]  }
 0x10a   :  { %6914 = vmatpush3.bf16.msra.mxu1 %v7541_v20  ;;  %v7580_v20 = vld [vmem:[%s9579_s2 + $0x5d8] sm:$0xff]  }
 0x10b   :  { %6915 = vmatprep.subr.bf16.mxu1 %v7544_v23  ;;  %v7583_v23 = vld [vmem:[%s9579_s2 + $0x520] sm:$0xff]  }
 0x10c   :  { %6894 = vmatpush3.bf16.msra.mxu0 %v7543_v22  ;;  %v7582_v22 = vld [vmem:[%s9579_s2 + $0x560] sm:$0xff]  }
 0x10d   :  { %6895 = vmatprep.subr.bf16.mxu0 %v7546_v25  ;;  %v7585_v25 = vld [vmem:[%s9579_s2 + $0x5a0] sm:$0xff]  }
 0x10e   :  { %6916 = vmatpush3.bf16.msra.mxu1 %v7545_v24  ;;  %v7584_v24 = vld [vmem:[%s9579_s2 + $0x5e0] sm:$0xff]  }
 0x10f   :  { %6917 = vmatprep.subr.bf16.mxu1 %v7548_v27  ;;  %v7587_v27 = vld [vmem:[%s9579_s2 + $0x528] sm:$0xff]  }
 0x110   :  { %6896 = vmatpush3.bf16.msra.mxu0 %v7547_v26  ;;  %v7586_v26 = vld [vmem:[%s9579_s2 + $0x568] sm:$0xff]  }
 0x111   :  { %6897 = vmatprep.subr.bf16.mxu0 %v7550_v29  ;;  %v7589_v29 = vld [vmem:[%s9579_s2 + $0x5a8] sm:$0xff]  }
 0x112   :  { %6918 = vmatpush3.bf16.msra.mxu1 %v7549_v28  ;;  %v7588_v28 = vld [vmem:[%s9579_s2 + $0x5e8] sm:$0xff]  }
 0x113   :  { %6919 = vmatprep.subr.bf16.mxu1 %v7552_v31 }
 0x114   :  { %6898 = vmatpush3.bf16.msra.mxu0 %v7551_v30  ;;  %v7590_v30 = vld [vmem:[%s9579_s2 + $0x570] sm:$0xff]  }
 0x115   :  { %6899 = vmatprep.subr.bf16.mxu0 %v7554_v33 }
 0x116   :  { %v6597_v39 = vpop.f32.mrb[4].mxu0  ;;  %6920 = vmatpush3.bf16.msra.mxu1 %v7553_v32  ;;  %v7591_v32 = vld [vmem:[%s9579_s2 + $0x530] sm:$0xff]  }
 0x117   :  { %v6598_v44 = vpop.f32.mrb[5].mxu0  ;;  %6921 = vmatprep.subr.bf16.mxu1 %v7556_v35  ;;  %v6619_v48 = vpop.f32.mrb[4].mxu1 }
 0x118   :  { %v6599_v46 = vadd.f32 %v6598_v44, %v6597_v39  ;;  %v6600_v47 = vpop.f32.mrb[6].mxu0  ;;  %6900 = vmatpush3.bf16.msra.mxu0 %v7555_v34  ;;  %v6620_v52 = vpop.f32.mrb[5].mxu1  ;;  %v7592_v34 = vld [vmem:[%s9579_s2 + $0x5f0] sm:$0xff]   ;;  %v7594_v39 = vld [vmem:[%s9579_s2 + $0x578] sm:$0xff]  }
 0x119   :  { %v6601_v51 = vpop.f32.mrb[7].mxu0  ;;  %6901 = vmatprep.subr.bf16.mxu0 %v7558_v37  ;;  %v6621_v56 = vadd.f32 %v6620_v52, %v6619_v48  ;;  %v6622_v60 = vpop.f32.mrb[6].mxu1  ;;  %v7596_v47 = vld [vmem:[%s9579_s2 + $0x5f8] sm:$0xff]   ;;  %v2410_v52 = vrot.slane %v8774_v50, %v7965_v41 }
 0x11a   :  { %v2070_v55 = vadd.f32 %v6599_v46, %v8681_v9  ;;  %6922 = vmatpush3.bf16.msra.mxu1 %v7557_v36  ;;  %v6623_v1 = vpop.f32.mrb[7].mxu1  ;;  %v7570_v9 = vld [vmem:[%s9579_s2 + $0x548] sm:$0xff]   ;;  %v7598_v51 = vld [vmem:[%s9579_s2 + $0x5b8] sm:$0xff]  }
 0x11b   :  { %6923 = vmatprep.subr.bf16.mxu1 %v7560_v45  ;;  %v7595_v45 = vld [vmem:[%s9579_s2 + $0x538] sm:$0xff]   ;;  %v2426_v50 = vcombine.high %v2410_v52, %v2410_v52  ;;  %v7606_v60 = vld [vmem:[%s9579_s2 + $0x688] sm:$0xff]  }
 0x11c   :  { %v8792_v62 = vadd.f32 %v6621_v56, %v2070_v55  ;;  %6902 = vmatpush3.bf16.msra.mxu0 %v7559_v40  ;;  %v7601_v55 = vld [vmem:[%s9579_s2 + $0x6c0] sm:$0xff]   ;;  %v7611_v1 = vld [vmem:[%s9579_s2 + $0x658] sm:$0xff]  }
 0x11d   :  { %6903 = vmatprep.subr.bf16.mxu0 %v7562_v54  ;;  %v7600_v54 = vld [vmem:[%s9579_s2 + $0x600] sm:$0xff]  }
 0x11e   :  { %6924 = vmatpush3.bf16.msra.mxu1 %v7561_v53  ;;  %v7599_v53 = vld [vmem:[%s9579_s2 + $0x640] sm:$0xff]  }
 0x11f   :  { %6925 = vmatprep.subr.bf16.mxu1 %v7564_v59  ;;  %v7602_v56 = vld [vmem:[%s9579_s2 + $0x680] sm:$0xff]   ;;  %v7605_v59 = vld [vmem:[%s9579_s2 + $0x6c8] sm:$0xff]  }
 0x120   :  { %6904 = vmatpush3.bf16.msra.mxu0 %v7563_v57  ;;  %v7603_v57 = vld [vmem:[%s9579_s2 + $0x648] sm:$0xff]  }
 0x121   :  { %6933 = vmatprep.subr.bf16.mxu0 %v7566_v3  ;;  %v7613_v3 = vld [vmem:[%s9579_s2 + $0x6d8] sm:$0xff]  }
 0x122   :  { %6926 = vmatpush3.bf16.msra.mxu1 %v7565_v63  ;;  %v7609_v63 = vld [vmem:[%s9579_s2 + $0x6d0] sm:$0xff]  }
 0x123   :  { %5344 = vmatmul.mubr.bf16.vlgmr.msra.gmra.mrb[32].mxu0 %v2403_v2  ;;  %6955 = vmatprep.subr.bf16.mxu1 %v7568_v6  ;;  %v7612_v2 = vld [vmem:[%s9579_s2 + $0x618] sm:$0xff]   ;;  %v7616_v6 = vld [vmem:[%s9579_s2 + $0x620] sm:$0xff]  }
 0x124   :  { %6934 = vmatpush3.bf16.msra.mxu0 %v7567_v4  ;;  %5423 = vmatprep.mubr.bf16.mxu0 %v2424_v5  ;;  %v7614_v4 = vld [vmem:[%s9579_s2 + $0x698] sm:$0xff]   ;;  %v7615_v5 = vld [vmem:[%s9579_s2 + $0x660] sm:$0xff]  }
 0x125   :  { %5384 = vmatmul.mubr.bf16.vlgmr.msra.gmra.mrb[32].mxu1 %v2425_v8  ;;  %6935 = vmatprep.subr.bf16.mxu0 %v7570_v9  ;;  %v7618_v8 = vld [vmem:[%s9579_s2 + $0x6a0] sm:$0xff]   ;;  %v7619_v9 = vld [vmem:[%s9579_s2 + $0x668] sm:$0xff]  }
 0x126   :  { %6956 = vmatpush3.bf16.msra.mxu1 %v7569_v7  ;;  %5463 = vmatprep.mubr.bf16.mxu1 %v2428_v11  ;;  %v7617_v7 = vld [vmem:[%s9579_s2 + $0x6e0] sm:$0xff]   ;;  %v7621_v11 = vld [vmem:[%s9579_s2 + $0x6e8] sm:$0xff]  }
 0x127   :  { %6957 = vmatprep.subr.bf16.mxu1 %v7572_v12  ;;  %v7622_v12 = vld [vmem:[%s9579_s2 + $0x6a8] sm:$0xff]  }
 0x128   :  { %6936 = vmatpush3.bf16.msra.mxu0 %v7571_v10  ;;  %v7620_v10 = vld [vmem:[%s9579_s2 + $0x628] sm:$0xff]  }
 0x129   :  { %6937 = vmatprep.subr.bf16.mxu0 %v7574_v14 }
 0x12a   :  { %6958 = vmatpush3.bf16.msra.mxu1 %v7573_v13  ;;  %v7623_v13 = vld [vmem:[%s9579_s2 + $0x670] sm:$0xff]  }
 0x12b   :  { %6959 = vmatprep.subr.bf16.mxu1 %v7576_v16  ;;  %v25_v16 = vld [vmem:[%s9577_s0 + $0x18] sm:$0xff] }
 0x12c   :  { %6938 = vmatpush3.bf16.msra.mxu0 %v7575_v15  ;;  %v7624_v15 = vld [vmem:[%s9579_s2 + $0x630] sm:$0xff]  }
 0x12d   :  { %6939 = vmatprep.subr.bf16.mxu0 %v7578_v18  ;;  %v7625_v18 = vld [vmem:[%s9579_s2 + $0x6f0] sm:$0xff]  }
 0x12e   :  { %6960 = vmatpush3.bf16.msra.mxu1 %v7577_v17 }
 0x12f   :  { %6961 = vmatprep.subr.bf16.mxu1 %v7580_v20  ;;  %v2429_v20 = vcombine.high %v25_v16, %v25_v16 }
 0x130   :  { %6940 = vmatpush3.bf16.msra.mxu0 %v7579_v19  ;;  %v2436_v19 = vrot.slane %v25_v16, %v7965_v41 }
 0x131   :  { %6941 = vmatprep.subr.bf16.mxu0 %v7582_v22 }
 0x132   :  { %6962 = vmatpush3.bf16.msra.mxu1 %v7581_v21 }
 0x133   :  { %6963 = vmatprep.subr.bf16.mxu1 %v7584_v24 }
 0x134   :  { %6942 = vmatpush3.bf16.msra.mxu0 %v7583_v23 }
 0x135   :  { %6943 = vmatprep.subr.bf16.mxu0 %v7586_v26  ;;  %v7626_v26 = vld [vmem:[%s9579_s2 + $0x6b0] sm:$0xff]  }
 0x136   :  { %v6641_v31 = vpop.f32.mrb[8].mxu0  ;;  %6964 = vmatpush3.bf16.msra.mxu1 %v7585_v25 }
 0x137   :  { %v6642_v33 = vpop.f32.mrb[9].mxu0  ;;  %6965 = vmatprep.subr.bf16.mxu1 %v7588_v28  ;;  %v2444_v28 = vcombine.high %v2436_v19, %v2436_v19 }
 0x138   :  { %v6643_v35 = vadd.f32 %v6642_v33, %v6641_v31  ;;  %v6644_v36 = vpop.f32.mrb[10].mxu0  ;;  %v6663_v37 = vpop.f32.mrb[8].mxu1  ;;  %6944 = vmatpush3.bf16.msra.mxu0 %v7587_v27  ;;  %v7627_v27 = vld [vmem:[%s9579_s2 + $0x678] sm:$0xff]  }
 0x139   :  { %v6645_v40 = vpop.f32.mrb[11].mxu0  ;;  %v6664_v42 = vpop.f32.mrb[9].mxu1  ;;  %6945 = vmatprep.subr.bf16.mxu0 %v7590_v30  ;;  %v7629_v33 = vld [vmem:[%s9579_s2 + $0x6f8] sm:$0xff]  }
 0x13a   :  { %v2150_v43 = vadd.f32 %v6643_v35, %v8792_v62  ;;  %v6665_v44 = vadd.f32 %v6664_v42, %v6663_v37  ;;  %6966 = vmatpush3.bf16.msra.mxu1 %v7589_v29  ;;  %v6666_v46 = vpop.f32.mrb[10].mxu1  ;;  %v7608_v62 = vld [vmem:[%s9579_s2 + $0x610] sm:$0xff]   ;;  %v8992_v29 = vrot.slane %v2429_v20, %v7965_v41  ;;  %v2452_v40 = vrot.slane %v2436_v19, %v7965_v41  ;;  %v7631_v42 = vld [vmem:[%s9579_s2 + $0x740] sm:$0xff]   ;;  %v7660_v20 = vld [vmem:[%s9579_s2 + $0x738] sm:$0xff]  }
 0x13b   :  { %6967 = vmatprep.subr.bf16.mxu1 %v7592_v34  ;;  %v6667_v48 = vpop.f32.mrb[11].mxu1  ;;  %v2466_v34 = vrot.slane %v2444_v28, %v7965_v41  ;;  %v7633_v46 = vld [vmem:[%s9579_s2 + $0x7c0] sm:$0xff]  }
 0x13c   :  { %v8893_v49 = vadd.f32 %v6665_v44, %v2150_v43  ;;  %6946 = vmatpush3.bf16.msra.mxu0 %v7591_v32  ;;  %v7628_v32 = vld [vmem:[%s9579_s2 + $0x638] sm:$0xff]   ;;  %v2445_v36 = vcombine.high %v8992_v29, %v8992_v29  ;;  %v7632_v44 = vld [vmem:[%s9579_s2 + $0x700] sm:$0xff]   ;;  %v2474_v48 = vcombine.high %v2452_v40, %v2452_v40 }
 0x13d   :  { %6947 = vmatprep.subr.bf16.mxu0 %v7594_v39  ;;  %v2476_v43 = vcombine.high %v2466_v34, %v2466_v34  ;;  %v7665_v28 = vld [vmem:[%s9579_s2 + $0x800] sm:$0xff]  }
 0x13e   :  { %6968 = vmatpush3.bf16.msra.mxu1 %v7593_v38  ;;  %v7630_v38 = vld [vmem:[%s9579_s2 + $0x6b8] sm:$0xff]  }
 0x13f   :  { %6969 = vmatprep.subr.bf16.mxu1 %v7596_v47  ;;  %v7634_v47 = vld [vmem:[%s9579_s2 + $0x780] sm:$0xff]  }
 0x140   :  { %6948 = vmatpush3.bf16.msra.mxu0 %v7595_v45  ;;  %v2473_v45 = vrot.slane %v2445_v36, %v7965_v41  ;;  %v7672_v36 = vld [vmem:[%s9579_s2 + $0x850] sm:$0xff]  }
 0x141   :  { %6977 = vmatprep.subr.bf16.mxu0 %v7599_v53  ;;  %v7637_v53 = vld [vmem:[%s9579_s2 + $0x7c8] sm:$0xff]  }
 0x142   :  { %6970 = vmatpush3.bf16.msra.mxu1 %v7598_v51  ;;  %v7636_v51 = vld [vmem:[%s9579_s2 + $0x708] sm:$0xff]  }
 0x143   :  { %5424 = vmatmul.mubr.bf16.vlgmr.msra.gmra.mrb[36].mxu0 %v2410_v52  ;;  %6999 = vmatprep.subr.bf16.mxu1 %v7601_v55  ;;  %v2477_v52 = vcombine.high %v2473_v45, %v2473_v45  ;;  %v7639_v55 = vld [vmem:[%s9579_s2 + $0x750] sm:$0xff]  }
 0x144   :  { %6978 = vmatpush3.bf16.msra.mxu0 %v7600_v54  ;;  %5503 = vmatprep.mubr.bf16.mxu0 %v2466_v34  ;;  %v7638_v54 = vld [vmem:[%s9579_s2 + $0x788] sm:$0xff]  }
 0x145   :  { %5464 = vmatmul.mubr.bf16.vlgmr.msra.gmra.mrb[36].mxu1 %v2426_v50  ;;  %6979 = vmatprep.subr.bf16.mxu0 %v7603_v57  ;;  %v7641_v50 = vld [vmem:[%s9579_s2 + $0x7d0] sm:$0xff]   ;;  %v7670_v34 = vld [vmem:[%s9579_s2 + $0x8c8] sm:$0xff]  }
 0x146   :  { %7000 = vmatpush3.bf16.msra.mxu1 %v7602_v56  ;;  %5543 = vmatprep.mubr.bf16.mxu1 %v2476_v43  ;;  %v7640_v56 = vld [vmem:[%s9579_s2 + $0x710] sm:$0xff]   ;;  %v7678_v43 = vld [vmem:[%s9579_s2 + $0x8d8] sm:$0xff]  }
 0x147   :  { %7001 = vmatprep.subr.bf16.mxu1 %v7605_v59  ;;  %v7642_v57 = vld [vmem:[%s9579_s2 + $0x790] sm:$0xff]   ;;  %v7644_v59 = vld [vmem:[%s9579_s2 + $0x718] sm:$0xff]  }
 0x148   :  { %6980 = vmatpush3.bf16.msra.mxu0 %v7604_v58  ;;  %v7643_v58 = vld [vmem:[%s9579_s2 + $0x758] sm:$0xff]  }
 0x149   :  { %6981 = vmatprep.subr.bf16.mxu0 %v7607_v61  ;;  %v7646_v61 = vld [vmem:[%s9579_s2 + $0x798] sm:$0xff]  }
 0x14a   :  { %7002 = vmatpush3.bf16.msra.mxu1 %v7606_v60  ;;  %v7645_v60 = vld [vmem:[%s9579_s2 + $0x7d8] sm:$0xff]  }
 0x14b   :  { %7003 = vmatprep.subr.bf16.mxu1 %v7609_v63  ;;  %v7648_v63 = vld [vmem:[%s9579_s2 + $0x720] sm:$0xff]  }
 0x14c   :  { %6982 = vmatpush3.bf16.msra.mxu0 %v7608_v62  ;;  %v7647_v62 = vld [vmem:[%s9579_s2 + $0x760] sm:$0xff]  }
 0x14d   :  { %6983 = vmatprep.subr.bf16.mxu0 %v7611_v1  ;;  %v7650_v1 = vld [vmem:[%s9579_s2 + $0x7a0] sm:$0xff]  }
 0x14e   :  { %7004 = vmatpush3.bf16.msra.mxu1 %v7610_v0  ;;  %v7649_v0 = vld [vmem:[%s9579_s2 + $0x7e0] sm:$0xff]  }
 0x14f   :  { %7005 = vmatprep.subr.bf16.mxu1 %v7613_v3  ;;  %v7652_v3 = vld [vmem:[%s9579_s2 + $0x728] sm:$0xff]  }
 0x150   :  { %6984 = vmatpush3.bf16.msra.mxu0 %v7612_v2  ;;  %v7651_v2 = vld [vmem:[%s9579_s2 + $0x768] sm:$0xff]  }
 0x151   :  { %6985 = vmatprep.subr.bf16.mxu0 %v7615_v5  ;;  %v7654_v5 = vld [vmem:[%s9579_s2 + $0x7a8] sm:$0xff]  }
 0x152   :  { %7006 = vmatpush3.bf16.msra.mxu1 %v7614_v4  ;;  %v7653_v4 = vld [vmem:[%s9579_s2 + $0x7e8] sm:$0xff]  }
 0x153   :  { %7007 = vmatprep.subr.bf16.mxu1 %v7617_v7 }
 0x154   :  { %6986 = vmatpush3.bf16.msra.mxu0 %v7616_v6  ;;  %v7655_v6 = vld [vmem:[%s9579_s2 + $0x770] sm:$0xff]  }
 0x155   :  { %6987 = vmatprep.subr.bf16.mxu0 %v7619_v9 }
 0x156   :  { %v6685_v14 = vpop.f32.mrb[12].mxu0  ;;  %7008 = vmatpush3.bf16.msra.mxu1 %v7618_v8  ;;  %v7656_v8 = vld [vmem:[%s9579_s2 + $0x730] sm:$0xff]  }
 0x157   :  { %v6686_v17 = vpop.f32.mrb[13].mxu0  ;;  %7009 = vmatprep.subr.bf16.mxu1 %v7621_v11 }
 0x158   :  { %v6687_v21 = vadd.f32 %v6686_v17, %v6685_v14  ;;  %v6688_v22 = vpop.f32.mrb[14].mxu0  ;;  %v6707_v23 = vpop.f32.mrb[12].mxu1  ;;  %6988 = vmatpush3.bf16.msra.mxu0 %v7620_v10  ;;  %v7657_v10 = vld [vmem:[%s9579_s2 + $0x7f0] sm:$0xff]  }
 0x159   :  { %v6689_v24 = vpop.f32.mrb[15].mxu0  ;;  %v6708_v25 = vpop.f32.mrb[13].mxu1  ;;  %6989 = vmatprep.subr.bf16.mxu0 %v7623_v13  ;;  %v7658_v14 = vld [vmem:[%s9579_s2 + $0x7b0] sm:$0xff]   ;;  %v7661_v22 = vld [vmem:[%s9579_s2 + $0x7f8] sm:$0xff]  }
 0x15a   :  { %v2230_v30 = vadd.f32 %v6687_v21, %v8893_v49  ;;  %v6709_v31 = vadd.f32 %v6708_v25, %v6707_v23  ;;  %7010 = vmatpush3.bf16.msra.mxu1 %v7622_v12  ;;  %v6710_v35 = vpop.f32.mrb[14].mxu1  ;;  %v7635_v49 = vld [vmem:[%s9579_s2 + $0x748] sm:$0xff]   ;;  %v7663_v25 = vld [vmem:[%s9579_s2 + $0x7b8] sm:$0xff]  }
 0x15b   :  { %7011 = vmatprep.subr.bf16.mxu1 %v7625_v18  ;;  %v6711_v39 = vpop.f32.mrb[15].mxu1  ;;  %v7671_v35 = vld [vmem:[%s9579_s2 + $0x888] sm:$0xff]  }
 0x15c   :  { %v9004_v37 = vadd.f32 %v6709_v31, %v2230_v30  ;;  %6990 = vmatpush3.bf16.msra.mxu0 %v7624_v15  ;;  %v7659_v15 = vld [vmem:[%s9579_s2 + $0x778] sm:$0xff]   ;;  %v7666_v30 = vld [vmem:[%s9579_s2 + $0x8c0] sm:$0xff]   ;;  %v7675_v39 = vld [vmem:[%s9579_s2 + $0x890] sm:$0xff]  }
 0x15d   :  { %6991 = vmatprep.subr.bf16.mxu0 %v7627_v27  ;;  %v7664_v27 = vld [vmem:[%s9579_s2 + $0x840] sm:$0xff]  }
 0x15e   :  { %7012 = vmatpush3.bf16.msra.mxu1 %v7626_v26  ;;  %v2459_v26 = vrot.slane %v8992_v29, %v7965_v41  ;;  %v7667_v31 = vld [vmem:[%s9579_s2 + $0x880] sm:$0xff]  }
 0x15f   :  { %7013 = vmatprep.subr.bf16.mxu1 %v7629_v33  ;;  %v7669_v33 = vld [vmem:[%s9579_s2 + $0x808] sm:$0xff]  }
 0x160   :  { %6992 = vmatpush3.bf16.msra.mxu0 %v7628_v32  ;;  %v2475_v29 = vcombine.high %v2459_v26, %v2459_v26  ;;  %v7668_v32 = vld [vmem:[%s9579_s2 + $0x848] sm:$0xff]  }
 0x161   :  { %7021 = vmatprep.subr.bf16.mxu0 %v7631_v42  ;;  %v7677_v42 = vld [vmem:[%s9579_s2 + $0x818] sm:$0xff]  }
 0x162   :  { %7014 = vmatpush3.bf16.msra.mxu1 %v7630_v38  ;;  %v7674_v38 = vld [vmem:[%s9579_s2 + $0x8d0] sm:$0xff]  }
 0x163   :  { %5504 = vmatmul.mubr.bf16.vlgmr.msra.gmra.mrb[40].mxu0 %v2452_v40  ;;  %7043 = vmatprep.subr.bf16.mxu1 %v7633_v46  ;;  %v7676_v40 = vld [vmem:[%s9579_s2 + $0x858] sm:$0xff]   ;;  %v7681_v46 = vld [vmem:[%s9579_s2 + $0x820] sm:$0xff]  }
 0x164   :  { %7022 = vmatpush3.bf16.msra.mxu0 %v7632_v44  ;;  %5583 = vmatprep.mubr.bf16.mxu0 %v2473_v45  ;;  %v7679_v44 = vld [vmem:[%s9579_s2 + $0x898] sm:$0xff]   ;;  %v7680_v45 = vld [vmem:[%s9579_s2 + $0x860] sm:$0xff]  }
 0x165   :  { %5544 = vmatmul.mubr.bf16.vlgmr.msra.gmra.mrb[40].mxu1 %v2474_v48  ;;  %7023 = vmatprep.subr.bf16.mxu0 %v7635_v49  ;;  %v7683_v48 = vld [vmem:[%s9579_s2 + $0x8a0] sm:$0xff]   ;;  %v7684_v49 = vld [vmem:[%s9579_s2 + $0x868] sm:$0xff]  }
 0x166   :  { %7044 = vmatpush3.bf16.msra.mxu1 %v7634_v47  ;;  %5623 = vmatprep.mubr.bf16.mxu1 %v2477_v52  ;;  %v7682_v47 = vld [vmem:[%s9579_s2 + $0x8e0] sm:$0xff]   ;;  %v7686_v52 = vld [vmem:[%s9579_s2 + $0x8e8] sm:$0xff]  }
 0x167   :  { %7045 = vmatprep.subr.bf16.mxu1 %v7637_v53  ;;  %v7687_v53 = vld [vmem:[%s9579_s2 + $0x8a8] sm:$0xff]  }
 0x168   :  { %7024 = vmatpush3.bf16.msra.mxu0 %v7636_v51  ;;  %v7685_v51 = vld [vmem:[%s9579_s2 + $0x828] sm:$0xff]  }
 0x169   :  { %7025 = vmatprep.subr.bf16.mxu0 %v7639_v55 }
 0x16a   :  { %7046 = vmatpush3.bf16.msra.mxu1 %v7638_v54  ;;  %v7688_v54 = vld [vmem:[%s9579_s2 + $0x870] sm:$0xff]  }
 0x16b   :  { %7047 = vmatprep.subr.bf16.mxu1 %v7641_v50 }
 0x16c   :  { %7026 = vmatpush3.bf16.msra.mxu0 %v7640_v56  ;;  %v7689_v56 = vld [vmem:[%s9579_s2 + $0x830] sm:$0xff]  }
 0x16d   :  { %7027 = vmatprep.subr.bf16.mxu0 %v7643_v58  ;;  %v26_v58 = vld [vmem:[%s9577_s0 + $0x20] sm:$0xff] }
 0x16e   :  { %7048 = vmatpush3.bf16.msra.mxu1 %v7642_v57  ;;  %v7690_v57 = vld [vmem:[%s9579_s2 + $0x8f0] sm:$0xff]  }
 0x16f   :  { %7049 = vmatprep.subr.bf16.mxu1 %v7645_v60 }
 0x170   :  { %7028 = vmatpush3.bf16.msra.mxu0 %v7644_v59 }
 0x171   :  { %7029 = vmatprep.subr.bf16.mxu0 %v7647_v62  ;;  %v2485_v62 = vrot.slane %v26_v58, %v7965_v41 }
 0x172   :  { %7050 = vmatpush3.bf16.msra.mxu1 %v7646_v61 }
 0x173   :  { %7051 = vmatprep.subr.bf16.mxu1 %v7649_v0 }
 0x174   :  { %7030 = vmatpush3.bf16.msra.mxu0 %v7648_v63  ;;  %v2478_v63 = vcombine.high %v26_v58, %v26_v58 }
 0x175   :  { %7031 = vmatprep.subr.bf16.mxu0 %v7651_v2  ;;  %v7691_v2 = vld [vmem:[%s9579_s2 + $0x8b0] sm:$0xff]  }
 0x176   :  { %v6729_v7 = vpop.f32.mrb[16].mxu0  ;;  %7052 = vmatpush3.bf16.msra.mxu1 %v7650_v1 }
 0x177   :  { %v6730_v9 = vpop.f32.mrb[17].mxu0  ;;  %7053 = vmatprep.subr.bf16.mxu1 %v7653_v4 }
 0x178   :  { %v6731_v11 = vadd.f32 %v6730_v9, %v6729_v7  ;;  %v6732_v12 = vpop.f32.mrb[18].mxu0  ;;  %v6751_v13 = vpop.f32.mrb[16].mxu1  ;;  %7032 = vmatpush3.bf16.msra.mxu0 %v7652_v3  ;;  %v7692_v3 = vld [vmem:[%s9579_s2 + $0x878] sm:$0xff]   ;;  %v2493_v7 = vcombine.high %v2485_v62, %v2485_v62 }
 0x179   :  { %v6733_v16 = vpop.f32.mrb[19].mxu0  ;;  %v6752_v17 = vpop.f32.mrb[17].mxu1  ;;  %7033 = vmatprep.subr.bf16.mxu0 %v7655_v6  ;;  %v7693_v6 = vld [vmem:[%s9579_s2 + $0x838] sm:$0xff]  }
 0x17a   :  { %v5026_v18 = vadd.f32 %v6731_v11, %v9004_v37  ;;  %v6753_v19 = vadd.f32 %v6752_v17, %v6751_v13  ;;  %7054 = vmatpush3.bf16.msra.mxu1 %v7654_v5  ;;  %v6754_v21 = vpop.f32.mrb[18].mxu1  ;;  %v7673_v37 = vld [vmem:[%s9579_s2 + $0x810] sm:$0xff]   ;;  %v2515_v12 = vrot.slane %v2493_v7, %v7965_v41  ;;  %v7695_v13 = vld [vmem:[%s9579_s2 + $0x8b8] sm:$0xff]   ;;  %v7696_v16 = vld [vmem:[%s9579_s2 + $0x940] sm:$0xff]  }
 0x17b   :  { %7055 = vmatprep.subr.bf16.mxu1 %v7657_v10  ;;  %v6755_v23 = vpop.f32.mrb[19].mxu1  ;;  %v9211_v10 = vrot.slane %v2478_v63, %v7965_v41 }
 0x17c   :  { %v9105_v24 = vadd.f32 %v6753_v19, %v5026_v18  ;;  %7034 = vmatpush3.bf16.msra.mxu0 %v7656_v8  ;;  %v7694_v8 = vld [vmem:[%s9579_s2 + $0x8f8] sm:$0xff]   ;;  %v2525_v18 = vcombine.high %v2515_v12, %v2515_v12  ;;  %v7697_v19 = vld [vmem:[%s9579_s2 + $0x900] sm:$0xff]  }
 0x17d   :  { %7035 = vmatprep.subr.bf16.mxu0 %v7659_v15  ;;  %v2501_v15 = vrot.slane %v2485_v62, %v7965_v41  ;;  %v2494_v17 = vcombine.high %v9211_v10, %v9211_v10  ;;  %v7726_v62 = vld [vmem:[%s9579_s2 + $0x9f8] sm:$0xff]  }
 0x17e   :  { %7056 = vmatpush3.bf16.msra.mxu1 %v7658_v14 }
 0x17f   :  { %7057 = vmatprep.subr.bf16.mxu1 %v7661_v22  ;;  %v2522_v21 = vrot.slane %v2494_v17, %v7965_v41  ;;  %v7699_v22 = vld [vmem:[%s9579_s2 + $0x980] sm:$0xff]   ;;  %v2523_v23 = vcombine.high %v2501_v15, %v2501_v15  ;;  %v7742_v17 = vld [vmem:[%s9579_s2 + $0xa18] sm:$0xff]  }
 0x180   :  { %7036 = vmatpush3.bf16.msra.mxu0 %v7660_v20  ;;  %v7698_v20 = vld [vmem:[%s9579_s2 + $0x9c0] sm:$0xff]  }
 0x181   :  { %7065 = vmatprep.subr.bf16.mxu0 %v7664_v27  ;;  %v7702_v27 = vld [vmem:[%s9579_s2 + $0x9c8] sm:$0xff]  }
 0x182   :  { %7058 = vmatpush3.bf16.msra.mxu1 %v7663_v25  ;;  %v7701_v25 = vld [vmem:[%s9579_s2 + $0x908] sm:$0xff]  }
 0x183   :  { %5584 = vmatmul.mubr.bf16.vlgmr.msra.gmra.mrb[44].mxu0 %v2459_v26  ;;  %7087 = vmatprep.subr.bf16.mxu1 %v7666_v30  ;;  %v2526_v26 = vcombine.high %v2522_v21, %v2522_v21  ;;  %v7704_v30 = vld [vmem:[%s9579_s2 + $0x950] sm:$0xff]  }
 0x184   :  { %7066 = vmatpush3.bf16.msra.mxu0 %v7665_v28  ;;  %5663 = vmatprep.mubr.bf16.mxu0 %v2515_v12  ;;  %v7703_v28 = vld [vmem:[%s9579_s2 + $0x988] sm:$0xff]   ;;  %v7737_v12 = vld [vmem:[%s9579_s2 + $0xa50] sm:$0xff]  }
 0x185   :  { %5624 = vmatmul.mubr.bf16.vlgmr.msra.gmra.mrb[44].mxu1 %v2475_v29  ;;  %7067 = vmatprep.subr.bf16.mxu0 %v7668_v32  ;;  %v7706_v29 = vld [vmem:[%s9579_s2 + $0x9d0] sm:$0xff]  }
 0x186   :  { %7088 = vmatpush3.bf16.msra.mxu1 %v7667_v31  ;;  %5703 = vmatprep.mubr.bf16.mxu1 %v2525_v18  ;;  %v7705_v31 = vld [vmem:[%s9579_s2 + $0x910] sm:$0xff]   ;;  %v7743_v18 = vld [vmem:[%s9579_s2 + $0xad8] sm:$0xff]  }
 0x187   :  { %7089 = vmatprep.subr.bf16.mxu1 %v7670_v34  ;;  %v7707_v32 = vld [vmem:[%s9579_s2 + $0x990] sm:$0xff]   ;;  %v7709_v34 = vld [vmem:[%s9579_s2 + $0x918] sm:$0xff]  }
 0x188   :  { %7068 = vmatpush3.bf16.msra.mxu0 %v7669_v33  ;;  %v7708_v33 = vld [vmem:[%s9579_s2 + $0x958] sm:$0xff]  }
 0x189   :  { %7069 = vmatprep.subr.bf16.mxu0 %v7672_v36  ;;  %v7711_v36 = vld [vmem:[%s9579_s2 + $0x998] sm:$0xff]  }
 0x18a   :  { %7090 = vmatpush3.bf16.msra.mxu1 %v7671_v35  ;;  %v7710_v35 = vld [vmem:[%s9579_s2 + $0x9d8] sm:$0xff]  }
 0x18b   :  { %7091 = vmatprep.subr.bf16.mxu1 %v7674_v38  ;;  %v7713_v38 = vld [vmem:[%s9579_s2 + $0x920] sm:$0xff]  }
 0x18c   :  { %7070 = vmatpush3.bf16.msra.mxu0 %v7673_v37  ;;  %v7712_v37 = vld [vmem:[%s9579_s2 + $0x960] sm:$0xff]  }
 0x18d   :  { %7071 = vmatprep.subr.bf16.mxu0 %v7676_v40  ;;  %v7715_v40 = vld [vmem:[%s9579_s2 + $0x9a0] sm:$0xff]  }
 0x18e   :  { %7092 = vmatpush3.bf16.msra.mxu1 %v7675_v39  ;;  %v7714_v39 = vld [vmem:[%s9579_s2 + $0x9e0] sm:$0xff]  }
 0x18f   :  { %7093 = vmatprep.subr.bf16.mxu1 %v7678_v43  ;;  %v7717_v43 = vld [vmem:[%s9579_s2 + $0x928] sm:$0xff]  }
 0x190   :  { %7072 = vmatpush3.bf16.msra.mxu0 %v7677_v42  ;;  %v7716_v42 = vld [vmem:[%s9579_s2 + $0x968] sm:$0xff]  }
 0x191   :  { %7073 = vmatprep.subr.bf16.mxu0 %v7680_v45  ;;  %v7719_v45 = vld [vmem:[%s9579_s2 + $0x9a8] sm:$0xff]  }
 0x192   :  { %7094 = vmatpush3.bf16.msra.mxu1 %v7679_v44  ;;  %v7718_v44 = vld [vmem:[%s9579_s2 + $0x9e8] sm:$0xff]  }
 0x193   :  { %7095 = vmatprep.subr.bf16.mxu1 %v7682_v47 }
 0x194   :  { %7074 = vmatpush3.bf16.msra.mxu0 %v7681_v46  ;;  %v7720_v46 = vld [vmem:[%s9579_s2 + $0x970] sm:$0xff]  }
 0x195   :  { %7075 = vmatprep.subr.bf16.mxu0 %v7684_v49 }
 0x196   :  { %v6773_v55 = vpop.f32.mrb[20].mxu0  ;;  %7096 = vmatpush3.bf16.msra.mxu1 %v7683_v48  ;;  %v7721_v48 = vld [vmem:[%s9579_s2 + $0x930] sm:$0xff]  }
 0x197   :  { %v6774_v50 = vpop.f32.mrb[21].mxu0  ;;  %7097 = vmatprep.subr.bf16.mxu1 %v7686_v52 }
 0x198   :  { %v6775_v59 = vadd.f32 %v6774_v50, %v6773_v55  ;;  %v6776_v60 = vpop.f32.mrb[22].mxu0  ;;  %v6795_v61 = vpop.f32.mrb[20].mxu1  ;;  %7076 = vmatpush3.bf16.msra.mxu0 %v7685_v51  ;;  %v7722_v51 = vld [vmem:[%s9579_s2 + $0x9f0] sm:$0xff]  }
 0x199   :  { %v6777_v0 = vpop.f32.mrb[23].mxu0  ;;  %v6796_v1 = vpop.f32.mrb[21].mxu1  ;;  %7077 = vmatprep.subr.bf16.mxu0 %v7688_v54  ;;  %v7723_v55 = vld [vmem:[%s9579_s2 + $0x9b0] sm:$0xff]   ;;  %v7725_v60 = vld [vmem:[%s9579_s2 + $0x938] sm:$0xff]  }
 0x19a   :  { %v5106_v4 = vadd.f32 %v6775_v59, %v9105_v24  ;;  %v6797_v5 = vadd.f32 %v6796_v1, %v6795_v61  ;;  %7098 = vmatpush3.bf16.msra.mxu1 %v7687_v53  ;;  %v6798_v9 = vpop.f32.mrb[22].mxu1  ;;  %v7700_v24 = vld [vmem:[%s9579_s2 + $0x948] sm:$0xff]   ;;  %v7728_v1 = vld [vmem:[%s9579_s2 + $0x9b8] sm:$0xff]  }
 0x19b   :  { %7099 = vmatprep.subr.bf16.mxu1 %v7690_v57  ;;  %v6799_v14 = vpop.f32.mrb[23].mxu1  ;;  %v7734_v9 = vld [vmem:[%s9579_s2 + $0xa08] sm:$0xff]  }
 0x19c   :  { %v9213_v11 = vadd.f32 %v6797_v5, %v5106_v4  ;;  %7078 = vmatpush3.bf16.msra.mxu0 %v7689_v56  ;;  %v7724_v56 = vld [vmem:[%s9579_s2 + $0x978] sm:$0xff]   ;;  %v7730_v4 = vld [vmem:[%s9579_s2 + $0xa00] sm:$0xff]   ;;  %v7739_v14 = vld [vmem:[%s9579_s2 + $0xad0] sm:$0xff]  }
 0x19d   :  { %7079 = vmatprep.subr.bf16.mxu0 %v7692_v3  ;;  %v7729_v3 = vld [vmem:[%s9579_s2 + $0xa40] sm:$0xff]  }
 0x19e   :  { %7100 = vmatpush3.bf16.msra.mxu1 %v7691_v2  ;;  %v2508_v2 = vrot.slane %v9211_v10, %v7965_v41  ;;  %v7731_v5 = vld [vmem:[%s9579_s2 + $0xac0] sm:$0xff]   ;;  %v7735_v10 = vld [vmem:[%s9579_s2 + $0xac8] sm:$0xff]  }
 0x19f   :  { %7101 = vmatprep.subr.bf16.mxu1 %v7694_v8  ;;  %v7733_v8 = vld [vmem:[%s9579_s2 + $0xa48] sm:$0xff]  }
 0x1a0   :  { %7080 = vmatpush3.bf16.msra.mxu0 %v7693_v6  ;;  %v7732_v6 = vld [vmem:[%s9579_s2 + $0xa80] sm:$0xff]   ;;  %v2524_v7 = vcombine.high %v2508_v2, %v2508_v2 }
 0x1a1   :  { %7109 = vmatprep.subr.bf16.mxu0 %v7696_v16  ;;  %v7741_v16 = vld [vmem:[%s9579_s2 + $0xa58] sm:$0xff]  }
 0x1a2   :  { %7102 = vmatpush3.bf16.msra.mxu1 %v7695_v13  ;;  %v7738_v13 = vld [vmem:[%s9579_s2 + $0xa10] sm:$0xff]  }
 0x1a3   :  { %5664 = vmatmul.mubr.bf16.vlgmr.msra.gmra.mrb[48].mxu0 %v2501_v15  ;;  %7131 = vmatprep.subr.bf16.mxu1 %v7698_v20  ;;  %v7740_v15 = vld [vmem:[%s9579_s2 + $0xa90] sm:$0xff]   ;;  %v7745_v20 = vld [vmem:[%s9579_s2 + $0xa60] sm:$0xff]  }
 0x1a4   :  { %7110 = vmatpush3.bf16.msra.mxu0 %v7697_v19  ;;  %5743 = vmatprep.mubr.bf16.mxu0 %v2522_v21  ;;  %v7744_v19 = vld [vmem:[%s9579_s2 + $0xa98] sm:$0xff]   ;;  %v7746_v21 = vld [vmem:[%s9579_s2 + $0xa20] sm:$0xff]  }
 0x1a5   :  { %5704 = vmatmul.mubr.bf16.vlgmr.msra.gmra.mrb[48].mxu1 %v2523_v23  ;;  %7111 = vmatprep.subr.bf16.mxu0 %v7700_v24  ;;  %v7748_v23 = vld [vmem:[%s9579_s2 + $0xaa0] sm:$0xff]   ;;  %v7749_v24 = vld [vmem:[%s9579_s2 + $0xa68] sm:$0xff]  }
 0x1a6   :  { %7132 = vmatpush3.bf16.msra.mxu1 %v7699_v22  ;;  %5783 = vmatprep.mubr.bf16.mxu1 %v2526_v26  ;;  %v7747_v22 = vld [vmem:[%s9579_s2 + $0xae0] sm:$0xff]   ;;  %v7751_v26 = vld [vmem:[%s9579_s2 + $0xae8] sm:$0xff]  }
 0x1a7   :  { %7133 = vmatprep.subr.bf16.mxu1 %v7702_v27  ;;  %v7752_v27 = vld [vmem:[%s9579_s2 + $0xaa8] sm:$0xff]  }
 0x1a8   :  { %7112 = vmatpush3.bf16.msra.mxu0 %v7701_v25  ;;  %v7750_v25 = vld [vmem:[%s9579_s2 + $0xa28] sm:$0xff]  }
 0x1a9   :  { %7113 = vmatprep.subr.bf16.mxu0 %v7704_v30 }
 0x1aa   :  { %7134 = vmatpush3.bf16.msra.mxu1 %v7703_v28  ;;  %v7753_v28 = vld [vmem:[%s9579_s2 + $0xa70] sm:$0xff]  }
 0x1ab   :  { %7135 = vmatprep.subr.bf16.mxu1 %v7706_v29 }
 0x1ac   :  { %7114 = vmatpush3.bf16.msra.mxu0 %v7705_v31  ;;  %v7754_v31 = vld [vmem:[%s9579_s2 + $0xa30] sm:$0xff]  }
 0x1ad   :  { %7115 = vmatprep.subr.bf16.mxu0 %v7708_v33 }
 0x1ae   :  { %7136 = vmatpush3.bf16.msra.mxu1 %v7707_v32  ;;  %v7755_v32 = vld [vmem:[%s9579_s2 + $0xaf0] sm:$0xff]  }
 0x1af   :  { %7137 = vmatprep.subr.bf16.mxu1 %v7710_v35 }
 0x1b0   :  { %7116 = vmatpush3.bf16.msra.mxu0 %v7709_v34 }
 0x1b1   :  { %7117 = vmatprep.subr.bf16.mxu0 %v7712_v37  ;;  %v27_v37 = vld [vmem:[%s9577_s0 + $0x28] sm:$0xff] }
 0x1b2   :  { %7138 = vmatpush3.bf16.msra.mxu1 %v7711_v36  ;;  %v7757_v36 = vld [vmem:[%s9579_s2 + $0xa78] sm:$0xff]  }
 0x1b3   :  { %7139 = vmatprep.subr.bf16.mxu1 %v7714_v39 }
 0x1b4   :  { %7118 = vmatpush3.bf16.msra.mxu0 %v7713_v38 }
 0x1b5   :  { %7119 = vmatprep.subr.bf16.mxu0 %v7716_v42  ;;  %v2527_v42 = vcombine.high %v27_v37, %v27_v37 }
 0x1b6   :  { %v6817_v47 = vpop.f32.mrb[24].mxu0  ;;  %7140 = vmatpush3.bf16.msra.mxu1 %v7715_v40  ;;  %v2534_v40 = vrot.slane %v27_v37, %v7965_v41 }
 0x1b7   :  { %v6818_v49 = vpop.f32.mrb[25].mxu0  ;;  %7141 = vmatprep.subr.bf16.mxu1 %v7718_v44 }
 0x1b8   :  { %v6819_v52 = vadd.f32 %v6818_v49, %v6817_v47  ;;  %v6820_v53 = vpop.f32.mrb[26].mxu0  ;;  %v6839_v54 = vpop.f32.mrb[24].mxu1  ;;  %7120 = vmatpush3.bf16.msra.mxu0 %v7717_v43  ;;  %v7759_v47 = vld [vmem:[%s9579_s2 + $0xaf8] sm:$0xff]  }
 0x1b9   :  { %v6821_v50 = vpop.f32.mrb[27].mxu0  ;;  %v6840_v57 = vpop.f32.mrb[25].mxu1  ;;  %7121 = vmatprep.subr.bf16.mxu0 %v7720_v46  ;;  %v7758_v53 = vld [vmem:[%s9579_s2 + $0xa38] sm:$0xff]  }
 0x1ba   :  { %v5186_v58 = vadd.f32 %v6819_v52, %v9213_v11  ;;  %v6841_v59 = vadd.f32 %v6840_v57, %v6839_v54  ;;  %7142 = vmatpush3.bf16.msra.mxu1 %v7719_v45  ;;  %v6842_v61 = vpop.f32.mrb[26].mxu1  ;;  %v7736_v11 = vld [vmem:[%s9579_s2 + $0xa88] sm:$0xff]   ;;  %v7756_v45 = vld [vmem:[%s9579_s2 + $0xab0] sm:$0xff]   ;;  %v7760_v57 = vld [vmem:[%s9579_s2 + $0xab8] sm:$0xff]  }
 0x1bb   :  { %7143 = vmatprep.subr.bf16.mxu1 %v7722_v51  ;;  %v6843_v63 = vpop.f32.mrb[27].mxu1  ;;  %v9420_v51 = vrot.slane %v2527_v42, %v7965_v41  ;;  %v7762_v61 = vld [vmem:[%s9579_s2 + $0xb00] sm:$0xff]   ;;  %v7793_v42 = vld [vmem:[%s9579_s2 + $0xbb8] sm:$0xff]  }
 0x1bc   :  { %v9317_v0 = vadd.f32 %v6841_v59, %v5186_v58  ;;  %7122 = vmatpush3.bf16.msra.mxu0 %v7721_v48  ;;  %v2542_v48 = vcombine.high %v2534_v40, %v2534_v40  ;;  %v7763_v59 = vld [vmem:[%s9579_s2 + $0xbc0] sm:$0xff]   ;;  %v7765_v63 = vld [vmem:[%s9579_s2 + $0xb48] sm:$0xff]  }
 0x1bd   :  { %7123 = vmatprep.subr.bf16.mxu0 %v7724_v56  ;;  %v7761_v56 = vld [vmem:[%s9579_s2 + $0xb40] sm:$0xff]   ;;  %v2543_v50 = vcombine.high %v9420_v51, %v9420_v51 }
 0x1be   :  { %7144 = vmatpush3.bf16.msra.mxu1 %v7723_v55  ;;  %v2564_v54 = vrot.slane %v2542_v48, %v7965_v41  ;;  %v2550_v55 = vrot.slane %v2534_v40, %v7965_v41  ;;  %v2557_v40 = vrot.slane %v9420_v51, %v7965_v41 }
 0x1bf   :  { %7145 = vmatprep.subr.bf16.mxu1 %v7726_v62 }
 0x1c0   :  { %7124 = vmatpush3.bf16.msra.mxu0 %v7725_v60  ;;  %v2574_v58 = vcombine.high %v2564_v54, %v2564_v54  ;;  %v2571_v60 = vrot.slane %v2543_v50, %v7965_v41  ;;  %v2572_v62 = vcombine.high %v2550_v55, %v2550_v55 }
 0x1c1   :  { %7153 = vmatprep.subr.bf16.mxu0 %v7729_v3  ;;  %v7766_v3 = vld [vmem:[%s9579_s2 + $0xb08] sm:$0xff]  }
 0x1c2   :  { %7146 = vmatpush3.bf16.msra.mxu1 %v7728_v1  ;;  %v2575_v1 = vcombine.high %v2571_v60, %v2571_v60 }
 0x1c3   :  { %5744 = vmatmul.mubr.bf16.vlgmr.msra.gmra.mrb[52].mxu0 %v2508_v2  ;;  %7175 = vmatprep.subr.bf16.mxu1 %v7731_v5  ;;  %v7767_v2 = vld [vmem:[%s9579_s2 + $0xbc8] sm:$0xff]  }
 0x1c4   :  { %7154 = vmatpush3.bf16.msra.mxu0 %v7730_v4  ;;  %5823 = vmatprep.mubr.bf16.mxu0 %v2564_v54  ;;  %v7769_v4 = vld [vmem:[%s9579_s2 + $0xb50] sm:$0xff]   ;;  %v7768_v5 = vld [vmem:[%s9579_s2 + $0xb88] sm:$0xff]  }
 0x1c5   :  { %5784 = vmatmul.mubr.bf16.vlgmr.msra.gmra.mrb[52].mxu1 %v2524_v7  ;;  %7155 = vmatprep.subr.bf16.mxu0 %v7733_v8  ;;  %v7770_v7 = vld [vmem:[%s9579_s2 + $0xb10] sm:$0xff]   ;;  %v7773_v8 = vld [vmem:[%s9579_s2 + $0xb58] sm:$0xff]  }
 0x1c6   :  { %7176 = vmatpush3.bf16.msra.mxu1 %v7732_v6  ;;  %5863 = vmatprep.mubr.bf16.mxu1 %v2574_v58  ;;  %v7771_v6 = vld [vmem:[%s9579_s2 + $0xbd0] sm:$0xff]  }
 0x1c7   :  { %7177 = vmatprep.subr.bf16.mxu1 %v7735_v10  ;;  %v7775_v10 = vld [vmem:[%s9579_s2 + $0xbd8] sm:$0xff]  }
 0x1c8   :  { %7156 = vmatpush3.bf16.msra.mxu0 %v7734_v9  ;;  %v7772_v9 = vld [vmem:[%s9579_s2 + $0xb90] sm:$0xff]  }
 0x1c9   :  { %7157 = vmatprep.subr.bf16.mxu0 %v7737_v12  ;;  %v7777_v12 = vld [vmem:[%s9579_s2 + $0xb60] sm:$0xff]  }
 0x1ca   :  { %7178 = vmatpush3.bf16.msra.mxu1 %v7736_v11  ;;  %v7774_v11 = vld [vmem:[%s9579_s2 + $0xb18] sm:$0xff]  }
 0x1cb   :  { %7179 = vmatprep.subr.bf16.mxu1 %v7739_v14  ;;  %v7779_v14 = vld [vmem:[%s9579_s2 + $0xbe0] sm:$0xff]  }
 0x1cc   :  { %7158 = vmatpush3.bf16.msra.mxu0 %v7738_v13  ;;  %v7776_v13 = vld [vmem:[%s9579_s2 + $0xb98] sm:$0xff]  }
 0x1cd   :  { %7159 = vmatprep.subr.bf16.mxu0 %v7741_v16  ;;  %v7781_v16 = vld [vmem:[%s9579_s2 + $0xb68] sm:$0xff]  }
 0x1ce   :  { %7180 = vmatpush3.bf16.msra.mxu1 %v7740_v15  ;;  %v7778_v15 = vld [vmem:[%s9579_s2 + $0xb20] sm:$0xff]  }
 0x1cf   :  { %7181 = vmatprep.subr.bf16.mxu1 %v7743_v18  ;;  %v7783_v18 = vld [vmem:[%s9579_s2 + $0xbe8] sm:$0xff]  }
 0x1d0   :  { %7160 = vmatpush3.bf16.msra.mxu0 %v7742_v17  ;;  %v7780_v17 = vld [vmem:[%s9579_s2 + $0xba0] sm:$0xff]  }
 0x1d1   :  { %7161 = vmatprep.subr.bf16.mxu0 %v7745_v20  ;;  %v7785_v20 = vld [vmem:[%s9579_s2 + $0xb70] sm:$0xff]  }
 0x1d2   :  { %7182 = vmatpush3.bf16.msra.mxu1 %v7744_v19  ;;  %v7782_v19 = vld [vmem:[%s9579_s2 + $0xb28] sm:$0xff]  }
 0x1d3   :  { %7183 = vmatprep.subr.bf16.mxu1 %v7747_v22  ;;  %v7784_v22 = vld [vmem:[%s9579_s2 + $0xba8] sm:$0xff]  }
 0x1d4   :  { %7162 = vmatpush3.bf16.msra.mxu0 %v7746_v21 }
 0x1d5   :  { %7163 = vmatprep.subr.bf16.mxu0 %v7749_v24  ;;  %v7787_v24 = vld [vmem:[%s9579_s2 + $0xbf0] sm:$0xff]  }
 0x1d6   :  { %v6861_v30 = vpop.f32.mrb[28].mxu0  ;;  %7184 = vmatpush3.bf16.msra.mxu1 %v7748_v23 }
 0x1d7   :  { %v6862_v29 = vpop.f32.mrb[29].mxu0  ;;  %7185 = vmatprep.subr.bf16.mxu1 %v7751_v26 }
 0x1d8   :  { %v6863_v33 = vadd.f32 %v6862_v29, %v6861_v30  ;;  %v6864_v34 = vpop.f32.mrb[30].mxu0  ;;  %v6883_v35 = vpop.f32.mrb[28].mxu1  ;;  %7164 = vmatpush3.bf16.msra.mxu0 %v7750_v25  ;;  %v7789_v30 = vld [vmem:[%s9579_s2 + $0xb78] sm:$0xff]  }
 0x1d9   :  { %v6865_v38 = vpop.f32.mrb[31].mxu0  ;;  %v6884_v39 = vpop.f32.mrb[29].mxu1  ;;  %7165 = vmatprep.subr.bf16.mxu0 %v7753_v28  ;;  %v7786_v28 = vld [vmem:[%s9579_s2 + $0xb30] sm:$0xff]  }
 0x1da   :  { %v5266_v43 = vadd.f32 %v6863_v33, %v9317_v0  ;;  %v6885_v44 = vadd.f32 %v6884_v39, %v6883_v35  ;;  %7186 = vmatpush3.bf16.msra.mxu1 %v7752_v27  ;;  %v6886_v46 = vpop.f32.mrb[30].mxu1  ;;  %v7764_v0 = vld [vmem:[%s9579_s2 + $0xb80] sm:$0xff]   ;;  %v7788_v34 = vld [vmem:[%s9579_s2 + $0xbb0] sm:$0xff]   ;;  %v7790_v39 = vld [vmem:[%s9579_s2 + $0xb38] sm:$0xff]  }
 0x1db   :  { %7187 = vmatprep.subr.bf16.mxu1 %v7755_v32  ;;  %v6887_v49 = vpop.f32.mrb[31].mxu1 }
 0x1dc   :  { %v9422_v52 = vadd.f32 %v6885_v44, %v5266_v43  ;;  %7166 = vmatpush3.bf16.msra.mxu0 %v7754_v31  ;;  %v7794_v43 = vld [vmem:[%s9579_s2 + $0xc00] sm:$0xff]   ;;  %v7827_v44 = vmov 0.0  }
 0x1dd   :  { %7167 = vmatprep.subr.bf16.mxu0 %v7757_v36  ;;  %v7791_v36 = vld [vmem:[%s9579_s2 + $0xbf8] sm:$0xff]  }
 0x1de   :  { %7188 = vmatpush3.bf16.msra.mxu1 %v7756_v45  ;;  %v2573_v45 = vcombine.high %v2557_v40, %v2557_v40 }
 0x1df   :  { %7189 = vmatprep.subr.bf16.mxu1 %v7759_v47 }
 0x1e0   :  { %7168 = vmatpush3.bf16.msra.mxu0 %v7758_v53 }
 0x1e1   :  { %7197 = vmatprep.subr.bf16.mxu0 %v7761_v56 }
 0x1e2   :  { %7190 = vmatpush3.bf16.msra.mxu1 %v7760_v57 }
 0x1e3   :  { %5824 = vmatmul.mubr.bf16.vlgmr.msra.gmra.mrb[56].mxu0 %v2550_v55  ;;  %7219 = vmatprep.subr.bf16.mxu1 %v7763_v59 }
 0x1e4   :  { %7198 = vmatpush3.bf16.msra.mxu0 %v7762_v61  ;;  %5903 = vmatprep.mubr.bf16.mxu0 %v2571_v60 }
 0x1e5   :  { %5864 = vmatmul.mubr.bf16.vlgmr.msra.gmra.mrb[56].mxu1 %v2572_v62  ;;  %7199 = vmatprep.subr.bf16.mxu0 %v7765_v63 }
 0x1e6   :  { %7220 = vmatpush3.bf16.msra.mxu1 %v7764_v0  ;;  %5943 = vmatprep.mubr.bf16.mxu1 %v2575_v1 }
 0x1e7   :  { %7221 = vmatprep.subr.bf16.mxu1 %v7767_v2 }
 0x1e8   :  { %7200 = vmatpush3.bf16.msra.mxu0 %v7766_v3 }
 0x1e9   :  { %7201 = vmatprep.subr.bf16.mxu0 %v7769_v4 }
 0x1ea   :  { %7222 = vmatpush3.bf16.msra.mxu1 %v7768_v5 }
 0x1eb   :  { %7223 = vmatprep.subr.bf16.mxu1 %v7771_v6 }
 0x1ec   :  { %7202 = vmatpush3.bf16.msra.mxu0 %v7770_v7 }
 0x1ed   :  { %7203 = vmatprep.subr.bf16.mxu0 %v7773_v8 }
 0x1ee   :  { %7224 = vmatpush3.bf16.msra.mxu1 %v7772_v9 }
 0x1ef   :  { %7225 = vmatprep.subr.bf16.mxu1 %v7775_v10 }
 0x1f0   :  { %7204 = vmatpush3.bf16.msra.mxu0 %v7774_v11 }
 0x1f1   :  { %7205 = vmatprep.subr.bf16.mxu0 %v7777_v12 }
 0x1f2   :  { %7226 = vmatpush3.bf16.msra.mxu1 %v7776_v13 }
 0x1f3   :  { %7227 = vmatprep.subr.bf16.mxu1 %v7779_v14 }
 0x1f4   :  { %7206 = vmatpush3.bf16.msra.mxu0 %v7778_v15 }
 0x1f5   :  { %7207 = vmatprep.subr.bf16.mxu0 %v7781_v16 }
 0x1f6   :  { %v6905_v21 = vpop.f32.mrb[32].mxu0  ;;  %7228 = vmatpush3.bf16.msra.mxu1 %v7780_v17 }
 0x1f7   :  { %v6906_v23 = vpop.f32.mrb[33].mxu0  ;;  %7229 = vmatprep.subr.bf16.mxu1 %v7783_v18 }
 0x1f8   :  { %v6907_v25 = vadd.f32 %v6906_v23, %v6905_v21  ;;  %v6908_v26 = vpop.f32.mrb[34].mxu0  ;;  %v6927_v27 = vpop.f32.mrb[32].mxu1  ;;  %7208 = vmatpush3.bf16.msra.mxu0 %v7782_v19 }
 0x1f9   :  { %v6909_v31 = vpop.f32.mrb[35].mxu0  ;;  %v6928_v29 = vpop.f32.mrb[33].mxu1  ;;  %7209 = vmatprep.subr.bf16.mxu0 %v7785_v20 }
 0x1fa   :  { %v5346_v32 = vadd.f32 %v6907_v25, %v9422_v52  ;;  %v6929_v33 = vadd.f32 %v6928_v29, %v6927_v27  ;;  %7230 = vmatpush3.bf16.msra.mxu1 %v7784_v22  ;;  %v6930_v35 = vpop.f32.mrb[34].mxu1 }
 0x1fb   :  { %7231 = vmatprep.subr.bf16.mxu1 %v7787_v24  ;;  %v6931_v37 = vpop.f32.mrb[35].mxu1 }
 0x1fc   :  { %v5386_v38 = vadd.f32 %v6929_v33, %v5346_v32  ;;  %7210 = vmatpush3.bf16.msra.mxu0 %v7786_v28 }
 0x1fd   :  { %7211 = vmatprep.subr.bf16.mxu0 %v7789_v30 }
 0x1fe   :  { %7232 = vmatpush3.bf16.msra.mxu1 %v7788_v34 }
 0x1ff   :  { %7233 = vmatprep.subr.bf16.mxu1 %v7791_v36 }
 0x200   :  { %7212 = vmatpush3.bf16.msra.mxu0 %v7790_v39 }
 0x201   :  { %7250 = vmatprep.subr.bf16.mxu0 %v7827_v44 }
 0x202   :  { %7234 = vmatpush3.bf16.msra.mxu1 %v7793_v42 }
 0x203   :  { %10 = vsyncpa [#allocation3], 0  ;;  %5904 = vmatmul.mubr.bf16.vlgmr.msra.gmra.mrb[60].mxu0 %v2557_v40  ;;  %v7795_v46 = vld [vmem:[%s9579_s2 + $0xc08] sm:$0xff]   ;;  %vm7828_vm0 = vmmov 0   ;;  %v7796_v47 = vld [vmem:[%s9579_s2 + $0xc10] sm:$0xff]   ;;  %s7829_s13 = smov [#allocation2]  }
 0x204   :  { %7251 = vmatpush3.bf16.msra.mxu0 %v7794_v43  ;;  %7266 = vmatprep.mubr.msk.bf16.mxu0 %vm7828_vm0, %v7827_v44  ;;  %v7797_v48 = vld [vmem:[%s9579_s2 + $0xc18] sm:$0xff]   ;;  %v7798_v49 = vld [vmem:[%s9579_s2 + $0xc20] sm:$0xff]   ;;  %v7799_v51 = vld [vmem:[%s9579_s2 + $0xc28] sm:$0xff]   ;;  %s6007_s14 = sshll.u32 %s7829_s13, 4  ;;  %vm5999_vm1 = vcmask 517120   ;;  %s6008_s14 = int_to_ptr.vmem [resolvable:$true] %s6007_s14 }
 0x205   :  { %5944 = vmatmul.mubr.bf16.vlgmr.msra.gmra.mrb[60].mxu1 %v2573_v45  ;;  %7252 = vmatprep.subr.bf16.mxu0 %v7827_v44  ;;  %v7800_v50 = vld [vmem:[%s9579_s2 + $0xc30] sm:$0xff]   ;;  %v7801_v0 = vld [vmem:[%s9579_s2 + $0xc38] sm:$0xff]   ;;  %s7802_s15 = scalar_lea.vmem %s6008_s14, 32  ;;  %p7807_p1 = scmp.lt.s32.totalorder %s6008_s14, %s6008_s14 }
 0x206   :  { %v6143_v1 = vld.sshfl [vmem:[%s9577_s0 + $0x30] sm:$0x1 pattern:$0x75316420]  ;;  %p7803_p0 = scmp.ne.s32.totalorder %s6008_s14, %s7802_s15  ;;  %p7808_p2 = scmp.lt.s32.totalorder %s7802_s15, %s7802_s15 }
 0x207   :  { %v2589_v2 = vrot.slane %v6143_v1, %v7965_v41 }
 0x208   :  { %7253 = vmatpush3.bf16.msra.mxu0 %v7795_v46  ;;  %p7809_p3 = por %p7808_p2, %p7807_p1 }
 0x209   :  { %7254 = vmatprep.subr.bf16.mxu0 %v7827_v44 }
 0x20a   :  { %p7810_p4 = pnand %p7809_p3, %p7803_p0 }
 0x20c   :  { %7255 = vmatpush3.bf16.msra.mxu0 %v7796_v47 }
 0x20d   :  { %7256 = vmatprep.subr.bf16.mxu0 %v7827_v44 }
 0x210   :  { %7257 = vmatpush3.bf16.msra.mxu0 %v7797_v48 }
 0x211   :  { %7258 = vmatprep.subr.bf16.mxu0 %v7827_v44 }
 0x214   :  { %7259 = vmatpush3.bf16.msra.mxu0 %v7798_v49 }
 0x215   :  { %7260 = vmatprep.subr.bf16.mxu0 %v7827_v44 }
 0x216   :  { %v6949_v52 = vpop.f32.mrb[36].mxu0 }
 0x217   :  { %v6950_v53 = vpop.f32.mrb[37].mxu0 }
 0x218   :  { %v6951_v54 = vadd.f32 %v6950_v53, %v6949_v52  ;;  %v6952_v55 = vpop.f32.mrb[38].mxu0  ;;  %v6971_v56 = vpop.f32.mrb[36].mxu1  ;;  %7261 = vmatpush3.bf16.msra.mxu0 %v7799_v51 }
 0x219   :  { %v6953_v57 = vpop.f32.mrb[39].mxu0  ;;  %v6972_v58 = vpop.f32.mrb[37].mxu1  ;;  %7262 = vmatprep.subr.bf16.mxu0 %v7827_v44 }
 0x21a   :  { %v5426_v59 = vadd.f32 %v6951_v54, %v5386_v38  ;;  %v6973_v60 = vadd.f32 %v6972_v58, %v6971_v56  ;;  %v6974_v61 = vpop.f32.mrb[38].mxu1 }
 0x21b   :  { %v6975_v62 = vpop.f32.mrb[39].mxu1 }
 0x21c   :  { %v5466_v63 = vadd.f32 %v6973_v60, %v5426_v59  ;;  %7263 = vmatpush3.bf16.msra.mxu0 %v7800_v50 }
 0x21d   :  { %7264 = vmatprep.subr.bf16.mxu0 %v7827_v44 }
 0x220   :  { %7265 = vmatpush3.bf16.msra.mxu0 %v7801_v0 }
 0x223   :  { %7267 = vmatmul.mubr.bf16.vlgmr.msra.gmra.mrb[64].mxu0 %v2589_v2 }
 0x236   :  { %v6993_v3 = vpop.f32.mrb[40].mxu0 }
 0x237   :  { %v6994_v4 = vpop.f32.mrb[41].mxu0 }
 0x238   :  { %v6995_v5 = vadd.f32 %v6994_v4, %v6993_v3  ;;  %v6996_v6 = vpop.f32.mrb[42].mxu0  ;;  %v7015_v7 = vpop.f32.mrb[40].mxu1 }
 0x239   :  { %v6997_v8 = vpop.f32.mrb[43].mxu0  ;;  %v7016_v9 = vpop.f32.mrb[41].mxu1 }
 0x23a   :  { %v5506_v10 = vadd.f32 %v6995_v5, %v5466_v63  ;;  %v7017_v11 = vadd.f32 %v7016_v9, %v7015_v7  ;;  %v7018_v12 = vpop.f32.mrb[42].mxu1 }
 0x23b   :  { %v7019_v13 = vpop.f32.mrb[43].mxu1  ;;  %v6536_v12 = vld [vmem:[%s9581_s4] ss:$0 sm:$0xff] }
 0x23c   :  { %v5546_v14 = vadd.f32 %v7017_v11, %v5506_v10 }
 0x256   :  { %v7037_v15 = vpop.f32.mrb[44].mxu0 }
 0x257   :  { %v7038_v16 = vpop.f32.mrb[45].mxu0 }
 0x258   :  { %v7039_v17 = vadd.f32 %v7038_v16, %v7037_v15  ;;  %v7040_v18 = vpop.f32.mrb[46].mxu0  ;;  %v7059_v19 = vpop.f32.mrb[44].mxu1 }
 0x259   :  { %v7041_v41 = vpop.f32.mrb[47].mxu0  ;;  %v7060_v20 = vpop.f32.mrb[45].mxu1 }
 0x25a   :  { %v5586_v21 = vadd.f32 %v7039_v17, %v5546_v14  ;;  %v7061_v22 = vadd.f32 %v7060_v20, %v7059_v19  ;;  %v7062_v23 = vpop.f32.mrb[46].mxu1 }
 0x25b   :  { %v7063_v24 = vpop.f32.mrb[47].mxu1 }
 0x25c   :  { %v5626_v25 = vadd.f32 %v7061_v22, %v5586_v21 }
 0x276   :  { %v7081_v26 = vpop.f32.mrb[48].mxu0 }
 0x277   :  { %v7082_v27 = vpop.f32.mrb[49].mxu0 }
 0x278   :  { %v7083_v28 = vadd.f32 %v7082_v27, %v7081_v26  ;;  %v7084_v30 = vpop.f32.mrb[50].mxu0  ;;  %v7103_v31 = vpop.f32.mrb[48].mxu1 }
 0x279   :  { %v7085_v29 = vpop.f32.mrb[51].mxu0  ;;  %v7104_v32 = vpop.f32.mrb[49].mxu1 }
 0x27a   :  { %v5666_v33 = vadd.f32 %v7083_v28, %v5626_v25  ;;  %v7105_v34 = vadd.f32 %v7104_v32, %v7103_v31  ;;  %v7106_v35 = vpop.f32.mrb[50].mxu1 }
 0x27b   :  { %v7107_v36 = vpop.f32.mrb[51].mxu1 }
 0x27c   :  { %v5706_v37 = vadd.f32 %v7105_v34, %v5666_v33 }
 0x296   :  { %v7125_v38 = vpop.f32.mrb[52].mxu0 }
 0x297   :  { %v7126_v39 = vpop.f32.mrb[53].mxu0 }
 0x298   :  { %v7127_v40 = vadd.f32 %v7126_v39, %v7125_v38  ;;  %v7128_v42 = vpop.f32.mrb[54].mxu0  ;;  %v7147_v43 = vpop.f32.mrb[52].mxu1 }
 0x299   :  { %v7129_v44 = vpop.f32.mrb[55].mxu0  ;;  %v7148_v45 = vpop.f32.mrb[53].mxu1 }
 0x29a   :  { %v5746_v46 = vadd.f32 %v7127_v40, %v5706_v37  ;;  %v7149_v47 = vadd.f32 %v7148_v45, %v7147_v43  ;;  %v7150_v48 = vpop.f32.mrb[54].mxu1 }
 0x29b   :  { %v7151_v49 = vpop.f32.mrb[55].mxu1 }
 0x29c   :  { %v5786_v51 = vadd.f32 %v7149_v47, %v5746_v46 }
 0x2b6   :  { %v7169_v52 = vpop.f32.mrb[56].mxu0 }
 0x2b7   :  { %v7170_v53 = vpop.f32.mrb[57].mxu0 }
 0x2b8   :  { %v7171_v54 = vadd.f32 %v7170_v53, %v7169_v52  ;;  %v7172_v55 = vpop.f32.mrb[58].mxu0  ;;  %v7191_v56 = vpop.f32.mrb[56].mxu1 }
 0x2b9   :  { %v7173_v50 = vpop.f32.mrb[59].mxu0  ;;  %v7192_v57 = vpop.f32.mrb[57].mxu1 }
 0x2ba   :  { %v5826_v58 = vadd.f32 %v7171_v54, %v5786_v51  ;;  %v7193_v59 = vadd.f32 %v7192_v57, %v7191_v56  ;;  %v7194_v60 = vpop.f32.mrb[58].mxu1 }
 0x2bb   :  { %v7195_v61 = vpop.f32.mrb[59].mxu1 }
 0x2bc   :  { %v5866_v62 = vadd.f32 %v7193_v59, %v5826_v58 }
 0x2d6   :  { %v7213_v63 = vpop.f32.mrb[60].mxu0 }
 0x2d7   :  { %v7214_v0 = vpop.f32.mrb[61].mxu0 }
 0x2d8   :  { %v7215_v1 = vadd.f32 %v7214_v0, %v7213_v63  ;;  %v7216_v2 = vpop.f32.mrb[62].mxu0  ;;  %v7235_v3 = vpop.f32.mrb[60].mxu1 }
 0x2d9   :  { %v7217_v4 = vpop.f32.mrb[63].mxu0  ;;  %v7236_v5 = vpop.f32.mrb[61].mxu1 }
 0x2da   :  { %v5906_v6 = vadd.f32 %v7215_v1, %v5866_v62  ;;  %v7237_v7 = vadd.f32 %v7236_v5, %v7235_v3  ;;  %v7238_v8 = vpop.f32.mrb[62].mxu1 }
 0x2db   :  { %v7239_v9 = vpop.f32.mrb[63].mxu1 }
 0x2dc   :  { %v5946_v10 = vadd.f32 %v7237_v7, %v5906_v6 }
 0x2f6   :  { %v5985_v11 = vpop.f32.mrb[64].mxu0 }
 0x2f7   :  { %v5986_v13 = vadd.f32 %v5985_v11, %v5946_v10  ;;  %v7268_v14 = vpop.f32.mrb[65].mxu0 }
 0x2f8   :  { %v5988_v15 = vpop.f32.mrb[66].mxu0 }
 0x2f9   :  { %v5998_v16 = vadd.f32 %v6536_v12, %v5986_v13  ;;  %v7269_v17 = vpop.f32.mrb[67].mxu0 }
 0x2fb   :  { %6000 = vst.msk [vmem:[#allocation2] sm:$0x3] %vm5999_vm1, %v5998_v16 }
 0x2fc   :  { %7813 = shalt.err (!%p7810_p4)
}
 0x2fd   :  { %s7814_s4 = scalar_lea.hbm %s9582_s5, 32 }
 0x2fe   :  { %p7815_p5 = scmp.ne.s32.totalorder %s9582_s5, %s7814_s4  ;;  %p7818_p6 = scmp.lt.u32.totalorder %s7814_s4, %s9582_s5 }
 0x300   :  { %p7820_p7 = pnand %p7818_p6, %p7815_p5 }
 0x302   :  { %7823 = shalt.err (!%p7820_p7)
}
 0x303   :  { %6010 = dma.vmem_to_hbm [thread:$0]  %s6008_s14, 32, %s9582_s5, [#allocation3]  }
 0x304   :  { %7824 = dma.done.wait [#allocation3], 32  }
 0x305   :  { %7825 = vsyncadd [#allocation3], 4294967264 }
 0x306   :  { %6014 = vsyncpa [#allocation3], 1 }

</bundles_post_ra>
